<compile_context>
chip_gen: v7x
topology: tpu7x:2x2x1
jax: 0.10.0
libtpu: 0.0.40
codegen_flags: <defaults>
</compile_context>

<pallas_src>
import functools

import jax
import jax.numpy as jnp
from jax import lax
from jax.experimental import pallas as pl
from jax.experimental.pallas import tpu as pltpu


def _points_per_step():
    # v5e MXU is 128 wide -> TP=128 already fills N; v6e/v7x MXUs are 256 wide.
    try:
        kind = jax.devices()[0].device_kind.lower()
    except Exception:
        return 128
    if ('v6' in kind) or ('v7' in kind) or ('7x' in kind):
        return 256
    return 128


TP = _points_per_step()   # points per grid step (lane width of all per-point slabs)

_N_ITERS = 5              # Newton iterations (broyden_cuda analog)
_STEP_CLIP = 100.0        # bound on a single Newton step (keeps f32 transients sane;
                          # diverging points fail the residual check anyway)
_DET_EPS = 1e-8           # Jacobian-determinant conditioning guard


# ----------------------------------------------------------------------------- Pallas kernel
def _fused_search_kernel(inp_ref, vox_ref, out_ref, interm_ref, *,
                         off_x, off_y, off_z, inv_scale, ratio, Dz, Hy, Wx, n_iters):
    tp = inp_ref.shape[1]

    # packed input slab: rows 0-2 = xc_init, rows 4-6 = target (rows 3, 7 padding)
    tgx = inp_ref[4:5, :]
    tgy = inp_ref[5:6, :]
    tgz = inp_ref[6:7, :]

    # hoisted constant plane (built ONCE per grid step; JAX does not CSE broadcast/iota,
    # so re-materializing this inside the unrolled Newton loop would be 6x VALU filler).
    iota_y = lax.broadcasted_iota(jnp.int32, (Hy, tp), 0).astype(jnp.float32)   # (Hy, TP)

    def eval_wtf(xcx, xcy, xcz):
        # normalize() (switch_to_explicit) then F.grid_sample(align_corners=True, border).
        xn = (xcx - off_x) * inv_scale
        yn = (xcy - off_y) * inv_scale
        zn = (xcz - off_z) * (inv_scale * ratio)
        fx = jnp.clip((xn + 1.0) * (0.5 * (Wx - 1)), 0.0, Wx - 1.0)
        fy = jnp.clip((yn + 1.0) * (0.5 * (Hy - 1)), 0.0, Hy - 1.0)
        fz = jnp.clip((zn + 1.0) * (0.5 * (Dz - 1)), 0.0, Dz - 1.0)

        # Separable trilinear weights as hat functions (no floor / int-cast / index math).
        hat_y = jnp.maximum(1.0 - jnp.abs(fy - iota_y), 0.0)            # (Hy, TP)
        chunks = []
        for z in range(Dz):                                             # static, Dz is tiny
            wz = jnp.maximum(1.0 - jnp.abs(fz - float(z)), 0.0)         # (1, TP)
            chunks.append(hat_y * wz)                                   # (Hy, TP)
        oh = jnp.concatenate(chunks, axis=0)                            # (Dz*Hy, TP)

        # MXU: fused (lbs_voxel @ tfs) table contracted over the z/y plane.
        # Result goes straight to the VMEM scratch so it never sits in 32+ live vregs.
        interm_ref[...] = jnp.dot(vox_ref[...], oh,
                                  preferred_element_type=jnp.float32)   # (Wx*16, TP)

        # Finish the x interpolation: 2 nonzero taps per point over Wx 16-row groups,
        # read back from scratch in vreg-aligned slices.
        wtf = jnp.zeros((16, tp), jnp.float32)
        for x in range(Wx):                                             # static unroll
            wx = jnp.maximum(1.0 - jnp.abs(fx - float(x)), 0.0)         # (1, TP)
            wtf = wtf + interm_ref[x * 16:(x + 1) * 16, :] * wx
        return wtf

    def cofactors(w):
        cA = w[5] * w[10] - w[6] * w[9]
        cB = w[2] * w[9] - w[1] * w[10]
        cC = w[1] * w[6] - w[2] * w[5]
        cD = w[6] * w[8] - w[4] * w[10]
        cE = w[0] * w[10] - w[2] * w[8]
        cF = w[2] * w[4] - w[0] * w[6]
        cG = w[4] * w[9] - w[5] * w[8]
        cH = w[1] * w[8] - w[0] * w[9]
        cI = w[0] * w[5] - w[1] * w[4]
        det = w[0] * cA + w[1] * cD + w[2] * cG
        det = jnp.where(jnp.abs(det) < _DET_EPS,
                        jnp.where(det < 0.0, -_DET_EPS, _DET_EPS), det)   # conditioning guard
        return (cA, cB, cC, cD, cE, cF, cG, cH, cI), 1.0 / det

    def skin_err(w, xcx, xcy, xcz):
        # homogeneous skinning as FMAs on (1, TP) rows
        e0 = w[0] * xcx + w[1] * xcy + w[2] * xcz + w[3] - tgx
        e1 = w[4] * xcx + w[5] * xcy + w[6] * xcz + w[7] - tgy
        e2 = w[8] * xcx + w[9] * xcy + w[10] * xcz + w[11] - tgz
        return e0, e1, e2

    def newton_step(_, carry):
        xcx, xcy, xcz = carry
        wtf = eval_wtf(xcx, xcy, xcz)
        w = [wtf[r:r + 1, :] for r in range(12)]
        e0, e1, e2 = skin_err(w, xcx, xcy, xcz)
        (cA, cB, cC, cD, cE, cF, cG, cH, cI), inv_det = cofactors(w)
        dx = jnp.clip(inv_det * (cA * e0 + cB * e1 + cC * e2), -_STEP_CLIP, _STEP_CLIP)
        dy = jnp.clip(inv_det * (cD * e0 + cE * e1 + cF * e2), -_STEP_CLIP, _STEP_CLIP)
        dz = jnp.clip(inv_det * (cG * e0 + cH * e1 + cI * e2), -_STEP_CLIP, _STEP_CLIP)
        return xcx - dx, xcy - dy, xcz - dz

    xcx, xcy, xcz = lax.fori_loop(
        0, n_iters, newton_step,
        (inp_ref[0:1, :], inp_ref[1:2, :], inp_ref[2:3, :]), unroll=True)

    # final evaluation: skinning matrix, residual, inverse Jacobian.
    wtf = eval_wtf(xcx, xcy, xcz)
    w = [wtf[r:r + 1, :] for r in range(12)]
    e0, e1, e2 = skin_err(w, xcx, xcy, xcz)
    cof, inv_det = cofactors(w)

    # packed lane-dense (32, TP) output slab, written row-by-row (no concatenate temporaries):
    #   rows 0:16 = w_tf (aligned store), 16:19 = xc, 19 = residual, 20:29 = J_inv, 29:32 = pad
    out_ref[0:16, :] = wtf
    out_ref[16:17, :] = xcx
    out_ref[17:18, :] = xcy
    out_ref[18:19, :] = xcz
    out_ref[19:20, :] = jnp.sqrt(e0 * e0 + e1 * e1 + e2 * e2)
    for r in range(9):
        out_ref[20 + r:21 + r, :] = cof[r] * inv_det
    out_ref[29:32, :] = jnp.zeros((3, tp), jnp.float32)


def _fused_search_call(inp, vox_tbl, *, offset, scale, ratio, dims, n_iters):
    Dz, Hy, Wx = dims
    DH = Dz * Hy
    P_pad = inp.shape[1]
    kernel = functools.partial(
        _fused_search_kernel,
        off_x=offset[0], off_y=offset[1], off_z=offset[2],
        inv_scale=1.0 / scale, ratio=ratio, Dz=Dz, Hy=Hy, Wx=Wx, n_iters=n_iters)
    return pl.pallas_call(
        kernel,
        out_shape=jax.ShapeDtypeStruct((32, P_pad), jnp.float32),
        grid=(P_pad // TP,),
        in_specs=[pl.BlockSpec((8, TP), lambda i: (0, i)),
                  # resident fused table; constant index_map -> one fetch, reused every step.
                  # TODO(synk): pipeline_mode=pl.Buffered(1) would drop its second VMEM buffer;
                  # only relevant at resolution >= 32 (table is 64 KiB at resolution 16).
                  pl.BlockSpec((16 * Wx, DH), lambda i: (0, 0))],
        out_specs=pl.BlockSpec((32, TP), lambda i: (0, i)),
        scratch_shapes=[pltpu.VMEM((16 * Wx, TP), jnp.float32)],    # MXU result staging
        compiler_params=pltpu.CompilerParams(dimension_semantics=("parallel",)),
    )(inp, vox_tbl)


# ----------------------------------------------------------------------------- small JAX glue
def _inv3x3(m):
    a = m[..., 0, 0]; b = m[..., 0, 1]; c = m[..., 0, 2]
    d = m[..., 1, 0]; e = m[..., 1, 1]; f = m[..., 1, 2]
    g = m[..., 2, 0]; h = m[..., 2, 1]; i = m[..., 2, 2]
    A = e * i - f * h; B = c * h - b * i; C = b * f - c * e
    Dc = f * g - d * i; E = a * i - c * g; F = c * d - a * f
    G = d * h - e * g; H = b * g - a * h; I = a * e - b * d
    det = a * A + b * Dc + c * G
    inv = jnp.stack([jnp.stack([A, B, C], -1),
                     jnp.stack([Dc, E, F], -1),
                     jnp.stack([G, H, I], -1)], -2)
    return inv / det[..., None, None]


def _inv_affine4x4(T):
    # T = [[A, t], [0, 1]]  ->  inv = [[A^-1, -A^-1 t], [0, 1]]
    R = T[..., :3, :3]
    t = T[..., :3, 3]
    Rinv = _inv3x3(R)
    tinv = -jnp.einsum('...ij,...j->...i', Rinv, t)
    top = jnp.concatenate([Rinv, tinv[..., None]], axis=-1)
    bottom = jnp.broadcast_to(jnp.array([0., 0., 0., 1.], jnp.float32),
                              top.shape[:-2] + (1, 4))
    return jnp.concatenate([top, bottom], axis=-2)


# ----------------------------------------------------------------------------- module port
class ForwardDeformer:
    def __init__(self, opt=None):
        self.opt = opt or {}
        self.soft_blend = 20
        self.init_bones = [0, 1, 2, 4, 5, 10, 11, 12, 15, 16, 17, 18, 19]
        self.global_scale = 1.2
        self.version = self.opt.get('version', 1)

    # switch_to_explicit analog: builds bbox / normalize constants and the LBS voxel
    def switch_to_explicit(self, resolution=16, smpl_verts=None, key=None):
        self.resolution = resolution
        d, h, w = resolution // 4, resolution, resolution
        self.dims = (d, h, w)
        self.ratio = float(h) / float(d)
        gt_min = jnp.min(smpl_verts[0], axis=0)
        gt_max = jnp.max(smpl_verts[0], axis=0)
        offset = (gt_min + gt_max) * 0.5
        scale = jnp.max(gt_max - gt_min) / 2.0 * self.global_scale
        self.offset = tuple(float(v) for v in offset)
        self.scale = float(scale)
        # TODO(synk): query_weights_smpl (pytorch3d knn_points + 30-step Laplacian relaxation)
        # has no clean Pallas equivalent here; the LBS voxel is initialized synthetically
        # (deterministic softmax-normalized weights over 24 joints) instead.
        logits = jax.random.normal(key, (d * h * w, 24), dtype=jnp.float32)
        # flat voxel index = (z*H + y)*W + x  (W fastest, matching NCDHW / grid_sample)
        self.lbs_voxel_flat = jax.nn.softmax(logits, axis=-1)       # (D*H*W, 24)

    # --- internal: one fused pallas_call does Newton search + final skinning eval -----------
    def _search_full(self, xd, tfs, n_iters=_N_ITERS, cvg_thresh=1e-4):
        B, N, _ = xd.shape
        I = len(self.init_bones)
        Dz, Hy, Wx = self.dims
        DH = Dz * Hy

        tfs0 = tfs[0]                                                # (24, 4, 4)
        # per-init-bone rigid initialization (cheap, done in the XLA wrapper)
        tfs_init_inv = _inv_affine4x4(tfs0[jnp.array(self.init_bones)])          # (I, 4, 4)
        xd_h = jnp.concatenate([xd[0], jnp.ones((N, 1), jnp.float32)], axis=1)   # (N, 4)
        xc_init = jnp.einsum('iab,nb->nia', tfs_init_inv, xd_h)[..., :3]         # (N, I, 3)
        xd_tgt = jnp.broadcast_to(xd[0][:, None, :], (N, I, 3))

        P = N * I
        P_pad = ((P + TP - 1) // TP) * TP

        # packed (8, P_pad) input slab (one aligned DMA per grid step); padded lanes are
        # seeded with the bbox centre so their (wasted) Newton iterations stay benign.
        seed = jnp.asarray(self.offset, jnp.float32).reshape(3, 1)
        inp = jnp.zeros((8, P_pad), jnp.float32)
        inp = inp.at[0:3, :].set(jnp.broadcast_to(seed, (3, P_pad)))
        inp = inp.at[4:7, :].set(jnp.broadcast_to(seed, (3, P_pad)))
        inp = inp.at[0:3, :P].set(xc_init.reshape(P, 3).T)
        inp = inp.at[4:7, :P].set(xd_tgt.reshape(P, 3).T)

        # fused voxel*tfs table (V,16) -> x-major / channel-minor, transposed for the
        # channels-first contraction: table[x*16 + c, z*H + y] = (voxel @ tfs_flat)[(zy)*W + x, c]
        tfs_flat = tfs0.reshape(24, 16)
        vox_tfs = jnp.dot(self.lbs_voxel_flat, tfs_flat)             # (V, 16)
        vox_tbl = vox_tfs.reshape(DH, Wx, 16).transpose(1, 2, 0).reshape(Wx * 16, DH)
        # TODO(synk): bf16 hi/lo split of vox_tbl (two bf16 MXU passes) pending a hardware
        # check that Newton still converges at the 1e-4 threshold.

        out = _fused_search_call(
            inp, vox_tbl,
            offset=self.offset, scale=self.scale, ratio=self.ratio,
            dims=self.dims, n_iters=n_iters)

        w_tf = out[0:16, :P].T.reshape(P, 4, 4)
        xc = out[16:19, :P].T                                        # (P, 3)
        resid = out[19, :P]                                          # (P,)
        J_inv = out[20:29, :P].T.reshape(P, 3, 3)
        valid = resid < cvg_thresh
        return xc, valid, J_inv, w_tf, resid, (B, N, I)

    # search / broyden_cuda analog
    def search(self, xd, tfs, n_iters=_N_ITERS, cvg_thresh=1e-4):
        # TODO(synk): fuse_kernel.fuse_broyden / filter_cuda.filter / precompute_cuda sources are
        # unavailable; re-implemented as fused in-kernel Newton iterations (no duplicate filter).
        xc, valid, J_inv, _, _, (B, N, I) = self._search_full(xd, tfs, n_iters, cvg_thresh)
        return {'result': xc.reshape(B, N, I, 3),
                'valid_ids': valid.reshape(B, N, I),
                'J_inv': J_inv.reshape(B, N, I, 3, 3)}

    def forward(self, xd, cond, tfs, eval_mode=False):
        xc, valid, J_inv, w_tf, resid, (B, N, I) = self._search_full(xd, tfs)
        others = {'result': xc.reshape(B, N, I, 3),
                  'valid_ids': valid.reshape(B, N, I),
                  'J_inv': J_inv.reshape(B, N, I, 3, 3)}
        mask = others['valid_ids']
        xc_opt = jnp.where(mask[..., None], others['result'], 0.0)   # xc_opt_[~mask] = 0
        others['result'] = xc_opt
        # fwd_tfs at converged (valid) points comes directly from the kernel's final evaluation
        fwd = w_tf[:, :3, :3].reshape(B, N, I, 3, 3)
        others['fwd_tfs'] = jnp.where(mask[..., None, None], fwd, 0.0)
        if eval_mode:
            return xc_opt, others
        if self.version == 1:
            # correction = bmv(-J_inv, xd_opt - stop_grad(xd_opt)); zero in a pure forward pass
            xc_h = jnp.concatenate([xc, jnp.ones((xc.shape[0], 1), jnp.float32)], axis=1)
            xd_opt = jnp.einsum('pij,pj->pi', w_tf, xc_h)[:, :3].reshape(B, N, I, 3)
            corr = xd_opt - lax.stop_gradient(xd_opt)
            corr = -jnp.einsum('...ij,...j->...i', others['J_inv'], corr)
            xc_out = xc_opt + jnp.where(mask[..., None], corr, 0.0)
            return xc_out, others
        # TODO(synk): version==2 branch (inverse-transform of xd with queried weights) not ported.
        return xc_opt, others


# ----------------------------------------------------------------------------- demo
if __name__ == "__main__":
    key = jax.random.PRNGKey(0)
    k_verts, k_vox, k_tfs, k_pts = jax.random.split(key, 4)

    B, N, J = 1, 64, 24
    smpl_verts = jax.random.uniform(k_verts, (1, 128, 3), minval=-0.8, maxval=0.8)

    deformer = ForwardDeformer({'version': 1})
    deformer.switch_to_explicit(resolution=16, smpl_verts=smpl_verts, key=k_vox)

    # deterministic near-identity, invertible bone transforms (last row [0,0,0,1])
    tfs = jnp.tile(jnp.eye(4, dtype=jnp.float32)[None], (J, 1, 1))
    tfs = tfs.at[:, :3, :].add(0.05 * jax.random.normal(k_tfs, (J, 3, 4), dtype=jnp.float32))
    tfs = tfs[None]                                                   # (1, 24, 4, 4)

    xd = jax.random.uniform(k_pts, (B, N, 3), minval=-0.5, maxval=0.5)

    fwd_fn = jax.jit(deformer.forward, static_argnames=('eval_mode',))
    xc, others = fwd_fn(xd, {}, tfs, eval_mode=True)
    jax.block_until_ready((xc, others['fwd_tfs'], others['valid_ids'], others['J_inv']))

    I = len(deformer.init_bones)
    assert xc.shape == (B, N, I, 3)
    assert others['valid_ids'].shape == (B, N, I)
    assert others['fwd_tfs'].shape == (B, N, I, 3, 3)
    assert others['J_inv'].shape == (B, N, I, 3, 3)
    assert bool(jnp.all(jnp.isfinite(xc)))
    print("KERNEL_OK")
</pallas_src>

<mosaic_0001>
module attributes {stable_mosaic.version = 11 : i64} {
  func.func @_fused_search_kernel(%arg0: i32, %arg1: memref<8x128xf32, #tpu.memory_space<vmem>>, %arg2: memref<256x64xf32, #tpu.memory_space<vmem>>, %arg3: memref<32x128xf32, #tpu.memory_space<vmem>>, %arg4: memref<256x128xf32, #tpu.memory_space<vmem>>) attributes {dimension_semantics = [#tpu.dimension_semantics<parallel>], iteration_bounds = array<i64: 7>, scalar_prefetch = 0 : i64, scratch_operands = 1 : i64, tpu.core_type = #tpu.core_type<tc>, window_params = [{transform_indices = @transform_0, window_bounds = array<i64: 8, 128>}, {pipeline_mode = #tpu.pipeline_mode<synchronous>, transform_indices = @transform_1, window_bounds = array<i64: 256, 64>}, {transform_indices = @transform_2, window_bounds = array<i64: 32, 128>}]} {
    %c4 = arith.constant 4 : index
    %c0 = arith.constant 0 : index
    %0 = vector.load %arg1[%c4, %c0] : memref<8x128xf32, #tpu.memory_space<vmem>>, vector<1x128xf32>
    %c5 = arith.constant 5 : index
    %c0_0 = arith.constant 0 : index
    %1 = vector.load %arg1[%c5, %c0_0] : memref<8x128xf32, #tpu.memory_space<vmem>>, vector<1x128xf32>
    %c6 = arith.constant 6 : index
    %c0_1 = arith.constant 0 : index
    %2 = vector.load %arg1[%c6, %c0_1] : memref<8x128xf32, #tpu.memory_space<vmem>>, vector<1x128xf32>
    %3 = tpu.iota {dimensions = array<i32: 0>} : vector<16x128xi32>
    %4 = arith.sitofp %3 : vector<16x128xi32> to vector<16x128xf32>
    %c0_2 = arith.constant 0 : index
    %c0_3 = arith.constant 0 : index
    %5 = vector.load %arg1[%c0_2, %c0_3] : memref<8x128xf32, #tpu.memory_space<vmem>>, vector<1x128xf32>
    %c1 = arith.constant 1 : index
    %c0_4 = arith.constant 0 : index
    %6 = vector.load %arg1[%c1, %c0_4] : memref<8x128xf32, #tpu.memory_space<vmem>>, vector<1x128xf32>
    %c2 = arith.constant 2 : index
    %c0_5 = arith.constant 0 : index
    %7 = vector.load %arg1[%c2, %c0_5] : memref<8x128xf32, #tpu.memory_space<vmem>>, vector<1x128xf32>
    %c0_i32 = arith.constant 0 : i32
    %cst = arith.constant 0.00169628859 : f32
    %8 = vector.broadcast %cst : f32 to vector<1x128xf32>
    %9 = arith.subf %5, %8 : vector<1x128xf32>
    %cst_6 = arith.constant 1.05144262 : f32
    %10 = vector.broadcast %cst_6 : f32 to vector<1x128xf32>
    %11 = arith.mulf %9, %10 : vector<1x128xf32>
    %cst_7 = arith.constant -0.00430172682 : f32
    %12 = vector.broadcast %cst_7 : f32 to vector<1x128xf32>
    %13 = arith.subf %6, %12 : vector<1x128xf32>
    %cst_8 = arith.constant 1.05144262 : f32
    %14 = vector.broadcast %cst_8 : f32 to vector<1x128xf32>
    %15 = arith.mulf %13, %14 : vector<1x128xf32>
    %cst_9 = arith.constant -0.00518578291 : f32
    %16 = vector.broadcast %cst_9 : f32 to vector<1x128xf32>
    %17 = arith.subf %7, %16 : vector<1x128xf32>
    %cst_10 = arith.constant 4.20577049 : f32
    %18 = vector.broadcast %cst_10 : f32 to vector<1x128xf32>
    %19 = arith.mulf %17, %18 : vector<1x128xf32>
    %cst_11 = arith.constant 1.000000e+00 : f32
    %20 = vector.broadcast %cst_11 : f32 to vector<1x128xf32>
    %21 = arith.addf %11, %20 : vector<1x128xf32>
    %cst_12 = arith.constant 7.500000e+00 : f32
    %22 = vector.broadcast %cst_12 : f32 to vector<1x128xf32>
    %23 = arith.mulf %21, %22 : vector<1x128xf32>
    %cst_13 = arith.constant 0.000000e+00 : f32
    %cst_14 = arith.constant 1.500000e+01 : f32
    %24 = vector.broadcast %cst_13 : f32 to vector<1x128xf32>
    %25 = arith.maximumf %24, %23 : vector<1x128xf32>
    %26 = vector.broadcast %cst_14 : f32 to vector<1x128xf32>
    %27 = arith.minimumf %26, %25 : vector<1x128xf32>
    %cst_15 = arith.constant 1.000000e+00 : f32
    %28 = vector.broadcast %cst_15 : f32 to vector<1x128xf32>
    %29 = arith.addf %15, %28 : vector<1x128xf32>
    %cst_16 = arith.constant 7.500000e+00 : f32
    %30 = vector.broadcast %cst_16 : f32 to vector<1x128xf32>
    %31 = arith.mulf %29, %30 : vector<1x128xf32>
    %cst_17 = arith.constant 0.000000e+00 : f32
    %cst_18 = arith.constant 1.500000e+01 : f32
    %32 = vector.broadcast %cst_17 : f32 to vector<1x128xf32>
    %33 = arith.maximumf %32, %31 : vector<1x128xf32>
    %34 = vector.broadcast %cst_18 : f32 to vector<1x128xf32>
    %35 = arith.minimumf %34, %33 : vector<1x128xf32>
    %cst_19 = arith.constant 1.000000e+00 : f32
    %36 = vector.broadcast %cst_19 : f32 to vector<1x128xf32>
    %37 = arith.addf %19, %36 : vector<1x128xf32>
    %cst_20 = arith.constant 1.500000e+00 : f32
    %38 = vector.broadcast %cst_20 : f32 to vector<1x128xf32>
    %39 = arith.mulf %37, %38 : vector<1x128xf32>
    %cst_21 = arith.constant 0.000000e+00 : f32
    %cst_22 = arith.constant 3.000000e+00 : f32
    %40 = vector.broadcast %cst_21 : f32 to vector<1x128xf32>
    %41 = arith.maximumf %40, %39 : vector<1x128xf32>
    %42 = vector.broadcast %cst_22 : f32 to vector<1x128xf32>
    %43 = arith.minimumf %42, %41 : vector<1x128xf32>
    %44 = vector.broadcast %35 : vector<1x128xf32> to vector<16x128xf32>
    %45 = arith.subf %44, %4 : vector<16x128xf32>
    %46 = math.absf %45 : vector<16x128xf32>
    %cst_23 = arith.constant 1.000000e+00 : f32
    %47 = vector.broadcast %cst_23 : f32 to vector<16x128xf32>
    %48 = arith.subf %47, %46 : vector<16x128xf32>
    %cst_24 = arith.constant 0.000000e+00 : f32
    %49 = vector.broadcast %cst_24 : f32 to vector<16x128xf32>
    %50 = arith.maximumf %48, %49 : vector<16x128xf32>
    %cst_25 = arith.constant 0.000000e+00 : f32
    %51 = vector.broadcast %cst_25 : f32 to vector<1x128xf32>
    %52 = arith.subf %43, %51 : vector<1x128xf32>
    %53 = math.absf %52 : vector<1x128xf32>
    %cst_26 = arith.constant 1.000000e+00 : f32
    %54 = vector.broadcast %cst_26 : f32 to vector<1x128xf32>
    %55 = arith.subf %54, %53 : vector<1x128xf32>
    %cst_27 = arith.constant 0.000000e+00 : f32
    %56 = vector.broadcast %cst_27 : f32 to vector<1x128xf32>
    %57 = arith.maximumf %55, %56 : vector<1x128xf32>
    %58 = vector.broadcast %57 : vector<1x128xf32> to vector<16x128xf32>
    %59 = arith.mulf %50, %58 : vector<16x128xf32>
    %cst_28 = arith.constant 1.000000e+00 : f32
    %60 = vector.broadcast %cst_28 : f32 to vector<1x128xf32>
    %61 = arith.subf %43, %60 : vector<1x128xf32>
    %62 = math.absf %61 : vector<1x128xf32>
    %cst_29 = arith.constant 1.000000e+00 : f32
    %63 = vector.broadcast %cst_29 : f32 to vector<1x128xf32>
    %64 = arith.subf %63, %62 : vector<1x128xf32>
    %cst_30 = arith.constant 0.000000e+00 : f32
    %65 = vector.broadcast %cst_30 : f32 to vector<1x128xf32>
    %66 = arith.maximumf %64, %65 : vector<1x128xf32>
    %67 = vector.broadcast %66 : vector<1x128xf32> to vector<16x128xf32>
    %68 = arith.mulf %50, %67 : vector<16x128xf32>
    %cst_31 = arith.constant 2.000000e+00 : f32
    %69 = vector.broadcast %cst_31 : f32 to vector<1x128xf32>
    %70 = arith.subf %43, %69 : vector<1x128xf32>
    %71 = math.absf %70 : vector<1x128xf32>
    %cst_32 = arith.constant 1.000000e+00 : f32
    %72 = vector.broadcast %cst_32 : f32 to vector<1x128xf32>
    %73 = arith.subf %72, %71 : vector<1x128xf32>
    %cst_33 = arith.constant 0.000000e+00 : f32
    %74 = vector.broadcast %cst_33 : f32 to vector<1x128xf32>
    %75 = arith.maximumf %73, %74 : vector<1x128xf32>
    %76 = vector.broadcast %75 : vector<1x128xf32> to vector<16x128xf32>
    %77 = arith.mulf %50, %76 : vector<16x128xf32>
    %cst_34 = arith.constant 3.000000e+00 : f32
    %78 = vector.broadcast %cst_34 : f32 to vector<1x128xf32>
    %79 = arith.subf %43, %78 : vector<1x128xf32>
    %80 = math.absf %79 : vector<1x128xf32>
    %cst_35 = arith.constant 1.000000e+00 : f32
    %81 = vector.broadcast %cst_35 : f32 to vector<1x128xf32>
    %82 = arith.subf %81, %80 : vector<1x128xf32>
    %cst_36 = arith.constant 0.000000e+00 : f32
    %83 = vector.broadcast %cst_36 : f32 to vector<1x128xf32>
    %84 = arith.maximumf %82, %83 : vector<1x128xf32>
    %85 = vector.broadcast %84 : vector<1x128xf32> to vector<16x128xf32>
    %86 = arith.mulf %50, %85 : vector<16x128xf32>
    %87 = tpu.concatenate %59, %68, %77, %86 in 0 : vector<16x128xf32>, vector<16x128xf32>, vector<16x128xf32>, vector<16x128xf32> -> vector<64x128xf32>
    %c0_37 = arith.constant 0 : index
    %c0_38 = arith.constant 0 : index
    %88 = vector.load %arg2[%c0_37, %c0_38] : memref<256x64xf32, #tpu.memory_space<vmem>>, vector<256x64xf32>
    %cst_39 = arith.constant dense<0.000000e+00> : vector<256x128xf32>
    %89 = tpu.matmul %88, %87, %cst_39 {dimension_numbers = #tpu.dot_dimension_numbers<[1], [0], [0], [1], [0, 0, 1, 1], [], []>} : vector<256x64xf32>, vector<64x128xf32>, vector<256x128xf32> -> vector<256x128xf32>
    %c0_40 = arith.constant 0 : index
    %c0_41 = arith.constant 0 : index
    %90 = vector.load %arg4[%c0_40, %c0_41] : memref<256x128xf32, #tpu.memory_space<vmem>>, vector<256x128xf32>
    tpu.vector_store %arg4[%c0_40, %c0_41], %89 {strides = array<i32>} : memref<256x128xf32, #tpu.memory_space<vmem>>, vector<256x128xf32>,
    %cst_42 = arith.constant 0.000000e+00 : f32
    %91 = vector.broadcast %cst_42 : f32 to vector<16x128xf32>
    %cst_43 = arith.constant 0.000000e+00 : f32
    %92 = vector.broadcast %cst_43 : f32 to vector<1x128xf32>
    %93 = arith.subf %27, %92 : vector<1x128xf32>
    %94 = math.absf %93 : vector<1x128xf32>
    %cst_44 = arith.constant 1.000000e+00 : f32
    %95 = vector.broadcast %cst_44 : f32 to vector<1x128xf32>
    %96 = arith.subf %95, %94 : vector<1x128xf32>
    %cst_45 = arith.constant 0.000000e+00 : f32
    %97 = vector.broadcast %cst_45 : f32 to vector<1x128xf32>
    %98 = arith.maximumf %96, %97 : vector<1x128xf32>
    %c0_46 = arith.constant 0 : index
    %c0_47 = arith.constant 0 : index
    %99 = vector.load %arg4[%c0_46, %c0_47] : memref<256x128xf32, #tpu.memory_space<vmem>>, vector<16x128xf32>
    %100 = vector.broadcast %98 : vector<1x128xf32> to vector<16x128xf32>
    %101 = arith.mulf %99, %100 : vector<16x128xf32>
    %102 = arith.addf %91, %101 : vector<16x128xf32>
    %cst_48 = arith.constant 1.000000e+00 : f32
    %103 = vector.broadcast %cst_48 : f32 to vector<1x128xf32>
    %104 = arith.subf %27, %103 : vector<1x128xf32>
    %105 = math.absf %104 : vector<1x128xf32>
    %cst_49 = arith.constant 1.000000e+00 : f32
    %106 = vector.broadcast %cst_49 : f32 to vector<1x128xf32>
    %107 = arith.subf %106, %105 : vector<1x128xf32>
    %cst_50 = arith.constant 0.000000e+00 : f32
    %108 = vector.broadcast %cst_50 : f32 to vector<1x128xf32>
    %109 = arith.maximumf %107, %108 : vector<1x128xf32>
    %c16 = arith.constant 16 : index
    %c0_51 = arith.constant 0 : index
    %110 = vector.load %arg4[%c16, %c0_51] : memref<256x128xf32, #tpu.memory_space<vmem>>, vector<16x128xf32>
    %111 = vector.broadcast %109 : vector<1x128xf32> to vector<16x128xf32>
    %112 = arith.mulf %110, %111 : vector<16x128xf32>
    %113 = arith.addf %102, %112 : vector<16x128xf32>
    %cst_52 = arith.constant 2.000000e+00 : f32
    %114 = vector.broadcast %cst_52 : f32 to vector<1x128xf32>
    %115 = arith.subf %27, %114 : vector<1x128xf32>
    %116 = math.absf %115 : vector<1x128xf32>
    %cst_53 = arith.constant 1.000000e+00 : f32
    %117 = vector.broadcast %cst_53 : f32 to vector<1x128xf32>
    %118 = arith.subf %117, %116 : vector<1x128xf32>
    %cst_54 = arith.constant 0.000000e+00 : f32
    %119 = vector.broadcast %cst_54 : f32 to vector<1x128xf32>
    %120 = arith.maximumf %118, %119 : vector<1x128xf32>
    %c32 = arith.constant 32 : index
    %c0_55 = arith.constant 0 : index
    %121 = vector.load %arg4[%c32, %c0_55] : memref<256x128xf32, #tpu.memory_space<vmem>>, vector<16x128xf32>
    %122 = vector.broadcast %120 : vector<1x128xf32> to vector<16x128xf32>
    %123 = arith.mulf %121, %122 : vector<16x128xf32>
    %124 = arith.addf %113, %123 : vector<16x128xf32>
    %cst_56 = arith.constant 3.000000e+00 : f32
    %125 = vector.broadcast %cst_56 : f32 to vector<1x128xf32>
    %126 = arith.subf %27, %125 : vector<1x128xf32>
    %127 = math.absf %126 : vector<1x128xf32>
    %cst_57 = arith.constant 1.000000e+00 : f32
    %128 = vector.broadcast %cst_57 : f32 to vector<1x128xf32>
    %129 = arith.subf %128, %127 : vector<1x128xf32>
    %cst_58 = arith.constant 0.000000e+00 : f32
    %130 = vector.broadcast %cst_58 : f32 to vector<1x128xf32>
    %131 = arith.maximumf %129, %130 : vector<1x128xf32>
    %c48 = arith.constant 48 : index
    %c0_59 = arith.constant 0 : index
    %132 = vector.load %arg4[%c48, %c0_59] : memref<256x128xf32, #tpu.memory_space<vmem>>, vector<16x128xf32>
    %133 = vector.broadcast %131 : vector<1x128xf32> to vector<16x128xf32>
    %134 = arith.mulf %132, %133 : vector<16x128xf32>
    %135 = arith.addf %124, %134 : vector<16x128xf32>
    %cst_60 = arith.constant 4.000000e+00 : f32
    %136 = vector.broadcast %cst_60 : f32 to vector<1x128xf32>
    %137 = arith.subf %27, %136 : vector<1x128xf32>
    %138 = math.absf %137 : vector<1x128xf32>
    %cst_61 = arith.constant 1.000000e+00 : f32
    %139 = vector.broadcast %cst_61 : f32 to vector<1x128xf32>
    %140 = arith.subf %139, %138 : vector<1x128xf32>
    %cst_62 = arith.constant 0.000000e+00 : f32
    %141 = vector.broadcast %cst_62 : f32 to vector<1x128xf32>
    %142 = arith.maximumf %140, %141 : vector<1x128xf32>
    %c64 = arith.constant 64 : index
    %c0_63 = arith.constant 0 : index
    %143 = vector.load %arg4[%c64, %c0_63] : memref<256x128xf32, #tpu.memory_space<vmem>>, vector<16x128xf32>
    %144 = vector.broadcast %142 : vector<1x128xf32> to vector<16x128xf32>
    %145 = arith.mulf %143, %144 : vector<16x128xf32>
    %146 = arith.addf %135, %145 : vector<16x128xf32>
    %cst_64 = arith.constant 5.000000e+00 : f32
    %147 = vector.broadcast %cst_64 : f32 to vector<1x128xf32>
    %148 = arith.subf %27, %147 : vector<1x128xf32>
    %149 = math.absf %148 : vector<1x128xf32>
    %cst_65 = arith.constant 1.000000e+00 : f32
    %150 = vector.broadcast %cst_65 : f32 to vector<1x128xf32>
    %151 = arith.subf %150, %149 : vector<1x128xf32>
    %cst_66 = arith.constant 0.000000e+00 : f32
    %152 = vector.broadcast %cst_66 : f32 to vector<1x128xf32>
    %153 = arith.maximumf %151, %152 : vector<1x128xf32>
    %c80 = arith.constant 80 : index
    %c0_67 = arith.constant 0 : index
    %154 = vector.load %arg4[%c80, %c0_67] : memref<256x128xf32, #tpu.memory_space<vmem>>, vector<16x128xf32>
    %155 = vector.broadcast %153 : vector<1x128xf32> to vector<16x128xf32>
    %156 = arith.mulf %154, %155 : vector<16x128xf32>
    %157 = arith.addf %146, %156 : vector<16x128xf32>
    %cst_68 = arith.constant 6.000000e+00 : f32
    %158 = vector.broadcast %cst_68 : f32 to vector<1x128xf32>
    %159 = arith.subf %27, %158 : vector<1x128xf32>
    %160 = math.absf %159 : vector<1x128xf32>
    %cst_69 = arith.constant 1.000000e+00 : f32
    %161 = vector.broadcast %cst_69 : f32 to vector<1x128xf32>
    %162 = arith.subf %161, %160 : vector<1x128xf32>
    %cst_70 = arith.constant 0.000000e+00 : f32
    %163 = vector.broadcast %cst_70 : f32 to vector<1x128xf32>
    %164 = arith.maximumf %162, %163 : vector<1x128xf32>
    %c96 = arith.constant 96 : index
    %c0_71 = arith.constant 0 : index
    %165 = vector.load %arg4[%c96, %c0_71] : memref<256x128xf32, #tpu.memory_space<vmem>>, vector<16x128xf32>
    %166 = vector.broadcast %164 : vector<1x128xf32> to vector<16x128xf32>
    %167 = arith.mulf %165, %166 : vector<16x128xf32>
    %168 = arith.addf %157, %167 : vector<16x128xf32>
    %cst_72 = arith.constant 7.000000e+00 : f32
    %169 = vector.broadcast %cst_72 : f32 to vector<1x128xf32>
    %170 = arith.subf %27, %169 : vector<1x128xf32>
    %171 = math.absf %170 : vector<1x128xf32>
    %cst_73 = arith.constant 1.000000e+00 : f32
    %172 = vector.broadcast %cst_73 : f32 to vector<1x128xf32>
    %173 = arith.subf %172, %171 : vector<1x128xf32>
    %cst_74 = arith.constant 0.000000e+00 : f32
    %174 = vector.broadcast %cst_74 : f32 to vector<1x128xf32>
    %175 = arith.maximumf %173, %174 : vector<1x128xf32>
    %c112 = arith.constant 112 : index
    %c0_75 = arith.constant 0 : index
    %176 = vector.load %arg4[%c112, %c0_75] : memref<256x128xf32, #tpu.memory_space<vmem>>, vector<16x128xf32>
    %177 = vector.broadcast %175 : vector<1x128xf32> to vector<16x128xf32>
    %178 = arith.mulf %176, %177 : vector<16x128xf32>
    %179 = arith.addf %168, %178 : vector<16x128xf32>
    %cst_76 = arith.constant 8.000000e+00 : f32
    %180 = vector.broadcast %cst_76 : f32 to vector<1x128xf32>
    %181 = arith.subf %27, %180 : vector<1x128xf32>
    %182 = math.absf %181 : vector<1x128xf32>
    %cst_77 = arith.constant 1.000000e+00 : f32
    %183 = vector.broadcast %cst_77 : f32 to vector<1x128xf32>
    %184 = arith.subf %183, %182 : vector<1x128xf32>
    %cst_78 = arith.constant 0.000000e+00 : f32
    %185 = vector.broadcast %cst_78 : f32 to vector<1x128xf32>
    %186 = arith.maximumf %184, %185 : vector<1x128xf32>
    %c128 = arith.constant 128 : index
    %c0_79 = arith.constant 0 : index
    %187 = vector.load %arg4[%c128, %c0_79] : memref<256x128xf32, #tpu.memory_space<vmem>>, vector<16x128xf32>
    %188 = vector.broadcast %186 : vector<1x128xf32> to vector<16x128xf32>
    %189 = arith.mulf %187, %188 : vector<16x128xf32>
    %190 = arith.addf %179, %189 : vector<16x128xf32>
    %cst_80 = arith.constant 9.000000e+00 : f32
    %191 = vector.broadcast %cst_80 : f32 to vector<1x128xf32>
    %192 = arith.subf %27, %191 : vector<1x128xf32>
    %193 = math.absf %192 : vector<1x128xf32>
    %cst_81 = arith.constant 1.000000e+00 : f32
    %194 = vector.broadcast %cst_81 : f32 to vector<1x128xf32>
    %195 = arith.subf %194, %193 : vector<1x128xf32>
    %cst_82 = arith.constant 0.000000e+00 : f32
    %196 = vector.broadcast %cst_82 : f32 to vector<1x128xf32>
    %197 = arith.maximumf %195, %196 : vector<1x128xf32>
    %c144 = arith.constant 144 : index
    %c0_83 = arith.constant 0 : index
    %198 = vector.load %arg4[%c144, %c0_83] : memref<256x128xf32, #tpu.memory_space<vmem>>, vector<16x128xf32>
    %199 = vector.broadcast %197 : vector<1x128xf32> to vector<16x128xf32>
    %200 = arith.mulf %198, %199 : vector<16x128xf32>
    %201 = arith.addf %190, %200 : vector<16x128xf32>
    %cst_84 = arith.constant 1.000000e+01 : f32
    %202 = vector.broadcast %cst_84 : f32 to vector<1x128xf32>
    %203 = arith.subf %27, %202 : vector<1x128xf32>
    %204 = math.absf %203 : vector<1x128xf32>
    %cst_85 = arith.constant 1.000000e+00 : f32
    %205 = vector.broadcast %cst_85 : f32 to vector<1x128xf32>
    %206 = arith.subf %205, %204 : vector<1x128xf32>
    %cst_86 = arith.constant 0.000000e+00 : f32
    %207 = vector.broadcast %cst_86 : f32 to vector<1x128xf32>
    %208 = arith.maximumf %206, %207 : vector<1x128xf32>
    %c160 = arith.constant 160 : index
    %c0_87 = arith.constant 0 : index
    %209 = vector.load %arg4[%c160, %c0_87] : memref<256x128xf32, #tpu.memory_space<vmem>>, vector<16x128xf32>
    %210 = vector.broadcast %208 : vector<1x128xf32> to vector<16x128xf32>
    %211 = arith.mulf %209, %210 : vector<16x128xf32>
    %212 = arith.addf %201, %211 : vector<16x128xf32>
    %cst_88 = arith.constant 1.100000e+01 : f32
    %213 = vector.broadcast %cst_88 : f32 to vector<1x128xf32>
    %214 = arith.subf %27, %213 : vector<1x128xf32>
    %215 = math.absf %214 : vector<1x128xf32>
    %cst_89 = arith.constant 1.000000e+00 : f32
    %216 = vector.broadcast %cst_89 : f32 to vector<1x128xf32>
    %217 = arith.subf %216, %215 : vector<1x128xf32>
    %cst_90 = arith.constant 0.000000e+00 : f32
    %218 = vector.broadcast %cst_90 : f32 to vector<1x128xf32>
    %219 = arith.maximumf %217, %218 : vector<1x128xf32>
    %c176 = arith.constant 176 : index
    %c0_91 = arith.constant 0 : index
    %220 = vector.load %arg4[%c176, %c0_91] : memref<256x128xf32, #tpu.memory_space<vmem>>, vector<16x128xf32>
    %221 = vector.broadcast %219 : vector<1x128xf32> to vector<16x128xf32>
    %222 = arith.mulf %220, %221 : vector<16x128xf32>
    %223 = arith.addf %212, %222 : vector<16x128xf32>
    %cst_92 = arith.constant 1.200000e+01 : f32
    %224 = vector.broadcast %cst_92 : f32 to vector<1x128xf32>
    %225 = arith.subf %27, %224 : vector<1x128xf32>
    %226 = math.absf %225 : vector<1x128xf32>
    %cst_93 = arith.constant 1.000000e+00 : f32
    %227 = vector.broadcast %cst_93 : f32 to vector<1x128xf32>
    %228 = arith.subf %227, %226 : vector<1x128xf32>
    %cst_94 = arith.constant 0.000000e+00 : f32
    %229 = vector.broadcast %cst_94 : f32 to vector<1x128xf32>
    %230 = arith.maximumf %228, %229 : vector<1x128xf32>
    %c192 = arith.constant 192 : index
    %c0_95 = arith.constant 0 : index
    %231 = vector.load %arg4[%c192, %c0_95] : memref<256x128xf32, #tpu.memory_space<vmem>>, vector<16x128xf32>
    %232 = vector.broadcast %230 : vector<1x128xf32> to vector<16x128xf32>
    %233 = arith.mulf %231, %232 : vector<16x128xf32>
    %234 = arith.addf %223, %233 : vector<16x128xf32>
    %cst_96 = arith.constant 1.300000e+01 : f32
    %235 = vector.broadcast %cst_96 : f32 to vector<1x128xf32>
    %236 = arith.subf %27, %235 : vector<1x128xf32>
    %237 = math.absf %236 : vector<1x128xf32>
    %cst_97 = arith.constant 1.000000e+00 : f32
    %238 = vector.broadcast %cst_97 : f32 to vector<1x128xf32>
    %239 = arith.subf %238, %237 : vector<1x128xf32>
    %cst_98 = arith.constant 0.000000e+00 : f32
    %240 = vector.broadcast %cst_98 : f32 to vector<1x128xf32>
    %241 = arith.maximumf %239, %240 : vector<1x128xf32>
    %c208 = arith.constant 208 : index
    %c0_99 = arith.constant 0 : index
    %242 = vector.load %arg4[%c208, %c0_99] : memref<256x128xf32, #tpu.memory_space<vmem>>, vector<16x128xf32>
    %243 = vector.broadcast %241 : vector<1x128xf32> to vector<16x128xf32>
    %244 = arith.mulf %242, %243 : vector<16x128xf32>
    %245 = arith.addf %234, %244 : vector<16x128xf32>
    %cst_100 = arith.constant 1.400000e+01 : f32
    %246 = vector.broadcast %cst_100 : f32 to vector<1x128xf32>
    %247 = arith.subf %27, %246 : vector<1x128xf32>
    %248 = math.absf %247 : vector<1x128xf32>
    %cst_101 = arith.constant 1.000000e+00 : f32
    %249 = vector.broadcast %cst_101 : f32 to vector<1x128xf32>
    %250 = arith.subf %249, %248 : vector<1x128xf32>
    %cst_102 = arith.constant 0.000000e+00 : f32
    %251 = vector.broadcast %cst_102 : f32 to vector<1x128xf32>
    %252 = arith.maximumf %250, %251 : vector<1x128xf32>
    %c224 = arith.constant 224 : index
    %c0_103 = arith.constant 0 : index
    %253 = vector.load %arg4[%c224, %c0_103] : memref<256x128xf32, #tpu.memory_space<vmem>>, vector<16x128xf32>
    %254 = vector.broadcast %252 : vector<1x128xf32> to vector<16x128xf32>
    %255 = arith.mulf %253, %254 : vector<16x128xf32>
    %256 = arith.addf %245, %255 : vector<16x128xf32>
    %cst_104 = arith.constant 1.500000e+01 : f32
    %257 = vector.broadcast %cst_104 : f32 to vector<1x128xf32>
    %258 = arith.subf %27, %257 : vector<1x128xf32>
    %259 = math.absf %258 : vector<1x128xf32>
    %cst_105 = arith.constant 1.000000e+00 : f32
    %260 = vector.broadcast %cst_105 : f32 to vector<1x128xf32>
    %261 = arith.subf %260, %259 : vector<1x128xf32>
    %cst_106 = arith.constant 0.000000e+00 : f32
    %262 = vector.broadcast %cst_106 : f32 to vector<1x128xf32>
    %263 = arith.maximumf %261, %262 : vector<1x128xf32>
    %c240 = arith.constant 240 : index
    %c0_107 = arith.constant 0 : index
    %264 = vector.load %arg4[%c240, %c0_107] : memref<256x128xf32, #tpu.memory_space<vmem>>, vector<16x128xf32>
    %265 = vector.broadcast %263 : vector<1x128xf32> to vector<16x128xf32>
    %266 = arith.mulf %264, %265 : vector<16x128xf32>
    %267 = arith.addf %256, %266 : vector<16x128xf32>
    %268 = vector.extract_strided_slice %267 {offsets = [0, 0], sizes = [1, 128], strides = [1, 1]} : vector<16x128xf32> to vector<1x128xf32>
    %269 = vector.extract_strided_slice %267 {offsets = [1, 0], sizes = [1, 128], strides = [1, 1]} : vector<16x128xf32> to vector<1x128xf32>
    %270 = vector.extract_strided_slice %267 {offsets = [2, 0], sizes = [1, 128], strides = [1, 1]} : vector<16x128xf32> to vector<1x128xf32>
    %271 = vector.extract_strided_slice %267 {offsets = [3, 0], sizes = [1, 128], strides = [1, 1]} : vector<16x128xf32> to vector<1x128xf32>
    %272 = vector.extract_strided_slice %267 {offsets = [4, 0], sizes = [1, 128], strides = [1, 1]} : vector<16x128xf32> to vector<1x128xf32>
    %273 = vector.extract_strided_slice %267 {offsets = [5, 0], sizes = [1, 128], strides = [1, 1]} : vector<16x128xf32> to vector<1x128xf32>
    %274 = vector.extract_strided_slice %267 {offsets = [6, 0], sizes = [1, 128], strides = [1, 1]} : vector<16x128xf32> to vector<1x128xf32>
    %275 = vector.extract_strided_slice %267 {offsets = [7, 0], sizes = [1, 128], strides = [1, 1]} : vector<16x128xf32> to vector<1x128xf32>
    %276 = vector.extract_strided_slice %267 {offsets = [8, 0], sizes = [1, 128], strides = [1, 1]} : vector<16x128xf32> to vector<1x128xf32>
    %277 = vector.extract_strided_slice %267 {offsets = [9, 0], sizes = [1, 128], strides = [1, 1]} : vector<16x128xf32> to vector<1x128xf32>
    %278 = vector.extract_strided_slice %267 {offsets = [10, 0], sizes = [1, 128], strides = [1, 1]} : vector<16x128xf32> to vector<1x128xf32>
    %279 = vector.extract_strided_slice %267 {offsets = [11, 0], sizes = [1, 128], strides = [1, 1]} : vector<16x128xf32> to vector<1x128xf32>
    %280 = arith.mulf %268, %5 : vector<1x128xf32>
    %281 = arith.mulf %269, %6 : vector<1x128xf32>
    %282 = arith.addf %280, %281 : vector<1x128xf32>
    %283 = arith.mulf %270, %7 : vector<1x128xf32>
    %284 = arith.addf %282, %283 : vector<1x128xf32>
    %285 = arith.addf %284, %271 : vector<1x128xf32>
    %286 = arith.subf %285, %0 : vector<1x128xf32>
    %287 = arith.mulf %272, %5 : vector<1x128xf32>
    %288 = arith.mulf %273, %6 : vector<1x128xf32>
    %289 = arith.addf %287, %288 : vector<1x128xf32>
    %290 = arith.mulf %274, %7 : vector<1x128xf32>
    %291 = arith.addf %289, %290 : vector<1x128xf32>
    %292 = arith.addf %291, %275 : vector<1x128xf32>
    %293 = arith.subf %292, %1 : vector<1x128xf32>
    %294 = arith.mulf %276, %5 : vector<1x128xf32>
    %295 = arith.mulf %277, %6 : vector<1x128xf32>
    %296 = arith.addf %294, %295 : vector<1x128xf32>
    %297 = arith.mulf %278, %7 : vector<1x128xf32>
    %298 = arith.addf %296, %297 : vector<1x128xf32>
    %299 = arith.addf %298, %279 : vector<1x128xf32>
    %300 = arith.subf %299, %2 : vector<1x128xf32>
    %301 = arith.mulf %273, %278 : vector<1x128xf32>
    %302 = arith.mulf %274, %277 : vector<1x128xf32>
    %303 = arith.subf %301, %302 : vector<1x128xf32>
    %304 = arith.mulf %270, %277 : vector<1x128xf32>
    %305 = arith.mulf %269, %278 : vector<1x128xf32>
    %306 = arith.subf %304, %305 : vector<1x128xf32>
    %307 = arith.mulf %269, %274 : vector<1x128xf32>
    %308 = arith.mulf %270, %273 : vector<1x128xf32>
    %309 = arith.subf %307, %308 : vector<1x128xf32>
    %310 = arith.mulf %274, %276 : vector<1x128xf32>
    %311 = arith.mulf %272, %278 : vector<1x128xf32>
    %312 = arith.subf %310, %311 : vector<1x128xf32>
    %313 = arith.mulf %268, %278 : vector<1x128xf32>
    %314 = arith.mulf %270, %276 : vector<1x128xf32>
    %315 = arith.subf %313, %314 : vector<1x128xf32>
    %316 = arith.mulf %270, %272 : vector<1x128xf32>
    %317 = arith.mulf %268, %274 : vector<1x128xf32>
    %318 = arith.subf %316, %317 : vector<1x128xf32>
    %319 = arith.mulf %272, %277 : vector<1x128xf32>
    %320 = arith.mulf %273, %276 : vector<1x128xf32>
    %321 = arith.subf %319, %320 : vector<1x128xf32>
    %322 = arith.mulf %269, %276 : vector<1x128xf32>
    %323 = arith.mulf %268, %277 : vector<1x128xf32>
    %324 = arith.subf %322, %323 : vector<1x128xf32>
    %325 = arith.mulf %268, %273 : vector<1x128xf32>
    %326 = arith.mulf %269, %272 : vector<1x128xf32>
    %327 = arith.subf %325, %326 : vector<1x128xf32>
    %328 = arith.mulf %268, %303 : vector<1x128xf32>
    %329 = arith.mulf %269, %312 : vector<1x128xf32>
    %330 = arith.addf %328, %329 : vector<1x128xf32>
    %331 = arith.mulf %270, %321 : vector<1x128xf32>
    %332 = arith.addf %330, %331 : vector<1x128xf32>
    %333 = math.absf %332 : vector<1x128xf32>
    %cst_108 = arith.constant 9.99999993E-9 : f32
    %334 = vector.broadcast %cst_108 : f32 to vector<1x128xf32>
    %335 = arith.cmpf olt, %333, %334 : vector<1x128xf32>
    %cst_109 = arith.constant 0.000000e+00 : f32
    %336 = vector.broadcast %cst_109 : f32 to vector<1x128xf32>
    %337 = arith.cmpf olt, %332, %336 : vector<1x128xf32>
    %cst_110 = arith.constant -9.99999993E-9 : f32
    %cst_111 = arith.constant 9.99999993E-9 : f32
    %338 = vector.broadcast %cst_110 : f32 to vector<1x128xf32>
    %339 = vector.broadcast %cst_111 : f32 to vector<1x128xf32>
    %340 = arith.select %337, %338, %339 : vector<1x128xi1>, vector<1x128xf32>
    %341 = arith.select %335, %340, %332 : vector<1x128xi1>, vector<1x128xf32>
    %cst_112 = arith.constant 1.000000e+00 : f32
    %342 = vector.broadcast %cst_112 : f32 to vector<1x128xf32>
    %343 = arith.divf %342, %341 : vector<1x128xf32>
    %344 = arith.mulf %303, %286 : vector<1x128xf32>
    %345 = arith.mulf %306, %293 : vector<1x128xf32>
    %346 = arith.addf %344, %345 : vector<1x128xf32>
    %347 = arith.mulf %309, %300 : vector<1x128xf32>
    %348 = arith.addf %346, %347 : vector<1x128xf32>
    %349 = arith.mulf %343, %348 : vector<1x128xf32>
    %cst_113 = arith.constant -1.000000e+02 : f32
    %cst_114 = arith.constant 1.000000e+02 : f32
    %350 = vector.broadcast %cst_113 : f32 to vector<1x128xf32>
    %351 = arith.maximumf %350, %349 : vector<1x128xf32>
    %352 = vector.broadcast %cst_114 : f32 to vector<1x128xf32>
    %353 = arith.minimumf %352, %351 : vector<1x128xf32>
    %354 = arith.mulf %312, %286 : vector<1x128xf32>
    %355 = arith.mulf %315, %293 : vector<1x128xf32>
    %356 = arith.addf %354, %355 : vector<1x128xf32>
    %357 = arith.mulf %318, %300 : vector<1x128xf32>
    %358 = arith.addf %356, %357 : vector<1x128xf32>
    %359 = arith.mulf %343, %358 : vector<1x128xf32>
    %cst_115 = arith.constant -1.000000e+02 : f32
    %cst_116 = arith.constant 1.000000e+02 : f32
    %360 = vector.broadcast %cst_115 : f32 to vector<1x128xf32>
    %361 = arith.maximumf %360, %359 : vector<1x128xf32>
    %362 = vector.broadcast %cst_116 : f32 to vector<1x128xf32>
    %363 = arith.minimumf %362, %361 : vector<1x128xf32>
    %364 = arith.mulf %321, %286 : vector<1x128xf32>
    %365 = arith.mulf %324, %293 : vector<1x128xf32>
    %366 = arith.addf %364, %365 : vector<1x128xf32>
    %367 = arith.mulf %327, %300 : vector<1x128xf32>
    %368 = arith.addf %366, %367 : vector<1x128xf32>
    %369 = arith.mulf %343, %368 : vector<1x128xf32>
    %cst_117 = arith.constant -1.000000e+02 : f32
    %cst_118 = arith.constant 1.000000e+02 : f32
    %370 = vector.broadcast %cst_117 : f32 to vector<1x128xf32>
    %371 = arith.maximumf %370, %369 : vector<1x128xf32>
    %372 = vector.broadcast %cst_118 : f32 to vector<1x128xf32>
    %373 = arith.minimumf %372, %371 : vector<1x128xf32>
    %374 = arith.subf %5, %353 : vector<1x128xf32>
    %375 = arith.subf %6, %363 : vector<1x128xf32>
    %376 = arith.subf %7, %373 : vector<1x128xf32>
    %c1_i32 = arith.constant 1 : i32
    %cst_119 = arith.constant 0.00169628859 : f32
    %377 = vector.broadcast %cst_119 : f32 to vector<1x128xf32>
    %378 = arith.subf %374, %377 : vector<1x128xf32>
    %cst_120 = arith.constant 1.05144262 : f32
    %379 = vector.broadcast %cst_120 : f32 to vector<1x128xf32>
    %380 = arith.mulf %378, %379 : vector<1x128xf32>
    %cst_121 = arith.constant -0.00430172682 : f32
    %381 = vector.broadcast %cst_121 : f32 to vector<1x128xf32>
    %382 = arith.subf %375, %381 : vector<1x128xf32>
    %cst_122 = arith.constant 1.05144262 : f32
    %383 = vector.broadcast %cst_122 : f32 to vector<1x128xf32>
    %384 = arith.mulf %382, %383 : vector<1x128xf32>
    %cst_123 = arith.constant -0.00518578291 : f32
    %385 = vector.broadcast %cst_123 : f32 to vector<1x128xf32>
    %386 = arith.subf %376, %385 : vector<1x128xf32>
    %cst_124 = arith.constant 4.20577049 : f32
    %387 = vector.broadcast %cst_124 : f32 to vector<1x128xf32>
    %388 = arith.mulf %386, %387 : vector<1x128xf32>
    %cst_125 = arith.constant 1.000000e+00 : f32
    %389 = vector.broadcast %cst_125 : f32 to vector<1x128xf32>
    %390 = arith.addf %380, %389 : vector<1x128xf32>
    %cst_126 = arith.constant 7.500000e+00 : f32
    %391 = vector.broadcast %cst_126 : f32 to vector<1x128xf32>
    %392 = arith.mulf %390, %391 : vector<1x128xf32>
    %cst_127 = arith.constant 0.000000e+00 : f32
    %cst_128 = arith.constant 1.500000e+01 : f32
    %393 = vector.broadcast %cst_127 : f32 to vector<1x128xf32>
    %394 = arith.maximumf %393, %392 : vector<1x128xf32>
    %395 = vector.broadcast %cst_128 : f32 to vector<1x128xf32>
    %396 = arith.minimumf %395, %394 : vector<1x128xf32>
    %cst_129 = arith.constant 1.000000e+00 : f32
    %397 = vector.broadcast %cst_129 : f32 to vector<1x128xf32>
    %398 = arith.addf %384, %397 : vector<1x128xf32>
    %cst_130 = arith.constant 7.500000e+00 : f32
    %399 = vector.broadcast %cst_130 : f32 to vector<1x128xf32>
    %400 = arith.mulf %398, %399 : vector<1x128xf32>
    %cst_131 = arith.constant 0.000000e+00 : f32
    %cst_132 = arith.constant 1.500000e+01 : f32
    %401 = vector.broadcast %cst_131 : f32 to vector<1x128xf32>
    %402 = arith.maximumf %401, %400 : vector<1x128xf32>
    %403 = vector.broadcast %cst_132 : f32 to vector<1x128xf32>
    %404 = arith.minimumf %403, %402 : vector<1x128xf32>
    %cst_133 = arith.constant 1.000000e+00 : f32
    %405 = vector.broadcast %cst_133 : f32 to vector<1x128xf32>
    %406 = arith.addf %388, %405 : vector<1x128xf32>
    %cst_134 = arith.constant 1.500000e+00 : f32
    %407 = vector.broadcast %cst_134 : f32 to vector<1x128xf32>
    %408 = arith.mulf %406, %407 : vector<1x128xf32>
    %cst_135 = arith.constant 0.000000e+00 : f32
    %cst_136 = arith.constant 3.000000e+00 : f32
    %409 = vector.broadcast %cst_135 : f32 to vector<1x128xf32>
    %410 = arith.maximumf %409, %408 : vector<1x128xf32>
    %411 = vector.broadcast %cst_136 : f32 to vector<1x128xf32>
    %412 = arith.minimumf %411, %410 : vector<1x128xf32>
    %413 = vector.broadcast %404 : vector<1x128xf32> to vector<16x128xf32>
    %414 = arith.subf %413, %4 : vector<16x128xf32>
    %415 = math.absf %414 : vector<16x128xf32>
    %cst_137 = arith.constant 1.000000e+00 : f32
    %416 = vector.broadcast %cst_137 : f32 to vector<16x128xf32>
    %417 = arith.subf %416, %415 : vector<16x128xf32>
    %cst_138 = arith.constant 0.000000e+00 : f32
    %418 = vector.broadcast %cst_138 : f32 to vector<16x128xf32>
    %419 = arith.maximumf %417, %418 : vector<16x128xf32>
    %cst_139 = arith.constant 0.000000e+00 : f32
    %420 = vector.broadcast %cst_139 : f32 to vector<1x128xf32>
    %421 = arith.subf %412, %420 : vector<1x128xf32>
    %422 = math.absf %421 : vector<1x128xf32>
    %cst_140 = arith.constant 1.000000e+00 : f32
    %423 = vector.broadcast %cst_140 : f32 to vector<1x128xf32>
    %424 = arith.subf %423, %422 : vector<1x128xf32>
    %cst_141 = arith.constant 0.000000e+00 : f32
    %425 = vector.broadcast %cst_141 : f32 to vector<1x128xf32>
    %426 = arith.maximumf %424, %425 : vector<1x128xf32>
    %427 = vector.broadcast %426 : vector<1x128xf32> to vector<16x128xf32>
    %428 = arith.mulf %419, %427 : vector<16x128xf32>
    %cst_142 = arith.constant 1.000000e+00 : f32
    %429 = vector.broadcast %cst_142 : f32 to vector<1x128xf32>
    %430 = arith.subf %412, %429 : vector<1x128xf32>
    %431 = math.absf %430 : vector<1x128xf32>
    %cst_143 = arith.constant 1.000000e+00 : f32
    %432 = vector.broadcast %cst_143 : f32 to vector<1x128xf32>
    %433 = arith.subf %432, %431 : vector<1x128xf32>
    %cst_144 = arith.constant 0.000000e+00 : f32
    %434 = vector.broadcast %cst_144 : f32 to vector<1x128xf32>
    %435 = arith.maximumf %433, %434 : vector<1x128xf32>
    %436 = vector.broadcast %435 : vector<1x128xf32> to vector<16x128xf32>
    %437 = arith.mulf %419, %436 : vector<16x128xf32>
    %cst_145 = arith.constant 2.000000e+00 : f32
    %438 = vector.broadcast %cst_145 : f32 to vector<1x128xf32>
    %439 = arith.subf %412, %438 : vector<1x128xf32>
    %440 = math.absf %439 : vector<1x128xf32>
    %cst_146 = arith.constant 1.000000e+00 : f32
    %441 = vector.broadcast %cst_146 : f32 to vector<1x128xf32>
    %442 = arith.subf %441, %440 : vector<1x128xf32>
    %cst_147 = arith.constant 0.000000e+00 : f32
    %443 = vector.broadcast %cst_147 : f32 to vector<1x128xf32>
    %444 = arith.maximumf %442, %443 : vector<1x128xf32>
    %445 = vector.broadcast %444 : vector<1x128xf32> to vector<16x128xf32>
    %446 = arith.mulf %419, %445 : vector<16x128xf32>
    %cst_148 = arith.constant 3.000000e+00 : f32
    %447 = vector.broadcast %cst_148 : f32 to vector<1x128xf32>
    %448 = arith.subf %412, %447 : vector<1x128xf32>
    %449 = math.absf %448 : vector<1x128xf32>
    %cst_149 = arith.constant 1.000000e+00 : f32
    %450 = vector.broadcast %cst_149 : f32 to vector<1x128xf32>
    %451 = arith.subf %450, %449 : vector<1x128xf32>
    %cst_150 = arith.constant 0.000000e+00 : f32
    %452 = vector.broadcast %cst_150 : f32 to vector<1x128xf32>
    %453 = arith.maximumf %451, %452 : vector<1x128xf32>
    %454 = vector.broadcast %453 : vector<1x128xf32> to vector<16x128xf32>
    %455 = arith.mulf %419, %454 : vector<16x128xf32>
    %456 = tpu.concatenate %428, %437, %446, %455 in 0 : vector<16x128xf32>, vector<16x128xf32>, vector<16x128xf32>, vector<16x128xf32> -> vector<64x128xf32>
    %c0_151 = arith.constant 0 : index
    %c0_152 = arith.constant 0 : index
    %457 = vector.load %arg2[%c0_151, %c0_152] : memref<256x64xf32, #tpu.memory_space<vmem>>, vector<256x64xf32>
    %cst_153 = arith.constant dense<0.000000e+00> : vector<256x128xf32>
    %458 = tpu.matmul %457, %456, %cst_153 {dimension_numbers = #tpu.dot_dimension_numbers<[1], [0], [0], [1], [0, 0, 1, 1], [], []>} : vector<256x64xf32>, vector<64x128xf32>, vector<256x128xf32> -> vector<256x128xf32>
    %c0_154 = arith.constant 0 : index
    %c0_155 = arith.constant 0 : index
    %459 = vector.load %arg4[%c0_154, %c0_155] : memref<256x128xf32, #tpu.memory_space<vmem>>, vector<256x128xf32>
    tpu.vector_store %arg4[%c0_154, %c0_155], %458 {strides = array<i32>} : memref<256x128xf32, #tpu.memory_space<vmem>>, vector<256x128xf32>,
    %cst_156 = arith.constant 0.000000e+00 : f32
    %460 = vector.broadcast %cst_156 : f32 to vector<16x128xf32>
    %cst_157 = arith.constant 0.000000e+00 : f32
    %461 = vector.broadcast %cst_157 : f32 to vector<1x128xf32>
    %462 = arith.subf %396, %461 : vector<1x128xf32>
    %463 = math.absf %462 : vector<1x128xf32>
    %cst_158 = arith.constant 1.000000e+00 : f32
    %464 = vector.broadcast %cst_158 : f32 to vector<1x128xf32>
    %465 = arith.subf %464, %463 : vector<1x128xf32>
    %cst_159 = arith.constant 0.000000e+00 : f32
    %466 = vector.broadcast %cst_159 : f32 to vector<1x128xf32>
    %467 = arith.maximumf %465, %466 : vector<1x128xf32>
    %c0_160 = arith.constant 0 : index
    %c0_161 = arith.constant 0 : index
    %468 = vector.load %arg4[%c0_160, %c0_161] : memref<256x128xf32, #tpu.memory_space<vmem>>, vector<16x128xf32>
    %469 = vector.broadcast %467 : vector<1x128xf32> to vector<16x128xf32>
    %470 = arith.mulf %468, %469 : vector<16x128xf32>
    %471 = arith.addf %460, %470 : vector<16x128xf32>
    %cst_162 = arith.constant 1.000000e+00 : f32
    %472 = vector.broadcast %cst_162 : f32 to vector<1x128xf32>
    %473 = arith.subf %396, %472 : vector<1x128xf32>
    %474 = math.absf %473 : vector<1x128xf32>
    %cst_163 = arith.constant 1.000000e+00 : f32
    %475 = vector.broadcast %cst_163 : f32 to vector<1x128xf32>
    %476 = arith.subf %475, %474 : vector<1x128xf32>
    %cst_164 = arith.constant 0.000000e+00 : f32
    %477 = vector.broadcast %cst_164 : f32 to vector<1x128xf32>
    %478 = arith.maximumf %476, %477 : vector<1x128xf32>
    %c16_165 = arith.constant 16 : index
    %c0_166 = arith.constant 0 : index
    %479 = vector.load %arg4[%c16_165, %c0_166] : memref<256x128xf32, #tpu.memory_space<vmem>>, vector<16x128xf32>
    %480 = vector.broadcast %478 : vector<1x128xf32> to vector<16x128xf32>
    %481 = arith.mulf %479, %480 : vector<16x128xf32>
    %482 = arith.addf %471, %481 : vector<16x128xf32>
    %cst_167 = arith.constant 2.000000e+00 : f32
    %483 = vector.broadcast %cst_167 : f32 to vector<1x128xf32>
    %484 = arith.subf %396, %483 : vector<1x128xf32>
    %485 = math.absf %484 : vector<1x128xf32>
    %cst_168 = arith.constant 1.000000e+00 : f32
    %486 = vector.broadcast %cst_168 : f32 to vector<1x128xf32>
    %487 = arith.subf %486, %485 : vector<1x128xf32>
    %cst_169 = arith.constant 0.000000e+00 : f32
    %488 = vector.broadcast %cst_169 : f32 to vector<1x128xf32>
    %489 = arith.maximumf %487, %488 : vector<1x128xf32>
    %c32_170 = arith.constant 32 : index
    %c0_171 = arith.constant 0 : index
    %490 = vector.load %arg4[%c32_170, %c0_171] : memref<256x128xf32, #tpu.memory_space<vmem>>, vector<16x128xf32>
    %491 = vector.broadcast %489 : vector<1x128xf32> to vector<16x128xf32>
    %492 = arith.mulf %490, %491 : vector<16x128xf32>
    %493 = arith.addf %482, %492 : vector<16x128xf32>
    %cst_172 = arith.constant 3.000000e+00 : f32
    %494 = vector.broadcast %cst_172 : f32 to vector<1x128xf32>
    %495 = arith.subf %396, %494 : vector<1x128xf32>
    %496 = math.absf %495 : vector<1x128xf32>
    %cst_173 = arith.constant 1.000000e+00 : f32
    %497 = vector.broadcast %cst_173 : f32 to vector<1x128xf32>
    %498 = arith.subf %497, %496 : vector<1x128xf32>
    %cst_174 = arith.constant 0.000000e+00 : f32
    %499 = vector.broadcast %cst_174 : f32 to vector<1x128xf32>
    %500 = arith.maximumf %498, %499 : vector<1x128xf32>
    %c48_175 = arith.constant 48 : index
    %c0_176 = arith.constant 0 : index
    %501 = vector.load %arg4[%c48_175, %c0_176] : memref<256x128xf32, #tpu.memory_space<vmem>>, vector<16x128xf32>
    %502 = vector.broadcast %500 : vector<1x128xf32> to vector<16x128xf32>
    %503 = arith.mulf %501, %502 : vector<16x128xf32>
    %504 = arith.addf %493, %503 : vector<16x128xf32>
    %cst_177 = arith.constant 4.000000e+00 : f32
    %505 = vector.broadcast %cst_177 : f32 to vector<1x128xf32>
    %506 = arith.subf %396, %505 : vector<1x128xf32>
    %507 = math.absf %506 : vector<1x128xf32>
    %cst_178 = arith.constant 1.000000e+00 : f32
    %508 = vector.broadcast %cst_178 : f32 to vector<1x128xf32>
    %509 = arith.subf %508, %507 : vector<1x128xf32>
    %cst_179 = arith.constant 0.000000e+00 : f32
    %510 = vector.broadcast %cst_179 : f32 to vector<1x128xf32>
    %511 = arith.maximumf %509, %510 : vector<1x128xf32>
    %c64_180 = arith.constant 64 : index
    %c0_181 = arith.constant 0 : index
    %512 = vector.load %arg4[%c64_180, %c0_181] : memref<256x128xf32, #tpu.memory_space<vmem>>, vector<16x128xf32>
    %513 = vector.broadcast %511 : vector<1x128xf32> to vector<16x128xf32>
    %514 = arith.mulf %512, %513 : vector<16x128xf32>
    %515 = arith.addf %504, %514 : vector<16x128xf32>
    %cst_182 = arith.constant 5.000000e+00 : f32
    %516 = vector.broadcast %cst_182 : f32 to vector<1x128xf32>
    %517 = arith.subf %396, %516 : vector<1x128xf32>
    %518 = math.absf %517 : vector<1x128xf32>
    %cst_183 = arith.constant 1.000000e+00 : f32
    %519 = vector.broadcast %cst_183 : f32 to vector<1x128xf32>
    %520 = arith.subf %519, %518 : vector<1x128xf32>
    %cst_184 = arith.constant 0.000000e+00 : f32
    %521 = vector.broadcast %cst_184 : f32 to vector<1x128xf32>
    %522 = arith.maximumf %520, %521 : vector<1x128xf32>
    %c80_185 = arith.constant 80 : index
    %c0_186 = arith.constant 0 : index
    %523 = vector.load %arg4[%c80_185, %c0_186] : memref<256x128xf32, #tpu.memory_space<vmem>>, vector<16x128xf32>
    %524 = vector.broadcast %522 : vector<1x128xf32> to vector<16x128xf32>
    %525 = arith.mulf %523, %524 : vector<16x128xf32>
    %526 = arith.addf %515, %525 : vector<16x128xf32>
    %cst_187 = arith.constant 6.000000e+00 : f32
    %527 = vector.broadcast %cst_187 : f32 to vector<1x128xf32>
    %528 = arith.subf %396, %527 : vector<1x128xf32>
    %529 = math.absf %528 : vector<1x128xf32>
    %cst_188 = arith.constant 1.000000e+00 : f32
    %530 = vector.broadcast %cst_188 : f32 to vector<1x128xf32>
    %531 = arith.subf %530, %529 : vector<1x128xf32>
    %cst_189 = arith.constant 0.000000e+00 : f32
    %532 = vector.broadcast %cst_189 : f32 to vector<1x128xf32>
    %533 = arith.maximumf %531, %532 : vector<1x128xf32>
    %c96_190 = arith.constant 96 : index
    %c0_191 = arith.constant 0 : index
    %534 = vector.load %arg4[%c96_190, %c0_191] : memref<256x128xf32, #tpu.memory_space<vmem>>, vector<16x128xf32>
    %535 = vector.broadcast %533 : vector<1x128xf32> to vector<16x128xf32>
    %536 = arith.mulf %534, %535 : vector<16x128xf32>
    %537 = arith.addf %526, %536 : vector<16x128xf32>
    %cst_192 = arith.constant 7.000000e+00 : f32
    %538 = vector.broadcast %cst_192 : f32 to vector<1x128xf32>
    %539 = arith.subf %396, %538 : vector<1x128xf32>
    %540 = math.absf %539 : vector<1x128xf32>
    %cst_193 = arith.constant 1.000000e+00 : f32
    %541 = vector.broadcast %cst_193 : f32 to vector<1x128xf32>
    %542 = arith.subf %541, %540 : vector<1x128xf32>
    %cst_194 = arith.constant 0.000000e+00 : f32
    %543 = vector.broadcast %cst_194 : f32 to vector<1x128xf32>
    %544 = arith.maximumf %542, %543 : vector<1x128xf32>
    %c112_195 = arith.constant 112 : index
    %c0_196 = arith.constant 0 : index
    %545 = vector.load %arg4[%c112_195, %c0_196] : memref<256x128xf32, #tpu.memory_space<vmem>>, vector<16x128xf32>
    %546 = vector.broadcast %544 : vector<1x128xf32> to vector<16x128xf32>
    %547 = arith.mulf %545, %546 : vector<16x128xf32>
    %548 = arith.addf %537, %547 : vector<16x128xf32>
    %cst_197 = arith.constant 8.000000e+00 : f32
    %549 = vector.broadcast %cst_197 : f32 to vector<1x128xf32>
    %550 = arith.subf %396, %549 : vector<1x128xf32>
    %551 = math.absf %550 : vector<1x128xf32>
    %cst_198 = arith.constant 1.000000e+00 : f32
    %552 = vector.broadcast %cst_198 : f32 to vector<1x128xf32>
    %553 = arith.subf %552, %551 : vector<1x128xf32>
    %cst_199 = arith.constant 0.000000e+00 : f32
    %554 = vector.broadcast %cst_199 : f32 to vector<1x128xf32>
    %555 = arith.maximumf %553, %554 : vector<1x128xf32>
    %c128_200 = arith.constant 128 : index
    %c0_201 = arith.constant 0 : index
    %556 = vector.load %arg4[%c128_200, %c0_201] : memref<256x128xf32, #tpu.memory_space<vmem>>, vector<16x128xf32>
    %557 = vector.broadcast %555 : vector<1x128xf32> to vector<16x128xf32>
    %558 = arith.mulf %556, %557 : vector<16x128xf32>
    %559 = arith.addf %548, %558 : vector<16x128xf32>
    %cst_202 = arith.constant 9.000000e+00 : f32
    %560 = vector.broadcast %cst_202 : f32 to vector<1x128xf32>
    %561 = arith.subf %396, %560 : vector<1x128xf32>
    %562 = math.absf %561 : vector<1x128xf32>
    %cst_203 = arith.constant 1.000000e+00 : f32
    %563 = vector.broadcast %cst_203 : f32 to vector<1x128xf32>
    %564 = arith.subf %563, %562 : vector<1x128xf32>
    %cst_204 = arith.constant 0.000000e+00 : f32
    %565 = vector.broadcast %cst_204 : f32 to vector<1x128xf32>
    %566 = arith.maximumf %564, %565 : vector<1x128xf32>
    %c144_205 = arith.constant 144 : index
    %c0_206 = arith.constant 0 : index
    %567 = vector.load %arg4[%c144_205, %c0_206] : memref<256x128xf32, #tpu.memory_space<vmem>>, vector<16x128xf32>
    %568 = vector.broadcast %566 : vector<1x128xf32> to vector<16x128xf32>
    %569 = arith.mulf %567, %568 : vector<16x128xf32>
    %570 = arith.addf %559, %569 : vector<16x128xf32>
    %cst_207 = arith.constant 1.000000e+01 : f32
    %571 = vector.broadcast %cst_207 : f32 to vector<1x128xf32>
    %572 = arith.subf %396, %571 : vector<1x128xf32>
    %573 = math.absf %572 : vector<1x128xf32>
    %cst_208 = arith.constant 1.000000e+00 : f32
    %574 = vector.broadcast %cst_208 : f32 to vector<1x128xf32>
    %575 = arith.subf %574, %573 : vector<1x128xf32>
    %cst_209 = arith.constant 0.000000e+00 : f32
    %576 = vector.broadcast %cst_209 : f32 to vector<1x128xf32>
    %577 = arith.maximumf %575, %576 : vector<1x128xf32>
    %c160_210 = arith.constant 160 : index
    %c0_211 = arith.constant 0 : index
    %578 = vector.load %arg4[%c160_210, %c0_211] : memref<256x128xf32, #tpu.memory_space<vmem>>, vector<16x128xf32>
    %579 = vector.broadcast %577 : vector<1x128xf32> to vector<16x128xf32>
    %580 = arith.mulf %578, %579 : vector<16x128xf32>
    %581 = arith.addf %570, %580 : vector<16x128xf32>
    %cst_212 = arith.constant 1.100000e+01 : f32
    %582 = vector.broadcast %cst_212 : f32 to vector<1x128xf32>
    %583 = arith.subf %396, %582 : vector<1x128xf32>
    %584 = math.absf %583 : vector<1x128xf32>
    %cst_213 = arith.constant 1.000000e+00 : f32
    %585 = vector.broadcast %cst_213 : f32 to vector<1x128xf32>
    %586 = arith.subf %585, %584 : vector<1x128xf32>
    %cst_214 = arith.constant 0.000000e+00 : f32
    %587 = vector.broadcast %cst_214 : f32 to vector<1x128xf32>
    %588 = arith.maximumf %586, %587 : vector<1x128xf32>
    %c176_215 = arith.constant 176 : index
    %c0_216 = arith.constant 0 : index
    %589 = vector.load %arg4[%c176_215, %c0_216] : memref<256x128xf32, #tpu.memory_space<vmem>>, vector<16x128xf32>
    %590 = vector.broadcast %588 : vector<1x128xf32> to vector<16x128xf32>
    %591 = arith.mulf %589, %590 : vector<16x128xf32>
    %592 = arith.addf %581, %591 : vector<16x128xf32>
    %cst_217 = arith.constant 1.200000e+01 : f32
    %593 = vector.broadcast %cst_217 : f32 to vector<1x128xf32>
    %594 = arith.subf %396, %593 : vector<1x128xf32>
    %595 = math.absf %594 : vector<1x128xf32>
    %cst_218 = arith.constant 1.000000e+00 : f32
    %596 = vector.broadcast %cst_218 : f32 to vector<1x128xf32>
    %597 = arith.subf %596, %595 : vector<1x128xf32>
    %cst_219 = arith.constant 0.000000e+00 : f32
    %598 = vector.broadcast %cst_219 : f32 to vector<1x128xf32>
    %599 = arith.maximumf %597, %598 : vector<1x128xf32>
    %c192_220 = arith.constant 192 : index
    %c0_221 = arith.constant 0 : index
    %600 = vector.load %arg4[%c192_220, %c0_221] : memref<256x128xf32, #tpu.memory_space<vmem>>, vector<16x128xf32>
    %601 = vector.broadcast %599 : vector<1x128xf32> to vector<16x128xf32>
    %602 = arith.mulf %600, %601 : vector<16x128xf32>
    %603 = arith.addf %592, %602 : vector<16x128xf32>
    %cst_222 = arith.constant 1.300000e+01 : f32
    %604 = vector.broadcast %cst_222 : f32 to vector<1x128xf32>
    %605 = arith.subf %396, %604 : vector<1x128xf32>
    %606 = math.absf %605 : vector<1x128xf32>
    %cst_223 = arith.constant 1.000000e+00 : f32
    %607 = vector.broadcast %cst_223 : f32 to vector<1x128xf32>
    %608 = arith.subf %607, %606 : vector<1x128xf32>
    %cst_224 = arith.constant 0.000000e+00 : f32
    %609 = vector.broadcast %cst_224 : f32 to vector<1x128xf32>
    %610 = arith.maximumf %608, %609 : vector<1x128xf32>
    %c208_225 = arith.constant 208 : index
    %c0_226 = arith.constant 0 : index
    %611 = vector.load %arg4[%c208_225, %c0_226] : memref<256x128xf32, #tpu.memory_space<vmem>>, vector<16x128xf32>
    %612 = vector.broadcast %610 : vector<1x128xf32> to vector<16x128xf32>
    %613 = arith.mulf %611, %612 : vector<16x128xf32>
    %614 = arith.addf %603, %613 : vector<16x128xf32>
    %cst_227 = arith.constant 1.400000e+01 : f32
    %615 = vector.broadcast %cst_227 : f32 to vector<1x128xf32>
    %616 = arith.subf %396, %615 : vector<1x128xf32>
    %617 = math.absf %616 : vector<1x128xf32>
    %cst_228 = arith.constant 1.000000e+00 : f32
    %618 = vector.broadcast %cst_228 : f32 to vector<1x128xf32>
    %619 = arith.subf %618, %617 : vector<1x128xf32>
    %cst_229 = arith.constant 0.000000e+00 : f32
    %620 = vector.broadcast %cst_229 : f32 to vector<1x128xf32>
    %621 = arith.maximumf %619, %620 : vector<1x128xf32>
    %c224_230 = arith.constant 224 : index
    %c0_231 = arith.constant 0 : index
    %622 = vector.load %arg4[%c224_230, %c0_231] : memref<256x128xf32, #tpu.memory_space<vmem>>, vector<16x128xf32>
    %623 = vector.broadcast %621 : vector<1x128xf32> to vector<16x128xf32>
    %624 = arith.mulf %622, %623 : vector<16x128xf32>
    %625 = arith.addf %614, %624 : vector<16x128xf32>
    %cst_232 = arith.constant 1.500000e+01 : f32
    %626 = vector.broadcast %cst_232 : f32 to vector<1x128xf32>
    %627 = arith.subf %396, %626 : vector<1x128xf32>
    %628 = math.absf %627 : vector<1x128xf32>
    %cst_233 = arith.constant 1.000000e+00 : f32
    %629 = vector.broadcast %cst_233 : f32 to vector<1x128xf32>
    %630 = arith.subf %629, %628 : vector<1x128xf32>
    %cst_234 = arith.constant 0.000000e+00 : f32
    %631 = vector.broadcast %cst_234 : f32 to vector<1x128xf32>
    %632 = arith.maximumf %630, %631 : vector<1x128xf32>
    %c240_235 = arith.constant 240 : index
    %c0_236 = arith.constant 0 : index
    %633 = vector.load %arg4[%c240_235, %c0_236] : memref<256x128xf32, #tpu.memory_space<vmem>>, vector<16x128xf32>
    %634 = vector.broadcast %632 : vector<1x128xf32> to vector<16x128xf32>
    %635 = arith.mulf %633, %634 : vector<16x128xf32>
    %636 = arith.addf %625, %635 : vector<16x128xf32>
    %637 = vector.extract_strided_slice %636 {offsets = [0, 0], sizes = [1, 128], strides = [1, 1]} : vector<16x128xf32> to vector<1x128xf32>
    %638 = vector.extract_strided_slice %636 {offsets = [1, 0], sizes = [1, 128], strides = [1, 1]} : vector<16x128xf32> to vector<1x128xf32>
    %639 = vector.extract_strided_slice %636 {offsets = [2, 0], sizes = [1, 128], strides = [1, 1]} : vector<16x128xf32> to vector<1x128xf32>
    %640 = vector.extract_strided_slice %636 {offsets = [3, 0], sizes = [1, 128], strides = [1, 1]} : vector<16x128xf32> to vector<1x128xf32>
    %641 = vector.extract_strided_slice %636 {offsets = [4, 0], sizes = [1, 128], strides = [1, 1]} : vector<16x128xf32> to vector<1x128xf32>
    %642 = vector.extract_strided_slice %636 {offsets = [5, 0], sizes = [1, 128], strides = [1, 1]} : vector<16x128xf32> to vector<1x128xf32>
    %643 = vector.extract_strided_slice %636 {offsets = [6, 0], sizes = [1, 128], strides = [1, 1]} : vector<16x128xf32> to vector<1x128xf32>
    %644 = vector.extract_strided_slice %636 {offsets = [7, 0], sizes = [1, 128], strides = [1, 1]} : vector<16x128xf32> to vector<1x128xf32>
    %645 = vector.extract_strided_slice %636 {offsets = [8, 0], sizes = [1, 128], strides = [1, 1]} : vector<16x128xf32> to vector<1x128xf32>
    %646 = vector.extract_strided_slice %636 {offsets = [9, 0], sizes = [1, 128], strides = [1, 1]} : vector<16x128xf32> to vector<1x128xf32>
    %647 = vector.extract_strided_slice %636 {offsets = [10, 0], sizes = [1, 128], strides = [1, 1]} : vector<16x128xf32> to vector<1x128xf32>
    %648 = vector.extract_strided_slice %636 {offsets = [11, 0], sizes = [1, 128], strides = [1, 1]} : vector<16x128xf32> to vector<1x128xf32>
    %649 = arith.mulf %637, %374 : vector<1x128xf32>
    %650 = arith.mulf %638, %375 : vector<1x128xf32>
    %651 = arith.addf %649, %650 : vector<1x128xf32>
    %652 = arith.mulf %639, %376 : vector<1x128xf32>
    %653 = arith.addf %651, %652 : vector<1x128xf32>
    %654 = arith.addf %653, %640 : vector<1x128xf32>
    %655 = arith.subf %654, %0 : vector<1x128xf32>
    %656 = arith.mulf %641, %374 : vector<1x128xf32>
    %657 = arith.mulf %642, %375 : vector<1x128xf32>
    %658 = arith.addf %656, %657 : vector<1x128xf32>
    %659 = arith.mulf %643, %376 : vector<1x128xf32>
    %660 = arith.addf %658, %659 : vector<1x128xf32>
    %661 = arith.addf %660, %644 : vector<1x128xf32>
    %662 = arith.subf %661, %1 : vector<1x128xf32>
    %663 = arith.mulf %645, %374 : vector<1x128xf32>
    %664 = arith.mulf %646, %375 : vector<1x128xf32>
    %665 = arith.addf %663, %664 : vector<1x128xf32>
    %666 = arith.mulf %647, %376 : vector<1x128xf32>
    %667 = arith.addf %665, %666 : vector<1x128xf32>
    %668 = arith.addf %667, %648 : vector<1x128xf32>
    %669 = arith.subf %668, %2 : vector<1x128xf32>
    %670 = arith.mulf %642, %647 : vector<1x128xf32>
    %671 = arith.mulf %643, %646 : vector<1x128xf32>
    %672 = arith.subf %670, %671 : vector<1x128xf32>
    %673 = arith.mulf %639, %646 : vector<1x128xf32>
    %674 = arith.mulf %638, %647 : vector<1x128xf32>
    %675 = arith.subf %673, %674 : vector<1x128xf32>
    %676 = arith.mulf %638, %643 : vector<1x128xf32>
    %677 = arith.mulf %639, %642 : vector<1x128xf32>
    %678 = arith.subf %676, %677 : vector<1x128xf32>
    %679 = arith.mulf %643, %645 : vector<1x128xf32>
    %680 = arith.mulf %641, %647 : vector<1x128xf32>
    %681 = arith.subf %679, %680 : vector<1x128xf32>
    %682 = arith.mulf %637, %647 : vector<1x128xf32>
    %683 = arith.mulf %639, %645 : vector<1x128xf32>
    %684 = arith.subf %682, %683 : vector<1x128xf32>
    %685 = arith.mulf %639, %641 : vector<1x128xf32>
    %686 = arith.mulf %637, %643 : vector<1x128xf32>
    %687 = arith.subf %685, %686 : vector<1x128xf32>
    %688 = arith.mulf %641, %646 : vector<1x128xf32>
    %689 = arith.mulf %642, %645 : vector<1x128xf32>
    %690 = arith.subf %688, %689 : vector<1x128xf32>
    %691 = arith.mulf %638, %645 : vector<1x128xf32>
    %692 = arith.mulf %637, %646 : vector<1x128xf32>
    %693 = arith.subf %691, %692 : vector<1x128xf32>
    %694 = arith.mulf %637, %642 : vector<1x128xf32>
    %695 = arith.mulf %638, %641 : vector<1x128xf32>
    %696 = arith.subf %694, %695 : vector<1x128xf32>
    %697 = arith.mulf %637, %672 : vector<1x128xf32>
    %698 = arith.mulf %638, %681 : vector<1x128xf32>
    %699 = arith.addf %697, %698 : vector<1x128xf32>
    %700 = arith.mulf %639, %690 : vector<1x128xf32>
    %701 = arith.addf %699, %700 : vector<1x128xf32>
    %702 = math.absf %701 : vector<1x128xf32>
    %cst_237 = arith.constant 9.99999993E-9 : f32
    %703 = vector.broadcast %cst_237 : f32 to vector<1x128xf32>
    %704 = arith.cmpf olt, %702, %703 : vector<1x128xf32>
    %cst_238 = arith.constant 0.000000e+00 : f32
    %705 = vector.broadcast %cst_238 : f32 to vector<1x128xf32>
    %706 = arith.cmpf olt, %701, %705 : vector<1x128xf32>
    %cst_239 = arith.constant -9.99999993E-9 : f32
    %cst_240 = arith.constant 9.99999993E-9 : f32
    %707 = vector.broadcast %cst_239 : f32 to vector<1x128xf32>
    %708 = vector.broadcast %cst_240 : f32 to vector<1x128xf32>
    %709 = arith.select %706, %707, %708 : vector<1x128xi1>, vector<1x128xf32>
    %710 = arith.select %704, %709, %701 : vector<1x128xi1>, vector<1x128xf32>
    %cst_241 = arith.constant 1.000000e+00 : f32
    %711 = vector.broadcast %cst_241 : f32 to vector<1x128xf32>
    %712 = arith.divf %711, %710 : vector<1x128xf32>
    %713 = arith.mulf %672, %655 : vector<1x128xf32>
    %714 = arith.mulf %675, %662 : vector<1x128xf32>
    %715 = arith.addf %713, %714 : vector<1x128xf32>
    %716 = arith.mulf %678, %669 : vector<1x128xf32>
    %717 = arith.addf %715, %716 : vector<1x128xf32>
    %718 = arith.mulf %712, %717 : vector<1x128xf32>
    %cst_242 = arith.constant -1.000000e+02 : f32
    %cst_243 = arith.constant 1.000000e+02 : f32
    %719 = vector.broadcast %cst_242 : f32 to vector<1x128xf32>
    %720 = arith.maximumf %719, %718 : vector<1x128xf32>
    %721 = vector.broadcast %cst_243 : f32 to vector<1x128xf32>
    %722 = arith.minimumf %721, %720 : vector<1x128xf32>
    %723 = arith.mulf %681, %655 : vector<1x128xf32>
    %724 = arith.mulf %684, %662 : vector<1x128xf32>
    %725 = arith.addf %723, %724 : vector<1x128xf32>
    %726 = arith.mulf %687, %669 : vector<1x128xf32>
    %727 = arith.addf %725, %726 : vector<1x128xf32>
    %728 = arith.mulf %712, %727 : vector<1x128xf32>
    %cst_244 = arith.constant -1.000000e+02 : f32
    %cst_245 = arith.constant 1.000000e+02 : f32
    %729 = vector.broadcast %cst_244 : f32 to vector<1x128xf32>
    %730 = arith.maximumf %729, %728 : vector<1x128xf32>
    %731 = vector.broadcast %cst_245 : f32 to vector<1x128xf32>
    %732 = arith.minimumf %731, %730 : vector<1x128xf32>
    %733 = arith.mulf %690, %655 : vector<1x128xf32>
    %734 = arith.mulf %693, %662 : vector<1x128xf32>
    %735 = arith.addf %733, %734 : vector<1x128xf32>
    %736 = arith.mulf %696, %669 : vector<1x128xf32>
    %737 = arith.addf %735, %736 : vector<1x128xf32>
    %738 = arith.mulf %712, %737 : vector<1x128xf32>
    %cst_246 = arith.constant -1.000000e+02 : f32
    %cst_247 = arith.constant 1.000000e+02 : f32
    %739 = vector.broadcast %cst_246 : f32 to vector<1x128xf32>
    %740 = arith.maximumf %739, %738 : vector<1x128xf32>
    %741 = vector.broadcast %cst_247 : f32 to vector<1x128xf32>
    %742 = arith.minimumf %741, %740 : vector<1x128xf32>
    %743 = arith.subf %374, %722 : vector<1x128xf32>
    %744 = arith.subf %375, %732 : vector<1x128xf32>
    %745 = arith.subf %376, %742 : vector<1x128xf32>
    %c2_i32 = arith.constant 2 : i32
    %cst_248 = arith.constant 0.00169628859 : f32
    %746 = vector.broadcast %cst_248 : f32 to vector<1x128xf32>
    %747 = arith.subf %743, %746 : vector<1x128xf32>
    %cst_249 = arith.constant 1.05144262 : f32
    %748 = vector.broadcast %cst_249 : f32 to vector<1x128xf32>
    %749 = arith.mulf %747, %748 : vector<1x128xf32>
    %cst_250 = arith.constant -0.00430172682 : f32
    %750 = vector.broadcast %cst_250 : f32 to vector<1x128xf32>
    %751 = arith.subf %744, %750 : vector<1x128xf32>
    %cst_251 = arith.constant 1.05144262 : f32
    %752 = vector.broadcast %cst_251 : f32 to vector<1x128xf32>
    %753 = arith.mulf %751, %752 : vector<1x128xf32>
    %cst_252 = arith.constant -0.00518578291 : f32
    %754 = vector.broadcast %cst_252 : f32 to vector<1x128xf32>
    %755 = arith.subf %745, %754 : vector<1x128xf32>
    %cst_253 = arith.constant 4.20577049 : f32
    %756 = vector.broadcast %cst_253 : f32 to vector<1x128xf32>
    %757 = arith.mulf %755, %756 : vector<1x128xf32>
    %cst_254 = arith.constant 1.000000e+00 : f32
    %758 = vector.broadcast %cst_254 : f32 to vector<1x128xf32>
    %759 = arith.addf %749, %758 : vector<1x128xf32>
    %cst_255 = arith.constant 7.500000e+00 : f32
    %760 = vector.broadcast %cst_255 : f32 to vector<1x128xf32>
    %761 = arith.mulf %759, %760 : vector<1x128xf32>
    %cst_256 = arith.constant 0.000000e+00 : f32
    %cst_257 = arith.constant 1.500000e+01 : f32
    %762 = vector.broadcast %cst_256 : f32 to vector<1x128xf32>
    %763 = arith.maximumf %762, %761 : vector<1x128xf32>
    %764 = vector.broadcast %cst_257 : f32 to vector<1x128xf32>
    %765 = arith.minimumf %764, %763 : vector<1x128xf32>
    %cst_258 = arith.constant 1.000000e+00 : f32
    %766 = vector.broadcast %cst_258 : f32 to vector<1x128xf32>
    %767 = arith.addf %753, %766 : vector<1x128xf32>
    %cst_259 = arith.constant 7.500000e+00 : f32
    %768 = vector.broadcast %cst_259 : f32 to vector<1x128xf32>
    %769 = arith.mulf %767, %768 : vector<1x128xf32>
    %cst_260 = arith.constant 0.000000e+00 : f32
    %cst_261 = arith.constant 1.500000e+01 : f32
    %770 = vector.broadcast %cst_260 : f32 to vector<1x128xf32>
    %771 = arith.maximumf %770, %769 : vector<1x128xf32>
    %772 = vector.broadcast %cst_261 : f32 to vector<1x128xf32>
    %773 = arith.minimumf %772, %771 : vector<1x128xf32>
    %cst_262 = arith.constant 1.000000e+00 : f32
    %774 = vector.broadcast %cst_262 : f32 to vector<1x128xf32>
    %775 = arith.addf %757, %774 : vector<1x128xf32>
    %cst_263 = arith.constant 1.500000e+00 : f32
    %776 = vector.broadcast %cst_263 : f32 to vector<1x128xf32>
    %777 = arith.mulf %775, %776 : vector<1x128xf32>
    %cst_264 = arith.constant 0.000000e+00 : f32
    %cst_265 = arith.constant 3.000000e+00 : f32
    %778 = vector.broadcast %cst_264 : f32 to vector<1x128xf32>
    %779 = arith.maximumf %778, %777 : vector<1x128xf32>
    %780 = vector.broadcast %cst_265 : f32 to vector<1x128xf32>
    %781 = arith.minimumf %780, %779 : vector<1x128xf32>
    %782 = vector.broadcast %773 : vector<1x128xf32> to vector<16x128xf32>
    %783 = arith.subf %782, %4 : vector<16x128xf32>
    %784 = math.absf %783 : vector<16x128xf32>
    %cst_266 = arith.constant 1.000000e+00 : f32
    %785 = vector.broadcast %cst_266 : f32 to vector<16x128xf32>
    %786 = arith.subf %785, %784 : vector<16x128xf32>
    %cst_267 = arith.constant 0.000000e+00 : f32
    %787 = vector.broadcast %cst_267 : f32 to vector<16x128xf32>
    %788 = arith.maximumf %786, %787 : vector<16x128xf32>
    %cst_268 = arith.constant 0.000000e+00 : f32
    %789 = vector.broadcast %cst_268 : f32 to vector<1x128xf32>
    %790 = arith.subf %781, %789 : vector<1x128xf32>
    %791 = math.absf %790 : vector<1x128xf32>
    %cst_269 = arith.constant 1.000000e+00 : f32
    %792 = vector.broadcast %cst_269 : f32 to vector<1x128xf32>
    %793 = arith.subf %792, %791 : vector<1x128xf32>
    %cst_270 = arith.constant 0.000000e+00 : f32
    %794 = vector.broadcast %cst_270 : f32 to vector<1x128xf32>
    %795 = arith.maximumf %793, %794 : vector<1x128xf32>
    %796 = vector.broadcast %795 : vector<1x128xf32> to vector<16x128xf32>
    %797 = arith.mulf %788, %796 : vector<16x128xf32>
    %cst_271 = arith.constant 1.000000e+00 : f32
    %798 = vector.broadcast %cst_271 : f32 to vector<1x128xf32>
    %799 = arith.subf %781, %798 : vector<1x128xf32>
    %800 = math.absf %799 : vector<1x128xf32>
    %cst_272 = arith.constant 1.000000e+00 : f32
    %801 = vector.broadcast %cst_272 : f32 to vector<1x128xf32>
    %802 = arith.subf %801, %800 : vector<1x128xf32>
    %cst_273 = arith.constant 0.000000e+00 : f32
    %803 = vector.broadcast %cst_273 : f32 to vector<1x128xf32>
    %804 = arith.maximumf %802, %803 : vector<1x128xf32>
    %805 = vector.broadcast %804 : vector<1x128xf32> to vector<16x128xf32>
    %806 = arith.mulf %788, %805 : vector<16x128xf32>
    %cst_274 = arith.constant 2.000000e+00 : f32
    %807 = vector.broadcast %cst_274 : f32 to vector<1x128xf32>
    %808 = arith.subf %781, %807 : vector<1x128xf32>
    %809 = math.absf %808 : vector<1x128xf32>
    %cst_275 = arith.constant 1.000000e+00 : f32
    %810 = vector.broadcast %cst_275 : f32 to vector<1x128xf32>
    %811 = arith.subf %810, %809 : vector<1x128xf32>
    %cst_276 = arith.constant 0.000000e+00 : f32
    %812 = vector.broadcast %cst_276 : f32 to vector<1x128xf32>
    %813 = arith.maximumf %811, %812 : vector<1x128xf32>
    %814 = vector.broadcast %813 : vector<1x128xf32> to vector<16x128xf32>
    %815 = arith.mulf %788, %814 : vector<16x128xf32>
    %cst_277 = arith.constant 3.000000e+00 : f32
    %816 = vector.broadcast %cst_277 : f32 to vector<1x128xf32>
    %817 = arith.subf %781, %816 : vector<1x128xf32>
    %818 = math.absf %817 : vector<1x128xf32>
    %cst_278 = arith.constant 1.000000e+00 : f32
    %819 = vector.broadcast %cst_278 : f32 to vector<1x128xf32>
    %820 = arith.subf %819, %818 : vector<1x128xf32>
    %cst_279 = arith.constant 0.000000e+00 : f32
    %821 = vector.broadcast %cst_279 : f32 to vector<1x128xf32>
    %822 = arith.maximumf %820, %821 : vector<1x128xf32>
    %823 = vector.broadcast %822 : vector<1x128xf32> to vector<16x128xf32>
    %824 = arith.mulf %788, %823 : vector<16x128xf32>
    %825 = tpu.concatenate %797, %806, %815, %824 in 0 : vector<16x128xf32>, vector<16x128xf32>, vector<16x128xf32>, vector<16x128xf32> -> vector<64x128xf32>
    %c0_280 = arith.constant 0 : index
    %c0_281 = arith.constant 0 : index
    %826 = vector.load %arg2[%c0_280, %c0_281] : memref<256x64xf32, #tpu.memory_space<vmem>>, vector<256x64xf32>
    %cst_282 = arith.constant dense<0.000000e+00> : vector<256x128xf32>
    %827 = tpu.matmul %826, %825, %cst_282 {dimension_numbers = #tpu.dot_dimension_numbers<[1], [0], [0], [1], [0, 0, 1, 1], [], []>} : vector<256x64xf32>, vector<64x128xf32>, vector<256x128xf32> -> vector<256x128xf32>
    %c0_283 = arith.constant 0 : index
    %c0_284 = arith.constant 0 : index
    %828 = vector.load %arg4[%c0_283, %c0_284] : memref<256x128xf32, #tpu.memory_space<vmem>>, vector<256x128xf32>
    tpu.vector_store %arg4[%c0_283, %c0_284], %827 {strides = array<i32>} : memref<256x128xf32, #tpu.memory_space<vmem>>, vector<256x128xf32>,
    %cst_285 = arith.constant 0.000000e+00 : f32
    %829 = vector.broadcast %cst_285 : f32 to vector<16x128xf32>
    %cst_286 = arith.constant 0.000000e+00 : f32
    %830 = vector.broadcast %cst_286 : f32 to vector<1x128xf32>
    %831 = arith.subf %765, %830 : vector<1x128xf32>
    %832 = math.absf %831 : vector<1x128xf32>
    %cst_287 = arith.constant 1.000000e+00 : f32
    %833 = vector.broadcast %cst_287 : f32 to vector<1x128xf32>
    %834 = arith.subf %833, %832 : vector<1x128xf32>
    %cst_288 = arith.constant 0.000000e+00 : f32
    %835 = vector.broadcast %cst_288 : f32 to vector<1x128xf32>
    %836 = arith.maximumf %834, %835 : vector<1x128xf32>
    %c0_289 = arith.constant 0 : index
    %c0_290 = arith.constant 0 : index
    %837 = vector.load %arg4[%c0_289, %c0_290] : memref<256x128xf32, #tpu.memory_space<vmem>>, vector<16x128xf32>
    %838 = vector.broadcast %836 : vector<1x128xf32> to vector<16x128xf32>
    %839 = arith.mulf %837, %838 : vector<16x128xf32>
    %840 = arith.addf %829, %839 : vector<16x128xf32>
    %cst_291 = arith.constant 1.000000e+00 : f32
    %841 = vector.broadcast %cst_291 : f32 to vector<1x128xf32>
    %842 = arith.subf %765, %841 : vector<1x128xf32>
    %843 = math.absf %842 : vector<1x128xf32>
    %cst_292 = arith.constant 1.000000e+00 : f32
    %844 = vector.broadcast %cst_292 : f32 to vector<1x128xf32>
    %845 = arith.subf %844, %843 : vector<1x128xf32>
    %cst_293 = arith.constant 0.000000e+00 : f32
    %846 = vector.broadcast %cst_293 : f32 to vector<1x128xf32>
    %847 = arith.maximumf %845, %846 : vector<1x128xf32>
    %c16_294 = arith.constant 16 : index
    %c0_295 = arith.constant 0 : index
    %848 = vector.load %arg4[%c16_294, %c0_295] : memref<256x128xf32, #tpu.memory_space<vmem>>, vector<16x128xf32>
    %849 = vector.broadcast %847 : vector<1x128xf32> to vector<16x128xf32>
    %850 = arith.mulf %848, %849 : vector<16x128xf32>
    %851 = arith.addf %840, %850 : vector<16x128xf32>
    %cst_296 = arith.constant 2.000000e+00 : f32
    %852 = vector.broadcast %cst_296 : f32 to vector<1x128xf32>
    %853 = arith.subf %765, %852 : vector<1x128xf32>
    %854 = math.absf %853 : vector<1x128xf32>
    %cst_297 = arith.constant 1.000000e+00 : f32
    %855 = vector.broadcast %cst_297 : f32 to vector<1x128xf32>
    %856 = arith.subf %855, %854 : vector<1x128xf32>
    %cst_298 = arith.constant 0.000000e+00 : f32
    %857 = vector.broadcast %cst_298 : f32 to vector<1x128xf32>
    %858 = arith.maximumf %856, %857 : vector<1x128xf32>
    %c32_299 = arith.constant 32 : index
    %c0_300 = arith.constant 0 : index
    %859 = vector.load %arg4[%c32_299, %c0_300] : memref<256x128xf32, #tpu.memory_space<vmem>>, vector<16x128xf32>
    %860 = vector.broadcast %858 : vector<1x128xf32> to vector<16x128xf32>
    %861 = arith.mulf %859, %860 : vector<16x128xf32>
    %862 = arith.addf %851, %861 : vector<16x128xf32>
    %cst_301 = arith.constant 3.000000e+00 : f32
    %863 = vector.broadcast %cst_301 : f32 to vector<1x128xf32>
    %864 = arith.subf %765, %863 : vector<1x128xf32>
    %865 = math.absf %864 : vector<1x128xf32>
    %cst_302 = arith.constant 1.000000e+00 : f32
    %866 = vector.broadcast %cst_302 : f32 to vector<1x128xf32>
    %867 = arith.subf %866, %865 : vector<1x128xf32>
    %cst_303 = arith.constant 0.000000e+00 : f32
    %868 = vector.broadcast %cst_303 : f32 to vector<1x128xf32>
    %869 = arith.maximumf %867, %868 : vector<1x128xf32>
    %c48_304 = arith.constant 48 : index
    %c0_305 = arith.constant 0 : index
    %870 = vector.load %arg4[%c48_304, %c0_305] : memref<256x128xf32, #tpu.memory_space<vmem>>, vector<16x128xf32>
    %871 = vector.broadcast %869 : vector<1x128xf32> to vector<16x128xf32>
    %872 = arith.mulf %870, %871 : vector<16x128xf32>
    %873 = arith.addf %862, %872 : vector<16x128xf32>
    %cst_306 = arith.constant 4.000000e+00 : f32
    %874 = vector.broadcast %cst_306 : f32 to vector<1x128xf32>
    %875 = arith.subf %765, %874 : vector<1x128xf32>
    %876 = math.absf %875 : vector<1x128xf32>
    %cst_307 = arith.constant 1.000000e+00 : f32
    %877 = vector.broadcast %cst_307 : f32 to vector<1x128xf32>
    %878 = arith.subf %877, %876 : vector<1x128xf32>
    %cst_308 = arith.constant 0.000000e+00 : f32
    %879 = vector.broadcast %cst_308 : f32 to vector<1x128xf32>
    %880 = arith.maximumf %878, %879 : vector<1x128xf32>
    %c64_309 = arith.constant 64 : index
    %c0_310 = arith.constant 0 : index
    %881 = vector.load %arg4[%c64_309, %c0_310] : memref<256x128xf32, #tpu.memory_space<vmem>>, vector<16x128xf32>
    %882 = vector.broadcast %880 : vector<1x128xf32> to vector<16x128xf32>
    %883 = arith.mulf %881, %882 : vector<16x128xf32>
    %884 = arith.addf %873, %883 : vector<16x128xf32>
    %cst_311 = arith.constant 5.000000e+00 : f32
    %885 = vector.broadcast %cst_311 : f32 to vector<1x128xf32>
    %886 = arith.subf %765, %885 : vector<1x128xf32>
    %887 = math.absf %886 : vector<1x128xf32>
    %cst_312 = arith.constant 1.000000e+00 : f32
    %888 = vector.broadcast %cst_312 : f32 to vector<1x128xf32>
    %889 = arith.subf %888, %887 : vector<1x128xf32>
    %cst_313 = arith.constant 0.000000e+00 : f32
    %890 = vector.broadcast %cst_313 : f32 to vector<1x128xf32>
    %891 = arith.maximumf %889, %890 : vector<1x128xf32>
    %c80_314 = arith.constant 80 : index
    %c0_315 = arith.constant 0 : index
    %892 = vector.load %arg4[%c80_314, %c0_315] : memref<256x128xf32, #tpu.memory_space<vmem>>, vector<16x128xf32>
    %893 = vector.broadcast %891 : vector<1x128xf32> to vector<16x128xf32>
    %894 = arith.mulf %892, %893 : vector<16x128xf32>
    %895 = arith.addf %884, %894 : vector<16x128xf32>
    %cst_316 = arith.constant 6.000000e+00 : f32
    %896 = vector.broadcast %cst_316 : f32 to vector<1x128xf32>
    %897 = arith.subf %765, %896 : vector<1x128xf32>
    %898 = math.absf %897 : vector<1x128xf32>
    %cst_317 = arith.constant 1.000000e+00 : f32
    %899 = vector.broadcast %cst_317 : f32 to vector<1x128xf32>
    %900 = arith.subf %899, %898 : vector<1x128xf32>
    %cst_318 = arith.constant 0.000000e+00 : f32
    %901 = vector.broadcast %cst_318 : f32 to vector<1x128xf32>
    %902 = arith.maximumf %900, %901 : vector<1x128xf32>
    %c96_319 = arith.constant 96 : index
    %c0_320 = arith.constant 0 : index
    %903 = vector.load %arg4[%c96_319, %c0_320] : memref<256x128xf32, #tpu.memory_space<vmem>>, vector<16x128xf32>
    %904 = vector.broadcast %902 : vector<1x128xf32> to vector<16x128xf32>
    %905 = arith.mulf %903, %904 : vector<16x128xf32>
    %906 = arith.addf %895, %905 : vector<16x128xf32>
    %cst_321 = arith.constant 7.000000e+00 : f32
    %907 = vector.broadcast %cst_321 : f32 to vector<1x128xf32>
    %908 = arith.subf %765, %907 : vector<1x128xf32>
    %909 = math.absf %908 : vector<1x128xf32>
    %cst_322 = arith.constant 1.000000e+00 : f32
    %910 = vector.broadcast %cst_322 : f32 to vector<1x128xf32>
    %911 = arith.subf %910, %909 : vector<1x128xf32>
    %cst_323 = arith.constant 0.000000e+00 : f32
    %912 = vector.broadcast %cst_323 : f32 to vector<1x128xf32>
    %913 = arith.maximumf %911, %912 : vector<1x128xf32>
    %c112_324 = arith.constant 112 : index
    %c0_325 = arith.constant 0 : index
    %914 = vector.load %arg4[%c112_324, %c0_325] : memref<256x128xf32, #tpu.memory_space<vmem>>, vector<16x128xf32>
    %915 = vector.broadcast %913 : vector<1x128xf32> to vector<16x128xf32>
    %916 = arith.mulf %914, %915 : vector<16x128xf32>
    %917 = arith.addf %906, %916 : vector<16x128xf32>
    %cst_326 = arith.constant 8.000000e+00 : f32
    %918 = vector.broadcast %cst_326 : f32 to vector<1x128xf32>
    %919 = arith.subf %765, %918 : vector<1x128xf32>
    %920 = math.absf %919 : vector<1x128xf32>
    %cst_327 = arith.constant 1.000000e+00 : f32
    %921 = vector.broadcast %cst_327 : f32 to vector<1x128xf32>
    %922 = arith.subf %921, %920 : vector<1x128xf32>
    %cst_328 = arith.constant 0.000000e+00 : f32
    %923 = vector.broadcast %cst_328 : f32 to vector<1x128xf32>
    %924 = arith.maximumf %922, %923 : vector<1x128xf32>
    %c128_329 = arith.constant 128 : index
    %c0_330 = arith.constant 0 : index
    %925 = vector.load %arg4[%c128_329, %c0_330] : memref<256x128xf32, #tpu.memory_space<vmem>>, vector<16x128xf32>
    %926 = vector.broadcast %924 : vector<1x128xf32> to vector<16x128xf32>
    %927 = arith.mulf %925, %926 : vector<16x128xf32>
    %928 = arith.addf %917, %927 : vector<16x128xf32>
    %cst_331 = arith.constant 9.000000e+00 : f32
    %929 = vector.broadcast %cst_331 : f32 to vector<1x128xf32>
    %930 = arith.subf %765, %929 : vector<1x128xf32>
    %931 = math.absf %930 : vector<1x128xf32>
    %cst_332 = arith.constant 1.000000e+00 : f32
    %932 = vector.broadcast %cst_332 : f32 to vector<1x128xf32>
    %933 = arith.subf %932, %931 : vector<1x128xf32>
    %cst_333 = arith.constant 0.000000e+00 : f32
    %934 = vector.broadcast %cst_333 : f32 to vector<1x128xf32>
    %935 = arith.maximumf %933, %934 : vector<1x128xf32>
    %c144_334 = arith.constant 144 : index
    %c0_335 = arith.constant 0 : index
    %936 = vector.load %arg4[%c144_334, %c0_335] : memref<256x128xf32, #tpu.memory_space<vmem>>, vector<16x128xf32>
    %937 = vector.broadcast %935 : vector<1x128xf32> to vector<16x128xf32>
    %938 = arith.mulf %936, %937 : vector<16x128xf32>
    %939 = arith.addf %928, %938 : vector<16x128xf32>
    %cst_336 = arith.constant 1.000000e+01 : f32
    %940 = vector.broadcast %cst_336 : f32 to vector<1x128xf32>
    %941 = arith.subf %765, %940 : vector<1x128xf32>
    %942 = math.absf %941 : vector<1x128xf32>
    %cst_337 = arith.constant 1.000000e+00 : f32
    %943 = vector.broadcast %cst_337 : f32 to vector<1x128xf32>
    %944 = arith.subf %943, %942 : vector<1x128xf32>
    %cst_338 = arith.constant 0.000000e+00 : f32
    %945 = vector.broadcast %cst_338 : f32 to vector<1x128xf32>
    %946 = arith.maximumf %944, %945 : vector<1x128xf32>
    %c160_339 = arith.constant 160 : index
    %c0_340 = arith.constant 0 : index
    %947 = vector.load %arg4[%c160_339, %c0_340] : memref<256x128xf32, #tpu.memory_space<vmem>>, vector<16x128xf32>
    %948 = vector.broadcast %946 : vector<1x128xf32> to vector<16x128xf32>
    %949 = arith.mulf %947, %948 : vector<16x128xf32>
    %950 = arith.addf %939, %949 : vector<16x128xf32>
    %cst_341 = arith.constant 1.100000e+01 : f32
    %951 = vector.broadcast %cst_341 : f32 to vector<1x128xf32>
    %952 = arith.subf %765, %951 : vector<1x128xf32>
    %953 = math.absf %952 : vector<1x128xf32>
    %cst_342 = arith.constant 1.000000e+00 : f32
    %954 = vector.broadcast %cst_342 : f32 to vector<1x128xf32>
    %955 = arith.subf %954, %953 : vector<1x128xf32>
    %cst_343 = arith.constant 0.000000e+00 : f32
    %956 = vector.broadcast %cst_343 : f32 to vector<1x128xf32>
    %957 = arith.maximumf %955, %956 : vector<1x128xf32>
    %c176_344 = arith.constant 176 : index
    %c0_345 = arith.constant 0 : index
    %958 = vector.load %arg4[%c176_344, %c0_345] : memref<256x128xf32, #tpu.memory_space<vmem>>, vector<16x128xf32>
    %959 = vector.broadcast %957 : vector<1x128xf32> to vector<16x128xf32>
    %960 = arith.mulf %958, %959 : vector<16x128xf32>
    %961 = arith.addf %950, %960 : vector<16x128xf32>
    %cst_346 = arith.constant 1.200000e+01 : f32
    %962 = vector.broadcast %cst_346 : f32 to vector<1x128xf32>
    %963 = arith.subf %765, %962 : vector<1x128xf32>
    %964 = math.absf %963 : vector<1x128xf32>
    %cst_347 = arith.constant 1.000000e+00 : f32
    %965 = vector.broadcast %cst_347 : f32 to vector<1x128xf32>
    %966 = arith.subf %965, %964 : vector<1x128xf32>
    %cst_348 = arith.constant 0.000000e+00 : f32
    %967 = vector.broadcast %cst_348 : f32 to vector<1x128xf32>
    %968 = arith.maximumf %966, %967 : vector<1x128xf32>
    %c192_349 = arith.constant 192 : index
    %c0_350 = arith.constant 0 : index
    %969 = vector.load %arg4[%c192_349, %c0_350] : memref<256x128xf32, #tpu.memory_space<vmem>>, vector<16x128xf32>
    %970 = vector.broadcast %968 : vector<1x128xf32> to vector<16x128xf32>
    %971 = arith.mulf %969, %970 : vector<16x128xf32>
    %972 = arith.addf %961, %971 : vector<16x128xf32>
    %cst_351 = arith.constant 1.300000e+01 : f32
    %973 = vector.broadcast %cst_351 : f32 to vector<1x128xf32>
    %974 = arith.subf %765, %973 : vector<1x128xf32>
    %975 = math.absf %974 : vector<1x128xf32>
    %cst_352 = arith.constant 1.000000e+00 : f32
    %976 = vector.broadcast %cst_352 : f32 to vector<1x128xf32>
    %977 = arith.subf %976, %975 : vector<1x128xf32>
    %cst_353 = arith.constant 0.000000e+00 : f32
    %978 = vector.broadcast %cst_353 : f32 to vector<1x128xf32>
    %979 = arith.maximumf %977, %978 : vector<1x128xf32>
    %c208_354 = arith.constant 208 : index
    %c0_355 = arith.constant 0 : index
    %980 = vector.load %arg4[%c208_354, %c0_355] : memref<256x128xf32, #tpu.memory_space<vmem>>, vector<16x128xf32>
    %981 = vector.broadcast %979 : vector<1x128xf32> to vector<16x128xf32>
    %982 = arith.mulf %980, %981 : vector<16x128xf32>
    %983 = arith.addf %972, %982 : vector<16x128xf32>
    %cst_356 = arith.constant 1.400000e+01 : f32
    %984 = vector.broadcast %cst_356 : f32 to vector<1x128xf32>
    %985 = arith.subf %765, %984 : vector<1x128xf32>
    %986 = math.absf %985 : vector<1x128xf32>
    %cst_357 = arith.constant 1.000000e+00 : f32
    %987 = vector.broadcast %cst_357 : f32 to vector<1x128xf32>
    %988 = arith.subf %987, %986 : vector<1x128xf32>
    %cst_358 = arith.constant 0.000000e+00 : f32
    %989 = vector.broadcast %cst_358 : f32 to vector<1x128xf32>
    %990 = arith.maximumf %988, %989 : vector<1x128xf32>
    %c224_359 = arith.constant 224 : index
    %c0_360 = arith.constant 0 : index
    %991 = vector.load %arg4[%c224_359, %c0_360] : memref<256x128xf32, #tpu.memory_space<vmem>>, vector<16x128xf32>
    %992 = vector.broadcast %990 : vector<1x128xf32> to vector<16x128xf32>
    %993 = arith.mulf %991, %992 : vector<16x128xf32>
    %994 = arith.addf %983, %993 : vector<16x128xf32>
    %cst_361 = arith.constant 1.500000e+01 : f32
    %995 = vector.broadcast %cst_361 : f32 to vector<1x128xf32>
    %996 = arith.subf %765, %995 : vector<1x128xf32>
    %997 = math.absf %996 : vector<1x128xf32>
    %cst_362 = arith.constant 1.000000e+00 : f32
    %998 = vector.broadcast %cst_362 : f32 to vector<1x128xf32>
    %999 = arith.subf %998, %997 : vector<1x128xf32>
    %cst_363 = arith.constant 0.000000e+00 : f32
    %1000 = vector.broadcast %cst_363 : f32 to vector<1x128xf32>
    %1001 = arith.maximumf %999, %1000 : vector<1x128xf32>
    %c240_364 = arith.constant 240 : index
    %c0_365 = arith.constant 0 : index
    %1002 = vector.load %arg4[%c240_364, %c0_365] : memref<256x128xf32, #tpu.memory_space<vmem>>, vector<16x128xf32>
    %1003 = vector.broadcast %1001 : vector<1x128xf32> to vector<16x128xf32>
    %1004 = arith.mulf %1002, %1003 : vector<16x128xf32>
    %1005 = arith.addf %994, %1004 : vector<16x128xf32>
    %1006 = vector.extract_strided_slice %1005 {offsets = [0, 0], sizes = [1, 128], strides = [1, 1]} : vector<16x128xf32> to vector<1x128xf32>
    %1007 = vector.extract_strided_slice %1005 {offsets = [1, 0], sizes = [1, 128], strides = [1, 1]} : vector<16x128xf32> to vector<1x128xf32>
    %1008 = vector.extract_strided_slice %1005 {offsets = [2, 0], sizes = [1, 128], strides = [1, 1]} : vector<16x128xf32> to vector<1x128xf32>
    %1009 = vector.extract_strided_slice %1005 {offsets = [3, 0], sizes = [1, 128], strides = [1, 1]} : vector<16x128xf32> to vector<1x128xf32>
    %1010 = vector.extract_strided_slice %1005 {offsets = [4, 0], sizes = [1, 128], strides = [1, 1]} : vector<16x128xf32> to vector<1x128xf32>
    %1011 = vector.extract_strided_slice %1005 {offsets = [5, 0], sizes = [1, 128], strides = [1, 1]} : vector<16x128xf32> to vector<1x128xf32>
    %1012 = vector.extract_strided_slice %1005 {offsets = [6, 0], sizes = [1, 128], strides = [1, 1]} : vector<16x128xf32> to vector<1x128xf32>
    %1013 = vector.extract_strided_slice %1005 {offsets = [7, 0], sizes = [1, 128], strides = [1, 1]} : vector<16x128xf32> to vector<1x128xf32>
    %1014 = vector.extract_strided_slice %1005 {offsets = [8, 0], sizes = [1, 128], strides = [1, 1]} : vector<16x128xf32> to vector<1x128xf32>
    %1015 = vector.extract_strided_slice %1005 {offsets = [9, 0], sizes = [1, 128], strides = [1, 1]} : vector<16x128xf32> to vector<1x128xf32>
    %1016 = vector.extract_strided_slice %1005 {offsets = [10, 0], sizes = [1, 128], strides = [1, 1]} : vector<16x128xf32> to vector<1x128xf32>
    %1017 = vector.extract_strided_slice %1005 {offsets = [11, 0], sizes = [1, 128], strides = [1, 1]} : vector<16x128xf32> to vector<1x128xf32>
    %1018 = arith.mulf %1006, %743 : vector<1x128xf32>
    %1019 = arith.mulf %1007, %744 : vector<1x128xf32>
    %1020 = arith.addf %1018, %1019 : vector<1x128xf32>
    %1021 = arith.mulf %1008, %745 : vector<1x128xf32>
    %1022 = arith.addf %1020, %1021 : vector<1x128xf32>
    %1023 = arith.addf %1022, %1009 : vector<1x128xf32>
    %1024 = arith.subf %1023, %0 : vector<1x128xf32>
    %1025 = arith.mulf %1010, %743 : vector<1x128xf32>
    %1026 = arith.mulf %1011, %744 : vector<1x128xf32>
    %1027 = arith.addf %1025, %1026 : vector<1x128xf32>
    %1028 = arith.mulf %1012, %745 : vector<1x128xf32>
    %1029 = arith.addf %1027, %1028 : vector<1x128xf32>
    %1030 = arith.addf %1029, %1013 : vector<1x128xf32>
    %1031 = arith.subf %1030, %1 : vector<1x128xf32>
    %1032 = arith.mulf %1014, %743 : vector<1x128xf32>
    %1033 = arith.mulf %1015, %744 : vector<1x128xf32>
    %1034 = arith.addf %1032, %1033 : vector<1x128xf32>
    %1035 = arith.mulf %1016, %745 : vector<1x128xf32>
    %1036 = arith.addf %1034, %1035 : vector<1x128xf32>
    %1037 = arith.addf %1036, %1017 : vector<1x128xf32>
    %1038 = arith.subf %1037, %2 : vector<1x128xf32>
    %1039 = arith.mulf %1011, %1016 : vector<1x128xf32>
    %1040 = arith.mulf %1012, %1015 : vector<1x128xf32>
    %1041 = arith.subf %1039, %1040 : vector<1x128xf32>
    %1042 = arith.mulf %1008, %1015 : vector<1x128xf32>
    %1043 = arith.mulf %1007, %1016 : vector<1x128xf32>
    %1044 = arith.subf %1042, %1043 : vector<1x128xf32>
    %1045 = arith.mulf %1007, %1012 : vector<1x128xf32>
    %1046 = arith.mulf %1008, %1011 : vector<1x128xf32>
    %1047 = arith.subf %1045, %1046 : vector<1x128xf32>
    %1048 = arith.mulf %1012, %1014 : vector<1x128xf32>
    %1049 = arith.mulf %1010, %1016 : vector<1x128xf32>
    %1050 = arith.subf %1048, %1049 : vector<1x128xf32>
    %1051 = arith.mulf %1006, %1016 : vector<1x128xf32>
    %1052 = arith.mulf %1008, %1014 : vector<1x128xf32>
    %1053 = arith.subf %1051, %1052 : vector<1x128xf32>
    %1054 = arith.mulf %1008, %1010 : vector<1x128xf32>
    %1055 = arith.mulf %1006, %1012 : vector<1x128xf32>
    %1056 = arith.subf %1054, %1055 : vector<1x128xf32>
    %1057 = arith.mulf %1010, %1015 : vector<1x128xf32>
    %1058 = arith.mulf %1011, %1014 : vector<1x128xf32>
    %1059 = arith.subf %1057, %1058 : vector<1x128xf32>
    %1060 = arith.mulf %1007, %1014 : vector<1x128xf32>
    %1061 = arith.mulf %1006, %1015 : vector<1x128xf32>
    %1062 = arith.subf %1060, %1061 : vector<1x128xf32>
    %1063 = arith.mulf %1006, %1011 : vector<1x128xf32>
    %1064 = arith.mulf %1007, %1010 : vector<1x128xf32>
    %1065 = arith.subf %1063, %1064 : vector<1x128xf32>
    %1066 = arith.mulf %1006, %1041 : vector<1x128xf32>
    %1067 = arith.mulf %1007, %1050 : vector<1x128xf32>
    %1068 = arith.addf %1066, %1067 : vector<1x128xf32>
    %1069 = arith.mulf %1008, %1059 : vector<1x128xf32>
    %1070 = arith.addf %1068, %1069 : vector<1x128xf32>
    %1071 = math.absf %1070 : vector<1x128xf32>
    %cst_366 = arith.constant 9.99999993E-9 : f32
    %1072 = vector.broadcast %cst_366 : f32 to vector<1x128xf32>
    %1073 = arith.cmpf olt, %1071, %1072 : vector<1x128xf32>
    %cst_367 = arith.constant 0.000000e+00 : f32
    %1074 = vector.broadcast %cst_367 : f32 to vector<1x128xf32>
    %1075 = arith.cmpf olt, %1070, %1074 : vector<1x128xf32>
    %cst_368 = arith.constant -9.99999993E-9 : f32
    %cst_369 = arith.constant 9.99999993E-9 : f32
    %1076 = vector.broadcast %cst_368 : f32 to vector<1x128xf32>
    %1077 = vector.broadcast %cst_369 : f32 to vector<1x128xf32>
    %1078 = arith.select %1075, %1076, %1077 : vector<1x128xi1>, vector<1x128xf32>
    %1079 = arith.select %1073, %1078, %1070 : vector<1x128xi1>, vector<1x128xf32>
    %cst_370 = arith.constant 1.000000e+00 : f32
    %1080 = vector.broadcast %cst_370 : f32 to vector<1x128xf32>
    %1081 = arith.divf %1080, %1079 : vector<1x128xf32>
    %1082 = arith.mulf %1041, %1024 : vector<1x128xf32>
    %1083 = arith.mulf %1044, %1031 : vector<1x128xf32>
    %1084 = arith.addf %1082, %1083 : vector<1x128xf32>
    %1085 = arith.mulf %1047, %1038 : vector<1x128xf32>
    %1086 = arith.addf %1084, %1085 : vector<1x128xf32>
    %1087 = arith.mulf %1081, %1086 : vector<1x128xf32>
    %cst_371 = arith.constant -1.000000e+02 : f32
    %cst_372 = arith.constant 1.000000e+02 : f32
    %1088 = vector.broadcast %cst_371 : f32 to vector<1x128xf32>
    %1089 = arith.maximumf %1088, %1087 : vector<1x128xf32>
    %1090 = vector.broadcast %cst_372 : f32 to vector<1x128xf32>
    %1091 = arith.minimumf %1090, %1089 : vector<1x128xf32>
    %1092 = arith.mulf %1050, %1024 : vector<1x128xf32>
    %1093 = arith.mulf %1053, %1031 : vector<1x128xf32>
    %1094 = arith.addf %1092, %1093 : vector<1x128xf32>
    %1095 = arith.mulf %1056, %1038 : vector<1x128xf32>
    %1096 = arith.addf %1094, %1095 : vector<1x128xf32>
    %1097 = arith.mulf %1081, %1096 : vector<1x128xf32>
    %cst_373 = arith.constant -1.000000e+02 : f32
    %cst_374 = arith.constant 1.000000e+02 : f32
    %1098 = vector.broadcast %cst_373 : f32 to vector<1x128xf32>
    %1099 = arith.maximumf %1098, %1097 : vector<1x128xf32>
    %1100 = vector.broadcast %cst_374 : f32 to vector<1x128xf32>
    %1101 = arith.minimumf %1100, %1099 : vector<1x128xf32>
    %1102 = arith.mulf %1059, %1024 : vector<1x128xf32>
    %1103 = arith.mulf %1062, %1031 : vector<1x128xf32>
    %1104 = arith.addf %1102, %1103 : vector<1x128xf32>
    %1105 = arith.mulf %1065, %1038 : vector<1x128xf32>
    %1106 = arith.addf %1104, %1105 : vector<1x128xf32>
    %1107 = arith.mulf %1081, %1106 : vector<1x128xf32>
    %cst_375 = arith.constant -1.000000e+02 : f32
    %cst_376 = arith.constant 1.000000e+02 : f32
    %1108 = vector.broadcast %cst_375 : f32 to vector<1x128xf32>
    %1109 = arith.maximumf %1108, %1107 : vector<1x128xf32>
    %1110 = vector.broadcast %cst_376 : f32 to vector<1x128xf32>
    %1111 = arith.minimumf %1110, %1109 : vector<1x128xf32>
    %1112 = arith.subf %743, %1091 : vector<1x128xf32>
    %1113 = arith.subf %744, %1101 : vector<1x128xf32>
    %1114 = arith.subf %745, %1111 : vector<1x128xf32>
    %c3_i32 = arith.constant 3 : i32
    %cst_377 = arith.constant 0.00169628859 : f32
    %1115 = vector.broadcast %cst_377 : f32 to vector<1x128xf32>
    %1116 = arith.subf %1112, %1115 : vector<1x128xf32>
    %cst_378 = arith.constant 1.05144262 : f32
    %1117 = vector.broadcast %cst_378 : f32 to vector<1x128xf32>
    %1118 = arith.mulf %1116, %1117 : vector<1x128xf32>
    %cst_379 = arith.constant -0.00430172682 : f32
    %1119 = vector.broadcast %cst_379 : f32 to vector<1x128xf32>
    %1120 = arith.subf %1113, %1119 : vector<1x128xf32>
    %cst_380 = arith.constant 1.05144262 : f32
    %1121 = vector.broadcast %cst_380 : f32 to vector<1x128xf32>
    %1122 = arith.mulf %1120, %1121 : vector<1x128xf32>
    %cst_381 = arith.constant -0.00518578291 : f32
    %1123 = vector.broadcast %cst_381 : f32 to vector<1x128xf32>
    %1124 = arith.subf %1114, %1123 : vector<1x128xf32>
    %cst_382 = arith.constant 4.20577049 : f32
    %1125 = vector.broadcast %cst_382 : f32 to vector<1x128xf32>
    %1126 = arith.mulf %1124, %1125 : vector<1x128xf32>
    %cst_383 = arith.constant 1.000000e+00 : f32
    %1127 = vector.broadcast %cst_383 : f32 to vector<1x128xf32>
    %1128 = arith.addf %1118, %1127 : vector<1x128xf32>
    %cst_384 = arith.constant 7.500000e+00 : f32
    %1129 = vector.broadcast %cst_384 : f32 to vector<1x128xf32>
    %1130 = arith.mulf %1128, %1129 : vector<1x128xf32>
    %cst_385 = arith.constant 0.000000e+00 : f32
    %cst_386 = arith.constant 1.500000e+01 : f32
    %1131 = vector.broadcast %cst_385 : f32 to vector<1x128xf32>
    %1132 = arith.maximumf %1131, %1130 : vector<1x128xf32>
    %1133 = vector.broadcast %cst_386 : f32 to vector<1x128xf32>
    %1134 = arith.minimumf %1133, %1132 : vector<1x128xf32>
    %cst_387 = arith.constant 1.000000e+00 : f32
    %1135 = vector.broadcast %cst_387 : f32 to vector<1x128xf32>
    %1136 = arith.addf %1122, %1135 : vector<1x128xf32>
    %cst_388 = arith.constant 7.500000e+00 : f32
    %1137 = vector.broadcast %cst_388 : f32 to vector<1x128xf32>
    %1138 = arith.mulf %1136, %1137 : vector<1x128xf32>
    %cst_389 = arith.constant 0.000000e+00 : f32
    %cst_390 = arith.constant 1.500000e+01 : f32
    %1139 = vector.broadcast %cst_389 : f32 to vector<1x128xf32>
    %1140 = arith.maximumf %1139, %1138 : vector<1x128xf32>
    %1141 = vector.broadcast %cst_390 : f32 to vector<1x128xf32>
    %1142 = arith.minimumf %1141, %1140 : vector<1x128xf32>
    %cst_391 = arith.constant 1.000000e+00 : f32
    %1143 = vector.broadcast %cst_391 : f32 to vector<1x128xf32>
    %1144 = arith.addf %1126, %1143 : vector<1x128xf32>
    %cst_392 = arith.constant 1.500000e+00 : f32
    %1145 = vector.broadcast %cst_392 : f32 to vector<1x128xf32>
    %1146 = arith.mulf %1144, %1145 : vector<1x128xf32>
    %cst_393 = arith.constant 0.000000e+00 : f32
    %cst_394 = arith.constant 3.000000e+00 : f32
    %1147 = vector.broadcast %cst_393 : f32 to vector<1x128xf32>
    %1148 = arith.maximumf %1147, %1146 : vector<1x128xf32>
    %1149 = vector.broadcast %cst_394 : f32 to vector<1x128xf32>
    %1150 = arith.minimumf %1149, %1148 : vector<1x128xf32>
    %1151 = vector.broadcast %1142 : vector<1x128xf32> to vector<16x128xf32>
    %1152 = arith.subf %1151, %4 : vector<16x128xf32>
    %1153 = math.absf %1152 : vector<16x128xf32>
    %cst_395 = arith.constant 1.000000e+00 : f32
    %1154 = vector.broadcast %cst_395 : f32 to vector<16x128xf32>
    %1155 = arith.subf %1154, %1153 : vector<16x128xf32>
    %cst_396 = arith.constant 0.000000e+00 : f32
    %1156 = vector.broadcast %cst_396 : f32 to vector<16x128xf32>
    %1157 = arith.maximumf %1155, %1156 : vector<16x128xf32>
    %cst_397 = arith.constant 0.000000e+00 : f32
    %1158 = vector.broadcast %cst_397 : f32 to vector<1x128xf32>
    %1159 = arith.subf %1150, %1158 : vector<1x128xf32>
    %1160 = math.absf %1159 : vector<1x128xf32>
    %cst_398 = arith.constant 1.000000e+00 : f32
    %1161 = vector.broadcast %cst_398 : f32 to vector<1x128xf32>
    %1162 = arith.subf %1161, %1160 : vector<1x128xf32>
    %cst_399 = arith.constant 0.000000e+00 : f32
    %1163 = vector.broadcast %cst_399 : f32 to vector<1x128xf32>
    %1164 = arith.maximumf %1162, %1163 : vector<1x128xf32>
    %1165 = vector.broadcast %1164 : vector<1x128xf32> to vector<16x128xf32>
    %1166 = arith.mulf %1157, %1165 : vector<16x128xf32>
    %cst_400 = arith.constant 1.000000e+00 : f32
    %1167 = vector.broadcast %cst_400 : f32 to vector<1x128xf32>
    %1168 = arith.subf %1150, %1167 : vector<1x128xf32>
    %1169 = math.absf %1168 : vector<1x128xf32>
    %cst_401 = arith.constant 1.000000e+00 : f32
    %1170 = vector.broadcast %cst_401 : f32 to vector<1x128xf32>
    %1171 = arith.subf %1170, %1169 : vector<1x128xf32>
    %cst_402 = arith.constant 0.000000e+00 : f32
    %1172 = vector.broadcast %cst_402 : f32 to vector<1x128xf32>
    %1173 = arith.maximumf %1171, %1172 : vector<1x128xf32>
    %1174 = vector.broadcast %1173 : vector<1x128xf32> to vector<16x128xf32>
    %1175 = arith.mulf %1157, %1174 : vector<16x128xf32>
    %cst_403 = arith.constant 2.000000e+00 : f32
    %1176 = vector.broadcast %cst_403 : f32 to vector<1x128xf32>
    %1177 = arith.subf %1150, %1176 : vector<1x128xf32>
    %1178 = math.absf %1177 : vector<1x128xf32>
    %cst_404 = arith.constant 1.000000e+00 : f32
    %1179 = vector.broadcast %cst_404 : f32 to vector<1x128xf32>
    %1180 = arith.subf %1179, %1178 : vector<1x128xf32>
    %cst_405 = arith.constant 0.000000e+00 : f32
    %1181 = vector.broadcast %cst_405 : f32 to vector<1x128xf32>
    %1182 = arith.maximumf %1180, %1181 : vector<1x128xf32>
    %1183 = vector.broadcast %1182 : vector<1x128xf32> to vector<16x128xf32>
    %1184 = arith.mulf %1157, %1183 : vector<16x128xf32>
    %cst_406 = arith.constant 3.000000e+00 : f32
    %1185 = vector.broadcast %cst_406 : f32 to vector<1x128xf32>
    %1186 = arith.subf %1150, %1185 : vector<1x128xf32>
    %1187 = math.absf %1186 : vector<1x128xf32>
    %cst_407 = arith.constant 1.000000e+00 : f32
    %1188 = vector.broadcast %cst_407 : f32 to vector<1x128xf32>
    %1189 = arith.subf %1188, %1187 : vector<1x128xf32>
    %cst_408 = arith.constant 0.000000e+00 : f32
    %1190 = vector.broadcast %cst_408 : f32 to vector<1x128xf32>
    %1191 = arith.maximumf %1189, %1190 : vector<1x128xf32>
    %1192 = vector.broadcast %1191 : vector<1x128xf32> to vector<16x128xf32>
    %1193 = arith.mulf %1157, %1192 : vector<16x128xf32>
    %1194 = tpu.concatenate %1166, %1175, %1184, %1193 in 0 : vector<16x128xf32>, vector<16x128xf32>, vector<16x128xf32>, vector<16x128xf32> -> vector<64x128xf32>
    %c0_409 = arith.constant 0 : index
    %c0_410 = arith.constant 0 : index
    %1195 = vector.load %arg2[%c0_409, %c0_410] : memref<256x64xf32, #tpu.memory_space<vmem>>, vector<256x64xf32>
    %cst_411 = arith.constant dense<0.000000e+00> : vector<256x128xf32>
    %1196 = tpu.matmul %1195, %1194, %cst_411 {dimension_numbers = #tpu.dot_dimension_numbers<[1], [0], [0], [1], [0, 0, 1, 1], [], []>} : vector<256x64xf32>, vector<64x128xf32>, vector<256x128xf32> -> vector<256x128xf32>
    %c0_412 = arith.constant 0 : index
    %c0_413 = arith.constant 0 : index
    %1197 = vector.load %arg4[%c0_412, %c0_413] : memref<256x128xf32, #tpu.memory_space<vmem>>, vector<256x128xf32>
    tpu.vector_store %arg4[%c0_412, %c0_413], %1196 {strides = array<i32>} : memref<256x128xf32, #tpu.memory_space<vmem>>, vector<256x128xf32>,
    %cst_414 = arith.constant 0.000000e+00 : f32
    %1198 = vector.broadcast %cst_414 : f32 to vector<16x128xf32>
    %cst_415 = arith.constant 0.000000e+00 : f32
    %1199 = vector.broadcast %cst_415 : f32 to vector<1x128xf32>
    %1200 = arith.subf %1134, %1199 : vector<1x128xf32>
    %1201 = math.absf %1200 : vector<1x128xf32>
    %cst_416 = arith.constant 1.000000e+00 : f32
    %1202 = vector.broadcast %cst_416 : f32 to vector<1x128xf32>
    %1203 = arith.subf %1202, %1201 : vector<1x128xf32>
    %cst_417 = arith.constant 0.000000e+00 : f32
    %1204 = vector.broadcast %cst_417 : f32 to vector<1x128xf32>
    %1205 = arith.maximumf %1203, %1204 : vector<1x128xf32>
    %c0_418 = arith.constant 0 : index
    %c0_419 = arith.constant 0 : index
    %1206 = vector.load %arg4[%c0_418, %c0_419] : memref<256x128xf32, #tpu.memory_space<vmem>>, vector<16x128xf32>
    %1207 = vector.broadcast %1205 : vector<1x128xf32> to vector<16x128xf32>
    %1208 = arith.mulf %1206, %1207 : vector<16x128xf32>
    %1209 = arith.addf %1198, %1208 : vector<16x128xf32>
    %cst_420 = arith.constant 1.000000e+00 : f32
    %1210 = vector.broadcast %cst_420 : f32 to vector<1x128xf32>
    %1211 = arith.subf %1134, %1210 : vector<1x128xf32>
    %1212 = math.absf %1211 : vector<1x128xf32>
    %cst_421 = arith.constant 1.000000e+00 : f32
    %1213 = vector.broadcast %cst_421 : f32 to vector<1x128xf32>
    %1214 = arith.subf %1213, %1212 : vector<1x128xf32>
    %cst_422 = arith.constant 0.000000e+00 : f32
    %1215 = vector.broadcast %cst_422 : f32 to vector<1x128xf32>
    %1216 = arith.maximumf %1214, %1215 : vector<1x128xf32>
    %c16_423 = arith.constant 16 : index
    %c0_424 = arith.constant 0 : index
    %1217 = vector.load %arg4[%c16_423, %c0_424] : memref<256x128xf32, #tpu.memory_space<vmem>>, vector<16x128xf32>
    %1218 = vector.broadcast %1216 : vector<1x128xf32> to vector<16x128xf32>
    %1219 = arith.mulf %1217, %1218 : vector<16x128xf32>
    %1220 = arith.addf %1209, %1219 : vector<16x128xf32>
    %cst_425 = arith.constant 2.000000e+00 : f32
    %1221 = vector.broadcast %cst_425 : f32 to vector<1x128xf32>
    %1222 = arith.subf %1134, %1221 : vector<1x128xf32>
    %1223 = math.absf %1222 : vector<1x128xf32>
    %cst_426 = arith.constant 1.000000e+00 : f32
    %1224 = vector.broadcast %cst_426 : f32 to vector<1x128xf32>
    %1225 = arith.subf %1224, %1223 : vector<1x128xf32>
    %cst_427 = arith.constant 0.000000e+00 : f32
    %1226 = vector.broadcast %cst_427 : f32 to vector<1x128xf32>
    %1227 = arith.maximumf %1225, %1226 : vector<1x128xf32>
    %c32_428 = arith.constant 32 : index
    %c0_429 = arith.constant 0 : index
    %1228 = vector.load %arg4[%c32_428, %c0_429] : memref<256x128xf32, #tpu.memory_space<vmem>>, vector<16x128xf32>
    %1229 = vector.broadcast %1227 : vector<1x128xf32> to vector<16x128xf32>
    %1230 = arith.mulf %1228, %1229 : vector<16x128xf32>
    %1231 = arith.addf %1220, %1230 : vector<16x128xf32>
    %cst_430 = arith.constant 3.000000e+00 : f32
    %1232 = vector.broadcast %cst_430 : f32 to vector<1x128xf32>
    %1233 = arith.subf %1134, %1232 : vector<1x128xf32>
    %1234 = math.absf %1233 : vector<1x128xf32>
    %cst_431 = arith.constant 1.000000e+00 : f32
    %1235 = vector.broadcast %cst_431 : f32 to vector<1x128xf32>
    %1236 = arith.subf %1235, %1234 : vector<1x128xf32>
    %cst_432 = arith.constant 0.000000e+00 : f32
    %1237 = vector.broadcast %cst_432 : f32 to vector<1x128xf32>
    %1238 = arith.maximumf %1236, %1237 : vector<1x128xf32>
    %c48_433 = arith.constant 48 : index
    %c0_434 = arith.constant 0 : index
    %1239 = vector.load %arg4[%c48_433, %c0_434] : memref<256x128xf32, #tpu.memory_space<vmem>>, vector<16x128xf32>
    %1240 = vector.broadcast %1238 : vector<1x128xf32> to vector<16x128xf32>
    %1241 = arith.mulf %1239, %1240 : vector<16x128xf32>
    %1242 = arith.addf %1231, %1241 : vector<16x128xf32>
    %cst_435 = arith.constant 4.000000e+00 : f32
    %1243 = vector.broadcast %cst_435 : f32 to vector<1x128xf32>
    %1244 = arith.subf %1134, %1243 : vector<1x128xf32>
    %1245 = math.absf %1244 : vector<1x128xf32>
    %cst_436 = arith.constant 1.000000e+00 : f32
    %1246 = vector.broadcast %cst_436 : f32 to vector<1x128xf32>
    %1247 = arith.subf %1246, %1245 : vector<1x128xf32>
    %cst_437 = arith.constant 0.000000e+00 : f32
    %1248 = vector.broadcast %cst_437 : f32 to vector<1x128xf32>
    %1249 = arith.maximumf %1247, %1248 : vector<1x128xf32>
    %c64_438 = arith.constant 64 : index
    %c0_439 = arith.constant 0 : index
    %1250 = vector.load %arg4[%c64_438, %c0_439] : memref<256x128xf32, #tpu.memory_space<vmem>>, vector<16x128xf32>
    %1251 = vector.broadcast %1249 : vector<1x128xf32> to vector<16x128xf32>
    %1252 = arith.mulf %1250, %1251 : vector<16x128xf32>
    %1253 = arith.addf %1242, %1252 : vector<16x128xf32>
    %cst_440 = arith.constant 5.000000e+00 : f32
    %1254 = vector.broadcast %cst_440 : f32 to vector<1x128xf32>
    %1255 = arith.subf %1134, %1254 : vector<1x128xf32>
    %1256 = math.absf %1255 : vector<1x128xf32>
    %cst_441 = arith.constant 1.000000e+00 : f32
    %1257 = vector.broadcast %cst_441 : f32 to vector<1x128xf32>
    %1258 = arith.subf %1257, %1256 : vector<1x128xf32>
    %cst_442 = arith.constant 0.000000e+00 : f32
    %1259 = vector.broadcast %cst_442 : f32 to vector<1x128xf32>
    %1260 = arith.maximumf %1258, %1259 : vector<1x128xf32>
    %c80_443 = arith.constant 80 : index
    %c0_444 = arith.constant 0 : index
    %1261 = vector.load %arg4[%c80_443, %c0_444] : memref<256x128xf32, #tpu.memory_space<vmem>>, vector<16x128xf32>
    %1262 = vector.broadcast %1260 : vector<1x128xf32> to vector<16x128xf32>
    %1263 = arith.mulf %1261, %1262 : vector<16x128xf32>
    %1264 = arith.addf %1253, %1263 : vector<16x128xf32>
    %cst_445 = arith.constant 6.000000e+00 : f32
    %1265 = vector.broadcast %cst_445 : f32 to vector<1x128xf32>
    %1266 = arith.subf %1134, %1265 : vector<1x128xf32>
    %1267 = math.absf %1266 : vector<1x128xf32>
    %cst_446 = arith.constant 1.000000e+00 : f32
    %1268 = vector.broadcast %cst_446 : f32 to vector<1x128xf32>
    %1269 = arith.subf %1268, %1267 : vector<1x128xf32>
    %cst_447 = arith.constant 0.000000e+00 : f32
    %1270 = vector.broadcast %cst_447 : f32 to vector<1x128xf32>
    %1271 = arith.maximumf %1269, %1270 : vector<1x128xf32>
    %c96_448 = arith.constant 96 : index
    %c0_449 = arith.constant 0 : index
    %1272 = vector.load %arg4[%c96_448, %c0_449] : memref<256x128xf32, #tpu.memory_space<vmem>>, vector<16x128xf32>
    %1273 = vector.broadcast %1271 : vector<1x128xf32> to vector<16x128xf32>
    %1274 = arith.mulf %1272, %1273 : vector<16x128xf32>
    %1275 = arith.addf %1264, %1274 : vector<16x128xf32>
    %cst_450 = arith.constant 7.000000e+00 : f32
    %1276 = vector.broadcast %cst_450 : f32 to vector<1x128xf32>
    %1277 = arith.subf %1134, %1276 : vector<1x128xf32>
    %1278 = math.absf %1277 : vector<1x128xf32>
    %cst_451 = arith.constant 1.000000e+00 : f32
    %1279 = vector.broadcast %cst_451 : f32 to vector<1x128xf32>
    %1280 = arith.subf %1279, %1278 : vector<1x128xf32>
    %cst_452 = arith.constant 0.000000e+00 : f32
    %1281 = vector.broadcast %cst_452 : f32 to vector<1x128xf32>
    %1282 = arith.maximumf %1280, %1281 : vector<1x128xf32>
    %c112_453 = arith.constant 112 : index
    %c0_454 = arith.constant 0 : index
    %1283 = vector.load %arg4[%c112_453, %c0_454] : memref<256x128xf32, #tpu.memory_space<vmem>>, vector<16x128xf32>
    %1284 = vector.broadcast %1282 : vector<1x128xf32> to vector<16x128xf32>
    %1285 = arith.mulf %1283, %1284 : vector<16x128xf32>
    %1286 = arith.addf %1275, %1285 : vector<16x128xf32>
    %cst_455 = arith.constant 8.000000e+00 : f32
    %1287 = vector.broadcast %cst_455 : f32 to vector<1x128xf32>
    %1288 = arith.subf %1134, %1287 : vector<1x128xf32>
    %1289 = math.absf %1288 : vector<1x128xf32>
    %cst_456 = arith.constant 1.000000e+00 : f32
    %1290 = vector.broadcast %cst_456 : f32 to vector<1x128xf32>
    %1291 = arith.subf %1290, %1289 : vector<1x128xf32>
    %cst_457 = arith.constant 0.000000e+00 : f32
    %1292 = vector.broadcast %cst_457 : f32 to vector<1x128xf32>
    %1293 = arith.maximumf %1291, %1292 : vector<1x128xf32>
    %c128_458 = arith.constant 128 : index
    %c0_459 = arith.constant 0 : index
    %1294 = vector.load %arg4[%c128_458, %c0_459] : memref<256x128xf32, #tpu.memory_space<vmem>>, vector<16x128xf32>
    %1295 = vector.broadcast %1293 : vector<1x128xf32> to vector<16x128xf32>
    %1296 = arith.mulf %1294, %1295 : vector<16x128xf32>
    %1297 = arith.addf %1286, %1296 : vector<16x128xf32>
    %cst_460 = arith.constant 9.000000e+00 : f32
    %1298 = vector.broadcast %cst_460 : f32 to vector<1x128xf32>
    %1299 = arith.subf %1134, %1298 : vector<1x128xf32>
    %1300 = math.absf %1299 : vector<1x128xf32>
    %cst_461 = arith.constant 1.000000e+00 : f32
    %1301 = vector.broadcast %cst_461 : f32 to vector<1x128xf32>
    %1302 = arith.subf %1301, %1300 : vector<1x128xf32>
    %cst_462 = arith.constant 0.000000e+00 : f32
    %1303 = vector.broadcast %cst_462 : f32 to vector<1x128xf32>
    %1304 = arith.maximumf %1302, %1303 : vector<1x128xf32>
    %c144_463 = arith.constant 144 : index
    %c0_464 = arith.constant 0 : index
    %1305 = vector.load %arg4[%c144_463, %c0_464] : memref<256x128xf32, #tpu.memory_space<vmem>>, vector<16x128xf32>
    %1306 = vector.broadcast %1304 : vector<1x128xf32> to vector<16x128xf32>
    %1307 = arith.mulf %1305, %1306 : vector<16x128xf32>
    %1308 = arith.addf %1297, %1307 : vector<16x128xf32>
    %cst_465 = arith.constant 1.000000e+01 : f32
    %1309 = vector.broadcast %cst_465 : f32 to vector<1x128xf32>
    %1310 = arith.subf %1134, %1309 : vector<1x128xf32>
    %1311 = math.absf %1310 : vector<1x128xf32>
    %cst_466 = arith.constant 1.000000e+00 : f32
    %1312 = vector.broadcast %cst_466 : f32 to vector<1x128xf32>
    %1313 = arith.subf %1312, %1311 : vector<1x128xf32>
    %cst_467 = arith.constant 0.000000e+00 : f32
    %1314 = vector.broadcast %cst_467 : f32 to vector<1x128xf32>
    %1315 = arith.maximumf %1313, %1314 : vector<1x128xf32>
    %c160_468 = arith.constant 160 : index
    %c0_469 = arith.constant 0 : index
    %1316 = vector.load %arg4[%c160_468, %c0_469] : memref<256x128xf32, #tpu.memory_space<vmem>>, vector<16x128xf32>
    %1317 = vector.broadcast %1315 : vector<1x128xf32> to vector<16x128xf32>
    %1318 = arith.mulf %1316, %1317 : vector<16x128xf32>
    %1319 = arith.addf %1308, %1318 : vector<16x128xf32>
    %cst_470 = arith.constant 1.100000e+01 : f32
    %1320 = vector.broadcast %cst_470 : f32 to vector<1x128xf32>
    %1321 = arith.subf %1134, %1320 : vector<1x128xf32>
    %1322 = math.absf %1321 : vector<1x128xf32>
    %cst_471 = arith.constant 1.000000e+00 : f32
    %1323 = vector.broadcast %cst_471 : f32 to vector<1x128xf32>
    %1324 = arith.subf %1323, %1322 : vector<1x128xf32>
    %cst_472 = arith.constant 0.000000e+00 : f32
    %1325 = vector.broadcast %cst_472 : f32 to vector<1x128xf32>
    %1326 = arith.maximumf %1324, %1325 : vector<1x128xf32>
    %c176_473 = arith.constant 176 : index
    %c0_474 = arith.constant 0 : index
    %1327 = vector.load %arg4[%c176_473, %c0_474] : memref<256x128xf32, #tpu.memory_space<vmem>>, vector<16x128xf32>
    %1328 = vector.broadcast %1326 : vector<1x128xf32> to vector<16x128xf32>
    %1329 = arith.mulf %1327, %1328 : vector<16x128xf32>
    %1330 = arith.addf %1319, %1329 : vector<16x128xf32>
    %cst_475 = arith.constant 1.200000e+01 : f32
    %1331 = vector.broadcast %cst_475 : f32 to vector<1x128xf32>
    %1332 = arith.subf %1134, %1331 : vector<1x128xf32>
    %1333 = math.absf %1332 : vector<1x128xf32>
    %cst_476 = arith.constant 1.000000e+00 : f32
    %1334 = vector.broadcast %cst_476 : f32 to vector<1x128xf32>
    %1335 = arith.subf %1334, %1333 : vector<1x128xf32>
    %cst_477 = arith.constant 0.000000e+00 : f32
    %1336 = vector.broadcast %cst_477 : f32 to vector<1x128xf32>
    %1337 = arith.maximumf %1335, %1336 : vector<1x128xf32>
    %c192_478 = arith.constant 192 : index
    %c0_479 = arith.constant 0 : index
    %1338 = vector.load %arg4[%c192_478, %c0_479] : memref<256x128xf32, #tpu.memory_space<vmem>>, vector<16x128xf32>
    %1339 = vector.broadcast %1337 : vector<1x128xf32> to vector<16x128xf32>
    %1340 = arith.mulf %1338, %1339 : vector<16x128xf32>
    %1341 = arith.addf %1330, %1340 : vector<16x128xf32>
    %cst_480 = arith.constant 1.300000e+01 : f32
    %1342 = vector.broadcast %cst_480 : f32 to vector<1x128xf32>
    %1343 = arith.subf %1134, %1342 : vector<1x128xf32>
    %1344 = math.absf %1343 : vector<1x128xf32>
    %cst_481 = arith.constant 1.000000e+00 : f32
    %1345 = vector.broadcast %cst_481 : f32 to vector<1x128xf32>
    %1346 = arith.subf %1345, %1344 : vector<1x128xf32>
    %cst_482 = arith.constant 0.000000e+00 : f32
    %1347 = vector.broadcast %cst_482 : f32 to vector<1x128xf32>
    %1348 = arith.maximumf %1346, %1347 : vector<1x128xf32>
    %c208_483 = arith.constant 208 : index
    %c0_484 = arith.constant 0 : index
    %1349 = vector.load %arg4[%c208_483, %c0_484] : memref<256x128xf32, #tpu.memory_space<vmem>>, vector<16x128xf32>
    %1350 = vector.broadcast %1348 : vector<1x128xf32> to vector<16x128xf32>
    %1351 = arith.mulf %1349, %1350 : vector<16x128xf32>
    %1352 = arith.addf %1341, %1351 : vector<16x128xf32>
    %cst_485 = arith.constant 1.400000e+01 : f32
    %1353 = vector.broadcast %cst_485 : f32 to vector<1x128xf32>
    %1354 = arith.subf %1134, %1353 : vector<1x128xf32>
    %1355 = math.absf %1354 : vector<1x128xf32>
    %cst_486 = arith.constant 1.000000e+00 : f32
    %1356 = vector.broadcast %cst_486 : f32 to vector<1x128xf32>
    %1357 = arith.subf %1356, %1355 : vector<1x128xf32>
    %cst_487 = arith.constant 0.000000e+00 : f32
    %1358 = vector.broadcast %cst_487 : f32 to vector<1x128xf32>
    %1359 = arith.maximumf %1357, %1358 : vector<1x128xf32>
    %c224_488 = arith.constant 224 : index
    %c0_489 = arith.constant 0 : index
    %1360 = vector.load %arg4[%c224_488, %c0_489] : memref<256x128xf32, #tpu.memory_space<vmem>>, vector<16x128xf32>
    %1361 = vector.broadcast %1359 : vector<1x128xf32> to vector<16x128xf32>
    %1362 = arith.mulf %1360, %1361 : vector<16x128xf32>
    %1363 = arith.addf %1352, %1362 : vector<16x128xf32>
    %cst_490 = arith.constant 1.500000e+01 : f32
    %1364 = vector.broadcast %cst_490 : f32 to vector<1x128xf32>
    %1365 = arith.subf %1134, %1364 : vector<1x128xf32>
    %1366 = math.absf %1365 : vector<1x128xf32>
    %cst_491 = arith.constant 1.000000e+00 : f32
    %1367 = vector.broadcast %cst_491 : f32 to vector<1x128xf32>
    %1368 = arith.subf %1367, %1366 : vector<1x128xf32>
    %cst_492 = arith.constant 0.000000e+00 : f32
    %1369 = vector.broadcast %cst_492 : f32 to vector<1x128xf32>
    %1370 = arith.maximumf %1368, %1369 : vector<1x128xf32>
    %c240_493 = arith.constant 240 : index
    %c0_494 = arith.constant 0 : index
    %1371 = vector.load %arg4[%c240_493, %c0_494] : memref<256x128xf32, #tpu.memory_space<vmem>>, vector<16x128xf32>
    %1372 = vector.broadcast %1370 : vector<1x128xf32> to vector<16x128xf32>
    %1373 = arith.mulf %1371, %1372 : vector<16x128xf32>
    %1374 = arith.addf %1363, %1373 : vector<16x128xf32>
    %1375 = vector.extract_strided_slice %1374 {offsets = [0, 0], sizes = [1, 128], strides = [1, 1]} : vector<16x128xf32> to vector<1x128xf32>
    %1376 = vector.extract_strided_slice %1374 {offsets = [1, 0], sizes = [1, 128], strides = [1, 1]} : vector<16x128xf32> to vector<1x128xf32>
    %1377 = vector.extract_strided_slice %1374 {offsets = [2, 0], sizes = [1, 128], strides = [1, 1]} : vector<16x128xf32> to vector<1x128xf32>
    %1378 = vector.extract_strided_slice %1374 {offsets = [3, 0], sizes = [1, 128], strides = [1, 1]} : vector<16x128xf32> to vector<1x128xf32>
    %1379 = vector.extract_strided_slice %1374 {offsets = [4, 0], sizes = [1, 128], strides = [1, 1]} : vector<16x128xf32> to vector<1x128xf32>
    %1380 = vector.extract_strided_slice %1374 {offsets = [5, 0], sizes = [1, 128], strides = [1, 1]} : vector<16x128xf32> to vector<1x128xf32>
    %1381 = vector.extract_strided_slice %1374 {offsets = [6, 0], sizes = [1, 128], strides = [1, 1]} : vector<16x128xf32> to vector<1x128xf32>
    %1382 = vector.extract_strided_slice %1374 {offsets = [7, 0], sizes = [1, 128], strides = [1, 1]} : vector<16x128xf32> to vector<1x128xf32>
    %1383 = vector.extract_strided_slice %1374 {offsets = [8, 0], sizes = [1, 128], strides = [1, 1]} : vector<16x128xf32> to vector<1x128xf32>
    %1384 = vector.extract_strided_slice %1374 {offsets = [9, 0], sizes = [1, 128], strides = [1, 1]} : vector<16x128xf32> to vector<1x128xf32>
    %1385 = vector.extract_strided_slice %1374 {offsets = [10, 0], sizes = [1, 128], strides = [1, 1]} : vector<16x128xf32> to vector<1x128xf32>
    %1386 = vector.extract_strided_slice %1374 {offsets = [11, 0], sizes = [1, 128], strides = [1, 1]} : vector<16x128xf32> to vector<1x128xf32>
    %1387 = arith.mulf %1375, %1112 : vector<1x128xf32>
    %1388 = arith.mulf %1376, %1113 : vector<1x128xf32>
    %1389 = arith.addf %1387, %1388 : vector<1x128xf32>
    %1390 = arith.mulf %1377, %1114 : vector<1x128xf32>
    %1391 = arith.addf %1389, %1390 : vector<1x128xf32>
    %1392 = arith.addf %1391, %1378 : vector<1x128xf32>
    %1393 = arith.subf %1392, %0 : vector<1x128xf32>
    %1394 = arith.mulf %1379, %1112 : vector<1x128xf32>
    %1395 = arith.mulf %1380, %1113 : vector<1x128xf32>
    %1396 = arith.addf %1394, %1395 : vector<1x128xf32>
    %1397 = arith.mulf %1381, %1114 : vector<1x128xf32>
    %1398 = arith.addf %1396, %1397 : vector<1x128xf32>
    %1399 = arith.addf %1398, %1382 : vector<1x128xf32>
    %1400 = arith.subf %1399, %1 : vector<1x128xf32>
    %1401 = arith.mulf %1383, %1112 : vector<1x128xf32>
    %1402 = arith.mulf %1384, %1113 : vector<1x128xf32>
    %1403 = arith.addf %1401, %1402 : vector<1x128xf32>
    %1404 = arith.mulf %1385, %1114 : vector<1x128xf32>
    %1405 = arith.addf %1403, %1404 : vector<1x128xf32>
    %1406 = arith.addf %1405, %1386 : vector<1x128xf32>
    %1407 = arith.subf %1406, %2 : vector<1x128xf32>
    %1408 = arith.mulf %1380, %1385 : vector<1x128xf32>
    %1409 = arith.mulf %1381, %1384 : vector<1x128xf32>
    %1410 = arith.subf %1408, %1409 : vector<1x128xf32>
    %1411 = arith.mulf %1377, %1384 : vector<1x128xf32>
    %1412 = arith.mulf %1376, %1385 : vector<1x128xf32>
    %1413 = arith.subf %1411, %1412 : vector<1x128xf32>
    %1414 = arith.mulf %1376, %1381 : vector<1x128xf32>
    %1415 = arith.mulf %1377, %1380 : vector<1x128xf32>
    %1416 = arith.subf %1414, %1415 : vector<1x128xf32>
    %1417 = arith.mulf %1381, %1383 : vector<1x128xf32>
    %1418 = arith.mulf %1379, %1385 : vector<1x128xf32>
    %1419 = arith.subf %1417, %1418 : vector<1x128xf32>
    %1420 = arith.mulf %1375, %1385 : vector<1x128xf32>
    %1421 = arith.mulf %1377, %1383 : vector<1x128xf32>
    %1422 = arith.subf %1420, %1421 : vector<1x128xf32>
    %1423 = arith.mulf %1377, %1379 : vector<1x128xf32>
    %1424 = arith.mulf %1375, %1381 : vector<1x128xf32>
    %1425 = arith.subf %1423, %1424 : vector<1x128xf32>
    %1426 = arith.mulf %1379, %1384 : vector<1x128xf32>
    %1427 = arith.mulf %1380, %1383 : vector<1x128xf32>
    %1428 = arith.subf %1426, %1427 : vector<1x128xf32>
    %1429 = arith.mulf %1376, %1383 : vector<1x128xf32>
    %1430 = arith.mulf %1375, %1384 : vector<1x128xf32>
    %1431 = arith.subf %1429, %1430 : vector<1x128xf32>
    %1432 = arith.mulf %1375, %1380 : vector<1x128xf32>
    %1433 = arith.mulf %1376, %1379 : vector<1x128xf32>
    %1434 = arith.subf %1432, %1433 : vector<1x128xf32>
    %1435 = arith.mulf %1375, %1410 : vector<1x128xf32>
    %1436 = arith.mulf %1376, %1419 : vector<1x128xf32>
    %1437 = arith.addf %1435, %1436 : vector<1x128xf32>
    %1438 = arith.mulf %1377, %1428 : vector<1x128xf32>
    %1439 = arith.addf %1437, %1438 : vector<1x128xf32>
    %1440 = math.absf %1439 : vector<1x128xf32>
    %cst_495 = arith.constant 9.99999993E-9 : f32
    %1441 = vector.broadcast %cst_495 : f32 to vector<1x128xf32>
    %1442 = arith.cmpf olt, %1440, %1441 : vector<1x128xf32>
    %cst_496 = arith.constant 0.000000e+00 : f32
    %1443 = vector.broadcast %cst_496 : f32 to vector<1x128xf32>
    %1444 = arith.cmpf olt, %1439, %1443 : vector<1x128xf32>
    %cst_497 = arith.constant -9.99999993E-9 : f32
    %cst_498 = arith.constant 9.99999993E-9 : f32
    %1445 = vector.broadcast %cst_497 : f32 to vector<1x128xf32>
    %1446 = vector.broadcast %cst_498 : f32 to vector<1x128xf32>
    %1447 = arith.select %1444, %1445, %1446 : vector<1x128xi1>, vector<1x128xf32>
    %1448 = arith.select %1442, %1447, %1439 : vector<1x128xi1>, vector<1x128xf32>
    %cst_499 = arith.constant 1.000000e+00 : f32
    %1449 = vector.broadcast %cst_499 : f32 to vector<1x128xf32>
    %1450 = arith.divf %1449, %1448 : vector<1x128xf32>
    %1451 = arith.mulf %1410, %1393 : vector<1x128xf32>
    %1452 = arith.mulf %1413, %1400 : vector<1x128xf32>
    %1453 = arith.addf %1451, %1452 : vector<1x128xf32>
    %1454 = arith.mulf %1416, %1407 : vector<1x128xf32>
    %1455 = arith.addf %1453, %1454 : vector<1x128xf32>
    %1456 = arith.mulf %1450, %1455 : vector<1x128xf32>
    %cst_500 = arith.constant -1.000000e+02 : f32
    %cst_501 = arith.constant 1.000000e+02 : f32
    %1457 = vector.broadcast %cst_500 : f32 to vector<1x128xf32>
    %1458 = arith.maximumf %1457, %1456 : vector<1x128xf32>
    %1459 = vector.broadcast %cst_501 : f32 to vector<1x128xf32>
    %1460 = arith.minimumf %1459, %1458 : vector<1x128xf32>
    %1461 = arith.mulf %1419, %1393 : vector<1x128xf32>
    %1462 = arith.mulf %1422, %1400 : vector<1x128xf32>
    %1463 = arith.addf %1461, %1462 : vector<1x128xf32>
    %1464 = arith.mulf %1425, %1407 : vector<1x128xf32>
    %1465 = arith.addf %1463, %1464 : vector<1x128xf32>
    %1466 = arith.mulf %1450, %1465 : vector<1x128xf32>
    %cst_502 = arith.constant -1.000000e+02 : f32
    %cst_503 = arith.constant 1.000000e+02 : f32
    %1467 = vector.broadcast %cst_502 : f32 to vector<1x128xf32>
    %1468 = arith.maximumf %1467, %1466 : vector<1x128xf32>
    %1469 = vector.broadcast %cst_503 : f32 to vector<1x128xf32>
    %1470 = arith.minimumf %1469, %1468 : vector<1x128xf32>
    %1471 = arith.mulf %1428, %1393 : vector<1x128xf32>
    %1472 = arith.mulf %1431, %1400 : vector<1x128xf32>
    %1473 = arith.addf %1471, %1472 : vector<1x128xf32>
    %1474 = arith.mulf %1434, %1407 : vector<1x128xf32>
    %1475 = arith.addf %1473, %1474 : vector<1x128xf32>
    %1476 = arith.mulf %1450, %1475 : vector<1x128xf32>
    %cst_504 = arith.constant -1.000000e+02 : f32
    %cst_505 = arith.constant 1.000000e+02 : f32
    %1477 = vector.broadcast %cst_504 : f32 to vector<1x128xf32>
    %1478 = arith.maximumf %1477, %1476 : vector<1x128xf32>
    %1479 = vector.broadcast %cst_505 : f32 to vector<1x128xf32>
    %1480 = arith.minimumf %1479, %1478 : vector<1x128xf32>
    %1481 = arith.subf %1112, %1460 : vector<1x128xf32>
    %1482 = arith.subf %1113, %1470 : vector<1x128xf32>
    %1483 = arith.subf %1114, %1480 : vector<1x128xf32>
    %c4_i32 = arith.constant 4 : i32
    %cst_506 = arith.constant 0.00169628859 : f32
    %1484 = vector.broadcast %cst_506 : f32 to vector<1x128xf32>
    %1485 = arith.subf %1481, %1484 : vector<1x128xf32>
    %cst_507 = arith.constant 1.05144262 : f32
    %1486 = vector.broadcast %cst_507 : f32 to vector<1x128xf32>
    %1487 = arith.mulf %1485, %1486 : vector<1x128xf32>
    %cst_508 = arith.constant -0.00430172682 : f32
    %1488 = vector.broadcast %cst_508 : f32 to vector<1x128xf32>
    %1489 = arith.subf %1482, %1488 : vector<1x128xf32>
    %cst_509 = arith.constant 1.05144262 : f32
    %1490 = vector.broadcast %cst_509 : f32 to vector<1x128xf32>
    %1491 = arith.mulf %1489, %1490 : vector<1x128xf32>
    %cst_510 = arith.constant -0.00518578291 : f32
    %1492 = vector.broadcast %cst_510 : f32 to vector<1x128xf32>
    %1493 = arith.subf %1483, %1492 : vector<1x128xf32>
    %cst_511 = arith.constant 4.20577049 : f32
    %1494 = vector.broadcast %cst_511 : f32 to vector<1x128xf32>
    %1495 = arith.mulf %1493, %1494 : vector<1x128xf32>
    %cst_512 = arith.constant 1.000000e+00 : f32
    %1496 = vector.broadcast %cst_512 : f32 to vector<1x128xf32>
    %1497 = arith.addf %1487, %1496 : vector<1x128xf32>
    %cst_513 = arith.constant 7.500000e+00 : f32
    %1498 = vector.broadcast %cst_513 : f32 to vector<1x128xf32>
    %1499 = arith.mulf %1497, %1498 : vector<1x128xf32>
    %cst_514 = arith.constant 0.000000e+00 : f32
    %cst_515 = arith.constant 1.500000e+01 : f32
    %1500 = vector.broadcast %cst_514 : f32 to vector<1x128xf32>
    %1501 = arith.maximumf %1500, %1499 : vector<1x128xf32>
    %1502 = vector.broadcast %cst_515 : f32 to vector<1x128xf32>
    %1503 = arith.minimumf %1502, %1501 : vector<1x128xf32>
    %cst_516 = arith.constant 1.000000e+00 : f32
    %1504 = vector.broadcast %cst_516 : f32 to vector<1x128xf32>
    %1505 = arith.addf %1491, %1504 : vector<1x128xf32>
    %cst_517 = arith.constant 7.500000e+00 : f32
    %1506 = vector.broadcast %cst_517 : f32 to vector<1x128xf32>
    %1507 = arith.mulf %1505, %1506 : vector<1x128xf32>
    %cst_518 = arith.constant 0.000000e+00 : f32
    %cst_519 = arith.constant 1.500000e+01 : f32
    %1508 = vector.broadcast %cst_518 : f32 to vector<1x128xf32>
    %1509 = arith.maximumf %1508, %1507 : vector<1x128xf32>
    %1510 = vector.broadcast %cst_519 : f32 to vector<1x128xf32>
    %1511 = arith.minimumf %1510, %1509 : vector<1x128xf32>
    %cst_520 = arith.constant 1.000000e+00 : f32
    %1512 = vector.broadcast %cst_520 : f32 to vector<1x128xf32>
    %1513 = arith.addf %1495, %1512 : vector<1x128xf32>
    %cst_521 = arith.constant 1.500000e+00 : f32
    %1514 = vector.broadcast %cst_521 : f32 to vector<1x128xf32>
    %1515 = arith.mulf %1513, %1514 : vector<1x128xf32>
    %cst_522 = arith.constant 0.000000e+00 : f32
    %cst_523 = arith.constant 3.000000e+00 : f32
    %1516 = vector.broadcast %cst_522 : f32 to vector<1x128xf32>
    %1517 = arith.maximumf %1516, %1515 : vector<1x128xf32>
    %1518 = vector.broadcast %cst_523 : f32 to vector<1x128xf32>
    %1519 = arith.minimumf %1518, %1517 : vector<1x128xf32>
    %1520 = vector.broadcast %1511 : vector<1x128xf32> to vector<16x128xf32>
    %1521 = arith.subf %1520, %4 : vector<16x128xf32>
    %1522 = math.absf %1521 : vector<16x128xf32>
    %cst_524 = arith.constant 1.000000e+00 : f32
    %1523 = vector.broadcast %cst_524 : f32 to vector<16x128xf32>
    %1524 = arith.subf %1523, %1522 : vector<16x128xf32>
    %cst_525 = arith.constant 0.000000e+00 : f32
    %1525 = vector.broadcast %cst_525 : f32 to vector<16x128xf32>
    %1526 = arith.maximumf %1524, %1525 : vector<16x128xf32>
    %cst_526 = arith.constant 0.000000e+00 : f32
    %1527 = vector.broadcast %cst_526 : f32 to vector<1x128xf32>
    %1528 = arith.subf %1519, %1527 : vector<1x128xf32>
    %1529 = math.absf %1528 : vector<1x128xf32>
    %cst_527 = arith.constant 1.000000e+00 : f32
    %1530 = vector.broadcast %cst_527 : f32 to vector<1x128xf32>
    %1531 = arith.subf %1530, %1529 : vector<1x128xf32>
    %cst_528 = arith.constant 0.000000e+00 : f32
    %1532 = vector.broadcast %cst_528 : f32 to vector<1x128xf32>
    %1533 = arith.maximumf %1531, %1532 : vector<1x128xf32>
    %1534 = vector.broadcast %1533 : vector<1x128xf32> to vector<16x128xf32>
    %1535 = arith.mulf %1526, %1534 : vector<16x128xf32>
    %cst_529 = arith.constant 1.000000e+00 : f32
    %1536 = vector.broadcast %cst_529 : f32 to vector<1x128xf32>
    %1537 = arith.subf %1519, %1536 : vector<1x128xf32>
    %1538 = math.absf %1537 : vector<1x128xf32>
    %cst_530 = arith.constant 1.000000e+00 : f32
    %1539 = vector.broadcast %cst_530 : f32 to vector<1x128xf32>
    %1540 = arith.subf %1539, %1538 : vector<1x128xf32>
    %cst_531 = arith.constant 0.000000e+00 : f32
    %1541 = vector.broadcast %cst_531 : f32 to vector<1x128xf32>
    %1542 = arith.maximumf %1540, %1541 : vector<1x128xf32>
    %1543 = vector.broadcast %1542 : vector<1x128xf32> to vector<16x128xf32>
    %1544 = arith.mulf %1526, %1543 : vector<16x128xf32>
    %cst_532 = arith.constant 2.000000e+00 : f32
    %1545 = vector.broadcast %cst_532 : f32 to vector<1x128xf32>
    %1546 = arith.subf %1519, %1545 : vector<1x128xf32>
    %1547 = math.absf %1546 : vector<1x128xf32>
    %cst_533 = arith.constant 1.000000e+00 : f32
    %1548 = vector.broadcast %cst_533 : f32 to vector<1x128xf32>
    %1549 = arith.subf %1548, %1547 : vector<1x128xf32>
    %cst_534 = arith.constant 0.000000e+00 : f32
    %1550 = vector.broadcast %cst_534 : f32 to vector<1x128xf32>
    %1551 = arith.maximumf %1549, %1550 : vector<1x128xf32>
    %1552 = vector.broadcast %1551 : vector<1x128xf32> to vector<16x128xf32>
    %1553 = arith.mulf %1526, %1552 : vector<16x128xf32>
    %cst_535 = arith.constant 3.000000e+00 : f32
    %1554 = vector.broadcast %cst_535 : f32 to vector<1x128xf32>
    %1555 = arith.subf %1519, %1554 : vector<1x128xf32>
    %1556 = math.absf %1555 : vector<1x128xf32>
    %cst_536 = arith.constant 1.000000e+00 : f32
    %1557 = vector.broadcast %cst_536 : f32 to vector<1x128xf32>
    %1558 = arith.subf %1557, %1556 : vector<1x128xf32>
    %cst_537 = arith.constant 0.000000e+00 : f32
    %1559 = vector.broadcast %cst_537 : f32 to vector<1x128xf32>
    %1560 = arith.maximumf %1558, %1559 : vector<1x128xf32>
    %1561 = vector.broadcast %1560 : vector<1x128xf32> to vector<16x128xf32>
    %1562 = arith.mulf %1526, %1561 : vector<16x128xf32>
    %1563 = tpu.concatenate %1535, %1544, %1553, %1562 in 0 : vector<16x128xf32>, vector<16x128xf32>, vector<16x128xf32>, vector<16x128xf32> -> vector<64x128xf32>
    %c0_538 = arith.constant 0 : index
    %c0_539 = arith.constant 0 : index
    %1564 = vector.load %arg2[%c0_538, %c0_539] : memref<256x64xf32, #tpu.memory_space<vmem>>, vector<256x64xf32>
    %cst_540 = arith.constant dense<0.000000e+00> : vector<256x128xf32>
    %1565 = tpu.matmul %1564, %1563, %cst_540 {dimension_numbers = #tpu.dot_dimension_numbers<[1], [0], [0], [1], [0, 0, 1, 1], [], []>} : vector<256x64xf32>, vector<64x128xf32>, vector<256x128xf32> -> vector<256x128xf32>
    %c0_541 = arith.constant 0 : index
    %c0_542 = arith.constant 0 : index
    %1566 = vector.load %arg4[%c0_541, %c0_542] : memref<256x128xf32, #tpu.memory_space<vmem>>, vector<256x128xf32>
    tpu.vector_store %arg4[%c0_541, %c0_542], %1565 {strides = array<i32>} : memref<256x128xf32, #tpu.memory_space<vmem>>, vector<256x128xf32>,
    %cst_543 = arith.constant 0.000000e+00 : f32
    %1567 = vector.broadcast %cst_543 : f32 to vector<16x128xf32>
    %cst_544 = arith.constant 0.000000e+00 : f32
    %1568 = vector.broadcast %cst_544 : f32 to vector<1x128xf32>
    %1569 = arith.subf %1503, %1568 : vector<1x128xf32>
    %1570 = math.absf %1569 : vector<1x128xf32>
    %cst_545 = arith.constant 1.000000e+00 : f32
    %1571 = vector.broadcast %cst_545 : f32 to vector<1x128xf32>
    %1572 = arith.subf %1571, %1570 : vector<1x128xf32>
    %cst_546 = arith.constant 0.000000e+00 : f32
    %1573 = vector.broadcast %cst_546 : f32 to vector<1x128xf32>
    %1574 = arith.maximumf %1572, %1573 : vector<1x128xf32>
    %c0_547 = arith.constant 0 : index
    %c0_548 = arith.constant 0 : index
    %1575 = vector.load %arg4[%c0_547, %c0_548] : memref<256x128xf32, #tpu.memory_space<vmem>>, vector<16x128xf32>
    %1576 = vector.broadcast %1574 : vector<1x128xf32> to vector<16x128xf32>
    %1577 = arith.mulf %1575, %1576 : vector<16x128xf32>
    %1578 = arith.addf %1567, %1577 : vector<16x128xf32>
    %cst_549 = arith.constant 1.000000e+00 : f32
    %1579 = vector.broadcast %cst_549 : f32 to vector<1x128xf32>
    %1580 = arith.subf %1503, %1579 : vector<1x128xf32>
    %1581 = math.absf %1580 : vector<1x128xf32>
    %cst_550 = arith.constant 1.000000e+00 : f32
    %1582 = vector.broadcast %cst_550 : f32 to vector<1x128xf32>
    %1583 = arith.subf %1582, %1581 : vector<1x128xf32>
    %cst_551 = arith.constant 0.000000e+00 : f32
    %1584 = vector.broadcast %cst_551 : f32 to vector<1x128xf32>
    %1585 = arith.maximumf %1583, %1584 : vector<1x128xf32>
    %c16_552 = arith.constant 16 : index
    %c0_553 = arith.constant 0 : index
    %1586 = vector.load %arg4[%c16_552, %c0_553] : memref<256x128xf32, #tpu.memory_space<vmem>>, vector<16x128xf32>
    %1587 = vector.broadcast %1585 : vector<1x128xf32> to vector<16x128xf32>
    %1588 = arith.mulf %1586, %1587 : vector<16x128xf32>
    %1589 = arith.addf %1578, %1588 : vector<16x128xf32>
    %cst_554 = arith.constant 2.000000e+00 : f32
    %1590 = vector.broadcast %cst_554 : f32 to vector<1x128xf32>
    %1591 = arith.subf %1503, %1590 : vector<1x128xf32>
    %1592 = math.absf %1591 : vector<1x128xf32>
    %cst_555 = arith.constant 1.000000e+00 : f32
    %1593 = vector.broadcast %cst_555 : f32 to vector<1x128xf32>
    %1594 = arith.subf %1593, %1592 : vector<1x128xf32>
    %cst_556 = arith.constant 0.000000e+00 : f32
    %1595 = vector.broadcast %cst_556 : f32 to vector<1x128xf32>
    %1596 = arith.maximumf %1594, %1595 : vector<1x128xf32>
    %c32_557 = arith.constant 32 : index
    %c0_558 = arith.constant 0 : index
    %1597 = vector.load %arg4[%c32_557, %c0_558] : memref<256x128xf32, #tpu.memory_space<vmem>>, vector<16x128xf32>
    %1598 = vector.broadcast %1596 : vector<1x128xf32> to vector<16x128xf32>
    %1599 = arith.mulf %1597, %1598 : vector<16x128xf32>
    %1600 = arith.addf %1589, %1599 : vector<16x128xf32>
    %cst_559 = arith.constant 3.000000e+00 : f32
    %1601 = vector.broadcast %cst_559 : f32 to vector<1x128xf32>
    %1602 = arith.subf %1503, %1601 : vector<1x128xf32>
    %1603 = math.absf %1602 : vector<1x128xf32>
    %cst_560 = arith.constant 1.000000e+00 : f32
    %1604 = vector.broadcast %cst_560 : f32 to vector<1x128xf32>
    %1605 = arith.subf %1604, %1603 : vector<1x128xf32>
    %cst_561 = arith.constant 0.000000e+00 : f32
    %1606 = vector.broadcast %cst_561 : f32 to vector<1x128xf32>
    %1607 = arith.maximumf %1605, %1606 : vector<1x128xf32>
    %c48_562 = arith.constant 48 : index
    %c0_563 = arith.constant 0 : index
    %1608 = vector.load %arg4[%c48_562, %c0_563] : memref<256x128xf32, #tpu.memory_space<vmem>>, vector<16x128xf32>
    %1609 = vector.broadcast %1607 : vector<1x128xf32> to vector<16x128xf32>
    %1610 = arith.mulf %1608, %1609 : vector<16x128xf32>
    %1611 = arith.addf %1600, %1610 : vector<16x128xf32>
    %cst_564 = arith.constant 4.000000e+00 : f32
    %1612 = vector.broadcast %cst_564 : f32 to vector<1x128xf32>
    %1613 = arith.subf %1503, %1612 : vector<1x128xf32>
    %1614 = math.absf %1613 : vector<1x128xf32>
    %cst_565 = arith.constant 1.000000e+00 : f32
    %1615 = vector.broadcast %cst_565 : f32 to vector<1x128xf32>
    %1616 = arith.subf %1615, %1614 : vector<1x128xf32>
    %cst_566 = arith.constant 0.000000e+00 : f32
    %1617 = vector.broadcast %cst_566 : f32 to vector<1x128xf32>
    %1618 = arith.maximumf %1616, %1617 : vector<1x128xf32>
    %c64_567 = arith.constant 64 : index
    %c0_568 = arith.constant 0 : index
    %1619 = vector.load %arg4[%c64_567, %c0_568] : memref<256x128xf32, #tpu.memory_space<vmem>>, vector<16x128xf32>
    %1620 = vector.broadcast %1618 : vector<1x128xf32> to vector<16x128xf32>
    %1621 = arith.mulf %1619, %1620 : vector<16x128xf32>
    %1622 = arith.addf %1611, %1621 : vector<16x128xf32>
    %cst_569 = arith.constant 5.000000e+00 : f32
    %1623 = vector.broadcast %cst_569 : f32 to vector<1x128xf32>
    %1624 = arith.subf %1503, %1623 : vector<1x128xf32>
    %1625 = math.absf %1624 : vector<1x128xf32>
    %cst_570 = arith.constant 1.000000e+00 : f32
    %1626 = vector.broadcast %cst_570 : f32 to vector<1x128xf32>
    %1627 = arith.subf %1626, %1625 : vector<1x128xf32>
    %cst_571 = arith.constant 0.000000e+00 : f32
    %1628 = vector.broadcast %cst_571 : f32 to vector<1x128xf32>
    %1629 = arith.maximumf %1627, %1628 : vector<1x128xf32>
    %c80_572 = arith.constant 80 : index
    %c0_573 = arith.constant 0 : index
    %1630 = vector.load %arg4[%c80_572, %c0_573] : memref<256x128xf32, #tpu.memory_space<vmem>>, vector<16x128xf32>
    %1631 = vector.broadcast %1629 : vector<1x128xf32> to vector<16x128xf32>
    %1632 = arith.mulf %1630, %1631 : vector<16x128xf32>
    %1633 = arith.addf %1622, %1632 : vector<16x128xf32>
    %cst_574 = arith.constant 6.000000e+00 : f32
    %1634 = vector.broadcast %cst_574 : f32 to vector<1x128xf32>
    %1635 = arith.subf %1503, %1634 : vector<1x128xf32>
    %1636 = math.absf %1635 : vector<1x128xf32>
    %cst_575 = arith.constant 1.000000e+00 : f32
    %1637 = vector.broadcast %cst_575 : f32 to vector<1x128xf32>
    %1638 = arith.subf %1637, %1636 : vector<1x128xf32>
    %cst_576 = arith.constant 0.000000e+00 : f32
    %1639 = vector.broadcast %cst_576 : f32 to vector<1x128xf32>
    %1640 = arith.maximumf %1638, %1639 : vector<1x128xf32>
    %c96_577 = arith.constant 96 : index
    %c0_578 = arith.constant 0 : index
    %1641 = vector.load %arg4[%c96_577, %c0_578] : memref<256x128xf32, #tpu.memory_space<vmem>>, vector<16x128xf32>
    %1642 = vector.broadcast %1640 : vector<1x128xf32> to vector<16x128xf32>
    %1643 = arith.mulf %1641, %1642 : vector<16x128xf32>
    %1644 = arith.addf %1633, %1643 : vector<16x128xf32>
    %cst_579 = arith.constant 7.000000e+00 : f32
    %1645 = vector.broadcast %cst_579 : f32 to vector<1x128xf32>
    %1646 = arith.subf %1503, %1645 : vector<1x128xf32>
    %1647 = math.absf %1646 : vector<1x128xf32>
    %cst_580 = arith.constant 1.000000e+00 : f32
    %1648 = vector.broadcast %cst_580 : f32 to vector<1x128xf32>
    %1649 = arith.subf %1648, %1647 : vector<1x128xf32>
    %cst_581 = arith.constant 0.000000e+00 : f32
    %1650 = vector.broadcast %cst_581 : f32 to vector<1x128xf32>
    %1651 = arith.maximumf %1649, %1650 : vector<1x128xf32>
    %c112_582 = arith.constant 112 : index
    %c0_583 = arith.constant 0 : index
    %1652 = vector.load %arg4[%c112_582, %c0_583] : memref<256x128xf32, #tpu.memory_space<vmem>>, vector<16x128xf32>
    %1653 = vector.broadcast %1651 : vector<1x128xf32> to vector<16x128xf32>
    %1654 = arith.mulf %1652, %1653 : vector<16x128xf32>
    %1655 = arith.addf %1644, %1654 : vector<16x128xf32>
    %cst_584 = arith.constant 8.000000e+00 : f32
    %1656 = vector.broadcast %cst_584 : f32 to vector<1x128xf32>
    %1657 = arith.subf %1503, %1656 : vector<1x128xf32>
    %1658 = math.absf %1657 : vector<1x128xf32>
    %cst_585 = arith.constant 1.000000e+00 : f32
    %1659 = vector.broadcast %cst_585 : f32 to vector<1x128xf32>
    %1660 = arith.subf %1659, %1658 : vector<1x128xf32>
    %cst_586 = arith.constant 0.000000e+00 : f32
    %1661 = vector.broadcast %cst_586 : f32 to vector<1x128xf32>
    %1662 = arith.maximumf %1660, %1661 : vector<1x128xf32>
    %c128_587 = arith.constant 128 : index
    %c0_588 = arith.constant 0 : index
    %1663 = vector.load %arg4[%c128_587, %c0_588] : memref<256x128xf32, #tpu.memory_space<vmem>>, vector<16x128xf32>
    %1664 = vector.broadcast %1662 : vector<1x128xf32> to vector<16x128xf32>
    %1665 = arith.mulf %1663, %1664 : vector<16x128xf32>
    %1666 = arith.addf %1655, %1665 : vector<16x128xf32>
    %cst_589 = arith.constant 9.000000e+00 : f32
    %1667 = vector.broadcast %cst_589 : f32 to vector<1x128xf32>
    %1668 = arith.subf %1503, %1667 : vector<1x128xf32>
    %1669 = math.absf %1668 : vector<1x128xf32>
    %cst_590 = arith.constant 1.000000e+00 : f32
    %1670 = vector.broadcast %cst_590 : f32 to vector<1x128xf32>
    %1671 = arith.subf %1670, %1669 : vector<1x128xf32>
    %cst_591 = arith.constant 0.000000e+00 : f32
    %1672 = vector.broadcast %cst_591 : f32 to vector<1x128xf32>
    %1673 = arith.maximumf %1671, %1672 : vector<1x128xf32>
    %c144_592 = arith.constant 144 : index
    %c0_593 = arith.constant 0 : index
    %1674 = vector.load %arg4[%c144_592, %c0_593] : memref<256x128xf32, #tpu.memory_space<vmem>>, vector<16x128xf32>
    %1675 = vector.broadcast %1673 : vector<1x128xf32> to vector<16x128xf32>
    %1676 = arith.mulf %1674, %1675 : vector<16x128xf32>
    %1677 = arith.addf %1666, %1676 : vector<16x128xf32>
    %cst_594 = arith.constant 1.000000e+01 : f32
    %1678 = vector.broadcast %cst_594 : f32 to vector<1x128xf32>
    %1679 = arith.subf %1503, %1678 : vector<1x128xf32>
    %1680 = math.absf %1679 : vector<1x128xf32>
    %cst_595 = arith.constant 1.000000e+00 : f32
    %1681 = vector.broadcast %cst_595 : f32 to vector<1x128xf32>
    %1682 = arith.subf %1681, %1680 : vector<1x128xf32>
    %cst_596 = arith.constant 0.000000e+00 : f32
    %1683 = vector.broadcast %cst_596 : f32 to vector<1x128xf32>
    %1684 = arith.maximumf %1682, %1683 : vector<1x128xf32>
    %c160_597 = arith.constant 160 : index
    %c0_598 = arith.constant 0 : index
    %1685 = vector.load %arg4[%c160_597, %c0_598] : memref<256x128xf32, #tpu.memory_space<vmem>>, vector<16x128xf32>
    %1686 = vector.broadcast %1684 : vector<1x128xf32> to vector<16x128xf32>
    %1687 = arith.mulf %1685, %1686 : vector<16x128xf32>
    %1688 = arith.addf %1677, %1687 : vector<16x128xf32>
    %cst_599 = arith.constant 1.100000e+01 : f32
    %1689 = vector.broadcast %cst_599 : f32 to vector<1x128xf32>
    %1690 = arith.subf %1503, %1689 : vector<1x128xf32>
    %1691 = math.absf %1690 : vector<1x128xf32>
    %cst_600 = arith.constant 1.000000e+00 : f32
    %1692 = vector.broadcast %cst_600 : f32 to vector<1x128xf32>
    %1693 = arith.subf %1692, %1691 : vector<1x128xf32>
    %cst_601 = arith.constant 0.000000e+00 : f32
    %1694 = vector.broadcast %cst_601 : f32 to vector<1x128xf32>
    %1695 = arith.maximumf %1693, %1694 : vector<1x128xf32>
    %c176_602 = arith.constant 176 : index
    %c0_603 = arith.constant 0 : index
    %1696 = vector.load %arg4[%c176_602, %c0_603] : memref<256x128xf32, #tpu.memory_space<vmem>>, vector<16x128xf32>
    %1697 = vector.broadcast %1695 : vector<1x128xf32> to vector<16x128xf32>
    %1698 = arith.mulf %1696, %1697 : vector<16x128xf32>
    %1699 = arith.addf %1688, %1698 : vector<16x128xf32>
    %cst_604 = arith.constant 1.200000e+01 : f32
    %1700 = vector.broadcast %cst_604 : f32 to vector<1x128xf32>
    %1701 = arith.subf %1503, %1700 : vector<1x128xf32>
    %1702 = math.absf %1701 : vector<1x128xf32>
    %cst_605 = arith.constant 1.000000e+00 : f32
    %1703 = vector.broadcast %cst_605 : f32 to vector<1x128xf32>
    %1704 = arith.subf %1703, %1702 : vector<1x128xf32>
    %cst_606 = arith.constant 0.000000e+00 : f32
    %1705 = vector.broadcast %cst_606 : f32 to vector<1x128xf32>
    %1706 = arith.maximumf %1704, %1705 : vector<1x128xf32>
    %c192_607 = arith.constant 192 : index
    %c0_608 = arith.constant 0 : index
    %1707 = vector.load %arg4[%c192_607, %c0_608] : memref<256x128xf32, #tpu.memory_space<vmem>>, vector<16x128xf32>
    %1708 = vector.broadcast %1706 : vector<1x128xf32> to vector<16x128xf32>
    %1709 = arith.mulf %1707, %1708 : vector<16x128xf32>
    %1710 = arith.addf %1699, %1709 : vector<16x128xf32>
    %cst_609 = arith.constant 1.300000e+01 : f32
    %1711 = vector.broadcast %cst_609 : f32 to vector<1x128xf32>
    %1712 = arith.subf %1503, %1711 : vector<1x128xf32>
    %1713 = math.absf %1712 : vector<1x128xf32>
    %cst_610 = arith.constant 1.000000e+00 : f32
    %1714 = vector.broadcast %cst_610 : f32 to vector<1x128xf32>
    %1715 = arith.subf %1714, %1713 : vector<1x128xf32>
    %cst_611 = arith.constant 0.000000e+00 : f32
    %1716 = vector.broadcast %cst_611 : f32 to vector<1x128xf32>
    %1717 = arith.maximumf %1715, %1716 : vector<1x128xf32>
    %c208_612 = arith.constant 208 : index
    %c0_613 = arith.constant 0 : index
    %1718 = vector.load %arg4[%c208_612, %c0_613] : memref<256x128xf32, #tpu.memory_space<vmem>>, vector<16x128xf32>
    %1719 = vector.broadcast %1717 : vector<1x128xf32> to vector<16x128xf32>
    %1720 = arith.mulf %1718, %1719 : vector<16x128xf32>
    %1721 = arith.addf %1710, %1720 : vector<16x128xf32>
    %cst_614 = arith.constant 1.400000e+01 : f32
    %1722 = vector.broadcast %cst_614 : f32 to vector<1x128xf32>
    %1723 = arith.subf %1503, %1722 : vector<1x128xf32>
    %1724 = math.absf %1723 : vector<1x128xf32>
    %cst_615 = arith.constant 1.000000e+00 : f32
    %1725 = vector.broadcast %cst_615 : f32 to vector<1x128xf32>
    %1726 = arith.subf %1725, %1724 : vector<1x128xf32>
    %cst_616 = arith.constant 0.000000e+00 : f32
    %1727 = vector.broadcast %cst_616 : f32 to vector<1x128xf32>
    %1728 = arith.maximumf %1726, %1727 : vector<1x128xf32>
    %c224_617 = arith.constant 224 : index
    %c0_618 = arith.constant 0 : index
    %1729 = vector.load %arg4[%c224_617, %c0_618] : memref<256x128xf32, #tpu.memory_space<vmem>>, vector<16x128xf32>
    %1730 = vector.broadcast %1728 : vector<1x128xf32> to vector<16x128xf32>
    %1731 = arith.mulf %1729, %1730 : vector<16x128xf32>
    %1732 = arith.addf %1721, %1731 : vector<16x128xf32>
    %cst_619 = arith.constant 1.500000e+01 : f32
    %1733 = vector.broadcast %cst_619 : f32 to vector<1x128xf32>
    %1734 = arith.subf %1503, %1733 : vector<1x128xf32>
    %1735 = math.absf %1734 : vector<1x128xf32>
    %cst_620 = arith.constant 1.000000e+00 : f32
    %1736 = vector.broadcast %cst_620 : f32 to vector<1x128xf32>
    %1737 = arith.subf %1736, %1735 : vector<1x128xf32>
    %cst_621 = arith.constant 0.000000e+00 : f32
    %1738 = vector.broadcast %cst_621 : f32 to vector<1x128xf32>
    %1739 = arith.maximumf %1737, %1738 : vector<1x128xf32>
    %c240_622 = arith.constant 240 : index
    %c0_623 = arith.constant 0 : index
    %1740 = vector.load %arg4[%c240_622, %c0_623] : memref<256x128xf32, #tpu.memory_space<vmem>>, vector<16x128xf32>
    %1741 = vector.broadcast %1739 : vector<1x128xf32> to vector<16x128xf32>
    %1742 = arith.mulf %1740, %1741 : vector<16x128xf32>
    %1743 = arith.addf %1732, %1742 : vector<16x128xf32>
    %1744 = vector.extract_strided_slice %1743 {offsets = [0, 0], sizes = [1, 128], strides = [1, 1]} : vector<16x128xf32> to vector<1x128xf32>
    %1745 = vector.extract_strided_slice %1743 {offsets = [1, 0], sizes = [1, 128], strides = [1, 1]} : vector<16x128xf32> to vector<1x128xf32>
    %1746 = vector.extract_strided_slice %1743 {offsets = [2, 0], sizes = [1, 128], strides = [1, 1]} : vector<16x128xf32> to vector<1x128xf32>
    %1747 = vector.extract_strided_slice %1743 {offsets = [3, 0], sizes = [1, 128], strides = [1, 1]} : vector<16x128xf32> to vector<1x128xf32>
    %1748 = vector.extract_strided_slice %1743 {offsets = [4, 0], sizes = [1, 128], strides = [1, 1]} : vector<16x128xf32> to vector<1x128xf32>
    %1749 = vector.extract_strided_slice %1743 {offsets = [5, 0], sizes = [1, 128], strides = [1, 1]} : vector<16x128xf32> to vector<1x128xf32>
    %1750 = vector.extract_strided_slice %1743 {offsets = [6, 0], sizes = [1, 128], strides = [1, 1]} : vector<16x128xf32> to vector<1x128xf32>
    %1751 = vector.extract_strided_slice %1743 {offsets = [7, 0], sizes = [1, 128], strides = [1, 1]} : vector<16x128xf32> to vector<1x128xf32>
    %1752 = vector.extract_strided_slice %1743 {offsets = [8, 0], sizes = [1, 128], strides = [1, 1]} : vector<16x128xf32> to vector<1x128xf32>
    %1753 = vector.extract_strided_slice %1743 {offsets = [9, 0], sizes = [1, 128], strides = [1, 1]} : vector<16x128xf32> to vector<1x128xf32>
    %1754 = vector.extract_strided_slice %1743 {offsets = [10, 0], sizes = [1, 128], strides = [1, 1]} : vector<16x128xf32> to vector<1x128xf32>
    %1755 = vector.extract_strided_slice %1743 {offsets = [11, 0], sizes = [1, 128], strides = [1, 1]} : vector<16x128xf32> to vector<1x128xf32>
    %1756 = arith.mulf %1744, %1481 : vector<1x128xf32>
    %1757 = arith.mulf %1745, %1482 : vector<1x128xf32>
    %1758 = arith.addf %1756, %1757 : vector<1x128xf32>
    %1759 = arith.mulf %1746, %1483 : vector<1x128xf32>
    %1760 = arith.addf %1758, %1759 : vector<1x128xf32>
    %1761 = arith.addf %1760, %1747 : vector<1x128xf32>
    %1762 = arith.subf %1761, %0 : vector<1x128xf32>
    %1763 = arith.mulf %1748, %1481 : vector<1x128xf32>
    %1764 = arith.mulf %1749, %1482 : vector<1x128xf32>
    %1765 = arith.addf %1763, %1764 : vector<1x128xf32>
    %1766 = arith.mulf %1750, %1483 : vector<1x128xf32>
    %1767 = arith.addf %1765, %1766 : vector<1x128xf32>
    %1768 = arith.addf %1767, %1751 : vector<1x128xf32>
    %1769 = arith.subf %1768, %1 : vector<1x128xf32>
    %1770 = arith.mulf %1752, %1481 : vector<1x128xf32>
    %1771 = arith.mulf %1753, %1482 : vector<1x128xf32>
    %1772 = arith.addf %1770, %1771 : vector<1x128xf32>
    %1773 = arith.mulf %1754, %1483 : vector<1x128xf32>
    %1774 = arith.addf %1772, %1773 : vector<1x128xf32>
    %1775 = arith.addf %1774, %1755 : vector<1x128xf32>
    %1776 = arith.subf %1775, %2 : vector<1x128xf32>
    %1777 = arith.mulf %1749, %1754 : vector<1x128xf32>
    %1778 = arith.mulf %1750, %1753 : vector<1x128xf32>
    %1779 = arith.subf %1777, %1778 : vector<1x128xf32>
    %1780 = arith.mulf %1746, %1753 : vector<1x128xf32>
    %1781 = arith.mulf %1745, %1754 : vector<1x128xf32>
    %1782 = arith.subf %1780, %1781 : vector<1x128xf32>
    %1783 = arith.mulf %1745, %1750 : vector<1x128xf32>
    %1784 = arith.mulf %1746, %1749 : vector<1x128xf32>
    %1785 = arith.subf %1783, %1784 : vector<1x128xf32>
    %1786 = arith.mulf %1750, %1752 : vector<1x128xf32>
    %1787 = arith.mulf %1748, %1754 : vector<1x128xf32>
    %1788 = arith.subf %1786, %1787 : vector<1x128xf32>
    %1789 = arith.mulf %1744, %1754 : vector<1x128xf32>
    %1790 = arith.mulf %1746, %1752 : vector<1x128xf32>
    %1791 = arith.subf %1789, %1790 : vector<1x128xf32>
    %1792 = arith.mulf %1746, %1748 : vector<1x128xf32>
    %1793 = arith.mulf %1744, %1750 : vector<1x128xf32>
    %1794 = arith.subf %1792, %1793 : vector<1x128xf32>
    %1795 = arith.mulf %1748, %1753 : vector<1x128xf32>
    %1796 = arith.mulf %1749, %1752 : vector<1x128xf32>
    %1797 = arith.subf %1795, %1796 : vector<1x128xf32>
    %1798 = arith.mulf %1745, %1752 : vector<1x128xf32>
    %1799 = arith.mulf %1744, %1753 : vector<1x128xf32>
    %1800 = arith.subf %1798, %1799 : vector<1x128xf32>
    %1801 = arith.mulf %1744, %1749 : vector<1x128xf32>
    %1802 = arith.mulf %1745, %1748 : vector<1x128xf32>
    %1803 = arith.subf %1801, %1802 : vector<1x128xf32>
    %1804 = arith.mulf %1744, %1779 : vector<1x128xf32>
    %1805 = arith.mulf %1745, %1788 : vector<1x128xf32>
    %1806 = arith.addf %1804, %1805 : vector<1x128xf32>
    %1807 = arith.mulf %1746, %1797 : vector<1x128xf32>
    %1808 = arith.addf %1806, %1807 : vector<1x128xf32>
    %1809 = math.absf %1808 : vector<1x128xf32>
    %cst_624 = arith.constant 9.99999993E-9 : f32
    %1810 = vector.broadcast %cst_624 : f32 to vector<1x128xf32>
    %1811 = arith.cmpf olt, %1809, %1810 : vector<1x128xf32>
    %cst_625 = arith.constant 0.000000e+00 : f32
    %1812 = vector.broadcast %cst_625 : f32 to vector<1x128xf32>
    %1813 = arith.cmpf olt, %1808, %1812 : vector<1x128xf32>
    %cst_626 = arith.constant -9.99999993E-9 : f32
    %cst_627 = arith.constant 9.99999993E-9 : f32
    %1814 = vector.broadcast %cst_626 : f32 to vector<1x128xf32>
    %1815 = vector.broadcast %cst_627 : f32 to vector<1x128xf32>
    %1816 = arith.select %1813, %1814, %1815 : vector<1x128xi1>, vector<1x128xf32>
    %1817 = arith.select %1811, %1816, %1808 : vector<1x128xi1>, vector<1x128xf32>
    %cst_628 = arith.constant 1.000000e+00 : f32
    %1818 = vector.broadcast %cst_628 : f32 to vector<1x128xf32>
    %1819 = arith.divf %1818, %1817 : vector<1x128xf32>
    %1820 = arith.mulf %1779, %1762 : vector<1x128xf32>
    %1821 = arith.mulf %1782, %1769 : vector<1x128xf32>
    %1822 = arith.addf %1820, %1821 : vector<1x128xf32>
    %1823 = arith.mulf %1785, %1776 : vector<1x128xf32>
    %1824 = arith.addf %1822, %1823 : vector<1x128xf32>
    %1825 = arith.mulf %1819, %1824 : vector<1x128xf32>
    %cst_629 = arith.constant -1.000000e+02 : f32
    %cst_630 = arith.constant 1.000000e+02 : f32
    %1826 = vector.broadcast %cst_629 : f32 to vector<1x128xf32>
    %1827 = arith.maximumf %1826, %1825 : vector<1x128xf32>
    %1828 = vector.broadcast %cst_630 : f32 to vector<1x128xf32>
    %1829 = arith.minimumf %1828, %1827 : vector<1x128xf32>
    %1830 = arith.mulf %1788, %1762 : vector<1x128xf32>
    %1831 = arith.mulf %1791, %1769 : vector<1x128xf32>
    %1832 = arith.addf %1830, %1831 : vector<1x128xf32>
    %1833 = arith.mulf %1794, %1776 : vector<1x128xf32>
    %1834 = arith.addf %1832, %1833 : vector<1x128xf32>
    %1835 = arith.mulf %1819, %1834 : vector<1x128xf32>
    %cst_631 = arith.constant -1.000000e+02 : f32
    %cst_632 = arith.constant 1.000000e+02 : f32
    %1836 = vector.broadcast %cst_631 : f32 to vector<1x128xf32>
    %1837 = arith.maximumf %1836, %1835 : vector<1x128xf32>
    %1838 = vector.broadcast %cst_632 : f32 to vector<1x128xf32>
    %1839 = arith.minimumf %1838, %1837 : vector<1x128xf32>
    %1840 = arith.mulf %1797, %1762 : vector<1x128xf32>
    %1841 = arith.mulf %1800, %1769 : vector<1x128xf32>
    %1842 = arith.addf %1840, %1841 : vector<1x128xf32>
    %1843 = arith.mulf %1803, %1776 : vector<1x128xf32>
    %1844 = arith.addf %1842, %1843 : vector<1x128xf32>
    %1845 = arith.mulf %1819, %1844 : vector<1x128xf32>
    %cst_633 = arith.constant -1.000000e+02 : f32
    %cst_634 = arith.constant 1.000000e+02 : f32
    %1846 = vector.broadcast %cst_633 : f32 to vector<1x128xf32>
    %1847 = arith.maximumf %1846, %1845 : vector<1x128xf32>
    %1848 = vector.broadcast %cst_634 : f32 to vector<1x128xf32>
    %1849 = arith.minimumf %1848, %1847 : vector<1x128xf32>
    %1850 = arith.subf %1481, %1829 : vector<1x128xf32>
    %1851 = arith.subf %1482, %1839 : vector<1x128xf32>
    %1852 = arith.subf %1483, %1849 : vector<1x128xf32>
    %cst_635 = arith.constant 0.00169628859 : f32
    %1853 = vector.broadcast %cst_635 : f32 to vector<1x128xf32>
    %1854 = arith.subf %1850, %1853 : vector<1x128xf32>
    %cst_636 = arith.constant 1.05144262 : f32
    %1855 = vector.broadcast %cst_636 : f32 to vector<1x128xf32>
    %1856 = arith.mulf %1854, %1855 : vector<1x128xf32>
    %cst_637 = arith.constant -0.00430172682 : f32
    %1857 = vector.broadcast %cst_637 : f32 to vector<1x128xf32>
    %1858 = arith.subf %1851, %1857 : vector<1x128xf32>
    %cst_638 = arith.constant 1.05144262 : f32
    %1859 = vector.broadcast %cst_638 : f32 to vector<1x128xf32>
    %1860 = arith.mulf %1858, %1859 : vector<1x128xf32>
    %cst_639 = arith.constant -0.00518578291 : f32
    %1861 = vector.broadcast %cst_639 : f32 to vector<1x128xf32>
    %1862 = arith.subf %1852, %1861 : vector<1x128xf32>
    %cst_640 = arith.constant 4.20577049 : f32
    %1863 = vector.broadcast %cst_640 : f32 to vector<1x128xf32>
    %1864 = arith.mulf %1862, %1863 : vector<1x128xf32>
    %cst_641 = arith.constant 1.000000e+00 : f32
    %1865 = vector.broadcast %cst_641 : f32 to vector<1x128xf32>
    %1866 = arith.addf %1856, %1865 : vector<1x128xf32>
    %cst_642 = arith.constant 7.500000e+00 : f32
    %1867 = vector.broadcast %cst_642 : f32 to vector<1x128xf32>
    %1868 = arith.mulf %1866, %1867 : vector<1x128xf32>
    %cst_643 = arith.constant 0.000000e+00 : f32
    %cst_644 = arith.constant 1.500000e+01 : f32
    %1869 = vector.broadcast %cst_643 : f32 to vector<1x128xf32>
    %1870 = arith.maximumf %1869, %1868 : vector<1x128xf32>
    %1871 = vector.broadcast %cst_644 : f32 to vector<1x128xf32>
    %1872 = arith.minimumf %1871, %1870 : vector<1x128xf32>
    %cst_645 = arith.constant 1.000000e+00 : f32
    %1873 = vector.broadcast %cst_645 : f32 to vector<1x128xf32>
    %1874 = arith.addf %1860, %1873 : vector<1x128xf32>
    %cst_646 = arith.constant 7.500000e+00 : f32
    %1875 = vector.broadcast %cst_646 : f32 to vector<1x128xf32>
    %1876 = arith.mulf %1874, %1875 : vector<1x128xf32>
    %cst_647 = arith.constant 0.000000e+00 : f32
    %cst_648 = arith.constant 1.500000e+01 : f32
    %1877 = vector.broadcast %cst_647 : f32 to vector<1x128xf32>
    %1878 = arith.maximumf %1877, %1876 : vector<1x128xf32>
    %1879 = vector.broadcast %cst_648 : f32 to vector<1x128xf32>
    %1880 = arith.minimumf %1879, %1878 : vector<1x128xf32>
    %cst_649 = arith.constant 1.000000e+00 : f32
    %1881 = vector.broadcast %cst_649 : f32 to vector<1x128xf32>
    %1882 = arith.addf %1864, %1881 : vector<1x128xf32>
    %cst_650 = arith.constant 1.500000e+00 : f32
    %1883 = vector.broadcast %cst_650 : f32 to vector<1x128xf32>
    %1884 = arith.mulf %1882, %1883 : vector<1x128xf32>
    %cst_651 = arith.constant 0.000000e+00 : f32
    %cst_652 = arith.constant 3.000000e+00 : f32
    %1885 = vector.broadcast %cst_651 : f32 to vector<1x128xf32>
    %1886 = arith.maximumf %1885, %1884 : vector<1x128xf32>
    %1887 = vector.broadcast %cst_652 : f32 to vector<1x128xf32>
    %1888 = arith.minimumf %1887, %1886 : vector<1x128xf32>
    %1889 = vector.broadcast %1880 : vector<1x128xf32> to vector<16x128xf32>
    %1890 = arith.subf %1889, %4 : vector<16x128xf32>
    %1891 = math.absf %1890 : vector<16x128xf32>
    %cst_653 = arith.constant 1.000000e+00 : f32
    %1892 = vector.broadcast %cst_653 : f32 to vector<16x128xf32>
    %1893 = arith.subf %1892, %1891 : vector<16x128xf32>
    %cst_654 = arith.constant 0.000000e+00 : f32
    %1894 = vector.broadcast %cst_654 : f32 to vector<16x128xf32>
    %1895 = arith.maximumf %1893, %1894 : vector<16x128xf32>
    %cst_655 = arith.constant 0.000000e+00 : f32
    %1896 = vector.broadcast %cst_655 : f32 to vector<1x128xf32>
    %1897 = arith.subf %1888, %1896 : vector<1x128xf32>
    %1898 = math.absf %1897 : vector<1x128xf32>
    %cst_656 = arith.constant 1.000000e+00 : f32
    %1899 = vector.broadcast %cst_656 : f32 to vector<1x128xf32>
    %1900 = arith.subf %1899, %1898 : vector<1x128xf32>
    %cst_657 = arith.constant 0.000000e+00 : f32
    %1901 = vector.broadcast %cst_657 : f32 to vector<1x128xf32>
    %1902 = arith.maximumf %1900, %1901 : vector<1x128xf32>
    %1903 = vector.broadcast %1902 : vector<1x128xf32> to vector<16x128xf32>
    %1904 = arith.mulf %1895, %1903 : vector<16x128xf32>
    %cst_658 = arith.constant 1.000000e+00 : f32
    %1905 = vector.broadcast %cst_658 : f32 to vector<1x128xf32>
    %1906 = arith.subf %1888, %1905 : vector<1x128xf32>
    %1907 = math.absf %1906 : vector<1x128xf32>
    %cst_659 = arith.constant 1.000000e+00 : f32
    %1908 = vector.broadcast %cst_659 : f32 to vector<1x128xf32>
    %1909 = arith.subf %1908, %1907 : vector<1x128xf32>
    %cst_660 = arith.constant 0.000000e+00 : f32
    %1910 = vector.broadcast %cst_660 : f32 to vector<1x128xf32>
    %1911 = arith.maximumf %1909, %1910 : vector<1x128xf32>
    %1912 = vector.broadcast %1911 : vector<1x128xf32> to vector<16x128xf32>
    %1913 = arith.mulf %1895, %1912 : vector<16x128xf32>
    %cst_661 = arith.constant 2.000000e+00 : f32
    %1914 = vector.broadcast %cst_661 : f32 to vector<1x128xf32>
    %1915 = arith.subf %1888, %1914 : vector<1x128xf32>
    %1916 = math.absf %1915 : vector<1x128xf32>
    %cst_662 = arith.constant 1.000000e+00 : f32
    %1917 = vector.broadcast %cst_662 : f32 to vector<1x128xf32>
    %1918 = arith.subf %1917, %1916 : vector<1x128xf32>
    %cst_663 = arith.constant 0.000000e+00 : f32
    %1919 = vector.broadcast %cst_663 : f32 to vector<1x128xf32>
    %1920 = arith.maximumf %1918, %1919 : vector<1x128xf32>
    %1921 = vector.broadcast %1920 : vector<1x128xf32> to vector<16x128xf32>
    %1922 = arith.mulf %1895, %1921 : vector<16x128xf32>
    %cst_664 = arith.constant 3.000000e+00 : f32
    %1923 = vector.broadcast %cst_664 : f32 to vector<1x128xf32>
    %1924 = arith.subf %1888, %1923 : vector<1x128xf32>
    %1925 = math.absf %1924 : vector<1x128xf32>
    %cst_665 = arith.constant 1.000000e+00 : f32
    %1926 = vector.broadcast %cst_665 : f32 to vector<1x128xf32>
    %1927 = arith.subf %1926, %1925 : vector<1x128xf32>
    %cst_666 = arith.constant 0.000000e+00 : f32
    %1928 = vector.broadcast %cst_666 : f32 to vector<1x128xf32>
    %1929 = arith.maximumf %1927, %1928 : vector<1x128xf32>
    %1930 = vector.broadcast %1929 : vector<1x128xf32> to vector<16x128xf32>
    %1931 = arith.mulf %1895, %1930 : vector<16x128xf32>
    %1932 = tpu.concatenate %1904, %1913, %1922, %1931 in 0 : vector<16x128xf32>, vector<16x128xf32>, vector<16x128xf32>, vector<16x128xf32> -> vector<64x128xf32>
    %c0_667 = arith.constant 0 : index
    %c0_668 = arith.constant 0 : index
    %1933 = vector.load %arg2[%c0_667, %c0_668] : memref<256x64xf32, #tpu.memory_space<vmem>>, vector<256x64xf32>
    %cst_669 = arith.constant dense<0.000000e+00> : vector<256x128xf32>
    %1934 = tpu.matmul %1933, %1932, %cst_669 {dimension_numbers = #tpu.dot_dimension_numbers<[1], [0], [0], [1], [0, 0, 1, 1], [], []>} : vector<256x64xf32>, vector<64x128xf32>, vector<256x128xf32> -> vector<256x128xf32>
    %c0_670 = arith.constant 0 : index
    %c0_671 = arith.constant 0 : index
    %1935 = vector.load %arg4[%c0_670, %c0_671] : memref<256x128xf32, #tpu.memory_space<vmem>>, vector<256x128xf32>
    tpu.vector_store %arg4[%c0_670, %c0_671], %1934 {strides = array<i32>} : memref<256x128xf32, #tpu.memory_space<vmem>>, vector<256x128xf32>,
    %cst_672 = arith.constant 0.000000e+00 : f32
    %1936 = vector.broadcast %cst_672 : f32 to vector<16x128xf32>
    %cst_673 = arith.constant 0.000000e+00 : f32
    %1937 = vector.broadcast %cst_673 : f32 to vector<1x128xf32>
    %1938 = arith.subf %1872, %1937 : vector<1x128xf32>
    %1939 = math.absf %1938 : vector<1x128xf32>
    %cst_674 = arith.constant 1.000000e+00 : f32
    %1940 = vector.broadcast %cst_674 : f32 to vector<1x128xf32>
    %1941 = arith.subf %1940, %1939 : vector<1x128xf32>
    %cst_675 = arith.constant 0.000000e+00 : f32
    %1942 = vector.broadcast %cst_675 : f32 to vector<1x128xf32>
    %1943 = arith.maximumf %1941, %1942 : vector<1x128xf32>
    %c0_676 = arith.constant 0 : index
    %c0_677 = arith.constant 0 : index
    %1944 = vector.load %arg4[%c0_676, %c0_677] : memref<256x128xf32, #tpu.memory_space<vmem>>, vector<16x128xf32>
    %1945 = vector.broadcast %1943 : vector<1x128xf32> to vector<16x128xf32>
    %1946 = arith.mulf %1944, %1945 : vector<16x128xf32>
    %1947 = arith.addf %1936, %1946 : vector<16x128xf32>
    %cst_678 = arith.constant 1.000000e+00 : f32
    %1948 = vector.broadcast %cst_678 : f32 to vector<1x128xf32>
    %1949 = arith.subf %1872, %1948 : vector<1x128xf32>
    %1950 = math.absf %1949 : vector<1x128xf32>
    %cst_679 = arith.constant 1.000000e+00 : f32
    %1951 = vector.broadcast %cst_679 : f32 to vector<1x128xf32>
    %1952 = arith.subf %1951, %1950 : vector<1x128xf32>
    %cst_680 = arith.constant 0.000000e+00 : f32
    %1953 = vector.broadcast %cst_680 : f32 to vector<1x128xf32>
    %1954 = arith.maximumf %1952, %1953 : vector<1x128xf32>
    %c16_681 = arith.constant 16 : index
    %c0_682 = arith.constant 0 : index
    %1955 = vector.load %arg4[%c16_681, %c0_682] : memref<256x128xf32, #tpu.memory_space<vmem>>, vector<16x128xf32>
    %1956 = vector.broadcast %1954 : vector<1x128xf32> to vector<16x128xf32>
    %1957 = arith.mulf %1955, %1956 : vector<16x128xf32>
    %1958 = arith.addf %1947, %1957 : vector<16x128xf32>
    %cst_683 = arith.constant 2.000000e+00 : f32
    %1959 = vector.broadcast %cst_683 : f32 to vector<1x128xf32>
    %1960 = arith.subf %1872, %1959 : vector<1x128xf32>
    %1961 = math.absf %1960 : vector<1x128xf32>
    %cst_684 = arith.constant 1.000000e+00 : f32
    %1962 = vector.broadcast %cst_684 : f32 to vector<1x128xf32>
    %1963 = arith.subf %1962, %1961 : vector<1x128xf32>
    %cst_685 = arith.constant 0.000000e+00 : f32
    %1964 = vector.broadcast %cst_685 : f32 to vector<1x128xf32>
    %1965 = arith.maximumf %1963, %1964 : vector<1x128xf32>
    %c32_686 = arith.constant 32 : index
    %c0_687 = arith.constant 0 : index
    %1966 = vector.load %arg4[%c32_686, %c0_687] : memref<256x128xf32, #tpu.memory_space<vmem>>, vector<16x128xf32>
    %1967 = vector.broadcast %1965 : vector<1x128xf32> to vector<16x128xf32>
    %1968 = arith.mulf %1966, %1967 : vector<16x128xf32>
    %1969 = arith.addf %1958, %1968 : vector<16x128xf32>
    %cst_688 = arith.constant 3.000000e+00 : f32
    %1970 = vector.broadcast %cst_688 : f32 to vector<1x128xf32>
    %1971 = arith.subf %1872, %1970 : vector<1x128xf32>
    %1972 = math.absf %1971 : vector<1x128xf32>
    %cst_689 = arith.constant 1.000000e+00 : f32
    %1973 = vector.broadcast %cst_689 : f32 to vector<1x128xf32>
    %1974 = arith.subf %1973, %1972 : vector<1x128xf32>
    %cst_690 = arith.constant 0.000000e+00 : f32
    %1975 = vector.broadcast %cst_690 : f32 to vector<1x128xf32>
    %1976 = arith.maximumf %1974, %1975 : vector<1x128xf32>
    %c48_691 = arith.constant 48 : index
    %c0_692 = arith.constant 0 : index
    %1977 = vector.load %arg4[%c48_691, %c0_692] : memref<256x128xf32, #tpu.memory_space<vmem>>, vector<16x128xf32>
    %1978 = vector.broadcast %1976 : vector<1x128xf32> to vector<16x128xf32>
    %1979 = arith.mulf %1977, %1978 : vector<16x128xf32>
    %1980 = arith.addf %1969, %1979 : vector<16x128xf32>
    %cst_693 = arith.constant 4.000000e+00 : f32
    %1981 = vector.broadcast %cst_693 : f32 to vector<1x128xf32>
    %1982 = arith.subf %1872, %1981 : vector<1x128xf32>
    %1983 = math.absf %1982 : vector<1x128xf32>
    %cst_694 = arith.constant 1.000000e+00 : f32
    %1984 = vector.broadcast %cst_694 : f32 to vector<1x128xf32>
    %1985 = arith.subf %1984, %1983 : vector<1x128xf32>
    %cst_695 = arith.constant 0.000000e+00 : f32
    %1986 = vector.broadcast %cst_695 : f32 to vector<1x128xf32>
    %1987 = arith.maximumf %1985, %1986 : vector<1x128xf32>
    %c64_696 = arith.constant 64 : index
    %c0_697 = arith.constant 0 : index
    %1988 = vector.load %arg4[%c64_696, %c0_697] : memref<256x128xf32, #tpu.memory_space<vmem>>, vector<16x128xf32>
    %1989 = vector.broadcast %1987 : vector<1x128xf32> to vector<16x128xf32>
    %1990 = arith.mulf %1988, %1989 : vector<16x128xf32>
    %1991 = arith.addf %1980, %1990 : vector<16x128xf32>
    %cst_698 = arith.constant 5.000000e+00 : f32
    %1992 = vector.broadcast %cst_698 : f32 to vector<1x128xf32>
    %1993 = arith.subf %1872, %1992 : vector<1x128xf32>
    %1994 = math.absf %1993 : vector<1x128xf32>
    %cst_699 = arith.constant 1.000000e+00 : f32
    %1995 = vector.broadcast %cst_699 : f32 to vector<1x128xf32>
    %1996 = arith.subf %1995, %1994 : vector<1x128xf32>
    %cst_700 = arith.constant 0.000000e+00 : f32
    %1997 = vector.broadcast %cst_700 : f32 to vector<1x128xf32>
    %1998 = arith.maximumf %1996, %1997 : vector<1x128xf32>
    %c80_701 = arith.constant 80 : index
    %c0_702 = arith.constant 0 : index
    %1999 = vector.load %arg4[%c80_701, %c0_702] : memref<256x128xf32, #tpu.memory_space<vmem>>, vector<16x128xf32>
    %2000 = vector.broadcast %1998 : vector<1x128xf32> to vector<16x128xf32>
    %2001 = arith.mulf %1999, %2000 : vector<16x128xf32>
    %2002 = arith.addf %1991, %2001 : vector<16x128xf32>
    %cst_703 = arith.constant 6.000000e+00 : f32
    %2003 = vector.broadcast %cst_703 : f32 to vector<1x128xf32>
    %2004 = arith.subf %1872, %2003 : vector<1x128xf32>
    %2005 = math.absf %2004 : vector<1x128xf32>
    %cst_704 = arith.constant 1.000000e+00 : f32
    %2006 = vector.broadcast %cst_704 : f32 to vector<1x128xf32>
    %2007 = arith.subf %2006, %2005 : vector<1x128xf32>
    %cst_705 = arith.constant 0.000000e+00 : f32
    %2008 = vector.broadcast %cst_705 : f32 to vector<1x128xf32>
    %2009 = arith.maximumf %2007, %2008 : vector<1x128xf32>
    %c96_706 = arith.constant 96 : index
    %c0_707 = arith.constant 0 : index
    %2010 = vector.load %arg4[%c96_706, %c0_707] : memref<256x128xf32, #tpu.memory_space<vmem>>, vector<16x128xf32>
    %2011 = vector.broadcast %2009 : vector<1x128xf32> to vector<16x128xf32>
    %2012 = arith.mulf %2010, %2011 : vector<16x128xf32>
    %2013 = arith.addf %2002, %2012 : vector<16x128xf32>
    %cst_708 = arith.constant 7.000000e+00 : f32
    %2014 = vector.broadcast %cst_708 : f32 to vector<1x128xf32>
    %2015 = arith.subf %1872, %2014 : vector<1x128xf32>
    %2016 = math.absf %2015 : vector<1x128xf32>
    %cst_709 = arith.constant 1.000000e+00 : f32
    %2017 = vector.broadcast %cst_709 : f32 to vector<1x128xf32>
    %2018 = arith.subf %2017, %2016 : vector<1x128xf32>
    %cst_710 = arith.constant 0.000000e+00 : f32
    %2019 = vector.broadcast %cst_710 : f32 to vector<1x128xf32>
    %2020 = arith.maximumf %2018, %2019 : vector<1x128xf32>
    %c112_711 = arith.constant 112 : index
    %c0_712 = arith.constant 0 : index
    %2021 = vector.load %arg4[%c112_711, %c0_712] : memref<256x128xf32, #tpu.memory_space<vmem>>, vector<16x128xf32>
    %2022 = vector.broadcast %2020 : vector<1x128xf32> to vector<16x128xf32>
    %2023 = arith.mulf %2021, %2022 : vector<16x128xf32>
    %2024 = arith.addf %2013, %2023 : vector<16x128xf32>
    %cst_713 = arith.constant 8.000000e+00 : f32
    %2025 = vector.broadcast %cst_713 : f32 to vector<1x128xf32>
    %2026 = arith.subf %1872, %2025 : vector<1x128xf32>
    %2027 = math.absf %2026 : vector<1x128xf32>
    %cst_714 = arith.constant 1.000000e+00 : f32
    %2028 = vector.broadcast %cst_714 : f32 to vector<1x128xf32>
    %2029 = arith.subf %2028, %2027 : vector<1x128xf32>
    %cst_715 = arith.constant 0.000000e+00 : f32
    %2030 = vector.broadcast %cst_715 : f32 to vector<1x128xf32>
    %2031 = arith.maximumf %2029, %2030 : vector<1x128xf32>
    %c128_716 = arith.constant 128 : index
    %c0_717 = arith.constant 0 : index
    %2032 = vector.load %arg4[%c128_716, %c0_717] : memref<256x128xf32, #tpu.memory_space<vmem>>, vector<16x128xf32>
    %2033 = vector.broadcast %2031 : vector<1x128xf32> to vector<16x128xf32>
    %2034 = arith.mulf %2032, %2033 : vector<16x128xf32>
    %2035 = arith.addf %2024, %2034 : vector<16x128xf32>
    %cst_718 = arith.constant 9.000000e+00 : f32
    %2036 = vector.broadcast %cst_718 : f32 to vector<1x128xf32>
    %2037 = arith.subf %1872, %2036 : vector<1x128xf32>
    %2038 = math.absf %2037 : vector<1x128xf32>
    %cst_719 = arith.constant 1.000000e+00 : f32
    %2039 = vector.broadcast %cst_719 : f32 to vector<1x128xf32>
    %2040 = arith.subf %2039, %2038 : vector<1x128xf32>
    %cst_720 = arith.constant 0.000000e+00 : f32
    %2041 = vector.broadcast %cst_720 : f32 to vector<1x128xf32>
    %2042 = arith.maximumf %2040, %2041 : vector<1x128xf32>
    %c144_721 = arith.constant 144 : index
    %c0_722 = arith.constant 0 : index
    %2043 = vector.load %arg4[%c144_721, %c0_722] : memref<256x128xf32, #tpu.memory_space<vmem>>, vector<16x128xf32>
    %2044 = vector.broadcast %2042 : vector<1x128xf32> to vector<16x128xf32>
    %2045 = arith.mulf %2043, %2044 : vector<16x128xf32>
    %2046 = arith.addf %2035, %2045 : vector<16x128xf32>
    %cst_723 = arith.constant 1.000000e+01 : f32
    %2047 = vector.broadcast %cst_723 : f32 to vector<1x128xf32>
    %2048 = arith.subf %1872, %2047 : vector<1x128xf32>
    %2049 = math.absf %2048 : vector<1x128xf32>
    %cst_724 = arith.constant 1.000000e+00 : f32
    %2050 = vector.broadcast %cst_724 : f32 to vector<1x128xf32>
    %2051 = arith.subf %2050, %2049 : vector<1x128xf32>
    %cst_725 = arith.constant 0.000000e+00 : f32
    %2052 = vector.broadcast %cst_725 : f32 to vector<1x128xf32>
    %2053 = arith.maximumf %2051, %2052 : vector<1x128xf32>
    %c160_726 = arith.constant 160 : index
    %c0_727 = arith.constant 0 : index
    %2054 = vector.load %arg4[%c160_726, %c0_727] : memref<256x128xf32, #tpu.memory_space<vmem>>, vector<16x128xf32>
    %2055 = vector.broadcast %2053 : vector<1x128xf32> to vector<16x128xf32>
    %2056 = arith.mulf %2054, %2055 : vector<16x128xf32>
    %2057 = arith.addf %2046, %2056 : vector<16x128xf32>
    %cst_728 = arith.constant 1.100000e+01 : f32
    %2058 = vector.broadcast %cst_728 : f32 to vector<1x128xf32>
    %2059 = arith.subf %1872, %2058 : vector<1x128xf32>
    %2060 = math.absf %2059 : vector<1x128xf32>
    %cst_729 = arith.constant 1.000000e+00 : f32
    %2061 = vector.broadcast %cst_729 : f32 to vector<1x128xf32>
    %2062 = arith.subf %2061, %2060 : vector<1x128xf32>
    %cst_730 = arith.constant 0.000000e+00 : f32
    %2063 = vector.broadcast %cst_730 : f32 to vector<1x128xf32>
    %2064 = arith.maximumf %2062, %2063 : vector<1x128xf32>
    %c176_731 = arith.constant 176 : index
    %c0_732 = arith.constant 0 : index
    %2065 = vector.load %arg4[%c176_731, %c0_732] : memref<256x128xf32, #tpu.memory_space<vmem>>, vector<16x128xf32>
    %2066 = vector.broadcast %2064 : vector<1x128xf32> to vector<16x128xf32>
    %2067 = arith.mulf %2065, %2066 : vector<16x128xf32>
    %2068 = arith.addf %2057, %2067 : vector<16x128xf32>
    %cst_733 = arith.constant 1.200000e+01 : f32
    %2069 = vector.broadcast %cst_733 : f32 to vector<1x128xf32>
    %2070 = arith.subf %1872, %2069 : vector<1x128xf32>
    %2071 = math.absf %2070 : vector<1x128xf32>
    %cst_734 = arith.constant 1.000000e+00 : f32
    %2072 = vector.broadcast %cst_734 : f32 to vector<1x128xf32>
    %2073 = arith.subf %2072, %2071 : vector<1x128xf32>
    %cst_735 = arith.constant 0.000000e+00 : f32
    %2074 = vector.broadcast %cst_735 : f32 to vector<1x128xf32>
    %2075 = arith.maximumf %2073, %2074 : vector<1x128xf32>
    %c192_736 = arith.constant 192 : index
    %c0_737 = arith.constant 0 : index
    %2076 = vector.load %arg4[%c192_736, %c0_737] : memref<256x128xf32, #tpu.memory_space<vmem>>, vector<16x128xf32>
    %2077 = vector.broadcast %2075 : vector<1x128xf32> to vector<16x128xf32>
    %2078 = arith.mulf %2076, %2077 : vector<16x128xf32>
    %2079 = arith.addf %2068, %2078 : vector<16x128xf32>
    %cst_738 = arith.constant 1.300000e+01 : f32
    %2080 = vector.broadcast %cst_738 : f32 to vector<1x128xf32>
    %2081 = arith.subf %1872, %2080 : vector<1x128xf32>
    %2082 = math.absf %2081 : vector<1x128xf32>
    %cst_739 = arith.constant 1.000000e+00 : f32
    %2083 = vector.broadcast %cst_739 : f32 to vector<1x128xf32>
    %2084 = arith.subf %2083, %2082 : vector<1x128xf32>
    %cst_740 = arith.constant 0.000000e+00 : f32
    %2085 = vector.broadcast %cst_740 : f32 to vector<1x128xf32>
    %2086 = arith.maximumf %2084, %2085 : vector<1x128xf32>
    %c208_741 = arith.constant 208 : index
    %c0_742 = arith.constant 0 : index
    %2087 = vector.load %arg4[%c208_741, %c0_742] : memref<256x128xf32, #tpu.memory_space<vmem>>, vector<16x128xf32>
    %2088 = vector.broadcast %2086 : vector<1x128xf32> to vector<16x128xf32>
    %2089 = arith.mulf %2087, %2088 : vector<16x128xf32>
    %2090 = arith.addf %2079, %2089 : vector<16x128xf32>
    %cst_743 = arith.constant 1.400000e+01 : f32
    %2091 = vector.broadcast %cst_743 : f32 to vector<1x128xf32>
    %2092 = arith.subf %1872, %2091 : vector<1x128xf32>
    %2093 = math.absf %2092 : vector<1x128xf32>
    %cst_744 = arith.constant 1.000000e+00 : f32
    %2094 = vector.broadcast %cst_744 : f32 to vector<1x128xf32>
    %2095 = arith.subf %2094, %2093 : vector<1x128xf32>
    %cst_745 = arith.constant 0.000000e+00 : f32
    %2096 = vector.broadcast %cst_745 : f32 to vector<1x128xf32>
    %2097 = arith.maximumf %2095, %2096 : vector<1x128xf32>
    %c224_746 = arith.constant 224 : index
    %c0_747 = arith.constant 0 : index
    %2098 = vector.load %arg4[%c224_746, %c0_747] : memref<256x128xf32, #tpu.memory_space<vmem>>, vector<16x128xf32>
    %2099 = vector.broadcast %2097 : vector<1x128xf32> to vector<16x128xf32>
    %2100 = arith.mulf %2098, %2099 : vector<16x128xf32>
    %2101 = arith.addf %2090, %2100 : vector<16x128xf32>
    %cst_748 = arith.constant 1.500000e+01 : f32
    %2102 = vector.broadcast %cst_748 : f32 to vector<1x128xf32>
    %2103 = arith.subf %1872, %2102 : vector<1x128xf32>
    %2104 = math.absf %2103 : vector<1x128xf32>
    %cst_749 = arith.constant 1.000000e+00 : f32
    %2105 = vector.broadcast %cst_749 : f32 to vector<1x128xf32>
    %2106 = arith.subf %2105, %2104 : vector<1x128xf32>
    %cst_750 = arith.constant 0.000000e+00 : f32
    %2107 = vector.broadcast %cst_750 : f32 to vector<1x128xf32>
    %2108 = arith.maximumf %2106, %2107 : vector<1x128xf32>
    %c240_751 = arith.constant 240 : index
    %c0_752 = arith.constant 0 : index
    %2109 = vector.load %arg4[%c240_751, %c0_752] : memref<256x128xf32, #tpu.memory_space<vmem>>, vector<16x128xf32>
    %2110 = vector.broadcast %2108 : vector<1x128xf32> to vector<16x128xf32>
    %2111 = arith.mulf %2109, %2110 : vector<16x128xf32>
    %2112 = arith.addf %2101, %2111 : vector<16x128xf32>
    %2113 = vector.extract_strided_slice %2112 {offsets = [0, 0], sizes = [1, 128], strides = [1, 1]} : vector<16x128xf32> to vector<1x128xf32>
    %2114 = vector.extract_strided_slice %2112 {offsets = [1, 0], sizes = [1, 128], strides = [1, 1]} : vector<16x128xf32> to vector<1x128xf32>
    %2115 = vector.extract_strided_slice %2112 {offsets = [2, 0], sizes = [1, 128], strides = [1, 1]} : vector<16x128xf32> to vector<1x128xf32>
    %2116 = vector.extract_strided_slice %2112 {offsets = [3, 0], sizes = [1, 128], strides = [1, 1]} : vector<16x128xf32> to vector<1x128xf32>
    %2117 = vector.extract_strided_slice %2112 {offsets = [4, 0], sizes = [1, 128], strides = [1, 1]} : vector<16x128xf32> to vector<1x128xf32>
    %2118 = vector.extract_strided_slice %2112 {offsets = [5, 0], sizes = [1, 128], strides = [1, 1]} : vector<16x128xf32> to vector<1x128xf32>
    %2119 = vector.extract_strided_slice %2112 {offsets = [6, 0], sizes = [1, 128], strides = [1, 1]} : vector<16x128xf32> to vector<1x128xf32>
    %2120 = vector.extract_strided_slice %2112 {offsets = [7, 0], sizes = [1, 128], strides = [1, 1]} : vector<16x128xf32> to vector<1x128xf32>
    %2121 = vector.extract_strided_slice %2112 {offsets = [8, 0], sizes = [1, 128], strides = [1, 1]} : vector<16x128xf32> to vector<1x128xf32>
    %2122 = vector.extract_strided_slice %2112 {offsets = [9, 0], sizes = [1, 128], strides = [1, 1]} : vector<16x128xf32> to vector<1x128xf32>
    %2123 = vector.extract_strided_slice %2112 {offsets = [10, 0], sizes = [1, 128], strides = [1, 1]} : vector<16x128xf32> to vector<1x128xf32>
    %2124 = vector.extract_strided_slice %2112 {offsets = [11, 0], sizes = [1, 128], strides = [1, 1]} : vector<16x128xf32> to vector<1x128xf32>
    %2125 = arith.mulf %2113, %1850 : vector<1x128xf32>
    %2126 = arith.mulf %2114, %1851 : vector<1x128xf32>
    %2127 = arith.addf %2125, %2126 : vector<1x128xf32>
    %2128 = arith.mulf %2115, %1852 : vector<1x128xf32>
    %2129 = arith.addf %2127, %2128 : vector<1x128xf32>
    %2130 = arith.addf %2129, %2116 : vector<1x128xf32>
    %2131 = arith.subf %2130, %0 : vector<1x128xf32>
    %2132 = arith.mulf %2117, %1850 : vector<1x128xf32>
    %2133 = arith.mulf %2118, %1851 : vector<1x128xf32>
    %2134 = arith.addf %2132, %2133 : vector<1x128xf32>
    %2135 = arith.mulf %2119, %1852 : vector<1x128xf32>
    %2136 = arith.addf %2134, %2135 : vector<1x128xf32>
    %2137 = arith.addf %2136, %2120 : vector<1x128xf32>
    %2138 = arith.subf %2137, %1 : vector<1x128xf32>
    %2139 = arith.mulf %2121, %1850 : vector<1x128xf32>
    %2140 = arith.mulf %2122, %1851 : vector<1x128xf32>
    %2141 = arith.addf %2139, %2140 : vector<1x128xf32>
    %2142 = arith.mulf %2123, %1852 : vector<1x128xf32>
    %2143 = arith.addf %2141, %2142 : vector<1x128xf32>
    %2144 = arith.addf %2143, %2124 : vector<1x128xf32>
    %2145 = arith.subf %2144, %2 : vector<1x128xf32>
    %2146 = arith.mulf %2118, %2123 : vector<1x128xf32>
    %2147 = arith.mulf %2119, %2122 : vector<1x128xf32>
    %2148 = arith.subf %2146, %2147 : vector<1x128xf32>
    %2149 = arith.mulf %2115, %2122 : vector<1x128xf32>
    %2150 = arith.mulf %2114, %2123 : vector<1x128xf32>
    %2151 = arith.subf %2149, %2150 : vector<1x128xf32>
    %2152 = arith.mulf %2114, %2119 : vector<1x128xf32>
    %2153 = arith.mulf %2115, %2118 : vector<1x128xf32>
    %2154 = arith.subf %2152, %2153 : vector<1x128xf32>
    %2155 = arith.mulf %2119, %2121 : vector<1x128xf32>
    %2156 = arith.mulf %2117, %2123 : vector<1x128xf32>
    %2157 = arith.subf %2155, %2156 : vector<1x128xf32>
    %2158 = arith.mulf %2113, %2123 : vector<1x128xf32>
    %2159 = arith.mulf %2115, %2121 : vector<1x128xf32>
    %2160 = arith.subf %2158, %2159 : vector<1x128xf32>
    %2161 = arith.mulf %2115, %2117 : vector<1x128xf32>
    %2162 = arith.mulf %2113, %2119 : vector<1x128xf32>
    %2163 = arith.subf %2161, %2162 : vector<1x128xf32>
    %2164 = arith.mulf %2117, %2122 : vector<1x128xf32>
    %2165 = arith.mulf %2118, %2121 : vector<1x128xf32>
    %2166 = arith.subf %2164, %2165 : vector<1x128xf32>
    %2167 = arith.mulf %2114, %2121 : vector<1x128xf32>
    %2168 = arith.mulf %2113, %2122 : vector<1x128xf32>
    %2169 = arith.subf %2167, %2168 : vector<1x128xf32>
    %2170 = arith.mulf %2113, %2118 : vector<1x128xf32>
    %2171 = arith.mulf %2114, %2117 : vector<1x128xf32>
    %2172 = arith.subf %2170, %2171 : vector<1x128xf32>
    %2173 = arith.mulf %2113, %2148 : vector<1x128xf32>
    %2174 = arith.mulf %2114, %2157 : vector<1x128xf32>
    %2175 = arith.addf %2173, %2174 : vector<1x128xf32>
    %2176 = arith.mulf %2115, %2166 : vector<1x128xf32>
    %2177 = arith.addf %2175, %2176 : vector<1x128xf32>
    %2178 = math.absf %2177 : vector<1x128xf32>
    %cst_753 = arith.constant 9.99999993E-9 : f32
    %2179 = vector.broadcast %cst_753 : f32 to vector<1x128xf32>
    %2180 = arith.cmpf olt, %2178, %2179 : vector<1x128xf32>
    %cst_754 = arith.constant 0.000000e+00 : f32
    %2181 = vector.broadcast %cst_754 : f32 to vector<1x128xf32>
    %2182 = arith.cmpf olt, %2177, %2181 : vector<1x128xf32>
    %cst_755 = arith.constant -9.99999993E-9 : f32
    %cst_756 = arith.constant 9.99999993E-9 : f32
    %2183 = vector.broadcast %cst_755 : f32 to vector<1x128xf32>
    %2184 = vector.broadcast %cst_756 : f32 to vector<1x128xf32>
    %2185 = arith.select %2182, %2183, %2184 : vector<1x128xi1>, vector<1x128xf32>
    %2186 = arith.select %2180, %2185, %2177 : vector<1x128xi1>, vector<1x128xf32>
    %cst_757 = arith.constant 1.000000e+00 : f32
    %2187 = vector.broadcast %cst_757 : f32 to vector<1x128xf32>
    %2188 = arith.divf %2187, %2186 : vector<1x128xf32>
    %c0_758 = arith.constant 0 : index
    %c0_759 = arith.constant 0 : index
    %2189 = vector.load %arg3[%c0_758, %c0_759] : memref<32x128xf32, #tpu.memory_space<vmem>>, vector<16x128xf32>
    tpu.vector_store %arg3[%c0_758, %c0_759], %2112 {strides = array<i32>} : memref<32x128xf32, #tpu.memory_space<vmem>>, vector<16x128xf32>,
    %c16_760 = arith.constant 16 : index
    %c0_761 = arith.constant 0 : index
    %2190 = vector.load %arg3[%c16_760, %c0_761] : memref<32x128xf32, #tpu.memory_space<vmem>>, vector<1x128xf32>
    tpu.vector_store %arg3[%c16_760, %c0_761], %1850 {strides = array<i32>} : memref<32x128xf32, #tpu.memory_space<vmem>>, vector<1x128xf32>,
    %c17 = arith.constant 17 : index
    %c0_762 = arith.constant 0 : index
    %2191 = vector.load %arg3[%c17, %c0_762] : memref<32x128xf32, #tpu.memory_space<vmem>>, vector<1x128xf32>
    tpu.vector_store %arg3[%c17, %c0_762], %1851 {strides = array<i32>} : memref<32x128xf32, #tpu.memory_space<vmem>>, vector<1x128xf32>,
    %c18 = arith.constant 18 : index
    %c0_763 = arith.constant 0 : index
    %2192 = vector.load %arg3[%c18, %c0_763] : memref<32x128xf32, #tpu.memory_space<vmem>>, vector<1x128xf32>
    tpu.vector_store %arg3[%c18, %c0_763], %1852 {strides = array<i32>} : memref<32x128xf32, #tpu.memory_space<vmem>>, vector<1x128xf32>,
    %2193 = arith.mulf %2131, %2131 : vector<1x128xf32>
    %2194 = arith.mulf %2138, %2138 : vector<1x128xf32>
    %2195 = arith.addf %2193, %2194 : vector<1x128xf32>
    %2196 = arith.mulf %2145, %2145 : vector<1x128xf32>
    %2197 = arith.addf %2195, %2196 : vector<1x128xf32>
    %2198 = math.sqrt %2197 : vector<1x128xf32>
    %c19 = arith.constant 19 : index
    %c0_764 = arith.constant 0 : index
    %2199 = vector.load %arg3[%c19, %c0_764] : memref<32x128xf32, #tpu.memory_space<vmem>>, vector<1x128xf32>
    tpu.vector_store %arg3[%c19, %c0_764], %2198 {strides = array<i32>} : memref<32x128xf32, #tpu.memory_space<vmem>>, vector<1x128xf32>,
    %2200 = arith.mulf %2148, %2188 : vector<1x128xf32>
    %c20 = arith.constant 20 : index
    %c0_765 = arith.constant 0 : index
    %2201 = vector.load %arg3[%c20, %c0_765] : memref<32x128xf32, #tpu.memory_space<vmem>>, vector<1x128xf32>
    tpu.vector_store %arg3[%c20, %c0_765], %2200 {strides = array<i32>} : memref<32x128xf32, #tpu.memory_space<vmem>>, vector<1x128xf32>,
    %2202 = arith.mulf %2151, %2188 : vector<1x128xf32>
    %c21 = arith.constant 21 : index
    %c0_766 = arith.constant 0 : index
    %2203 = vector.load %arg3[%c21, %c0_766] : memref<32x128xf32, #tpu.memory_space<vmem>>, vector<1x128xf32>
    tpu.vector_store %arg3[%c21, %c0_766], %2202 {strides = array<i32>} : memref<32x128xf32, #tpu.memory_space<vmem>>, vector<1x128xf32>,
    %2204 = arith.mulf %2154, %2188 : vector<1x128xf32>
    %c22 = arith.constant 22 : index
    %c0_767 = arith.constant 0 : index
    %2205 = vector.load %arg3[%c22, %c0_767] : memref<32x128xf32, #tpu.memory_space<vmem>>, vector<1x128xf32>
    tpu.vector_store %arg3[%c22, %c0_767], %2204 {strides = array<i32>} : memref<32x128xf32, #tpu.memory_space<vmem>>, vector<1x128xf32>,
    %2206 = arith.mulf %2157, %2188 : vector<1x128xf32>
    %c23 = arith.constant 23 : index
    %c0_768 = arith.constant 0 : index
    %2207 = vector.load %arg3[%c23, %c0_768] : memref<32x128xf32, #tpu.memory_space<vmem>>, vector<1x128xf32>
    tpu.vector_store %arg3[%c23, %c0_768], %2206 {strides = array<i32>} : memref<32x128xf32, #tpu.memory_space<vmem>>, vector<1x128xf32>,
    %2208 = arith.mulf %2160, %2188 : vector<1x128xf32>
    %c24 = arith.constant 24 : index
    %c0_769 = arith.constant 0 : index
    %2209 = vector.load %arg3[%c24, %c0_769] : memref<32x128xf32, #tpu.memory_space<vmem>>, vector<1x128xf32>
    tpu.vector_store %arg3[%c24, %c0_769], %2208 {strides = array<i32>} : memref<32x128xf32, #tpu.memory_space<vmem>>, vector<1x128xf32>,
    %2210 = arith.mulf %2163, %2188 : vector<1x128xf32>
    %c25 = arith.constant 25 : index
    %c0_770 = arith.constant 0 : index
    %2211 = vector.load %arg3[%c25, %c0_770] : memref<32x128xf32, #tpu.memory_space<vmem>>, vector<1x128xf32>
    tpu.vector_store %arg3[%c25, %c0_770], %2210 {strides = array<i32>} : memref<32x128xf32, #tpu.memory_space<vmem>>, vector<1x128xf32>,
    %2212 = arith.mulf %2166, %2188 : vector<1x128xf32>
    %c26 = arith.constant 26 : index
    %c0_771 = arith.constant 0 : index
    %2213 = vector.load %arg3[%c26, %c0_771] : memref<32x128xf32, #tpu.memory_space<vmem>>, vector<1x128xf32>
    tpu.vector_store %arg3[%c26, %c0_771], %2212 {strides = array<i32>} : memref<32x128xf32, #tpu.memory_space<vmem>>, vector<1x128xf32>,
    %2214 = arith.mulf %2169, %2188 : vector<1x128xf32>
    %c27 = arith.constant 27 : index
    %c0_772 = arith.constant 0 : index
    %2215 = vector.load %arg3[%c27, %c0_772] : memref<32x128xf32, #tpu.memory_space<vmem>>, vector<1x128xf32>
    tpu.vector_store %arg3[%c27, %c0_772], %2214 {strides = array<i32>} : memref<32x128xf32, #tpu.memory_space<vmem>>, vector<1x128xf32>,
    %2216 = arith.mulf %2172, %2188 : vector<1x128xf32>
    %c28 = arith.constant 28 : index
    %c0_773 = arith.constant 0 : index
    %2217 = vector.load %arg3[%c28, %c0_773] : memref<32x128xf32, #tpu.memory_space<vmem>>, vector<1x128xf32>
    tpu.vector_store %arg3[%c28, %c0_773], %2216 {strides = array<i32>} : memref<32x128xf32, #tpu.memory_space<vmem>>, vector<1x128xf32>,
    %cst_774 = arith.constant 0.000000e+00 : f32
    %2218 = vector.broadcast %cst_774 : f32 to vector<3x128xf32>
    %c29 = arith.constant 29 : index
    %c0_775 = arith.constant 0 : index
    %2219 = vector.load %arg3[%c29, %c0_775] : memref<32x128xf32, #tpu.memory_space<vmem>>, vector<3x128xf32>
    tpu.vector_store %arg3[%c29, %c0_775], %2218 {strides = array<i32>} : memref<32x128xf32, #tpu.memory_space<vmem>>, vector<3x128xf32>,
    return
  }
  func.func @transform_0(%arg0: i32) -> (i32, i32) {
    %c0_i32 = arith.constant 0 : i32
    %c0_i32_0 = arith.constant 0 : i32
    return %c0_i32, %arg0 : i32, i32
  }
  func.func @transform_1(%arg0: i32) -> (i32, i32) {
    %c0_i32 = arith.constant 0 : i32
    %c0_i32_0 = arith.constant 0 : i32
    %c0_i32_1 = arith.constant 0 : i32
    return %c0_i32, %c0_i32_0 : i32, i32
  }
  func.func @transform_2(%arg0: i32) -> (i32, i32) {
    %c0_i32 = arith.constant 0 : i32
    %c0_i32_0 = arith.constant 0 : i32
    return %c0_i32, %arg0 : i32, i32
  }
}

</mosaic_0001>

<bundles_post_ra>
// kernel: forward.1
= control target key start
LH: loop header
LB: loop body
LE: loop exit
PB: predicated region body
PF: predicated region fallthrough
CT: control target
= control target key end

     0   :  { %s6678_s9 = smov 0   ;;  %s6680_s10 = smov 0   ;;  %s8192_s0 = inlined_call_operand.vmem [shape: f32[8,896], index: 0, kind: input, shape index: {}]   ;;  %s8193_s1 = inlined_call_operand.vmem [shape: f32[256,64], index: 1, kind: input, shape index: {}]   ;;  %s8194_s2 = inlined_call_operand.vmem [shape: f32[32,896], index: 2, kind: output, shape index: {}]  }
   0x1   :  { %s6682_s11 = smov 0  }
   0x2 LB: > { %s6691_s12 = sadd.s32 4294967295, %s6659_s11   ;;  %s6693_s13 = sadd.s32 1, %s6659_s11   ;;  %s6659_s11 = sphi %s6682_s11, %s8338_s11   ;;  %s6655_s10 = sphi %s6680_s10, %s8337_s10   ;;  %s6651_s9 = sphi %s6678_s9, %s8336_s9  }
   0x3   : > { %s63_s14 = ssub.s32 %s6659_s11, %s6693_s13  ;;  %s66_s15 = sadd.s32 1, %s6655_s10 }
   0x4   : > { %p64_p0 = scmp.eq.s32.totalorder %s63_s14, 0  ;;  %p76_p1 = scmp.ne.s32.totalorder %s6655_s10, %s6651_s9 }
   0x5   : > { %p77_p2 = scmp.eq.s32.totalorder %s6691_s12, 6  ;;  %p5533_p3 = scmp.ge.s32.totalorder %s6659_s11, 1 }
   0x6   : > { %s6701_s16 = scalar_select %p64_p0, %s6655_s10, %s66_s15  }
   0x7   : > { %p6703_p4 = por %p77_p2, %p76_p1  ;;  %p111_p5 = scmp.lt.s32.totalorder %s6659_s11, 8 }
   0x9   : > { %p112_p6 = pnand %p5533_p3, %p111_p5 }
   0xb   : > { %115 = sbr.rel (%p112_p6) target bundleno = 2223 (0x8af), region = 28 }
  0x12   : > { %p131_p7 = scmp.lt.s32.totalorder %s6691_s12, 6  ;;  %v215_v0 = vld [vmem:[%s8193_s1] sm:$0xff]  ;;  %vm247_vm0 = vcmask 523264   ;;  %v138_v1 = vlaneseq  ;;  %v6743_v61 = vld [vmem:[%s8193_s1 + $0x8] sm:$0xff]  ;;  %v6748_v62 = vld [vmem:[%s8193_s1 + $0x10] sm:$0xff]  ;;  %s128_s26 = sand.u32 1, %s6651_s9  }
  0x13   : > { %6129 = vmatprep.mubr.msk.f32.mxu0 %vm247_vm0, %v215_v0  ;;  %6193 = vmatprep.mubr.msk.f32.mxu1 %vm247_vm0, %v215_v0  ;;  %v6757_v63 = vld [vmem:[%s8193_s1 + $0x18] sm:$0xff]  ;;  %v6762_v0 = vld [vmem:[%s8193_s1 + $0x20] sm:$0xff]  ;;  %s5534_s27 = sshll.u32 %s128_s26, 5 }
  0x14   : > { %s132_s20 = scalar_select %p131_p7, %s6691_s12, 6  ;;  %v139_v6 = vshrl.u32 %v138_v1, 7  ;;  %v6771_v1 = vld [vmem:[%s8193_s1 + $0x28] sm:$0xff] }
  0x15   : > { %s7927_s9 = scalar_lea.vmem [#allocation3], %s5534_s27 }
  0x16   : > { %s5535_s21 = sshll.u32 %s132_s20, 3  ;;  %v140_v11 = vadd.s32 8, %v139_v6  ;;  %v6727_v16 = vsub.s32 0, %v139_v6  ;;  %v6729_v17 = vcvt.s32.f32 %v139_v6  ;;  %v6790_v6 = vld [vmem:[%s8193_s1 + $0x40] sm:$0xff] }
  0x17   : > { %s6717_s24 = scalar_lea.vmem %s8192_s0, %s5535_s21 }
  0x18   : > { %v6720_v2 = vld [vmem:[%s6717_s24 + $0x1] sm:$0x1]  ;;  %v6723_v3 = vld [vmem:[%s6717_s24 + $0x2] sm:$0x1]  ;;  %v6731_v18 = vcvt.s32.f32 %v140_v11  ;;  %v6827_v11 = vld [vmem:[%s8193_s1 + $0x68] sm:$0xff] }
  0x19   : > { %v5537_v4 = vadd.f32 0.004301727, %v6720_v2  ;;  %v5538_v5 = vadd.f32 0.005185783, %v6723_v3 }
  0x1b   : > { %v149_v7 = vmul.f32 1.0514426, %v5537_v4  ;;  %v151_v8 = vmul.f32 4.2057705, %v5538_v5  ;;  %v6776_v4 = vld [vmem:[%s8193_s1 + $0x30] sm:$0xff]  ;;  %v6785_v5 = vld [vmem:[%s8193_s1 + $0x38] sm:$0xff] }
  0x1d   : > { %v156_v9 = vadd.f32 1.0, %v149_v7  ;;  %v160_v10 = vadd.f32 1.0, %v151_v8  ;;  %v6799_v7 = vld [vmem:[%s8193_s1 + $0x48] sm:$0xff]  ;;  %v6804_v8 = vld [vmem:[%s8193_s1 + $0x50] sm:$0xff] }
  0x1f   : > { %v157_v12 = vmul.f32 7.5, %v156_v9  ;;  %v161_v13 = vmul.f32 1.5, %v160_v10  ;;  %v6813_v9 = vld [vmem:[%s8193_s1 + $0x58] sm:$0xff]  ;;  %v6818_v10 = vld [vmem:[%s8193_s1 + $0x60] sm:$0xff] }
  0x21   : > { %v158_v14 = vmax.f32 %v157_v12, 0.0  ;;  %v162_v15 = vmax.f32 %v161_v13, 0.0  ;;  %v6832_v12 = vld [vmem:[%s8193_s1 + $0x70] sm:$0xff]  ;;  %v6841_v13 = vld [vmem:[%s8193_s1 + $0x78] sm:$0xff] }
  0x23   : > { %v159_v19 = vmin.f32 %v158_v14, 15.0  ;;  %v163_v20 = vmin.f32 %v162_v15, 3.0  ;;  %v6846_v14 = vld [vmem:[%s8193_s1 + $0x80] sm:$0xff]  ;;  %v6855_v15 = vld [vmem:[%s8193_s1 + $0x88] sm:$0xff] }
  0x25   : > { %v167_v21 = vrot.slane %v159_v19, %v6727_v16  ;;  %v176_v22 = vand.u32 2147483647, %v163_v20  ;;  %v5539_v23 = vadd.f32 -1.0, %v163_v20  ;;  %v5540_v24 = vadd.f32 -2.0, %v163_v20  ;;  %v6860_v19 = vld [vmem:[%s8193_s1 + $0x90] sm:$0xff] }
  0x26   : > { %v5541_v25 = vadd.f32 -3.0, %v163_v20  ;;  %v6869_v20 = vld [vmem:[%s8193_s1 + $0x98] sm:$0xff] }
  0x27   : > { %v168_v26 = vsub.f32 %v167_v21, %v6729_v17  ;;  %v169_v27 = vsub.f32 %v167_v21, %v6731_v18  ;;  %v177_v28 = vsub.f32 1.0, %v176_v22  ;;  %v186_v29 = vand.u32 2147483647, %v5539_v23  ;;  %v6874_v21 = vld [vmem:[%s8193_s1 + $0xa0] sm:$0xff]  ;;  %v6883_v22 = vld [vmem:[%s8193_s1 + $0xa8] sm:$0xff]  ;;  %v6888_v23 = vld [vmem:[%s8193_s1 + $0xb0] sm:$0xff] }
  0x28   : > { %v196_v30 = vand.u32 2147483647, %v5540_v24  ;;  %v206_v31 = vand.u32 2147483647, %v5541_v25  ;;  %8245 = vst [vmem:[#allocation4_spill] sm:$0xff] %v6883_v22  ;;  %8246 = vst [vmem:[#allocation5_spill] sm:$0xff] %v6888_v23 }
  0x29   : > { %v170_v32 = vand.u32 2147483647, %v168_v26  ;;  %v171_v33 = vand.u32 2147483647, %v169_v27  ;;  %v178_v34 = vmax.f32 %v177_v28, 0.0  ;;  %v187_v35 = vsub.f32 1.0, %v186_v29 }
  0x2a   : > { %v197_v36 = vsub.f32 1.0, %v196_v30  ;;  %v207_v37 = vsub.f32 1.0, %v206_v31  ;;  %v6897_v24 = vld [vmem:[%s8193_s1 + $0xb8] sm:$0xff]  ;;  %v6902_v25 = vld [vmem:[%s8193_s1 + $0xc0] sm:$0xff]  ;;  %v6911_v26 = vld [vmem:[%s8193_s1 + $0xc8] sm:$0xff] }
  0x2b   : > { %v172_v38 = vsub.f32 1.0, %v170_v32  ;;  %v173_v39 = vsub.f32 1.0, %v171_v33  ;;  %v182_v40 = vrot.slane %v178_v34, %v6727_v16  ;;  %v188_v41 = vmax.f32 %v187_v35, 0.0  ;;  %8247 = vst [vmem:[#allocation6_spill] sm:$0xff] %v6897_v24  ;;  %8248 = vst [vmem:[#allocation7_spill] sm:$0xff] %v6902_v25  ;;  %v6916_v27 = vld [vmem:[%s8193_s1 + $0xd0] sm:$0xff] }
  0x2c   : > { %v198_v42 = vmax.f32 %v197_v36, 0.0  ;;  %v208_v43 = vmax.f32 %v207_v37, 0.0  ;;  %8249 = vst [vmem:[#allocation8_spill] sm:$0xff] %v6911_v26  ;;  %8250 = vst [vmem:[#allocation9_spill] sm:$0xff] %v6916_v27  ;;  %v6925_v28 = vld [vmem:[%s8193_s1 + $0xd8] sm:$0xff]  ;;  %v6930_v29 = vld [vmem:[%s8193_s1 + $0xe0] sm:$0xff] }
  0x2d   : > { %v174_v44 = vmax.f32 %v172_v38, 0.0  ;;  %v175_v45 = vmax.f32 %v173_v39, 0.0  ;;  %v192_v46 = vrot.slane %v188_v41, %v6727_v16  ;;  %8251 = vst [vmem:[#allocation10_spill] sm:$0xff] %v6925_v28  ;;  %8252 = vst [vmem:[#allocation11_spill] sm:$0xff] %v6930_v29  ;;  %v6939_v30 = vld [vmem:[%s8193_s1 + $0xe8] sm:$0xff]  ;;  %v6944_v31 = vld [vmem:[%s8193_s1 + $0xf0] sm:$0xff] }
  0x2e   : > { %v202_v47 = vrot.slane %v198_v42, %v6727_v16  ;;  %v212_v52 = vrot.slane %v208_v43, %v6727_v16  ;;  %8253 = vst [vmem:[#allocation12_spill] sm:$0xff] %v6939_v30  ;;  %8254 = vst [vmem:[#allocation13_spill] sm:$0xff] %v6944_v31  ;;  %v6953_v32 = vld [vmem:[%s8193_s1 + $0xf8] sm:$0xff]  ;;  %v6958_v33 = vld [vmem:[%s6717_s24] sm:$0x1] }
  0x2f   : > { %v183_v48 = vmul.f32 %v182_v40, %v174_v44  ;;  %v184_v49 = vmul.f32 %v182_v40, %v175_v45  ;;  %v193_v50 = vmul.f32 %v192_v46, %v174_v44  ;;  %v194_v51 = vmul.f32 %v192_v46, %v175_v45  ;;  %8255 = vst [vmem:[#allocation14_spill] sm:$0xff] %v6953_v32 }
  0x30   : > { %v203_v55 = vmul.f32 %v202_v47, %v174_v44  ;;  %v204_v56 = vmul.f32 %v202_v47, %v175_v45  ;;  %v213_v58 = vmul.f32 %v212_v52, %v174_v44  ;;  %v214_v59 = vmul.f32 %v212_v52, %v175_v45  ;;  %8256 = vst [vmem:[#allocation15_spill] sm:$0xff] %v6958_v33 }
  0x31   : > { %v6497_v53 = vpack.c.bf16 %v184_v49, %v183_v48  ;;  %v6501_v54 = vpack.c.bf16 %v194_v51, %v193_v50  ;;  %v5536_v34 = vadd.f32 -0.0016962886, %v6958_v33 }
  0x32   : > { %v6505_v57 = vpack.c.bf16 %v204_v56, %v203_v55  ;;  %v6509_v60 = vpack.c.bf16 %v214_v59, %v213_v58 }
  0x33   : > { %6498 = vmatprep.subr.bf16.mxu0 %v6497_v53  ;;  %v147_v35 = vmul.f32 1.0514426, %v5536_v34 }
  0x34   : > { %6500 = vmatpush3.bf16.msra.mxu0 %v6497_v53 }
  0x35   : > { %6502 = vmatprep.subr.bf16.mxu0 %v6501_v54  ;;  %v152_v36 = vadd.f32 1.0, %v147_v35 }
  0x37   : > { %v153_v37 = vmul.f32 7.5, %v152_v36 }
  0x38   : > { %6504 = vmatpush3.bf16.msra.mxu0 %v6501_v54 }
  0x39   : > { %6506 = vmatprep.subr.bf16.mxu0 %v6505_v57  ;;  %v154_v38 = vmax.f32 %v153_v37, 0.0 }
  0x3b   : > { %v6961_v39 = vmin.f32 %v154_v38, 15.0 }
  0x3c   : > { %6508 = vmatpush3.bf16.msra.mxu0 %v6505_v57 }
  0x3d   : > { %6510 = vmatprep.subr.bf16.mxu0 %v6509_v60  ;;  %v5574_v40 = vadd.f32 -1.0, %v6961_v39  ;;  %v5575_v41 = vadd.f32 -2.0, %v6961_v39  ;;  %v601_v42 = vand.u32 2147483647, %v6961_v39  ;;  %v5576_v45 = vadd.f32 -3.0, %v6961_v39 }
  0x3e   : > { %v5577_v52 = vadd.f32 -4.0, %v6961_v39  ;;  %v5579_v37 = vadd.f32 -6.0, %v6961_v39 }
  0x3f   : > { %v615_v43 = vand.u32 2147483647, %v5574_v40  ;;  %v629_v44 = vand.u32 2147483647, %v5575_v41  ;;  %v602_v46 = vsub.f32 1.0, %v601_v42 }
  0x40   : > { %6512 = vmatpush3.bf16.msra.mxu0 %v6509_v60  ;;  %v643_v49 = vand.u32 2147483647, %v5576_v45  ;;  %v657_v59 = vand.u32 2147483647, %v5577_v52  ;;  %v5578_v60 = vadd.f32 -5.0, %v6961_v39 }
  0x41   : > { %v616_v47 = vsub.f32 1.0, %v615_v43  ;;  %v630_v48 = vsub.f32 1.0, %v629_v44  ;;  %v603_v50 = vmax.f32 %v602_v46, 0.0 }
  0x42   : > { %v644_v55 = vsub.f32 1.0, %v643_v49  ;;  %v658_v42 = vsub.f32 1.0, %v657_v59  ;;  %v671_v43 = vand.u32 2147483647, %v5578_v60  ;;  %v685_v49 = vand.u32 2147483647, %v5579_v37 }
  0x43   : > { %6130 = vmatmul.mubr.msk.f32.vlgmr.msra.gmra.mrb[0].mxu0 %vm247_vm0, %v6743_v61  ;;  %v617_v51 = vmax.f32 %v616_v47, 0.0  ;;  %v631_v54 = vmax.f32 %v630_v48, 0.0  ;;  %v609_v56 = vrot.slane %v603_v50, %v6727_v16  ;;  %v5580_v50 = vadd.f32 -7.0, %v6961_v39 }
  0x44   : > { %6132 = vmatprep.mubr.msk.f32.mxu0 %vm247_vm0, %v6748_v62  ;;  %v645_v36 = vmax.f32 %v644_v55, 0.0  ;;  %v659_v55 = vmax.f32 %v658_v42, 0.0  ;;  %v686_v59 = vsub.f32 1.0, %v685_v49  ;;  %v5581_v37 = vadd.f32 -8.0, %v6961_v39 }
  0x45   : > { %v623_v58 = vrot.slane %v617_v51, %v6727_v16  ;;  %v637_v35 = vrot.slane %v631_v54, %v6727_v16  ;;  %v699_v60 = vand.u32 2147483647, %v5580_v50 }
  0x46   : > { %v651_v54 = vrot.slane %v645_v36, %v6727_v16  ;;  %v687_v36 = vmax.f32 %v686_v59, 0.0 }
  0x47   : > { %6133 = vmatmul.mubr.msk.f32.gmra.mrb[2].mxu0 %vm247_vm0, %v6757_v63  ;;  %v700_v42 = vsub.f32 1.0, %v699_v60 }
  0x48   : > { %6135 = vmatprep.mubr.msk.f32.mxu0 %vm247_vm0, %v6762_v0 }
  0x4b   : > { %6136 = vmatmul.mubr.msk.f32.gmra.mrb[4].mxu0 %vm247_vm0, %v6771_v1 }
  0x4c   : > { %6138 = vmatprep.mubr.msk.f32.mxu0 %vm247_vm0, %v6776_v4 }
  0x4f   : > { %6139 = vmatmul.mubr.msk.f32.gmra.mrb[6].mxu0 %vm247_vm0, %v6785_v5 }
  0x50   : > { %6141 = vmatprep.mubr.msk.f32.mxu0 %vm247_vm0, %v6790_v6 }
  0x53   : > { %6142 = vmatmul.mubr.msk.f32.gmra.mrb[8].mxu0 %vm247_vm0, %v6799_v7 }
  0x54   : > { %6144 = vmatprep.mubr.msk.f32.mxu0 %vm247_vm0, %v6804_v8 }
  0x57   : > { %6145 = vmatmul.mubr.msk.f32.gmra.mrb[10].mxu0 %vm247_vm0, %v6813_v9 }
  0x58   : > { %6147 = vmatprep.mubr.msk.f32.mxu0 %vm247_vm0, %v6818_v10 }
  0x5b   : > { %6148 = vmatmul.mubr.msk.f32.gmra.mrb[12].mxu0 %vm247_vm0, %v6827_v11 }
  0x5c   : > { %6150 = vmatprep.mubr.msk.f32.mxu0 %vm247_vm0, %v6832_v12 }
  0x5f   : > { %6151 = vmatmul.mubr.msk.f32.gmra.mrb[14].mxu0 %vm247_vm0, %v6841_v13 }
  0x60   : > { %6153 = vmatprep.mubr.msk.f32.mxu0 %vm247_vm0, %v6846_v14 }
  0x63   : > { %6154 = vmatmul.mubr.msk.f32.gmra.mrb[16].mxu0 %vm247_vm0, %v6855_v15 }
  0x64   : > { %6156 = vmatprep.mubr.msk.f32.mxu0 %vm247_vm0, %v6860_v19 }
  0x67   : > { %6157 = vmatmul.mubr.msk.f32.gmra.mrb[18].mxu0 %vm247_vm0, %v6869_v20 }
  0x68   : > { %6159 = vmatprep.mubr.msk.f32.mxu0 %vm247_vm0, %v6874_v21 }
  0x6b   : > { %6160 = vmatmul.mubr.msk.f32.gmra.mrb[20].mxu0 %vm247_vm0, %v6883_v22 }
  0x6c   : > { %6162 = vmatprep.mubr.msk.f32.mxu0 %vm247_vm0, %v6888_v23 }
  0x6f   : > { %6163 = vmatmul.mubr.msk.f32.gmra.mrb[22].mxu0 %vm247_vm0, %v6897_v24 }
  0x70   : > { %6165 = vmatprep.mubr.msk.f32.mxu0 %vm247_vm0, %v6902_v25 }
  0x73   : > { %6166 = vmatmul.mubr.msk.f32.gmra.mrb[24].mxu0 %vm247_vm0, %v6911_v26 }
  0x74   : > { %6168 = vmatprep.mubr.msk.f32.mxu0 %vm247_vm0, %v6916_v27 }
  0x77   : > { %6169 = vmatmul.mubr.msk.f32.gmra.mrb[26].mxu0 %vm247_vm0, %v6925_v28 }
  0x78   : > { %6171 = vmatprep.mubr.msk.f32.mxu0 %vm247_vm0, %v6930_v29 }
  0x7b   : > { %6172 = vmatmul.mubr.msk.f32.gmra.mrb[28].mxu0 %vm247_vm0, %v6939_v30 }
  0x7c   : > { %6174 = vmatprep.mubr.msk.f32.mxu0 %vm247_vm0, %v6944_v31 }
  0x7f   : > { %6175 = vmatmul.mubr.msk.f32.gmra.mrb[30].mxu0 %vm247_vm0, %v6953_v32  ;;  %v672_v32 = vsub.f32 1.0, %v671_v43 }
 0x116   : > { %v6131_v53 = vpop.f32.mrb[0].mxu0 }
 0x117   : > { %v410_v57 = vpop.f32.mrb[1].mxu0  ;;  %v611_v38 = vmul.f32 %v6131_v53, %v609_v56 }
 0x118   : > { %v610_v44 = vmul.f32 %v609_v56, %v410_v57 }
 0x11a   : > { %v6134_v34 = vpop.f32.mrb[2].mxu0 }
 0x11b   : > { %v625_v40 = vmul.f32 %v6134_v34, %v623_v58  ;;  %v420_v41 = vpop.f32.mrb[3].mxu0 }
 0x11c   : > { %v624_v45 = vmul.f32 %v623_v58, %v420_v41  ;;  %v665_v58 = vrot.slane %v659_v55, %v6727_v16 }
 0x11d   : > { %v627_v46 = vadd.f32 %v625_v40, %v611_v38  ;;  %v673_v38 = vmax.f32 %v672_v32, 0.0  ;;  %v693_v32 = vrot.slane %v687_v36, %v6727_v16 }
 0x11e   : > { %v626_v47 = vadd.f32 %v624_v45, %v610_v44  ;;  %v6137_v48 = vpop.f32.mrb[4].mxu0 }
 0x11f   : > { %v639_v51 = vmul.f32 %v6137_v48, %v637_v35  ;;  %v430_v52 = vpop.f32.mrb[5].mxu0 }
 0x120   : > { %v638_v31 = vmul.f32 %v637_v35, %v430_v52 }
 0x121   : > { %v641_v53 = vadd.f32 %v639_v51, %v627_v46  ;;  %v713_v46 = vand.u32 2147483647, %v5581_v37  ;;  %v701_v51 = vmax.f32 %v700_v42, 0.0 }
 0x122   : > { %v640_v34 = vadd.f32 %v638_v31, %v626_v47  ;;  %v6140_v30 = vpop.f32.mrb[6].mxu0  ;;  %v679_v31 = vrot.slane %v673_v38, %v6727_v16  ;;  %v5582_v47 = vadd.f32 -9.0, %v6961_v39 }
 0x123   : > { %v653_v56 = vmul.f32 %v6140_v30, %v651_v54  ;;  %v440_v57 = vpop.f32.mrb[7].mxu0  ;;  %v714_v55 = vsub.f32 1.0, %v713_v46  ;;  %v707_v38 = vrot.slane %v701_v51, %v6727_v16 }
 0x124   : > { %v652_v40 = vmul.f32 %v651_v54, %v440_v57 }
 0x125   : > { %v655_v41 = vadd.f32 %v653_v56, %v641_v53  ;;  %v727_v53 = vand.u32 2147483647, %v5582_v47  ;;  %v5585_v47 = vadd.f32 -12.0, %v6961_v39 }
 0x126   : > { %v654_v44 = vadd.f32 %v652_v40, %v640_v34  ;;  %v6143_v45 = vpop.f32.mrb[8].mxu0  ;;  %v5583_v34 = vadd.f32 -10.0, %v6961_v39 }
 0x127   : > { %v667_v43 = vmul.f32 %v6143_v45, %v665_v58  ;;  %v450_v35 = vpop.f32.mrb[9].mxu0 }
 0x128   : > { %v666_v30 = vmul.f32 %v665_v58, %v450_v35  ;;  %v5584_v58 = vadd.f32 -11.0, %v6961_v39  ;;  %v741_v45 = vand.u32 2147483647, %v5583_v34 }
 0x129   : > { %v669_v48 = vadd.f32 %v667_v43, %v655_v41  ;;  %v715_v41 = vmax.f32 %v714_v55, 0.0 }
 0x12a   : > { %v668_v49 = vadd.f32 %v666_v30, %v654_v44  ;;  %v6146_v50 = vpop.f32.mrb[10].mxu0  ;;  %v728_v44 = vsub.f32 1.0, %v727_v53  ;;  %v755_v46 = vand.u32 2147483647, %v5584_v58  ;;  %v769_v53 = vand.u32 2147483647, %v5585_v47 }
 0x12b   : > { %v681_v52 = vmul.f32 %v6146_v50, %v679_v31  ;;  %v460_v54 = vpop.f32.mrb[11].mxu0  ;;  %v742_v50 = vsub.f32 1.0, %v741_v45 }
 0x12c   : > { %v680_v59 = vmul.f32 %v679_v31, %v460_v54  ;;  %v756_v55 = vsub.f32 1.0, %v755_v46 }
 0x12d   : > { %v683_v60 = vadd.f32 %v681_v52, %v669_v48  ;;  %v721_v48 = vrot.slane %v715_v41, %v6727_v16 }
 0x12e   : > { %v682_v56 = vadd.f32 %v680_v59, %v668_v49  ;;  %v6149_v57 = vpop.f32.mrb[12].mxu0  ;;  %v729_v49 = vmax.f32 %v728_v44, 0.0  ;;  %v757_v41 = vmax.f32 %v756_v55, 0.0  ;;  %v770_v44 = vsub.f32 1.0, %v769_v53 }
 0x12f   : > { %v695_v37 = vmul.f32 %v6149_v57, %v693_v32  ;;  %v470_v40 = vpop.f32.mrb[13].mxu0  ;;  %v5586_v57 = vadd.f32 -13.0, %v6961_v39 }
 0x130   : > { %v694_v36 = vmul.f32 %v693_v32, %v470_v40 }
 0x131   : > { %v697_v42 = vadd.f32 %v695_v37, %v683_v60  ;;  %v735_v60 = vrot.slane %v729_v49, %v6727_v16  ;;  %v763_v49 = vrot.slane %v757_v41, %v6727_v16 }
 0x132   : > { %v696_v43 = vadd.f32 %v694_v36, %v682_v56  ;;  %v6152_v35 = vpop.f32.mrb[14].mxu0  ;;  %v743_v56 = vmax.f32 %v742_v50, 0.0  ;;  %v771_v50 = vmax.f32 %v770_v44, 0.0 }
 0x133   : > { %v709_v31 = vmul.f32 %v6152_v35, %v707_v38  ;;  %v480_v30 = vpop.f32.mrb[15].mxu0  ;;  %v5587_v35 = vadd.f32 -14.0, %v6961_v39 }
 0x134   : > { %v708_v51 = vmul.f32 %v707_v38, %v480_v30 }
 0x135   : > { %v711_v52 = vadd.f32 %v709_v31, %v697_v42  ;;  %v749_v42 = vrot.slane %v743_v56, %v6727_v16  ;;  %v777_v56 = vrot.slane %v771_v50, %v6727_v16 }
 0x136   : > { %v710_v54 = vadd.f32 %v708_v51, %v696_v43  ;;  %v6155_v59 = vpop.f32.mrb[16].mxu0  ;;  %v783_v43 = vand.u32 2147483647, %v5586_v57 }
 0x137   : > { %v723_v34 = vmul.f32 %v6155_v59, %v721_v48  ;;  %v490_v32 = vpop.f32.mrb[17].mxu0  ;;  %v5588_v59 = vadd.f32 -15.0, %v6961_v39 }
 0x138   : > { %v722_v58 = vmul.f32 %v721_v48, %v490_v32 }
 0x139   : > { %v725_v37 = vadd.f32 %v723_v34, %v711_v52  ;;  %v784_v52 = vsub.f32 1.0, %v783_v43 }
 0x13a   : > { %v724_v40 = vadd.f32 %v722_v58, %v710_v54  ;;  %v6158_v36 = vpop.f32.mrb[18].mxu0  ;;  %v797_v54 = vand.u32 2147483647, %v5587_v35 }
 0x13b   : > { %v737_v45 = vmul.f32 %v6158_v36, %v735_v60  ;;  %v500_v38 = vpop.f32.mrb[19].mxu0  ;;  %v785_v58 = vmax.f32 %v784_v52, 0.0 }
 0x13c   : > { %v736_v46 = vmul.f32 %v735_v60, %v500_v38 }
 0x13d   : > { %v739_v47 = vadd.f32 %v737_v45, %v725_v37  ;;  %v798_v37 = vsub.f32 1.0, %v797_v54  ;;  %v791_v35 = vrot.slane %v785_v58, %v6727_v16 }
 0x13e   : > { %v738_v31 = vadd.f32 %v736_v46, %v724_v40  ;;  %v6161_v30 = vpop.f32.mrb[20].mxu0  ;;  %v811_v40 = vand.u32 2147483647, %v5588_v59 }
 0x13f   : > { %v751_v48 = vmul.f32 %v6161_v30, %v749_v42  ;;  %v510_v51 = vpop.f32.mrb[21].mxu0  ;;  %v799_v39 = vmax.f32 %v798_v37, 0.0  ;;  %v136_v37 = vld [vmem:[%s6717_s24 + $0x5] sm:$0x1] }
 0x140   : > { %v750_v55 = vmul.f32 %v749_v42, %v510_v51  ;;  %v812_v42 = vsub.f32 1.0, %v811_v40  ;;  %v826_v40 = vrot.slane %v6720_v2, 7 }
 0x141   : > { %v753_v53 = vadd.f32 %v751_v48, %v739_v47  ;;  %v805_v51 = vrot.slane %v799_v39, %v6727_v16  ;;  %v857_v39 = vrot.slane %v6723_v3, 2 }
 0x142   : > { %v752_v34 = vadd.f32 %v750_v55, %v738_v31  ;;  %v6164_v32 = vpop.f32.mrb[22].mxu0  ;;  %v813_v52 = vmax.f32 %v812_v42, 0.0  ;;  %v7001_v42 = vrot.slane %v136_v37, 4 }
 0x143   : > { %v765_v57 = vmul.f32 %v6164_v32, %v763_v49  ;;  %v520_v60 = vpop.f32.mrb[23].mxu0 }
 0x144   : > { %v764_v36 = vmul.f32 %v763_v49, %v520_v60  ;;  %v819_v32 = vrot.slane %v813_v52, %v6727_v16  ;;  %8257 = vst [vmem:[#allocation16_spill] sm:$0xff] %v7001_v42 }
 0x145   : > { %v767_v41 = vadd.f32 %v765_v57, %v753_v53 }
 0x146   : > { %v766_v44 = vadd.f32 %v764_v36, %v752_v34  ;;  %v6167_v45 = vpop.f32.mrb[24].mxu0  ;;  %v834_v36 = vrot.slane %v6723_v3, 6 }
 0x147   : > { %v779_v38 = vmul.f32 %v6167_v45, %v777_v56  ;;  %v530_v43 = vpop.f32.mrb[25].mxu0 }
 0x148   : > { %v778_v46 = vmul.f32 %v777_v56, %v530_v43  ;;  %v847_v43 = vrot.slane %v6958_v33, 4 }
 0x149   : > { %v781_v47 = vadd.f32 %v779_v38, %v767_v41 }
 0x14a   : > { %v780_v31 = vadd.f32 %v778_v46, %v766_v44  ;;  %v6170_v30 = vpop.f32.mrb[26].mxu0 }
 0x14b   : > { %v793_v50 = vmul.f32 %v6170_v30, %v791_v35  ;;  %v540_v48 = vpop.f32.mrb[27].mxu0 }
 0x14c   : > { %v792_v49 = vmul.f32 %v791_v35, %v540_v48  ;;  %v850_v35 = vrot.slane %v6720_v2, 3 }
 0x14d   : > { %v795_v54 = vadd.f32 %v793_v50, %v781_v47 }
 0x14e   : > { %v794_v59 = vadd.f32 %v792_v49, %v780_v31  ;;  %v6173_v55 = vpop.f32.mrb[28].mxu0 }
 0x14f   : > { %v807_v53 = vmul.f32 %v6173_v55, %v805_v51  ;;  %v550_v34 = vpop.f32.mrb[29].mxu0 }
 0x150   : > { %v806_v57 = vmul.f32 %v805_v51, %v550_v34 }
 0x151   : > { %v809_v60 = vadd.f32 %v807_v53, %v795_v54 }
 0x152   : > { %v808_v56 = vadd.f32 %v806_v57, %v794_v59  ;;  %v6176_v58 = vpop.f32.mrb[30].mxu0 }
 0x153   : > { %v821_v41 = vmul.f32 %v6176_v58, %v819_v32  ;;  %v560_v44 = vpop.f32.mrb[31].mxu0 }
 0x154   : > { %v820_v45 = vmul.f32 %v819_v32, %v560_v44 }
 0x155   : > { %v823_v38 = vadd.f32 %v821_v41, %v809_v60 }
 0x156   : > { %v7003_v46 = vadd.f32 %v820_v45, %v808_v56 }
 0x157   : > { %v869_v47 = vmul.f32 %v823_v38, %v6958_v33  ;;  %v870_v31 = vmul.f32 %v826_v40, %v823_v38  ;;  %v875_v30 = vmul.f32 %v834_v36, %v823_v38  ;;  %v885_v50 = vrot.slane %v823_v38, 5 }
 0x158   : > { %v914_v48 = vrot.slane %v823_v38, 6  ;;  %v824_v51 = vmul.f32 %v7003_v46, %v6958_v33  ;;  %v828_v52 = vmul.f32 %v826_v40, %v7003_v46  ;;  %v836_v49 = vmul.f32 %v834_v36, %v7003_v46 }
 0x159   : > { %v872_v54 = vrot.slane %v870_v31, 1  ;;  %v877_v59 = vrot.slane %v875_v30, 2  ;;  %v842_v55 = vrot.slane %v7003_v46, 3  ;;  %v849_v53 = vmul.f32 %v847_v43, %v7003_v46 }
 0x15a   : > { %v830_v34 = vrot.slane %v828_v52, 1  ;;  %v838_v32 = vrot.slane %v836_v49, 2  ;;  %v852_v57 = vmul.f32 %v850_v35, %v7003_v46  ;;  %v859_v60 = vmul.f32 %v857_v39, %v7003_v46  ;;  %v7019_v35 = vld [vmem:[%s6717_s24 + $0x6] sm:$0x1] }
 0x15b   : > { %v874_v56 = vadd.f32 %v872_v54, %v869_v47  ;;  %v881_v58 = vrot.slane %v823_v38, 3  ;;  %v887_v37 = vmul.f32 %v885_v50, %v7003_v46  ;;  %v893_v40 = vrot.slane %v823_v38, 7  ;;  %8258 = vst [vmem:[#allocation17_spill] sm:$0xff] %v7019_v35  ;;  %v7024_v54 = vld [vmem:[%s6717_s24 + $0x4] sm:$0x1] }
 0x15c   : > { %v832_v36 = vadd.f32 %v830_v34, %v824_v51  ;;  %v854_v41 = vrot.slane %v852_v57, 1  ;;  %v861_v44 = vrot.slane %v859_v60, 2  ;;  %v896_v45 = vrot.slane %v823_v38, 1  ;;  %8259 = vst [vmem:[#allocation18_spill] sm:$0xff] %v7024_v54 }
 0x15d   : > { %v879_v31 = vadd.f32 %v877_v59, %v874_v56  ;;  %v888_v43 = vmul.f32 %v881_v58, %v7003_v46  ;;  %v895_v30 = vmul.f32 %v893_v40, %v7003_v46  ;;  %v903_v52 = vrot.slane %v7003_v46, 5 }
 0x15e   : > { %v840_v39 = vadd.f32 %v838_v32, %v832_v36  ;;  %v856_v47 = vadd.f32 %v854_v41, %v849_v53  ;;  %v898_v49 = vmul.f32 %v896_v45, %v7003_v46  ;;  %v906_v50 = vmul.f32 %v842_v55, %v7003_v46 }
 0x15f   : > { %v883_v51 = vadd.f32 %v881_v58, %v879_v31  ;;  %v890_v34 = vrot.slane %v888_v43, 1  ;;  %v905_v59 = vmul.f32 %v903_v52, %v7003_v46  ;;  %v911_v57 = vrot.slane %v823_v38, 2 }
 0x160   : > { %v844_v60 = vadd.f32 %v842_v55, %v840_v39  ;;  %v863_v56 = vadd.f32 %v861_v44, %v856_v47  ;;  %v900_v40 = vrot.slane %v898_v49, 7  ;;  %v908_v33 = vrot.slane %v906_v50, 1 }
 0x161   : > { %v884_v29 = vsub.f32 %v883_v51, %v7019_v35  ;;  %v892_v28 = vsub.f32 %v887_v37, %v890_v34  ;;  %v913_v53 = vmul.f32 %v911_v57, %v7003_v46  ;;  %v916_v32 = vmul.f32 %v914_v48, %v7003_v46 }
 0x162   : > { %v845_v36 = vsub.f32 %v844_v60, %v7024_v54  ;;  %v864_v41 = vadd.f32 %v863_v56, %v842_v55  ;;  %v902_v45 = vsub.f32 %v895_v30, %v900_v40  ;;  %v910_v58 = vsub.f32 %v905_v59, %v908_v33 }
 0x163   : > { %v918_v31 = vrot.slane %v916_v32, 6  ;;  %v921_v43 = vrot.slane %v916_v32, 2  ;;  %v924_v38 = vrot.slane %v7003_v46, 2  ;;  %v927_v44 = vrot.slane %v7003_v46, 6 }
 0x164   : > { %v868_v52 = vsub.f32 %v864_v41, %v7001_v42  ;;  %v935_v39 = vrot.slane %v892_v28, 5  ;;  %v946_v47 = vrot.slane %v892_v28, 2  ;;  %v961_v37 = vrot.slane %v845_v36, 3 }
 0x165   : > { %v920_v49 = vsub.f32 %v913_v53, %v918_v31  ;;  %v923_v50 = vsub.f32 %v913_v53, %v921_v43  ;;  %v926_v48 = vmul.f32 %v924_v38, %v7003_v46  ;;  %v929_v51 = vmul.f32 %v927_v44, %v7003_v46 }
 0x166   : > { %v937_v55 = vmul.f32 %v935_v39, %v7003_v46  ;;  %v948_v33 = vmul.f32 %v946_v47, %v7003_v46  ;;  %v963_v30 = vmul.f32 %v961_v37, %v892_v28  ;;  %v965_v34 = vrot.slane %v868_v52, 2 }
 0x167   : > { %v931_v59 = vrot.slane %v929_v51, 6  ;;  %v939_v57 = vrot.slane %v920_v49, 5  ;;  %v973_v60 = vrot.slane %v884_v29, 7  ;;  %v986_v56 = vrot.slane %v845_v36, 2 }
 0x168   : > { %v967_v40 = vmul.f32 %v965_v34, %v902_v45  ;;  %v989_v32 = vrot.slane %v868_v52, 4  ;;  %v996_v41 = vrot.slane %v884_v29, 6  ;;  %v1009_v54 = vrot.slane %v845_v36, 4 }
 0x169   : > { %v933_v42 = vsub.f32 %v926_v48, %v931_v59  ;;  %v941_v53 = vmul.f32 %v939_v57, %v7003_v46  ;;  %v975_v31 = vmul.f32 %v973_v60, %v910_v58  ;;  %v988_v43 = vmul.f32 %v986_v56, %v920_v49 }
 0x16a   : > { %v969_v38 = vrot.slane %v967_v40, 5  ;;  %v991_v44 = vmul.f32 %v989_v32, %v923_v50  ;;  %v1012_v39 = vrot.slane %v868_v52, 3  ;;  %v1019_v27 = vmul.f32 %v910_v58, %v884_v29 }
 0x16b   : > { %v943_v35 = vrot.slane %v941_v53, 1  ;;  %v977_v47 = vrot.slane %v975_v31, 4  ;;  %v998_v37 = vmul.f32 %v996_v41, %v933_v42  ;;  %v1011_v25 = vmul.f32 %v1009_v54, %v892_v28 }
 0x16c   : > { %v971_v51 = vadd.f32 %v969_v38, %v963_v30  ;;  %v993_v26 = vrot.slane %v991_v44, 2  ;;  %v1014_v24 = vmul.f32 %v1012_v39, %v902_v45  ;;  %v950_v23 = vrot.slane %v948_v33, 2 }
 0x16d   : > { %v945_v34 = vadd.f32 %v943_v35, %v937_v55  ;;  %v1000_v59 = vrot.slane %v998_v37, 4  ;;  %v1021_v50 = vrot.slane %v1019_v27, 4  ;;  %v8211_v52 = vmov 1e-08  }
 0x16e   : > { %v979_v22 = vadd.f32 %v977_v47, %v971_v51  ;;  %v995_v48 = vadd.f32 %v993_v26, %v988_v43  ;;  %v1016_v46 = vrot.slane %v1014_v24, 5 }
 0x16f   : > { %v952_v57 = vadd.f32 %v950_v23, %v945_v34 }
 0x170   : > { %v1002_v49 = vadd.f32 %v1000_v59, %v995_v48  ;;  %v1018_v60 = vadd.f32 %v1016_v46, %v1011_v25  ;;  %v981_v28 = vrot.slane %v979_v22, 5 }
 0x171   : > { %v953_v36 = vand.u32 2147483647, %v952_v57  ;;  %vm955_vm1 = vcmp.lt.f32.partialorder %v952_v57, 0.0 }
 0x172   : > { %v956_v42 = vsel %vm955_vm1, -1e-08, %v8211_v52  ;;  %v1023_v29 = vadd.f32 %v1021_v50, %v1018_v60  ;;  %v1004_v35 = vrot.slane %v1002_v49, 6 }
 0x173   : > { %vm954_vm2 = vcmp.lt.f32.partialorder %v953_v36, 1e-08 }
 0x174   : > { %v957_v58 = vsel %vm954_vm2, %v956_v42, %v952_v57  ;;  %v1025_v54 = vrot.slane %v1023_v29, 4 }
 0x175   : > { %6619 = vrcp.f32 %v957_v58 }
 0x17f   : > { %v6620_v45 = vpop.eup %6619 }
 0x180   : > { %v7040_v26 = vmul.f32 %v6620_v45, %v981_v28  ;;  %v1006_v24 = vmul.f32 %v6620_v45, %v1004_v35  ;;  %v1027_v23 = vmul.f32 %v6620_v45, %v1025_v54 }
 0x182   : > { %v5590_v55 = vclamps-f32 %v1006_v24, 100.0  ;;  %v5591_v25 = vclamps-f32 %v1027_v23, 100.0 }
 0x184   : > { %v7043_v27 = vsub.f32 %v6720_v2, %v5590_v55  ;;  %v7046_v33 = vsub.f32 %v6723_v3, %v5591_v25 }
 0x186   : > { %v5593_v30 = vadd.f32 0.004301727, %v7043_v27  ;;  %v5594_v56 = vadd.f32 0.005185783, %v7046_v33 }
 0x188   : > { %v1036_v22 = vmul.f32 1.0514426, %v5593_v30  ;;  %v1038_v40 = vmul.f32 4.2057705, %v5594_v56 }
 0x18a   : > { %v1043_v32 = vadd.f32 1.0, %v1036_v22  ;;  %v1047_v41 = vadd.f32 1.0, %v1038_v40 }
 0x18c   : > { %v1044_v53 = vmul.f32 7.5, %v1043_v32  ;;  %v1048_v31 = vmul.f32 1.5, %v1047_v41 }
 0x18e   : > { %v1045_v43 = vmax.f32 %v1044_v53, 0.0  ;;  %v1049_v38 = vmax.f32 %v1048_v31, 0.0 }
 0x190   : > { %v1046_v44 = vmin.f32 %v1045_v43, 15.0  ;;  %v1050_v39 = vmin.f32 %v1049_v38, 3.0 }
 0x192   : > { %v1054_v2 = vrot.slane %v1046_v44, %v6727_v16  ;;  %v1063_v47 = vand.u32 2147483647, %v1050_v39  ;;  %v5595_v37 = vadd.f32 -1.0, %v1050_v39  ;;  %v5596_v3 = vadd.f32 -2.0, %v1050_v39 }
 0x193   : > { %v5597_v51 = vadd.f32 -3.0, %v1050_v39 }
 0x194   : > { %v1055_v34 = vsub.f32 %v1054_v2, %v6729_v17  ;;  %v1056_v48 = vsub.f32 %v1054_v2, %v6731_v18  ;;  %v1064_v59 = vsub.f32 1.0, %v1063_v47  ;;  %v1073_v46 = vand.u32 2147483647, %v5595_v37 }
 0x195   : > { %v1083_v57 = vand.u32 2147483647, %v5596_v3  ;;  %v1093_v49 = vand.u32 2147483647, %v5597_v51 }
 0x196   : > { %v1057_v60 = vand.u32 2147483647, %v1055_v34  ;;  %v1058_v50 = vand.u32 2147483647, %v1056_v48  ;;  %v1065_v36 = vmax.f32 %v1064_v59, 0.0  ;;  %v1074_v42 = vsub.f32 1.0, %v1073_v46 }
 0x197   : > { %v1084_v29 = vsub.f32 1.0, %v1083_v57  ;;  %v1094_v58 = vsub.f32 1.0, %v1093_v49 }
 0x198   : > { %v1059_v28 = vsub.f32 1.0, %v1057_v60  ;;  %v1060_v35 = vsub.f32 1.0, %v1058_v50  ;;  %v1075_v54 = vmax.f32 %v1074_v42, 0.0  ;;  %v1069_v55 = vrot.slane %v1065_v36, %v6727_v16 }
 0x199   : > { %v1085_v45 = vmax.f32 %v1084_v29, 0.0  ;;  %v1095_v56 = vmax.f32 %v1094_v58, 0.0 }
 0x19a   : > { %v1061_v24 = vmax.f32 %v1059_v28, 0.0  ;;  %v1062_v23 = vmax.f32 %v1060_v35, 0.0  ;;  %v1079_v25 = vrot.slane %v1075_v54, %v6727_v16 }
 0x19b   : > { %v1089_v30 = vrot.slane %v1085_v45, %v6727_v16  ;;  %v1099_v44 = vrot.slane %v1095_v56, %v6727_v16 }
 0x19c   : > { %v1070_v22 = vmul.f32 %v1069_v55, %v1061_v24  ;;  %v1071_v40 = vmul.f32 %v1069_v55, %v1062_v23  ;;  %v1080_v32 = vmul.f32 %v1079_v25, %v1061_v24  ;;  %v1081_v41 = vmul.f32 %v1079_v25, %v1062_v23 }
 0x19d   : > { %v1090_v43 = vmul.f32 %v1089_v30, %v1061_v24  ;;  %v1091_v38 = vmul.f32 %v1089_v30, %v1062_v23  ;;  %v1100_v2 = vmul.f32 %v1099_v44, %v1061_v24  ;;  %v1101_v47 = vmul.f32 %v1099_v44, %v1062_v23 }
 0x19e   : > { %v6513_v53 = vpack.c.bf16 %v1071_v40, %v1070_v22  ;;  %v6517_v31 = vpack.c.bf16 %v1081_v41, %v1080_v32 }
 0x19f   : > { %v6521_v39 = vpack.c.bf16 %v1091_v38, %v1090_v43  ;;  %v6525_v37 = vpack.c.bf16 %v1101_v47, %v1100_v2 }
 0x1a0   : > { %6514 = vmatprep.subr.bf16.mxu1 %v6513_v53 }
 0x1a1   : > { %6516 = vmatpush3.bf16.msra.mxu1 %v6513_v53 }
 0x1a2   : > { %6518 = vmatprep.subr.bf16.mxu1 %v6517_v31 }
 0x1a5   : > { %6520 = vmatpush3.bf16.msra.mxu1 %v6517_v31 }
 0x1a6   : > { %6522 = vmatprep.subr.bf16.mxu1 %v6521_v39 }
 0x1a9   : > { %6524 = vmatpush3.bf16.msra.mxu1 %v6521_v39 }
 0x1aa   : > { %6526 = vmatprep.subr.bf16.mxu1 %v6525_v37 }
 0x1ad   : > { %6528 = vmatpush3.bf16.msra.mxu1 %v6525_v37 }
 0x1b0   : > { %6194 = vmatmul.mubr.msk.f32.vlgmr.msra.gmra.mrb[0].mxu1 %vm247_vm0, %v6743_v61  ;;  %v8260_v61 = vld [vmem:[#allocation4_spill] sm:$0xff] }
 0x1b1   : > { %6196 = vmatprep.mubr.msk.f32.mxu1 %vm247_vm0, %v6748_v62  ;;  %v8261_v62 = vld [vmem:[#allocation5_spill] sm:$0xff] }
 0x1b4   : > { %6197 = vmatmul.mubr.msk.f32.gmra.mrb[2].mxu1 %vm247_vm0, %v6757_v63  ;;  %v8262_v63 = vld [vmem:[#allocation6_spill] sm:$0xff] }
 0x1b5   : > { %6199 = vmatprep.mubr.msk.f32.mxu1 %vm247_vm0, %v6762_v0  ;;  %v8263_v0 = vld [vmem:[#allocation7_spill] sm:$0xff] }
 0x1b8   : > { %6200 = vmatmul.mubr.msk.f32.gmra.mrb[4].mxu1 %vm247_vm0, %v6771_v1  ;;  %v8264_v1 = vld [vmem:[#allocation8_spill] sm:$0xff] }
 0x1b9   : > { %6202 = vmatprep.mubr.msk.f32.mxu1 %vm247_vm0, %v6776_v4  ;;  %v8265_v4 = vld [vmem:[#allocation9_spill] sm:$0xff] }
 0x1bc   : > { %6203 = vmatmul.mubr.msk.f32.gmra.mrb[6].mxu1 %vm247_vm0, %v6785_v5  ;;  %v8266_v5 = vld [vmem:[#allocation10_spill] sm:$0xff] }
 0x1bd   : > { %6205 = vmatprep.mubr.msk.f32.mxu1 %vm247_vm0, %v6790_v6  ;;  %v8267_v6 = vld [vmem:[#allocation11_spill] sm:$0xff] }
 0x1c0   : > { %6206 = vmatmul.mubr.msk.f32.gmra.mrb[8].mxu1 %vm247_vm0, %v6799_v7  ;;  %v8268_v7 = vld [vmem:[#allocation12_spill] sm:$0xff] }
 0x1c1   : > { %6208 = vmatprep.mubr.msk.f32.mxu1 %vm247_vm0, %v6804_v8  ;;  %v8269_v8 = vld [vmem:[#allocation13_spill] sm:$0xff] }
 0x1c4   : > { %6209 = vmatmul.mubr.msk.f32.gmra.mrb[10].mxu1 %vm247_vm0, %v6813_v9  ;;  %v8270_v9 = vld [vmem:[#allocation14_spill] sm:$0xff] }
 0x1c5   : > { %6211 = vmatprep.mubr.msk.f32.mxu1 %vm247_vm0, %v6818_v10  ;;  %v5589_v10 = vclamps-f32 %v7040_v26, 100.0 }
 0x1c8   : > { %6212 = vmatmul.mubr.msk.f32.gmra.mrb[12].mxu1 %vm247_vm0, %v6827_v11  ;;  %v8271_v11 = vld [vmem:[#allocation15_spill] sm:$0xff] }
 0x1c9   : > { %6214 = vmatprep.mubr.msk.f32.mxu1 %vm247_vm0, %v6832_v12  ;;  %v7121_v12 = vsub.f32 %v8271_v11, %v5589_v10 }
 0x1cc   : > { %6215 = vmatmul.mubr.msk.f32.gmra.mrb[14].mxu1 %vm247_vm0, %v6841_v13  ;;  %v5592_v13 = vadd.f32 -0.0016962886, %v7121_v12 }
 0x1cd   : > { %6217 = vmatprep.mubr.msk.f32.mxu1 %vm247_vm0, %v6846_v14 }
 0x1ce   : > { %v1034_v14 = vmul.f32 1.0514426, %v5592_v13 }
 0x1d0   : > { %6218 = vmatmul.mubr.msk.f32.gmra.mrb[16].mxu1 %vm247_vm0, %v6855_v15  ;;  %v1039_v15 = vadd.f32 1.0, %v1034_v14 }
 0x1d1   : > { %6220 = vmatprep.mubr.msk.f32.mxu1 %vm247_vm0, %v6860_v19 }
 0x1d2   : > { %v1040_v19 = vmul.f32 7.5, %v1039_v15 }
 0x1d4   : > { %6221 = vmatmul.mubr.msk.f32.gmra.mrb[18].mxu1 %vm247_vm0, %v6869_v20  ;;  %v1041_v20 = vmax.f32 %v1040_v19, 0.0 }
 0x1d5   : > { %6223 = vmatprep.mubr.msk.f32.mxu1 %vm247_vm0, %v6874_v21 }
 0x1d6   : > { %v7124_v21 = vmin.f32 %v1041_v20, 15.0 }
 0x1d8   : > { %6224 = vmatmul.mubr.msk.f32.gmra.mrb[20].mxu1 %vm247_vm0, %v8260_v61  ;;  %v5630_v3 = vadd.f32 -1.0, %v7124_v21  ;;  %v1487_v51 = vand.u32 2147483647, %v7124_v21  ;;  %v5631_v48 = vadd.f32 -2.0, %v7124_v21  ;;  %v5632_v26 = vadd.f32 -3.0, %v7124_v21 }
 0x1d9   : > { %6226 = vmatprep.mubr.msk.f32.mxu1 %vm247_vm0, %v8261_v62  ;;  %v5633_v42 = vadd.f32 -4.0, %v7124_v21  ;;  %v5634_v23 = vadd.f32 -5.0, %v7124_v21  ;;  %v5635_v41 = vadd.f32 -6.0, %v7124_v21  ;;  %v5636_v62 = vadd.f32 -7.0, %v7124_v21 }
 0x1da   : > { %v1501_v34 = vand.u32 2147483647, %v5630_v3  ;;  %v1488_v59 = vsub.f32 1.0, %v1487_v51  ;;  %v1515_v57 = vand.u32 2147483647, %v5631_v48  ;;  %v5637_v11 = vadd.f32 -8.0, %v7124_v21 }
 0x1db   : > { %v1529_v60 = vand.u32 2147483647, %v5632_v26  ;;  %v1543_v24 = vand.u32 2147483647, %v5633_v42  ;;  %v1557_v38 = vand.u32 2147483647, %v5634_v23 }
 0x1dc   : > { %6227 = vmatmul.mubr.msk.f32.gmra.mrb[22].mxu1 %vm247_vm0, %v8262_v63  ;;  %v1502_v46 = vsub.f32 1.0, %v1501_v34  ;;  %v1489_v49 = vmax.f32 %v1488_v59, 0.0  ;;  %v1516_v36 = vsub.f32 1.0, %v1515_v57  ;;  %v1571_v61 = vand.u32 2147483647, %v5635_v41 }
 0x1dd   : > { %6229 = vmatprep.mubr.msk.f32.mxu1 %vm247_vm0, %v8263_v0  ;;  %v1530_v35 = vsub.f32 1.0, %v1529_v60  ;;  %v1544_v43 = vsub.f32 1.0, %v1543_v24  ;;  %v1585_v10 = vand.u32 2147483647, %v5636_v62  ;;  %v1599_v59 = vand.u32 2147483647, %v5637_v11 }
 0x1de   : > { %v1503_v50 = vmax.f32 %v1502_v46, 0.0  ;;  %v1495_v28 = vrot.slane %v1489_v49, %v6727_v16  ;;  %v1517_v45 = vmax.f32 %v1516_v36, 0.0  ;;  %v1572_v19 = vsub.f32 1.0, %v1571_v61 }
 0x1df   : > { %v1531_v32 = vmax.f32 %v1530_v35, 0.0  ;;  %v5638_v26 = vadd.f32 -9.0, %v7124_v21  ;;  %v1586_v60 = vsub.f32 1.0, %v1585_v10  ;;  %v5639_v35 = vadd.f32 -10.0, %v7124_v21 }
 0x1e0   : > { %6230 = vmatmul.mubr.msk.f32.gmra.mrb[24].mxu1 %vm247_vm0, %v8264_v1  ;;  %v1509_v54 = vrot.slane %v1503_v50, %v6727_v16  ;;  %v1523_v31 = vrot.slane %v1517_v45, %v6727_v16  ;;  %v1545_v1 = vmax.f32 %v1544_v43, 0.0  ;;  %v1573_v49 = vmax.f32 %v1572_v19, 0.0 }
 0x1e1   : > { %6232 = vmatprep.mubr.msk.f32.mxu1 %vm247_vm0, %v8265_v4  ;;  %v1537_v0 = vrot.slane %v1531_v32, %v6727_v16  ;;  %v1558_v4 = vsub.f32 1.0, %v1557_v38  ;;  %v1587_v24 = vmax.f32 %v1586_v60, 0.0  ;;  %v1600_v23 = vsub.f32 1.0, %v1599_v59 }
 0x1e2   : > { %v1551_v14 = vrot.slane %v1545_v1, %v6727_v16  ;;  %v1579_v45 = vrot.slane %v1573_v49, %v6727_v16  ;;  %v5640_v41 = vadd.f32 -11.0, %v7124_v21  ;;  %v1627_v38 = vand.u32 2147483647, %v5639_v35 }
 0x1e3   : > { %v1559_v15 = vmax.f32 %v1558_v4, 0.0  ;;  %v1601_v43 = vmax.f32 %v1600_v23, 0.0  ;;  %v5641_v4 = vadd.f32 -12.0, %v7124_v21  ;;  %v5642_v19 = vadd.f32 -13.0, %v7124_v21 }
 0x1e4   : > { %6233 = vmatmul.mubr.msk.f32.gmra.mrb[26].mxu1 %vm247_vm0, %v8266_v5  ;;  %v1641_v62 = vand.u32 2147483647, %v5640_v41  ;;  %v1628_v1 = vsub.f32 1.0, %v1627_v38  ;;  %v5644_v35 = vadd.f32 -15.0, %v7124_v21 }
 0x1e5   : > { %6235 = vmatprep.mubr.msk.f32.mxu1 %vm247_vm0, %v8267_v6  ;;  %v1565_v57 = vrot.slane %v1559_v15, %v6727_v16  ;;  %v1655_v15 = vand.u32 2147483647, %v5641_v4  ;;  %v1669_v60 = vand.u32 2147483647, %v5642_v19 }
 0x1e6   : > { %v1642_v11 = vsub.f32 1.0, %v1641_v62 }
 0x1e7   : > { %v1656_v49 = vsub.f32 1.0, %v1655_v15  ;;  %v1670_v23 = vsub.f32 1.0, %v1669_v60  ;;  %v1733_v60 = vrot.slane %v7121_v12, 4 }
 0x1e8   : > { %6236 = vmatmul.mubr.msk.f32.gmra.mrb[28].mxu1 %vm247_vm0, %v8268_v7  ;;  %v1643_v59 = vmax.f32 %v1642_v11, 0.0 }
 0x1e9   : > { %6238 = vmatprep.mubr.msk.f32.mxu1 %vm247_vm0, %v8269_v8 }
 0x1ec   : > { %6239 = vmatmul.mubr.msk.f32.gmra.mrb[30].mxu1 %vm247_vm0, %v8270_v9 }
 0x283   : > { %v6195_v29 = vpop.f32.mrb[0].mxu1 }
 0x284   : > { %v1296_v58 = vpop.f32.mrb[1].mxu1  ;;  %v1497_v25 = vmul.f32 %v6195_v29, %v1495_v28 }
 0x285   : > { %v1496_v22 = vmul.f32 %v1495_v28, %v1296_v58  ;;  %v1613_v28 = vand.u32 2147483647, %v5638_v26  ;;  %v5643_v26 = vadd.f32 -14.0, %v7124_v21 }
 0x287   : > { %v6198_v55 = vpop.f32.mrb[2].mxu1  ;;  %v1614_v32 = vsub.f32 1.0, %v1613_v28  ;;  %v1683_v28 = vand.u32 2147483647, %v5643_v26 }
 0x288   : > { %v1511_v30 = vmul.f32 %v6198_v55, %v1509_v54  ;;  %v1306_v56 = vpop.f32.mrb[3].mxu1  ;;  %v1985_v55 = vld [vmem:[%s8193_s1] sm:$0xff] }
 0x289   : > { %v1510_v40 = vmul.f32 %v1509_v54, %v1306_v56  ;;  %6257 = vmatprep.mubr.msk.f32.mxu0 %vm247_vm0, %v1985_v55  ;;  %6321 = vmatprep.mubr.msk.f32.mxu1 %vm247_vm0, %v1985_v55  ;;  %v1615_v61 = vmax.f32 %v1614_v32, 0.0 }
 0x28a   : > { %v1513_v53 = vadd.f32 %v1511_v30, %v1497_v25 }
 0x28b   : > { %v1512_v44 = vadd.f32 %v1510_v40, %v1496_v22  ;;  %v6201_v39 = vpop.f32.mrb[4].mxu1  ;;  %v1621_v10 = vrot.slane %v1615_v61, %v6727_v16 }
 0x28c   : > { %v1525_v2 = vmul.f32 %v6201_v39, %v1523_v31  ;;  %v1316_v47 = vpop.f32.mrb[5].mxu1 }
 0x28d   : > { %v1524_v37 = vmul.f32 %v1523_v31, %v1316_v47  ;;  %v1593_v31 = vrot.slane %v1587_v24, %v6727_v16  ;;  %v1657_v24 = vmax.f32 %v1656_v49, 0.0 }
 0x28e   : > { %v1527_v63 = vadd.f32 %v1525_v2, %v1513_v53 }
 0x28f   : > { %v1526_v5 = vadd.f32 %v1524_v37, %v1512_v44  ;;  %v6204_v6 = vpop.f32.mrb[6].mxu1  ;;  %v1663_v41 = vrot.slane %v1657_v24, %v6727_v16 }
 0x290   : > { %v1539_v7 = vmul.f32 %v6204_v6, %v1537_v0  ;;  %v1326_v8 = vpop.f32.mrb[7].mxu1 }
 0x291   : > { %v1538_v9 = vmul.f32 %v1537_v0, %v1326_v8  ;;  %v1607_v0 = vrot.slane %v1601_v43, %v6727_v16 }
 0x292   : > { %v1541_v13 = vadd.f32 %v1539_v7, %v1527_v63 }
 0x293   : > { %v1540_v20 = vadd.f32 %v1538_v9, %v1526_v5  ;;  %v6207_v3 = vpop.f32.mrb[8].mxu1 }
 0x294   : > { %v1553_v51 = vmul.f32 %v6207_v3, %v1551_v14  ;;  %v1336_v34 = vpop.f32.mrb[9].mxu1 }
 0x295   : > { %v1552_v48 = vmul.f32 %v1551_v14, %v1336_v34  ;;  %v1629_v14 = vmax.f32 %v1628_v1, 0.0 }
 0x296   : > { %v1555_v46 = vadd.f32 %v1553_v51, %v1541_v13 }
 0x297   : > { %v1554_v50 = vadd.f32 %v1552_v48, %v1540_v20  ;;  %v6210_v36 = vpop.f32.mrb[10].mxu1 }
 0x298   : > { %v1567_v42 = vmul.f32 %v6210_v36, %v1565_v57  ;;  %v1346_v29 = vpop.f32.mrb[11].mxu1 }
 0x299   : > { %v1566_v58 = vmul.f32 %v1565_v57, %v1346_v29  ;;  %v1635_v57 = vrot.slane %v1629_v14, %v6727_v16 }
 0x29a   : > { %v1569_v54 = vadd.f32 %v1567_v42, %v1555_v46 }
 0x29b   : > { %v1568_v25 = vadd.f32 %v1566_v58, %v1554_v50  ;;  %v6213_v30 = vpop.f32.mrb[12].mxu1 }
 0x29c   : > { %v1581_v56 = vmul.f32 %v6213_v30, %v1579_v45  ;;  %v1356_v22 = vpop.f32.mrb[13].mxu1 }
 0x29d   : > { %v1580_v40 = vmul.f32 %v1579_v45, %v1356_v22  ;;  %v1649_v45 = vrot.slane %v1643_v59, %v6727_v16  ;;  %v1720_v59 = vrot.slane %v7046_v33, 6 }
 0x29e   : > { %v1583_v53 = vadd.f32 %v1581_v56, %v1569_v54 }
 0x29f   : > { %v1582_v44 = vadd.f32 %v1580_v40, %v1568_v25  ;;  %v6216_v39 = vpop.f32.mrb[14].mxu1  ;;  %v1697_v40 = vand.u32 2147483647, %v5644_v35 }
 0x2a0   : > { %v1595_v2 = vmul.f32 %v6216_v39, %v1593_v31  ;;  %v1366_v47 = vpop.f32.mrb[15].mxu1 }
 0x2a1   : > { %v1594_v37 = vmul.f32 %v1593_v31, %v1366_v47  ;;  %v1684_v31 = vsub.f32 1.0, %v1683_v28  ;;  %v1698_v61 = vsub.f32 1.0, %v1697_v40 }
 0x2a2   : > { %v1597_v63 = vadd.f32 %v1595_v2, %v1583_v53  ;;  %v1671_v53 = vmax.f32 %v1670_v23, 0.0 }
 0x2a3   : > { %v1596_v5 = vadd.f32 %v1594_v37, %v1582_v44  ;;  %v6219_v6 = vpop.f32.mrb[16].mxu1  ;;  %v1685_v37 = vmax.f32 %v1684_v31, 0.0 }
 0x2a4   : > { %v1609_v7 = vmul.f32 %v6219_v6, %v1607_v0  ;;  %v1376_v8 = vpop.f32.mrb[17].mxu1  ;;  %v1677_v47 = vrot.slane %v1671_v53, %v6727_v16 }
 0x2a5   : > { %v1608_v9 = vmul.f32 %v1607_v0, %v1376_v8  ;;  %v1691_v6 = vrot.slane %v1685_v37, %v6727_v16 }
 0x2a6   : > { %v1611_v13 = vadd.f32 %v1609_v7, %v1597_v63  ;;  %v1699_v7 = vmax.f32 %v1698_v61, 0.0 }
 0x2a7   : > { %v1610_v20 = vadd.f32 %v1608_v9, %v1596_v5  ;;  %v6222_v3 = vpop.f32.mrb[18].mxu1 }
 0x2a8   : > { %v1623_v51 = vmul.f32 %v6222_v3, %v1621_v10  ;;  %v1386_v34 = vpop.f32.mrb[19].mxu1  ;;  %v1705_v15 = vrot.slane %v1699_v7, %v6727_v16 }
 0x2a9   : > { %v1622_v48 = vmul.f32 %v1621_v10, %v1386_v34 }
 0x2aa   : > { %v1625_v46 = vadd.f32 %v1623_v51, %v1611_v13 }
 0x2ab   : > { %v1624_v50 = vadd.f32 %v1622_v48, %v1610_v20  ;;  %v6225_v36 = vpop.f32.mrb[20].mxu1  ;;  %v1712_v48 = vrot.slane %v7043_v27, 7 }
 0x2ac   : > { %v1637_v42 = vmul.f32 %v6225_v36, %v1635_v57  ;;  %v1396_v29 = vpop.f32.mrb[21].mxu1 }
 0x2ad   : > { %v1636_v58 = vmul.f32 %v1635_v57, %v1396_v29  ;;  %v1743_v57 = vrot.slane %v7046_v33, 2 }
 0x2ae   : > { %v1639_v54 = vadd.f32 %v1637_v42, %v1625_v46  ;;  %v1736_v46 = vrot.slane %v7043_v27, 3 }
 0x2af   : > { %v1638_v55 = vadd.f32 %v1636_v58, %v1624_v50  ;;  %v6228_v25 = vpop.f32.mrb[22].mxu1 }
 0x2b0   : > { %v1651_v30 = vmul.f32 %v6228_v25, %v1649_v45  ;;  %v1406_v56 = vpop.f32.mrb[23].mxu1 }
 0x2b1   : > { %v1650_v22 = vmul.f32 %v1649_v45, %v1406_v56 }
 0x2b2   : > { %v1653_v32 = vadd.f32 %v1651_v30, %v1639_v54 }
 0x2b3   : > { %v1652_v43 = vadd.f32 %v1650_v22, %v1638_v55  ;;  %v6231_v38 = vpop.f32.mrb[24].mxu1 }
 0x2b4   : > { %v1665_v44 = vmul.f32 %v6231_v38, %v1663_v41  ;;  %v1416_v21 = vpop.f32.mrb[25].mxu1 }
 0x2b5   : > { %v1664_v39 = vmul.f32 %v1663_v41, %v1416_v21 }
 0x2b6   : > { %v1667_v2 = vadd.f32 %v1665_v44, %v1653_v32 }
 0x2b7   : > { %v1666_v62 = vadd.f32 %v1664_v39, %v1652_v43  ;;  %v6234_v63 = vpop.f32.mrb[26].mxu1 }
 0x2b8   : > { %v1679_v0 = vmul.f32 %v6234_v63, %v1677_v47  ;;  %v1426_v1 = vpop.f32.mrb[27].mxu1 }
 0x2b9   : > { %v1678_v4 = vmul.f32 %v1677_v47, %v1426_v1 }
 0x2ba   : > { %v1681_v5 = vadd.f32 %v1679_v0, %v1667_v2 }
 0x2bb   : > { %v1680_v8 = vadd.f32 %v1678_v4, %v1666_v62  ;;  %v6237_v9 = vpop.f32.mrb[28].mxu1 }
 0x2bc   : > { %v1693_v10 = vmul.f32 %v6237_v9, %v1691_v6  ;;  %v1436_v11 = vpop.f32.mrb[29].mxu1 }
 0x2bd   : > { %v1692_v13 = vmul.f32 %v1691_v6, %v1436_v11 }
 0x2be   : > { %v1695_v14 = vadd.f32 %v1693_v10, %v1681_v5 }
 0x2bf   : > { %v1694_v19 = vadd.f32 %v1692_v13, %v1680_v8  ;;  %v6240_v20 = vpop.f32.mrb[30].mxu1 }
 0x2c0   : > { %v1707_v3 = vmul.f32 %v6240_v20, %v1705_v15  ;;  %v1446_v51 = vpop.f32.mrb[31].mxu1 }
 0x2c1   : > { %v1706_v34 = vmul.f32 %v1705_v15, %v1446_v51  ;;  %v8272_v15 = vld [vmem:[#allocation17_spill] sm:$0xff] }
 0x2c2   : > { %v1709_v26 = vadd.f32 %v1707_v3, %v1695_v14 }
 0x2c3   : > { %v7167_v49 = vadd.f32 %v1706_v34, %v1694_v19 }
 0x2c4   : > { %v1752_v50 = vmul.f32 %v1709_v26, %v7121_v12  ;;  %v1753_v36 = vmul.f32 %v1712_v48, %v1709_v26  ;;  %v1758_v42 = vmul.f32 %v1720_v59, %v1709_v26  ;;  %v1764_v29 = vrot.slane %v1709_v26, 3 }
 0x2c5   : > { %v1768_v58 = vrot.slane %v1709_v26, 5  ;;  %v1776_v28 = vrot.slane %v1709_v26, 7  ;;  %v1779_v35 = vrot.slane %v1709_v26, 1  ;;  %v1794_v54 = vrot.slane %v1709_v26, 2 }
 0x2c6   : > { %v1755_v45 = vrot.slane %v1753_v36, 1  ;;  %v1760_v24 = vrot.slane %v1758_v42, 2  ;;  %v1797_v23 = vrot.slane %v1709_v26, 6  ;;  %v1710_v55 = vmul.f32 %v7167_v49, %v7121_v12  ;;  %v8273_v26 = vld [vmem:[#allocation18_spill] sm:$0xff]  ;;  %v8274_v36 = vld [vmem:[#allocation16_spill] sm:$0xff] }
 0x2c7   : > { %v1714_v25 = vmul.f32 %v1712_v48, %v7167_v49  ;;  %v1722_v30 = vmul.f32 %v1720_v59, %v7167_v49  ;;  %v1728_v56 = vrot.slane %v7167_v49, 3  ;;  %v1735_v22 = vmul.f32 %v1733_v60, %v7167_v49 }
 0x2c8   : > { %v1757_v40 = vadd.f32 %v1755_v45, %v1752_v50  ;;  %v1738_v32 = vmul.f32 %v1736_v46, %v7167_v49  ;;  %v1745_v41 = vmul.f32 %v1743_v57, %v7167_v49  ;;  %v1770_v53 = vmul.f32 %v1768_v58, %v7167_v49 }
 0x2c9   : > { %v1716_v31 = vrot.slane %v1714_v25, 1  ;;  %v1724_v43 = vrot.slane %v1722_v30, 2  ;;  %v1771_v38 = vmul.f32 %v1764_v29, %v7167_v49  ;;  %v1778_v44 = vmul.f32 %v1776_v28, %v7167_v49 }
 0x2ca   : > { %v1740_v21 = vrot.slane %v1738_v32, 1  ;;  %v1747_v39 = vrot.slane %v1745_v41, 2  ;;  %v1762_v2 = vadd.f32 %v1760_v24, %v1757_v40  ;;  %v1781_v47 = vmul.f32 %v1779_v35, %v7167_v49 }
 0x2cb   : > { %v1718_v37 = vadd.f32 %v1716_v31, %v1710_v55  ;;  %v1773_v61 = vrot.slane %v1771_v38, 1  ;;  %v1786_v62 = vrot.slane %v7167_v49, 5  ;;  %v1789_v63 = vmul.f32 %v1728_v56, %v7167_v49 }
 0x2cc   : > { %v1742_v0 = vadd.f32 %v1740_v21, %v1735_v22  ;;  %v1766_v1 = vadd.f32 %v1764_v29, %v1762_v2  ;;  %v1783_v4 = vrot.slane %v1781_v47, 7  ;;  %v1796_v5 = vmul.f32 %v1794_v54, %v7167_v49 }
 0x2cd   : > { %v1726_v6 = vadd.f32 %v1724_v43, %v1718_v37  ;;  %v1775_v7 = vsub.f32 %v1770_v53, %v1773_v61  ;;  %v1788_v8 = vmul.f32 %v1786_v62, %v7167_v49  ;;  %v1791_v9 = vrot.slane %v1789_v63, 1 }
 0x2ce   : > { %v1749_v10 = vadd.f32 %v1747_v39, %v1742_v0  ;;  %v1785_v11 = vsub.f32 %v1778_v44, %v1783_v4  ;;  %v1799_v13 = vmul.f32 %v1797_v23, %v7167_v49  ;;  %v1767_v19 = vsub.f32 %v1766_v1, %v8272_v15 }
 0x2cf   : > { %v1730_v14 = vadd.f32 %v1728_v56, %v1726_v6  ;;  %v1793_v20 = vsub.f32 %v1788_v8, %v1791_v9  ;;  %v1810_v3 = vrot.slane %v7167_v49, 6  ;;  %v1818_v59 = vrot.slane %v1775_v7, 5 }
 0x2d0   : > { %v1750_v51 = vadd.f32 %v1749_v10, %v1728_v56  ;;  %v1801_v34 = vrot.slane %v1799_v13, 6  ;;  %v1804_v48 = vrot.slane %v1799_v13, 2  ;;  %v1807_v57 = vrot.slane %v7167_v49, 2 }
 0x2d1   : > { %v1731_v46 = vsub.f32 %v1730_v14, %v8273_v26  ;;  %v1812_v60 = vmul.f32 %v1810_v3, %v7167_v49  ;;  %v1829_v50 = vrot.slane %v1775_v7, 2  ;;  %v1820_v28 = vmul.f32 %v1818_v59, %v7167_v49 }
 0x2d2   : > { %v1751_v42 = vsub.f32 %v1750_v51, %v8274_v36  ;;  %v1803_v29 = vsub.f32 %v1796_v5, %v1801_v34  ;;  %v1806_v58 = vsub.f32 %v1796_v5, %v1804_v48  ;;  %v1856_v24 = vrot.slane %v1767_v19, 7 }
 0x2d3   : > { %v1814_v35 = vrot.slane %v1812_v60, 6  ;;  %v1831_v54 = vmul.f32 %v1829_v50, %v7167_v49  ;;  %v1844_v45 = vrot.slane %v1731_v46, 3  ;;  %v1869_v25 = vrot.slane %v1731_v46, 2 }
 0x2d4   : > { %v1822_v23 = vrot.slane %v1803_v29, 5  ;;  %v1848_v55 = vrot.slane %v1751_v42, 2  ;;  %v1872_v30 = vrot.slane %v1751_v42, 4  ;;  %v1809_v56 = vmul.f32 %v1807_v57, %v7167_v49 }
 0x2d5   : > { %v1846_v22 = vmul.f32 %v1844_v45, %v1775_v7  ;;  %v1858_v40 = vmul.f32 %v1856_v24, %v1793_v20  ;;  %v1871_v53 = vmul.f32 %v1869_v25, %v1803_v29  ;;  %v1879_v38 = vrot.slane %v1767_v19, 6 }
 0x2d6   : > { %v1824_v32 = vmul.f32 %v1822_v23, %v7167_v49  ;;  %v1850_v41 = vmul.f32 %v1848_v55, %v1785_v11  ;;  %v1874_v31 = vmul.f32 %v1872_v30, %v1806_v58  ;;  %v1816_v43 = vsub.f32 %v1809_v56, %v1814_v35 }
 0x2d7   : > { %v1892_v44 = vrot.slane %v1731_v46, 4  ;;  %v1895_v21 = vrot.slane %v1751_v42, 3  ;;  %v1902_v37 = vmul.f32 %v1793_v20, %v1767_v19  ;;  %v1833_v61 = vrot.slane %v1831_v54, 2 }
 0x2d8   : > { %v1826_v39 = vrot.slane %v1824_v32, 1  ;;  %v1852_v2 = vrot.slane %v1850_v41, 5  ;;  %v1876_v47 = vrot.slane %v1874_v31, 2  ;;  %v1881_v62 = vmul.f32 %v1879_v38, %v1816_v43 }
 0x2d9   : > { %v1894_v63 = vmul.f32 %v1892_v44, %v1775_v7  ;;  %v1897_v0 = vmul.f32 %v1895_v21, %v1785_v11  ;;  %v1860_v5 = vrot.slane %v1858_v40, 4  ;;  %v1904_v15 = vrot.slane %v1902_v37, 4 }
 0x2da   : > { %v1828_v1 = vadd.f32 %v1826_v39, %v1820_v28  ;;  %v1854_v4 = vadd.f32 %v1852_v2, %v1846_v22  ;;  %v1878_v6 = vadd.f32 %v1876_v47, %v1871_v53  ;;  %v1883_v49 = vrot.slane %v1881_v62, 4 }
 0x2db   : > { %v1899_v8 = vrot.slane %v1897_v0, 5 }
 0x2dc   : > { %v1835_v9 = vadd.f32 %v1833_v61, %v1828_v1  ;;  %v1862_v10 = vadd.f32 %v1860_v5, %v1854_v4  ;;  %v1885_v13 = vadd.f32 %v1883_v49, %v1878_v6 }
 0x2dd   : > { %v1901_v14 = vadd.f32 %v1899_v8, %v1894_v63 }
 0x2de   : > { %v1836_v3 = vand.u32 2147483647, %v1835_v9  ;;  %vm1838_vm3 = vcmp.lt.f32.partialorder %v1835_v9, 0.0  ;;  %v1864_v7 = vrot.slane %v1862_v10, 5  ;;  %v1887_v11 = vrot.slane %v1885_v13, 6 }
 0x2df   : > { %v1839_v51 = vsel %vm1838_vm3, -1e-08, %v8211_v52  ;;  %v1906_v19 = vadd.f32 %v1904_v15, %v1901_v14 }
 0x2e0   : > { %vm1837_vm4 = vcmp.lt.f32.partialorder %v1836_v3, 1e-08 }
 0x2e1   : > { %v1840_v20 = vsel %vm1837_vm4, %v1839_v51, %v1835_v9  ;;  %v1908_v34 = vrot.slane %v1906_v19, 4 }
 0x2e2   : > { %6621 = vrcp.f32 %v1840_v20 }
 0x2ec   : > { %v6622_v48 = vpop.eup %6621 }
 0x2ed   : > { %v7199_v59 = vmul.f32 %v6622_v48, %v1864_v7  ;;  %v1889_v26 = vmul.f32 %v6622_v48, %v1887_v11  ;;  %v1910_v46 = vmul.f32 %v6622_v48, %v1908_v34 }
 0x2ef   : > { %v5646_v57 = vclamps-f32 %v1889_v26, 100.0  ;;  %v5647_v60 = vclamps-f32 %v1910_v46, 100.0  ;;  %v7219_v46 = vld [vmem:[%s8193_s1 + $0x8] sm:$0xff] }
 0x2f1   : > { %v7202_v50 = vsub.f32 %v7043_v27, %v5646_v57  ;;  %v7205_v42 = vsub.f32 %v7046_v33, %v5647_v60  ;;  %v7224_v57 = vld [vmem:[%s8193_s1 + $0x10] sm:$0xff]  ;;  %v7233_v60 = vld [vmem:[%s8193_s1 + $0x18] sm:$0xff] }
 0x2f3   : > { %v5649_v29 = vadd.f32 0.004301727, %v7202_v50  ;;  %v5650_v58 = vadd.f32 0.005185783, %v7205_v42 }
 0x2f5   : > { %v1919_v28 = vmul.f32 1.0514426, %v5649_v29  ;;  %v1921_v35 = vmul.f32 4.2057705, %v5650_v58  ;;  %v7238_v29 = vld [vmem:[%s8193_s1 + $0x20] sm:$0xff]  ;;  %v7247_v58 = vld [vmem:[%s8193_s1 + $0x28] sm:$0xff] }
 0x2f7   : > { %v1926_v54 = vadd.f32 1.0, %v1919_v28  ;;  %v1930_v45 = vadd.f32 1.0, %v1921_v35  ;;  %v7252_v28 = vld [vmem:[%s8193_s1 + $0x30] sm:$0xff]  ;;  %v7261_v35 = vld [vmem:[%s8193_s1 + $0x38] sm:$0xff] }
 0x2f9   : > { %v1927_v24 = vmul.f32 7.5, %v1926_v54  ;;  %v1931_v23 = vmul.f32 1.5, %v1930_v45  ;;  %v7266_v54 = vld [vmem:[%s8193_s1 + $0x40] sm:$0xff]  ;;  %v7275_v45 = vld [vmem:[%s8193_s1 + $0x48] sm:$0xff] }
 0x2fb   : > { %v1928_v55 = vmax.f32 %v1927_v24, 0.0  ;;  %v1932_v25 = vmax.f32 %v1931_v23, 0.0  ;;  %v7280_v24 = vld [vmem:[%s8193_s1 + $0x50] sm:$0xff]  ;;  %v7289_v23 = vld [vmem:[%s8193_s1 + $0x58] sm:$0xff] }
 0x2fd   : > { %v1929_v30 = vmin.f32 %v1928_v55, 15.0  ;;  %v1933_v56 = vmin.f32 %v1932_v25, 3.0  ;;  %v7294_v55 = vld [vmem:[%s8193_s1 + $0x60] sm:$0xff]  ;;  %v7303_v25 = vld [vmem:[%s8193_s1 + $0x68] sm:$0xff] }
 0x2ff   : > { %v1937_v27 = vrot.slane %v1929_v30, %v6727_v16  ;;  %v1946_v22 = vand.u32 2147483647, %v1933_v56  ;;  %v5651_v40 = vadd.f32 -1.0, %v1933_v56  ;;  %v5652_v33 = vadd.f32 -2.0, %v1933_v56  ;;  %v7308_v30 = vld [vmem:[%s8193_s1 + $0x70] sm:$0xff] }
 0x300   : > { %v5653_v32 = vadd.f32 -3.0, %v1933_v56  ;;  %v7317_v56 = vld [vmem:[%s8193_s1 + $0x78] sm:$0xff] }
 0x301   : > { %v1938_v41 = vsub.f32 %v1937_v27, %v6729_v17  ;;  %v1939_v53 = vsub.f32 %v1937_v27, %v6731_v18  ;;  %v1947_v31 = vsub.f32 1.0, %v1946_v22  ;;  %v1956_v43 = vand.u32 2147483647, %v5651_v40  ;;  %v7322_v27 = vld [vmem:[%s8193_s1 + $0x80] sm:$0xff]  ;;  %v7331_v22 = vld [vmem:[%s8193_s1 + $0x88] sm:$0xff]  ;;  %v7336_v40 = vld [vmem:[%s8193_s1 + $0x90] sm:$0xff] }
 0x302   : > { %v1966_v38 = vand.u32 2147483647, %v5652_v33  ;;  %v1976_v44 = vand.u32 2147483647, %v5653_v32  ;;  %v7345_v33 = vld [vmem:[%s8193_s1 + $0x98] sm:$0xff]  ;;  %v7350_v32 = vld [vmem:[%s8193_s1 + $0xa0] sm:$0xff] }
 0x303   : > { %v1940_v21 = vand.u32 2147483647, %v1938_v41  ;;  %v1941_v39 = vand.u32 2147483647, %v1939_v53  ;;  %v1948_v2 = vmax.f32 %v1947_v31, 0.0  ;;  %v1957_v47 = vsub.f32 1.0, %v1956_v43 }
 0x304   : > { %v1967_v37 = vsub.f32 1.0, %v1966_v38  ;;  %v1977_v61 = vsub.f32 1.0, %v1976_v44  ;;  %v7359_v41 = vld [vmem:[%s8193_s1 + $0xa8] sm:$0xff]  ;;  %v7364_v53 = vld [vmem:[%s8193_s1 + $0xb0] sm:$0xff]  ;;  %v7373_v31 = vld [vmem:[%s8193_s1 + $0xb8] sm:$0xff] }
 0x305   : > { %v1942_v62 = vsub.f32 1.0, %v1940_v21  ;;  %v1943_v63 = vsub.f32 1.0, %v1941_v39  ;;  %v1958_v0 = vmax.f32 %v1957_v47, 0.0  ;;  %v1952_v6 = vrot.slane %v1948_v2, %v6727_v16  ;;  %8275 = vst [vmem:[#allocation4_spill] sm:$0xff] %v7359_v41  ;;  %8276 = vst [vmem:[#allocation5_spill] sm:$0xff] %v7364_v53  ;;  %v7378_v43 = vld [vmem:[%s8193_s1 + $0xc0] sm:$0xff] }
 0x306   : > { %v1968_v1 = vmax.f32 %v1967_v37, 0.0  ;;  %v1978_v9 = vmax.f32 %v1977_v61, 0.0  ;;  %8277 = vst [vmem:[#allocation6_spill] sm:$0xff] %v7373_v31  ;;  %8278 = vst [vmem:[#allocation7_spill] sm:$0xff] %v7378_v43  ;;  %v7387_v38 = vld [vmem:[%s8193_s1 + $0xc8] sm:$0xff]  ;;  %v7392_v44 = vld [vmem:[%s8193_s1 + $0xd0] sm:$0xff] }
 0x307   : > { %v1944_v4 = vmax.f32 %v1942_v62, 0.0  ;;  %v1945_v5 = vmax.f32 %v1943_v63, 0.0  ;;  %v1962_v49 = vrot.slane %v1958_v0, %v6727_v16  ;;  %8279 = vst [vmem:[#allocation8_spill] sm:$0xff] %v7387_v38  ;;  %8280 = vst [vmem:[#allocation9_spill] sm:$0xff] %v7392_v44  ;;  %v7401_v21 = vld [vmem:[%s8193_s1 + $0xd8] sm:$0xff]  ;;  %v7406_v39 = vld [vmem:[%s8193_s1 + $0xe0] sm:$0xff] }
 0x308   : > { %v1972_v8 = vrot.slane %v1968_v1, %v6727_v16  ;;  %v1982_v7 = vrot.slane %v1978_v9, %v6727_v16  ;;  %8281 = vst [vmem:[#allocation10_spill] sm:$0xff] %v7401_v21  ;;  %8282 = vst [vmem:[#allocation11_spill] sm:$0xff] %v7406_v39  ;;  %v7415_v2 = vld [vmem:[%s8193_s1 + $0xe8] sm:$0xff]  ;;  %v7420_v47 = vld [vmem:[%s8193_s1 + $0xf0] sm:$0xff]  ;;  %v5645_v61 = vclamps-f32 %v7199_v59, 100.0 }
 0x309   : > { %v1953_v10 = vmul.f32 %v1952_v6, %v1944_v4  ;;  %v1954_v13 = vmul.f32 %v1952_v6, %v1945_v5  ;;  %v1963_v14 = vmul.f32 %v1962_v49, %v1944_v4  ;;  %v1964_v15 = vmul.f32 %v1962_v49, %v1945_v5  ;;  %8283 = vst [vmem:[#allocation12_spill] sm:$0xff] %v7415_v2  ;;  %v7429_v37 = vld [vmem:[%s8193_s1 + $0xf8] sm:$0xff] }
 0x30a   : > { %v1973_v19 = vmul.f32 %v1972_v8, %v1944_v4  ;;  %v1974_v20 = vmul.f32 %v1972_v8, %v1945_v5  ;;  %v1983_v34 = vmul.f32 %v1982_v7, %v1944_v4  ;;  %v1984_v48 = vmul.f32 %v1982_v7, %v1945_v5  ;;  %8284 = vst [vmem:[#allocation13_spill] sm:$0xff] %v7420_v47 }
 0x30b   : > { %v6529_v3 = vpack.c.bf16 %v1954_v13, %v1953_v10  ;;  %v6533_v51 = vpack.c.bf16 %v1964_v15, %v1963_v14  ;;  %8285 = vst [vmem:[#allocation14_spill] sm:$0xff] %v7429_v37  ;;  %v7435_v62 = vsub.f32 %v7121_v12, %v5645_v61 }
 0x30c   : > { %v6537_v11 = vpack.c.bf16 %v1974_v20, %v1973_v19  ;;  %v6541_v26 = vpack.c.bf16 %v1984_v48, %v1983_v34 }
 0x30d   : > { %6530 = vmatprep.subr.bf16.mxu0 %v6529_v3  ;;  %8286 = vst [vmem:[#allocation15_spill] sm:$0xff] %v7435_v62  ;;  %v5648_v63 = vadd.f32 -0.0016962886, %v7435_v62 }
 0x30e   : > { %6532 = vmatpush3.bf16.msra.mxu0 %v6529_v3 }
 0x30f   : > { %6534 = vmatprep.subr.bf16.mxu0 %v6533_v51  ;;  %v1917_v0 = vmul.f32 1.0514426, %v5648_v63 }
 0x311   : > { %v1922_v1 = vadd.f32 1.0, %v1917_v0 }
 0x312   : > { %6536 = vmatpush3.bf16.msra.mxu0 %v6533_v51 }
 0x313   : > { %6538 = vmatprep.subr.bf16.mxu0 %v6537_v11  ;;  %v1923_v4 = vmul.f32 7.5, %v1922_v1 }
 0x315   : > { %v1924_v5 = vmax.f32 %v1923_v4, 0.0 }
 0x316   : > { %6540 = vmatpush3.bf16.msra.mxu0 %v6537_v11 }
 0x317   : > { %6542 = vmatprep.subr.bf16.mxu0 %v6541_v26  ;;  %v7438_v6 = vmin.f32 %v1924_v5, 15.0 }
 0x319   : > { %v5686_v49 = vadd.f32 -1.0, %v7438_v6  ;;  %v2370_v8 = vand.u32 2147483647, %v7438_v6  ;;  %v5687_v10 = vadd.f32 -2.0, %v7438_v6  ;;  %v5688_v59 = vadd.f32 -3.0, %v7438_v6 }
 0x31a   : > { %6544 = vmatpush3.bf16.msra.mxu0 %v6541_v26  ;;  %v5689_v20 = vadd.f32 -4.0, %v7438_v6  ;;  %v5690_v0 = vadd.f32 -5.0, %v7438_v6 }
 0x31b   : > { %v2384_v9 = vand.u32 2147483647, %v5686_v49  ;;  %v2371_v13 = vsub.f32 1.0, %v2370_v8  ;;  %v2398_v14 = vand.u32 2147483647, %v5687_v10 }
 0x31c   : > { %v2412_v3 = vand.u32 2147483647, %v5688_v59  ;;  %v2426_v63 = vand.u32 2147483647, %v5689_v20 }
 0x31d   : > { %6258 = vmatmul.mubr.msk.f32.vlgmr.msra.gmra.mrb[32].mxu0 %vm247_vm0, %v7219_v46  ;;  %v2385_v12 = vsub.f32 1.0, %v2384_v9  ;;  %v2372_v15 = vmax.f32 %v2371_v13, 0.0  ;;  %v2399_v19 = vsub.f32 1.0, %v2398_v14  ;;  %v5691_v13 = vadd.f32 -6.0, %v7438_v6 }
 0x31e   : > { %6260 = vmatprep.mubr.msk.f32.mxu0 %vm247_vm0, %v7224_v57  ;;  %v2413_v48 = vsub.f32 1.0, %v2412_v3  ;;  %v2427_v14 = vsub.f32 1.0, %v2426_v63 }
 0x31f   : > { %v2386_v51 = vmax.f32 %v2385_v12, 0.0  ;;  %v2378_v34 = vrot.slane %v2372_v15, %v6727_v16  ;;  %v2400_v61 = vmax.f32 %v2399_v19, 0.0  ;;  %v2440_v15 = vand.u32 2147483647, %v5690_v0 }
 0x320   : > { %v2414_v10 = vmax.f32 %v2413_v48, 0.0  ;;  %v5693_v0 = vadd.f32 -8.0, %v7438_v6 }
 0x321   : > { %6261 = vmatmul.mubr.msk.f32.gmra.mrb[34].mxu0 %vm247_vm0, %v7233_v60  ;;  %v2392_v26 = vrot.slane %v2386_v51, %v6727_v16  ;;  %v2406_v12 = vrot.slane %v2400_v61, %v6727_v16  ;;  %v2441_v48 = vsub.f32 1.0, %v2440_v15 }
 0x322   : > { %6263 = vmatprep.mubr.msk.f32.mxu0 %vm247_vm0, %v7238_v29 }
 0x325   : > { %6264 = vmatmul.mubr.msk.f32.gmra.mrb[36].mxu0 %vm247_vm0, %v7247_v58 }
 0x326   : > { %6266 = vmatprep.mubr.msk.f32.mxu0 %vm247_vm0, %v7252_v28 }
 0x329   : > { %6267 = vmatmul.mubr.msk.f32.gmra.mrb[38].mxu0 %vm247_vm0, %v7261_v35 }
 0x32a   : > { %6269 = vmatprep.mubr.msk.f32.mxu0 %vm247_vm0, %v7266_v54 }
 0x32d   : > { %6270 = vmatmul.mubr.msk.f32.gmra.mrb[40].mxu0 %vm247_vm0, %v7275_v45 }
 0x32e   : > { %6272 = vmatprep.mubr.msk.f32.mxu0 %vm247_vm0, %v7280_v24 }
 0x331   : > { %6273 = vmatmul.mubr.msk.f32.gmra.mrb[42].mxu0 %vm247_vm0, %v7289_v23 }
 0x332   : > { %6275 = vmatprep.mubr.msk.f32.mxu0 %vm247_vm0, %v7294_v55 }
 0x335   : > { %6276 = vmatmul.mubr.msk.f32.gmra.mrb[44].mxu0 %vm247_vm0, %v7303_v25 }
 0x336   : > { %6278 = vmatprep.mubr.msk.f32.mxu0 %vm247_vm0, %v7308_v30 }
 0x339   : > { %6279 = vmatmul.mubr.msk.f32.gmra.mrb[46].mxu0 %vm247_vm0, %v7317_v56 }
 0x33a   : > { %6281 = vmatprep.mubr.msk.f32.mxu0 %vm247_vm0, %v7322_v27 }
 0x33d   : > { %6282 = vmatmul.mubr.msk.f32.gmra.mrb[48].mxu0 %vm247_vm0, %v7331_v22 }
 0x33e   : > { %6284 = vmatprep.mubr.msk.f32.mxu0 %vm247_vm0, %v7336_v40 }
 0x341   : > { %6285 = vmatmul.mubr.msk.f32.gmra.mrb[50].mxu0 %vm247_vm0, %v7345_v33 }
 0x342   : > { %6287 = vmatprep.mubr.msk.f32.mxu0 %vm247_vm0, %v7350_v32 }
 0x345   : > { %6288 = vmatmul.mubr.msk.f32.gmra.mrb[52].mxu0 %vm247_vm0, %v7359_v41 }
 0x346   : > { %6290 = vmatprep.mubr.msk.f32.mxu0 %vm247_vm0, %v7364_v53 }
 0x349   : > { %6291 = vmatmul.mubr.msk.f32.gmra.mrb[54].mxu0 %vm247_vm0, %v7373_v31 }
 0x34a   : > { %6293 = vmatprep.mubr.msk.f32.mxu0 %vm247_vm0, %v7378_v43 }
 0x34d   : > { %6294 = vmatmul.mubr.msk.f32.gmra.mrb[56].mxu0 %vm247_vm0, %v7387_v38 }
 0x34e   : > { %6296 = vmatprep.mubr.msk.f32.mxu0 %vm247_vm0, %v7392_v44 }
 0x351   : > { %6297 = vmatmul.mubr.msk.f32.gmra.mrb[58].mxu0 %vm247_vm0, %v7401_v21 }
 0x352   : > { %6299 = vmatprep.mubr.msk.f32.mxu0 %vm247_vm0, %v7406_v39 }
 0x355   : > { %6300 = vmatmul.mubr.msk.f32.gmra.mrb[60].mxu0 %vm247_vm0, %v7415_v2 }
 0x356   : > { %6302 = vmatprep.mubr.msk.f32.mxu0 %vm247_vm0, %v7420_v47 }
 0x359   : > { %6303 = vmatmul.mubr.msk.f32.gmra.mrb[62].mxu0 %vm247_vm0, %v7429_v37  ;;  %v2454_v37 = vand.u32 2147483647, %v5691_v13 }
 0x35b   : > { %v2455_v13 = vsub.f32 1.0, %v2454_v37  ;;  %v5695_v37 = vadd.f32 -10.0, %v7438_v6 }
 0x3f0   : > { %v6259_v7 = vpop.f32.mrb[32].mxu0 }
 0x3f1   : > { %v2179_v11 = vpop.f32.mrb[33].mxu0  ;;  %v2380_v4 = vmul.f32 %v6259_v7, %v2378_v34  ;;  %v5692_v7 = vadd.f32 -7.0, %v7438_v6 }
 0x3f2   : > { %v2379_v8 = vmul.f32 %v2378_v34, %v2179_v11  ;;  %v2420_v11 = vrot.slane %v2414_v10, %v6727_v16  ;;  %v2428_v34 = vmax.f32 %v2427_v14, 0.0  ;;  %v2482_v14 = vand.u32 2147483647, %v5693_v0 }
 0x3f3   : > { %v2468_v63 = vand.u32 2147483647, %v5692_v7 }
 0x3f4   : > { %v6262_v1 = vpop.f32.mrb[34].mxu0  ;;  %v2483_v0 = vsub.f32 1.0, %v2482_v14 }
 0x3f5   : > { %v2394_v5 = vmul.f32 %v6262_v1, %v2392_v26  ;;  %v2189_v49 = vpop.f32.mrb[35].mxu0  ;;  %v2469_v7 = vsub.f32 1.0, %v2468_v63  ;;  %v5696_v63 = vadd.f32 -11.0, %v7438_v6 }
 0x3f6   : > { %v2393_v9 = vmul.f32 %v2392_v26, %v2189_v49 }
 0x3f7   : > { %v2396_v59 = vadd.f32 %v2394_v5, %v2380_v4  ;;  %v2524_v14 = vand.u32 2147483647, %v5696_v63 }
 0x3f8   : > { %v2395_v3 = vadd.f32 %v2393_v9, %v2379_v8  ;;  %v6265_v51 = vpop.f32.mrb[36].mxu0  ;;  %v2434_v9 = vrot.slane %v2428_v34, %v6727_v16 }
 0x3f9   : > { %v2408_v19 = vmul.f32 %v6265_v51, %v2406_v12  ;;  %v2199_v20 = vpop.f32.mrb[37].mxu0 }
 0x3fa   : > { %v2407_v52 = vmul.f32 %v2406_v12, %v2199_v20  ;;  %v2442_v12 = vmax.f32 %v2441_v48, 0.0 }
 0x3fb   : > { %v2410_v1 = vadd.f32 %v2408_v19, %v2396_v59 }
 0x3fc   : > { %v2409_v26 = vadd.f32 %v2407_v52, %v2395_v3  ;;  %v6268_v49 = vpop.f32.mrb[38].mxu0  ;;  %v5694_v52 = vadd.f32 -9.0, %v7438_v6  ;;  %v2448_v3 = vrot.slane %v2442_v12, %v6727_v16 }
 0x3fd   : > { %v2422_v4 = vmul.f32 %v6268_v49, %v2420_v11  ;;  %v2209_v5 = vpop.f32.mrb[39].mxu0 }
 0x3fe   : > { %v2421_v61 = vmul.f32 %v2420_v11, %v2209_v5  ;;  %v2456_v11 = vmax.f32 %v2455_v13, 0.0  ;;  %v2496_v48 = vand.u32 2147483647, %v5694_v52  ;;  %v2510_v52 = vand.u32 2147483647, %v5695_v37 }
 0x3ff   : > { %v2424_v8 = vadd.f32 %v2422_v4, %v2410_v1 }
 0x400   : > { %v2423_v51 = vadd.f32 %v2421_v61, %v2409_v26  ;;  %v6271_v20 = vpop.f32.mrb[40].mxu0  ;;  %v2462_v61 = vrot.slane %v2456_v11, %v6727_v16  ;;  %v2497_v13 = vsub.f32 1.0, %v2496_v48  ;;  %v5697_v48 = vadd.f32 -12.0, %v7438_v6 }
 0x401   : > { %v2436_v59 = vmul.f32 %v6271_v20, %v2434_v9  ;;  %v2219_v19 = vpop.f32.mrb[41].mxu0 }
 0x402   : > { %v2435_v10 = vmul.f32 %v2434_v9, %v2219_v19  ;;  %v2470_v9 = vmax.f32 %v2469_v7, 0.0  ;;  %v2498_v7 = vmax.f32 %v2497_v13, 0.0  ;;  %v5698_v13 = vadd.f32 -13.0, %v7438_v6 }
 0x403   : > { %v2438_v15 = vadd.f32 %v2436_v59, %v2424_v8 }
 0x404   : > { %v2437_v49 = vadd.f32 %v2435_v10, %v2423_v51  ;;  %v6274_v5 = vpop.f32.mrb[42].mxu0  ;;  %v2476_v10 = vrot.slane %v2470_v9, %v6727_v16  ;;  %v2504_v37 = vrot.slane %v2498_v7, %v6727_v16 }
 0x405   : > { %v2450_v1 = vmul.f32 %v6274_v5, %v2448_v3  ;;  %v2229_v4 = vpop.f32.mrb[43].mxu0 }
 0x406   : > { %v2449_v34 = vmul.f32 %v2448_v3, %v2229_v4  ;;  %v2484_v3 = vmax.f32 %v2483_v0, 0.0  ;;  %v2525_v0 = vsub.f32 1.0, %v2524_v14 }
 0x407   : > { %v2452_v26 = vadd.f32 %v2450_v1, %v2438_v15 }
 0x408   : > { %v2451_v20 = vadd.f32 %v2449_v34, %v2437_v49  ;;  %v6277_v19 = vpop.f32.mrb[44].mxu0  ;;  %v2490_v34 = vrot.slane %v2484_v3, %v6727_v16 }
 0x409   : > { %v2464_v8 = vmul.f32 %v6277_v19, %v2462_v61  ;;  %v2239_v59 = vpop.f32.mrb[45].mxu0  ;;  %v2511_v19 = vsub.f32 1.0, %v2510_v52 }
 0x40a   : > { %v2463_v12 = vmul.f32 %v2462_v61, %v2239_v59 }
 0x40b   : > { %v2466_v51 = vadd.f32 %v2464_v8, %v2452_v26 }
 0x40c   : > { %v2465_v5 = vadd.f32 %v2463_v12, %v2451_v20  ;;  %v6280_v4 = vpop.f32.mrb[46].mxu0  ;;  %v2512_v12 = vmax.f32 %v2511_v19, 0.0 }
 0x40d   : > { %v2478_v15 = vmul.f32 %v6280_v4, %v2476_v10  ;;  %v2249_v1 = vpop.f32.mrb[47].mxu0  ;;  %v2538_v4 = vand.u32 2147483647, %v5697_v48 }
 0x40e   : > { %v2477_v11 = vmul.f32 %v2476_v10, %v2249_v1 }
 0x40f   : > { %v2480_v49 = vadd.f32 %v2478_v15, %v2466_v51  ;;  %v2526_v15 = vmax.f32 %v2525_v0, 0.0 }
 0x410   : > { %v2479_v61 = vadd.f32 %v2477_v11, %v2465_v5  ;;  %v6283_v59 = vpop.f32.mrb[48].mxu0  ;;  %v5699_v5 = vadd.f32 -14.0, %v7438_v6  ;;  %v2518_v11 = vrot.slane %v2512_v12, %v6727_v16 }
 0x411   : > { %v2492_v26 = vmul.f32 %v6283_v59, %v2490_v34  ;;  %v2259_v8 = vpop.f32.mrb[49].mxu0  ;;  %v2552_v59 = vand.u32 2147483647, %v5698_v13 }
 0x412   : > { %v2491_v9 = vmul.f32 %v2490_v34, %v2259_v8  ;;  %v2539_v34 = vsub.f32 1.0, %v2538_v4 }
 0x413   : > { %v2494_v20 = vadd.f32 %v2492_v26, %v2480_v49  ;;  %v2566_v26 = vand.u32 2147483647, %v5699_v5  ;;  %v2553_v0 = vsub.f32 1.0, %v2552_v59 }
 0x414   : > { %v2493_v63 = vadd.f32 %v2491_v9, %v2479_v61  ;;  %v6286_v51 = vpop.f32.mrb[50].mxu0  ;;  %v5700_v61 = vadd.f32 -15.0, %v7438_v6  ;;  %v2532_v9 = vrot.slane %v2526_v15, %v6727_v16 }
 0x415   : > { %v2506_v10 = vmul.f32 %v6286_v51, %v2504_v37  ;;  %v2269_v3 = vpop.f32.mrb[51].mxu0 }
 0x416   : > { %v2505_v52 = vmul.f32 %v2504_v37, %v2269_v3  ;;  %v2540_v37 = vmax.f32 %v2539_v34, 0.0  ;;  %v2580_v4 = vand.u32 2147483647, %v5700_v61 }
 0x417   : > { %v2508_v1 = vadd.f32 %v2506_v10, %v2494_v20 }
 0x418   : > { %v2507_v7 = vadd.f32 %v2505_v52, %v2493_v63  ;;  %v6289_v14 = vpop.f32.mrb[52].mxu0  ;;  %v2546_v63 = vrot.slane %v2540_v37, %v6727_v16  ;;  %v2554_v52 = vmax.f32 %v2553_v0, 0.0  ;;  %v2581_v59 = vsub.f32 1.0, %v2580_v4 }
 0x419   : > { %v2520_v49 = vmul.f32 %v6289_v14, %v2518_v11  ;;  %v2279_v19 = vpop.f32.mrb[53].mxu0  ;;  %v2567_v14 = vsub.f32 1.0, %v2566_v26 }
 0x41a   : > { %v2519_v48 = vmul.f32 %v2518_v11, %v2279_v19  ;;  %v2560_v15 = vrot.slane %v2554_v52, %v6727_v16  ;;  %v2582_v0 = vmax.f32 %v2581_v59, 0.0  ;;  %v2616_v59 = vrot.slane %v7435_v62, 4 }
 0x41b   : > { %v2522_v8 = vadd.f32 %v2520_v49, %v2508_v1  ;;  %v2568_v34 = vmax.f32 %v2567_v14, 0.0 }
 0x41c   : > { %v2521_v51 = vadd.f32 %v2519_v48, %v2507_v7  ;;  %v6292_v3 = vpop.f32.mrb[54].mxu0 }
 0x41d   : > { %v2534_v20 = vmul.f32 %v6292_v3, %v2532_v9  ;;  %v2289_v10 = vpop.f32.mrb[55].mxu0  ;;  %v2574_v37 = vrot.slane %v2568_v34, %v6727_v16 }
 0x41e   : > { %v2533_v12 = vmul.f32 %v2532_v9, %v2289_v10 }
 0x41f   : > { %v2536_v13 = vadd.f32 %v2534_v20, %v2522_v8 }
 0x420   : > { %v2535_v11 = vadd.f32 %v2533_v12, %v2521_v51  ;;  %v6295_v5 = vpop.f32.mrb[56].mxu0 }
 0x421   : > { %v2548_v19 = vmul.f32 %v6295_v5, %v2546_v63  ;;  %v2299_v6 = vpop.f32.mrb[57].mxu0 }
 0x422   : > { %v2547_v1 = vmul.f32 %v2546_v63, %v2299_v6  ;;  %v2603_v6 = vrot.slane %v7205_v42, 6 }
 0x423   : > { %v2550_v49 = vadd.f32 %v2548_v19, %v2536_v13  ;;  %v2588_v13 = vrot.slane %v2582_v0, %v6727_v16  ;;  %v2595_v19 = vrot.slane %v7202_v50, 7 }
 0x424   : > { %v2549_v7 = vadd.f32 %v2547_v1, %v2535_v11  ;;  %v6298_v48 = vpop.f32.mrb[58].mxu0 }
 0x425   : > { %v2562_v3 = vmul.f32 %v6298_v48, %v2560_v15  ;;  %v2309_v9 = vpop.f32.mrb[59].mxu0 }
 0x426   : > { %v2561_v61 = vmul.f32 %v2560_v15, %v2309_v9  ;;  %v2626_v15 = vrot.slane %v7205_v42, 2 }
 0x427   : > { %v2564_v8 = vadd.f32 %v2562_v3, %v2550_v49  ;;  %v2619_v49 = vrot.slane %v7202_v50, 3 }
 0x428   : > { %v2563_v26 = vadd.f32 %v2561_v61, %v2549_v7  ;;  %v6301_v51 = vpop.f32.mrb[60].mxu0 }
 0x429   : > { %v2576_v20 = vmul.f32 %v6301_v51, %v2574_v37  ;;  %v2319_v10 = vpop.f32.mrb[61].mxu0 }
 0x42a   : > { %v2575_v12 = vmul.f32 %v2574_v37, %v2319_v10 }
 0x42b   : > { %v2578_v63 = vadd.f32 %v2576_v20, %v2564_v8 }
 0x42c   : > { %v2577_v52 = vadd.f32 %v2575_v12, %v2563_v26  ;;  %v6304_v14 = vpop.f32.mrb[62].mxu0 }
 0x42d   : > { %v2590_v4 = vmul.f32 %v6304_v14, %v2588_v13  ;;  %v2329_v11 = vpop.f32.mrb[63].mxu0 }
 0x42e   : > { %v2589_v5 = vmul.f32 %v2588_v13, %v2329_v11 }
 0x42f   : > { %v2592_v1 = vadd.f32 %v2590_v4, %v2578_v63 }
 0x430   : > { %v7476_v34 = vadd.f32 %v2589_v5, %v2577_v52 }
 0x431   : > { %v2635_v7 = vmul.f32 %v2592_v1, %v7435_v62  ;;  %v2636_v48 = vmul.f32 %v2595_v19, %v2592_v1  ;;  %v2641_v3 = vmul.f32 %v2603_v6, %v2592_v1  ;;  %v2647_v9 = vrot.slane %v2592_v1, 3 }
 0x432   : > { %v2651_v61 = vrot.slane %v2592_v1, 5  ;;  %v2659_v8 = vrot.slane %v2592_v1, 7  ;;  %v2662_v37 = vrot.slane %v2592_v1, 1  ;;  %v2677_v0 = vrot.slane %v2592_v1, 2 }
 0x433   : > { %v2638_v26 = vrot.slane %v2636_v48, 1  ;;  %v2643_v51 = vrot.slane %v2641_v3, 2  ;;  %v2680_v20 = vrot.slane %v2592_v1, 6  ;;  %v2593_v10 = vmul.f32 %v7476_v34, %v7435_v62 }
 0x434   : > { %v2597_v12 = vmul.f32 %v2595_v19, %v7476_v34  ;;  %v2605_v63 = vmul.f32 %v2603_v6, %v7476_v34  ;;  %v2611_v13 = vrot.slane %v7476_v34, 3  ;;  %v2618_v52 = vmul.f32 %v2616_v59, %v7476_v34 }
 0x435   : > { %v2640_v14 = vadd.f32 %v2638_v26, %v2635_v7  ;;  %v2621_v4 = vmul.f32 %v2619_v49, %v7476_v34  ;;  %v2628_v11 = vmul.f32 %v2626_v15, %v7476_v34  ;;  %v2653_v5 = vmul.f32 %v2651_v61, %v7476_v34 }
 0x436   : > { %v2599_v48 = vrot.slane %v2597_v12, 1  ;;  %v2607_v1 = vrot.slane %v2605_v63, 2  ;;  %v2654_v3 = vmul.f32 %v2647_v9, %v7476_v34  ;;  %v2661_v62 = vmul.f32 %v2659_v8, %v7476_v34 }
 0x437   : > { %v2623_v19 = vrot.slane %v2621_v4, 1  ;;  %v2630_v47 = vrot.slane %v2628_v11, 2  ;;  %v2645_v6 = vadd.f32 %v2643_v51, %v2640_v14  ;;  %v2664_v2 = vmul.f32 %v2662_v37, %v7476_v34 }
 0x438   : > { %v2601_v39 = vadd.f32 %v2599_v48, %v2593_v10  ;;  %v2656_v59 = vrot.slane %v2654_v3, 1  ;;  %v2669_v49 = vrot.slane %v7476_v34, 5  ;;  %v2672_v15 = vmul.f32 %v2611_v13, %v7476_v34  ;;  %v7498_v48 = vld [vmem:[%s6717_s24 + $0x6] sm:$0x1] }
 0x439   : > { %v2625_v7 = vadd.f32 %v2623_v19, %v2618_v52  ;;  %v2649_v61 = vadd.f32 %v2647_v9, %v2645_v6  ;;  %v2666_v26 = vrot.slane %v2664_v2, 7  ;;  %v2679_v12 = vmul.f32 %v2677_v0, %v7476_v34  ;;  %8287 = vst [vmem:[#allocation17_spill] sm:$0xff] %v7498_v48 }
 0x43a   : > { %v2609_v63 = vadd.f32 %v2607_v1, %v2601_v39  ;;  %v2658_v8 = vsub.f32 %v2653_v5, %v2656_v59  ;;  %v2671_v4 = vmul.f32 %v2669_v49, %v7476_v34  ;;  %v2674_v51 = vrot.slane %v2672_v15, 1  ;;  %v7503_v5 = vld [vmem:[%s6717_s24 + $0x4] sm:$0x1] }
 0x43b   : > { %v2632_v14 = vadd.f32 %v2630_v47, %v2625_v7  ;;  %v2668_v37 = vsub.f32 %v2661_v62, %v2666_v26  ;;  %v2682_v10 = vmul.f32 %v2680_v20, %v7476_v34  ;;  %v2650_v3 = vsub.f32 %v2649_v61, %v7498_v48  ;;  %8288 = vst [vmem:[#allocation18_spill] sm:$0xff] %v7503_v5 }
 0x43c   : > { %v2613_v11 = vadd.f32 %v2611_v13, %v2609_v63  ;;  %v2676_v52 = vsub.f32 %v2671_v4, %v2674_v51  ;;  %v2693_v2 = vrot.slane %v7476_v34, 6  ;;  %v2701_v1 = vrot.slane %v2658_v8, 5 }
 0x43d   : > { %v2633_v9 = vadd.f32 %v2632_v14, %v2611_v13  ;;  %v2684_v0 = vrot.slane %v2682_v10, 6  ;;  %v2687_v39 = vrot.slane %v2682_v10, 2  ;;  %v2690_v47 = vrot.slane %v7476_v34, 2 }
 0x43e   : > { %v2614_v19 = vsub.f32 %v2613_v11, %v7503_v5  ;;  %v2695_v62 = vmul.f32 %v2693_v2, %v7476_v34  ;;  %v2712_v20 = vrot.slane %v2658_v8, 2  ;;  %v2703_v15 = vmul.f32 %v2701_v1, %v7476_v34 }
 0x43f   : > { %v2634_v6 = vsub.f32 %v2633_v9, %v8274_v36  ;;  %v2686_v59 = vsub.f32 %v2679_v12, %v2684_v0  ;;  %v2689_v49 = vsub.f32 %v2679_v12, %v2687_v39  ;;  %v2739_v26 = vrot.slane %v2650_v3, 7 }
 0x440   : > { %v2697_v7 = vrot.slane %v2695_v62, 6  ;;  %v2714_v13 = vmul.f32 %v2712_v20, %v7476_v34  ;;  %v2727_v61 = vrot.slane %v2614_v19, 3  ;;  %v2752_v51 = vrot.slane %v2614_v19, 2 }
 0x441   : > { %v2705_v63 = vrot.slane %v2686_v59, 5  ;;  %v2731_v4 = vrot.slane %v2634_v6, 2  ;;  %v2755_v14 = vrot.slane %v2634_v6, 4  ;;  %v2692_v10 = vmul.f32 %v2690_v47, %v7476_v34 }
 0x442   : > { %v2729_v11 = vmul.f32 %v2727_v61, %v2658_v8  ;;  %v2741_v2 = vmul.f32 %v2739_v26, %v2676_v52  ;;  %v2754_v0 = vmul.f32 %v2752_v51, %v2686_v59  ;;  %v2762_v1 = vrot.slane %v2650_v3, 6 }
 0x443   : > { %v2707_v5 = vmul.f32 %v2705_v63, %v7476_v34  ;;  %v2733_v9 = vmul.f32 %v2731_v4, %v2668_v37  ;;  %v2757_v12 = vmul.f32 %v2755_v14, %v2689_v49  ;;  %v2699_v39 = vsub.f32 %v2692_v10, %v2697_v7 }
 0x444   : > { %v2775_v62 = vrot.slane %v2614_v19, 4  ;;  %v2778_v36 = vrot.slane %v2634_v6, 3  ;;  %v2785_v44 = vmul.f32 %v2676_v52, %v2650_v3  ;;  %v2716_v38 = vrot.slane %v2714_v13, 2 }
 0x445   : > { %v2709_v20 = vrot.slane %v2707_v5, 1  ;;  %v2735_v48 = vrot.slane %v2733_v9, 5  ;;  %v2759_v21 = vrot.slane %v2757_v12, 2  ;;  %v2764_v43 = vmul.f32 %v2762_v1, %v2699_v39 }
 0x446   : > { %v2777_v31 = vmul.f32 %v2775_v62, %v2658_v8  ;;  %v2780_v53 = vmul.f32 %v2778_v36, %v2668_v37  ;;  %v2743_v26 = vrot.slane %v2741_v2, 4  ;;  %v2787_v19 = vrot.slane %v2785_v44, 4 }
 0x447   : > { %v2711_v47 = vadd.f32 %v2709_v20, %v2703_v15  ;;  %v2737_v61 = vadd.f32 %v2735_v48, %v2729_v11  ;;  %v2761_v41 = vadd.f32 %v2759_v21, %v2754_v0  ;;  %v2766_v34 = vrot.slane %v2764_v43, 4 }
 0x448   : > { %v2782_v63 = vrot.slane %v2780_v53, 5  ;;  %v8289_v5 = vmov 1e-08  }
 0x449   : > { %v2718_v59 = vadd.f32 %v2716_v38, %v2711_v47  ;;  %v2745_v49 = vadd.f32 %v2743_v26, %v2737_v61  ;;  %v2768_v7 = vadd.f32 %v2766_v34, %v2761_v41 }
 0x44a   : > { %v2784_v4 = vadd.f32 %v2782_v63, %v2777_v31 }
 0x44b   : > { %v2719_v6 = vand.u32 2147483647, %v2718_v59  ;;  %vm2721_vm5 = vcmp.lt.f32.partialorder %v2718_v59, 0.0  ;;  %v2747_v36 = vrot.slane %v2745_v49, 5  ;;  %v2770_v8 = vrot.slane %v2768_v7, 6 }
 0x44c   : > { %v2722_v51 = vsel %vm2721_vm5, -1e-08, %v8289_v5  ;;  %v2789_v3 = vadd.f32 %v2787_v19, %v2784_v4 }
 0x44d   : > { %vm2720_vm6 = vcmp.lt.f32.partialorder %v2719_v6, 1e-08 }
 0x44e   : > { %v2723_v52 = vsel %vm2720_vm6, %v2722_v51, %v2718_v59  ;;  %v2791_v37 = vrot.slane %v2789_v3, 4 }
 0x44f   : > { %6623 = vrcp.f32 %v2723_v52 }
 0x459   : > { %v6624_v48 = vpop.eup %6623 }
 0x45a   : > { %v7514_v21 = vmul.f32 %v6624_v48, %v2747_v36  ;;  %v2772_v53 = vmul.f32 %v6624_v48, %v2770_v8  ;;  %v2793_v43 = vmul.f32 %v6624_v48, %v2791_v37 }
 0x45c   : > { %v5702_v38 = vclamps-f32 %v2772_v53, 100.0  ;;  %v5703_v41 = vclamps-f32 %v2793_v43, 100.0 }
 0x45e   : > { %v7517_v31 = vsub.f32 %v7202_v50, %v5702_v38  ;;  %v7520_v44 = vsub.f32 %v7205_v42, %v5703_v41 }
 0x460   : > { %v5705_v15 = vadd.f32 0.004301727, %v7517_v31  ;;  %v5706_v13 = vadd.f32 0.005185783, %v7520_v44 }
 0x462   : > { %v2802_v14 = vmul.f32 1.0514426, %v5705_v15  ;;  %v2804_v10 = vmul.f32 4.2057705, %v5706_v13 }
 0x464   : > { %v2809_v11 = vadd.f32 1.0, %v2802_v14  ;;  %v2813_v2 = vadd.f32 1.0, %v2804_v10 }
 0x466   : > { %v2810_v9 = vmul.f32 7.5, %v2809_v11  ;;  %v2814_v0 = vmul.f32 1.5, %v2813_v2 }
 0x468   : > { %v2811_v12 = vmax.f32 %v2810_v9, 0.0  ;;  %v2815_v39 = vmax.f32 %v2814_v0, 0.0 }
 0x46a   : > { %v2812_v1 = vmin.f32 %v2811_v12, 15.0  ;;  %v2816_v62 = vmin.f32 %v2815_v39, 3.0 }
 0x46c   : > { %v2820_v50 = vrot.slane %v2812_v1, %v6727_v16  ;;  %v2829_v20 = vand.u32 2147483647, %v2816_v62  ;;  %v5707_v47 = vadd.f32 -1.0, %v2816_v62  ;;  %v5708_v42 = vadd.f32 -2.0, %v2816_v62 }
 0x46d   : > { %v5709_v61 = vadd.f32 -3.0, %v2816_v62 }
 0x46e   : > { %v2821_v26 = vsub.f32 %v2820_v50, %v6729_v17  ;;  %v2822_v34 = vsub.f32 %v2820_v50, %v6731_v18  ;;  %v2830_v63 = vsub.f32 1.0, %v2829_v20  ;;  %v2839_v59 = vand.u32 2147483647, %v5707_v47 }
 0x46f   : > { %v2849_v49 = vand.u32 2147483647, %v5708_v42  ;;  %v2859_v7 = vand.u32 2147483647, %v5709_v61 }
 0x470   : > { %v2823_v4 = vand.u32 2147483647, %v2821_v26  ;;  %v2824_v19 = vand.u32 2147483647, %v2822_v34  ;;  %v2831_v6 = vmax.f32 %v2830_v63, 0.0  ;;  %v2840_v51 = vsub.f32 1.0, %v2839_v59 }
 0x471   : > { %v2850_v3 = vsub.f32 1.0, %v2849_v49  ;;  %v2860_v52 = vsub.f32 1.0, %v2859_v7 }
 0x472   : > { %v2825_v36 = vsub.f32 1.0, %v2823_v4  ;;  %v2826_v8 = vsub.f32 1.0, %v2824_v19  ;;  %v2841_v37 = vmax.f32 %v2840_v51, 0.0  ;;  %v2835_v38 = vrot.slane %v2831_v6, %v6727_v16 }
 0x473   : > { %v2851_v48 = vmax.f32 %v2850_v3, 0.0  ;;  %v2861_v13 = vmax.f32 %v2860_v52, 0.0 }
 0x474   : > { %v2827_v53 = vmax.f32 %v2825_v36, 0.0  ;;  %v2828_v43 = vmax.f32 %v2826_v8, 0.0  ;;  %v2845_v41 = vrot.slane %v2841_v37, %v6727_v16 }
 0x475   : > { %v2855_v15 = vrot.slane %v2851_v48, %v6727_v16  ;;  %v2865_v1 = vrot.slane %v2861_v13, %v6727_v16 }
 0x476   : > { %v2836_v14 = vmul.f32 %v2835_v38, %v2827_v53  ;;  %v2837_v10 = vmul.f32 %v2835_v38, %v2828_v43  ;;  %v2846_v11 = vmul.f32 %v2845_v41, %v2827_v53  ;;  %v2847_v2 = vmul.f32 %v2845_v41, %v2828_v43 }
 0x477   : > { %v2856_v12 = vmul.f32 %v2855_v15, %v2827_v53  ;;  %v2857_v39 = vmul.f32 %v2855_v15, %v2828_v43  ;;  %v2866_v50 = vmul.f32 %v2865_v1, %v2827_v53  ;;  %v2867_v20 = vmul.f32 %v2865_v1, %v2828_v43 }
 0x478   : > { %v6545_v9 = vpack.c.bf16 %v2837_v10, %v2836_v14  ;;  %v6549_v0 = vpack.c.bf16 %v2847_v2, %v2846_v11 }
 0x479   : > { %v6553_v62 = vpack.c.bf16 %v2857_v39, %v2856_v12  ;;  %v6557_v47 = vpack.c.bf16 %v2867_v20, %v2866_v50 }
 0x47a   : > { %6546 = vmatprep.subr.bf16.mxu1 %v6545_v9 }
 0x47b   : > { %6548 = vmatpush3.bf16.msra.mxu1 %v6545_v9 }
 0x47c   : > { %6550 = vmatprep.subr.bf16.mxu1 %v6549_v0 }
 0x47f   : > { %6552 = vmatpush3.bf16.msra.mxu1 %v6549_v0 }
 0x480   : > { %6554 = vmatprep.subr.bf16.mxu1 %v6553_v62 }
 0x483   : > { %6556 = vmatpush3.bf16.msra.mxu1 %v6553_v62 }
 0x484   : > { %6558 = vmatprep.subr.bf16.mxu1 %v6557_v47 }
 0x487   : > { %6560 = vmatpush3.bf16.msra.mxu1 %v6557_v47 }
 0x48a   : > { %6322 = vmatmul.mubr.msk.f32.vlgmr.msra.gmra.mrb[32].mxu1 %vm247_vm0, %v7219_v46  ;;  %v8290_v46 = vld [vmem:[#allocation4_spill] sm:$0xff] }
 0x48b   : > { %6324 = vmatprep.mubr.msk.f32.mxu1 %vm247_vm0, %v7224_v57  ;;  %v8291_v57 = vld [vmem:[#allocation5_spill] sm:$0xff] }
 0x48e   : > { %6325 = vmatmul.mubr.msk.f32.gmra.mrb[34].mxu1 %vm247_vm0, %v7233_v60  ;;  %v8292_v60 = vld [vmem:[#allocation6_spill] sm:$0xff] }
 0x48f   : > { %6327 = vmatprep.mubr.msk.f32.mxu1 %vm247_vm0, %v7238_v29  ;;  %v8293_v29 = vld [vmem:[#allocation7_spill] sm:$0xff] }
 0x492   : > { %6328 = vmatmul.mubr.msk.f32.gmra.mrb[36].mxu1 %vm247_vm0, %v7247_v58  ;;  %v8294_v58 = vld [vmem:[#allocation8_spill] sm:$0xff] }
 0x493   : > { %6330 = vmatprep.mubr.msk.f32.mxu1 %vm247_vm0, %v7252_v28  ;;  %v8295_v28 = vld [vmem:[#allocation9_spill] sm:$0xff] }
 0x496   : > { %6331 = vmatmul.mubr.msk.f32.gmra.mrb[38].mxu1 %vm247_vm0, %v7261_v35  ;;  %v8296_v35 = vld [vmem:[#allocation10_spill] sm:$0xff] }
 0x497   : > { %6333 = vmatprep.mubr.msk.f32.mxu1 %vm247_vm0, %v7266_v54  ;;  %v8297_v54 = vld [vmem:[#allocation11_spill] sm:$0xff] }
 0x49a   : > { %6334 = vmatmul.mubr.msk.f32.gmra.mrb[40].mxu1 %vm247_vm0, %v7275_v45  ;;  %v8298_v45 = vld [vmem:[#allocation12_spill] sm:$0xff] }
 0x49b   : > { %6336 = vmatprep.mubr.msk.f32.mxu1 %vm247_vm0, %v7280_v24  ;;  %v8299_v24 = vld [vmem:[#allocation13_spill] sm:$0xff] }
 0x49e   : > { %6337 = vmatmul.mubr.msk.f32.gmra.mrb[42].mxu1 %vm247_vm0, %v7289_v23  ;;  %v8300_v23 = vld [vmem:[#allocation14_spill] sm:$0xff] }
 0x49f   : > { %6339 = vmatprep.mubr.msk.f32.mxu1 %vm247_vm0, %v7294_v55  ;;  %v5701_v55 = vclamps-f32 %v7514_v21, 100.0 }
 0x4a2   : > { %6340 = vmatmul.mubr.msk.f32.gmra.mrb[44].mxu1 %vm247_vm0, %v7303_v25  ;;  %v8301_v25 = vld [vmem:[#allocation15_spill] sm:$0xff] }
 0x4a3   : > { %6342 = vmatprep.mubr.msk.f32.mxu1 %vm247_vm0, %v7308_v30  ;;  %v7595_v30 = vsub.f32 %v8301_v25, %v5701_v55 }
 0x4a6   : > { %6343 = vmatmul.mubr.msk.f32.gmra.mrb[46].mxu1 %vm247_vm0, %v7317_v56  ;;  %v5704_v56 = vadd.f32 -0.0016962886, %v7595_v30 }
 0x4a7   : > { %6345 = vmatprep.mubr.msk.f32.mxu1 %vm247_vm0, %v7322_v27 }
 0x4a8   : > { %v2800_v27 = vmul.f32 1.0514426, %v5704_v56 }
 0x4aa   : > { %6346 = vmatmul.mubr.msk.f32.gmra.mrb[48].mxu1 %vm247_vm0, %v7331_v22  ;;  %v2805_v22 = vadd.f32 1.0, %v2800_v27 }
 0x4ab   : > { %6348 = vmatprep.mubr.msk.f32.mxu1 %vm247_vm0, %v7336_v40 }
 0x4ac   : > { %v2806_v40 = vmul.f32 7.5, %v2805_v22 }
 0x4ae   : > { %6349 = vmatmul.mubr.msk.f32.gmra.mrb[50].mxu1 %vm247_vm0, %v7345_v33  ;;  %v2807_v33 = vmax.f32 %v2806_v40, 0.0 }
 0x4af   : > { %6351 = vmatprep.mubr.msk.f32.mxu1 %vm247_vm0, %v7350_v32 }
 0x4b0   : > { %v7598_v32 = vmin.f32 %v2807_v33, 15.0 }
 0x4b2   : > { %6352 = vmatmul.mubr.msk.f32.gmra.mrb[52].mxu1 %vm247_vm0, %v8290_v46  ;;  %v5742_v42 = vadd.f32 -1.0, %v7598_v32  ;;  %v3253_v61 = vand.u32 2147483647, %v7598_v32  ;;  %v5743_v34 = vadd.f32 -2.0, %v7598_v32  ;;  %v5744_v21 = vadd.f32 -3.0, %v7598_v32 }
 0x4b3   : > { %6354 = vmatprep.mubr.msk.f32.mxu1 %vm247_vm0, %v8291_v57  ;;  %v5745_v51 = vadd.f32 -4.0, %v7598_v32  ;;  %v5746_v43 = vadd.f32 -5.0, %v7598_v32  ;;  %v5747_v2 = vadd.f32 -6.0, %v7598_v32  ;;  %v5748_v57 = vadd.f32 -7.0, %v7598_v32 }
 0x4b4   : > { %v3267_v26 = vand.u32 2147483647, %v5742_v42  ;;  %v3254_v63 = vsub.f32 1.0, %v3253_v61  ;;  %v3281_v49 = vand.u32 2147483647, %v5743_v34  ;;  %v5749_v25 = vadd.f32 -8.0, %v7598_v32 }
 0x4b5   : > { %v3295_v4 = vand.u32 2147483647, %v5744_v21  ;;  %v3309_v53 = vand.u32 2147483647, %v5745_v51  ;;  %v3323_v39 = vand.u32 2147483647, %v5746_v43 }
 0x4b6   : > { %6355 = vmatmul.mubr.msk.f32.gmra.mrb[54].mxu1 %vm247_vm0, %v8292_v60  ;;  %v3268_v59 = vsub.f32 1.0, %v3267_v26  ;;  %v3255_v7 = vmax.f32 %v3254_v63, 0.0  ;;  %v3282_v6 = vsub.f32 1.0, %v3281_v49  ;;  %v3337_v46 = vand.u32 2147483647, %v5747_v2 }
 0x4b7   : > { %6357 = vmatprep.mubr.msk.f32.mxu1 %vm247_vm0, %v8293_v29  ;;  %v3296_v8 = vsub.f32 1.0, %v3295_v4  ;;  %v3310_v12 = vsub.f32 1.0, %v3309_v53  ;;  %v3351_v55 = vand.u32 2147483647, %v5748_v57  ;;  %v3365_v63 = vand.u32 2147483647, %v5749_v25 }
 0x4b8   : > { %v3269_v19 = vmax.f32 %v3268_v59, 0.0  ;;  %v3261_v36 = vrot.slane %v3255_v7, %v6727_v16  ;;  %v3283_v48 = vmax.f32 %v3282_v6, 0.0  ;;  %v3338_v40 = vsub.f32 1.0, %v3337_v46 }
 0x4b9   : > { %v3297_v11 = vmax.f32 %v3296_v8, 0.0  ;;  %v5750_v21 = vadd.f32 -9.0, %v7598_v32  ;;  %v3352_v4 = vsub.f32 1.0, %v3351_v55  ;;  %v5751_v8 = vadd.f32 -10.0, %v7598_v32 }
 0x4ba   : > { %6358 = vmatmul.mubr.msk.f32.gmra.mrb[56].mxu1 %vm247_vm0, %v8294_v58  ;;  %v3275_v37 = vrot.slane %v3269_v19, %v6727_v16  ;;  %v3289_v0 = vrot.slane %v3283_v48, %v6727_v16  ;;  %v3311_v58 = vmax.f32 %v3310_v12, 0.0  ;;  %v3339_v7 = vmax.f32 %v3338_v40, 0.0 }
 0x4bb   : > { %6360 = vmatprep.mubr.msk.f32.mxu1 %vm247_vm0, %v8295_v28  ;;  %v3303_v29 = vrot.slane %v3297_v11, %v6727_v16  ;;  %v3324_v28 = vsub.f32 1.0, %v3323_v39  ;;  %v3353_v53 = vmax.f32 %v3352_v4, 0.0  ;;  %v3366_v43 = vsub.f32 1.0, %v3365_v63 }
 0x4bc   : > { %v3317_v27 = vrot.slane %v3311_v58, %v6727_v16  ;;  %v3345_v48 = vrot.slane %v3339_v7, %v6727_v16  ;;  %v5752_v2 = vadd.f32 -11.0, %v7598_v32  ;;  %v3393_v39 = vand.u32 2147483647, %v5751_v8 }
 0x4bd   : > { %v3325_v22 = vmax.f32 %v3324_v28, 0.0  ;;  %v3367_v12 = vmax.f32 %v3366_v43, 0.0  ;;  %v5753_v28 = vadd.f32 -12.0, %v7598_v32  ;;  %v5754_v40 = vadd.f32 -13.0, %v7598_v32 }
 0x4be   : > { %6361 = vmatmul.mubr.msk.f32.gmra.mrb[58].mxu1 %vm247_vm0, %v8296_v35  ;;  %v3407_v57 = vand.u32 2147483647, %v5752_v2  ;;  %v3394_v58 = vsub.f32 1.0, %v3393_v39  ;;  %v5756_v8 = vadd.f32 -15.0, %v7598_v32 }
 0x4bf   : > { %6363 = vmatprep.mubr.msk.f32.mxu1 %vm247_vm0, %v8297_v54  ;;  %v3331_v49 = vrot.slane %v3325_v22, %v6727_v16  ;;  %v3421_v22 = vand.u32 2147483647, %v5753_v28  ;;  %v3435_v4 = vand.u32 2147483647, %v5754_v40 }
 0x4c0   : > { %v3408_v25 = vsub.f32 1.0, %v3407_v57 }
 0x4c1   : > { %v3422_v7 = vsub.f32 1.0, %v3421_v22  ;;  %v3436_v43 = vsub.f32 1.0, %v3435_v4  ;;  %v3499_v4 = vrot.slane %v7595_v30, 4 }
 0x4c2   : > { %6364 = vmatmul.mubr.msk.f32.gmra.mrb[60].mxu1 %vm247_vm0, %v8298_v45  ;;  %v3409_v63 = vmax.f32 %v3408_v25, 0.0 }
 0x4c3   : > { %6366 = vmatprep.mubr.msk.f32.mxu1 %vm247_vm0, %v8299_v24 }
 0x4c6   : > { %6367 = vmatmul.mubr.msk.f32.gmra.mrb[62].mxu1 %vm247_vm0, %v8300_v23 }
 0x55d   : > { %v6323_v3 = vpop.f32.mrb[32].mxu1 }
 0x55e   : > { %v3062_v52 = vpop.f32.mrb[33].mxu1  ;;  %v3263_v41 = vmul.f32 %v6323_v3, %v3261_v36 }
 0x55f   : > { %v3262_v14 = vmul.f32 %v3261_v36, %v3062_v52  ;;  %v3379_v36 = vand.u32 2147483647, %v5750_v21  ;;  %v5755_v21 = vadd.f32 -14.0, %v7598_v32 }
 0x561   : > { %v6326_v38 = vpop.f32.mrb[34].mxu1  ;;  %v3380_v11 = vsub.f32 1.0, %v3379_v36  ;;  %v3449_v36 = vand.u32 2147483647, %v5755_v21 }
 0x562   : > { %v3277_v15 = vmul.f32 %v6326_v38, %v3275_v37  ;;  %v3072_v13 = vpop.f32.mrb[35].mxu1  ;;  %v3751_v38 = vld [vmem:[%s8193_s1] sm:$0xff] }
 0x563   : > { %v3276_v10 = vmul.f32 %v3275_v37, %v3072_v13  ;;  %6385 = vmatprep.mubr.msk.f32.mxu0 %vm247_vm0, %v3751_v38  ;;  %6449 = vmatprep.mubr.msk.f32.mxu1 %vm247_vm0, %v3751_v38  ;;  %v3381_v46 = vmax.f32 %v3380_v11, 0.0 }
 0x564   : > { %v3279_v9 = vadd.f32 %v3277_v15, %v3263_v41 }
 0x565   : > { %v3278_v1 = vadd.f32 %v3276_v10, %v3262_v14  ;;  %v6329_v62 = vpop.f32.mrb[36].mxu1  ;;  %v3387_v55 = vrot.slane %v3381_v46, %v6727_v16 }
 0x566   : > { %v3291_v50 = vmul.f32 %v6329_v62, %v3289_v0  ;;  %v3082_v20 = vpop.f32.mrb[37].mxu1 }
 0x567   : > { %v3290_v47 = vmul.f32 %v3289_v0, %v3082_v20  ;;  %v3359_v0 = vrot.slane %v3353_v53, %v6727_v16  ;;  %v3423_v53 = vmax.f32 %v3422_v7, 0.0 }
 0x568   : > { %v3293_v60 = vadd.f32 %v3291_v50, %v3279_v9 }
 0x569   : > { %v3292_v35 = vadd.f32 %v3290_v47, %v3278_v1  ;;  %v6332_v54 = vpop.f32.mrb[38].mxu1  ;;  %v3429_v2 = vrot.slane %v3423_v53, %v6727_v16 }
 0x56a   : > { %v3305_v45 = vmul.f32 %v6332_v54, %v3303_v29  ;;  %v3092_v24 = vpop.f32.mrb[39].mxu1 }
 0x56b   : > { %v3304_v23 = vmul.f32 %v3303_v29, %v3092_v24  ;;  %v3373_v29 = vrot.slane %v3367_v12, %v6727_v16 }
 0x56c   : > { %v3307_v56 = vadd.f32 %v3305_v45, %v3293_v60 }
 0x56d   : > { %v3306_v33 = vadd.f32 %v3304_v23, %v3292_v35  ;;  %v6335_v42 = vpop.f32.mrb[40].mxu1 }
 0x56e   : > { %v3319_v61 = vmul.f32 %v6335_v42, %v3317_v27  ;;  %v3102_v26 = vpop.f32.mrb[41].mxu1 }
 0x56f   : > { %v3318_v34 = vmul.f32 %v3317_v27, %v3102_v26  ;;  %v3395_v27 = vmax.f32 %v3394_v58, 0.0 }
 0x570   : > { %v3321_v59 = vadd.f32 %v3319_v61, %v3307_v56 }
 0x571   : > { %v3320_v19 = vadd.f32 %v3318_v34, %v3306_v33  ;;  %v6338_v6 = vpop.f32.mrb[42].mxu1 }
 0x572   : > { %v3333_v51 = vmul.f32 %v6338_v6, %v3331_v49  ;;  %v3112_v3 = vpop.f32.mrb[43].mxu1 }
 0x573   : > { %v3332_v52 = vmul.f32 %v3331_v49, %v3112_v3  ;;  %v3401_v49 = vrot.slane %v3395_v27, %v6727_v16 }
 0x574   : > { %v3335_v37 = vadd.f32 %v3333_v51, %v3321_v59 }
 0x575   : > { %v3334_v41 = vadd.f32 %v3332_v52, %v3320_v19  ;;  %v6341_v15 = vpop.f32.mrb[44].mxu1 }
 0x576   : > { %v3347_v13 = vmul.f32 %v6341_v15, %v3345_v48  ;;  %v3122_v14 = vpop.f32.mrb[45].mxu1 }
 0x577   : > { %v3346_v10 = vmul.f32 %v3345_v48, %v3122_v14  ;;  %v3415_v48 = vrot.slane %v3409_v63, %v6727_v16  ;;  %v3486_v63 = vrot.slane %v7520_v44, 6 }
 0x578   : > { %v3349_v9 = vadd.f32 %v3347_v13, %v3335_v37 }
 0x579   : > { %v3348_v1 = vadd.f32 %v3346_v10, %v3334_v41  ;;  %v6344_v62 = vpop.f32.mrb[46].mxu1  ;;  %v3463_v10 = vand.u32 2147483647, %v5756_v8 }
 0x57a   : > { %v3361_v50 = vmul.f32 %v6344_v62, %v3359_v0  ;;  %v3132_v20 = vpop.f32.mrb[47].mxu1 }
 0x57b   : > { %v3360_v47 = vmul.f32 %v3359_v0, %v3132_v20  ;;  %v3450_v0 = vsub.f32 1.0, %v3449_v36  ;;  %v3464_v46 = vsub.f32 1.0, %v3463_v10 }
 0x57c   : > { %v3363_v60 = vadd.f32 %v3361_v50, %v3349_v9  ;;  %v3437_v9 = vmax.f32 %v3436_v43, 0.0 }
 0x57d   : > { %v3362_v35 = vadd.f32 %v3360_v47, %v3348_v1  ;;  %v6347_v54 = vpop.f32.mrb[48].mxu1  ;;  %v3451_v47 = vmax.f32 %v3450_v0, 0.0 }
 0x57e   : > { %v3375_v45 = vmul.f32 %v6347_v54, %v3373_v29  ;;  %v3142_v24 = vpop.f32.mrb[49].mxu1  ;;  %v3443_v20 = vrot.slane %v3437_v9, %v6727_v16 }
 0x57f   : > { %v3374_v23 = vmul.f32 %v3373_v29, %v3142_v24  ;;  %v3457_v54 = vrot.slane %v3451_v47, %v6727_v16 }
 0x580   : > { %v3377_v56 = vadd.f32 %v3375_v45, %v3363_v60  ;;  %v3465_v45 = vmax.f32 %v3464_v46, 0.0 }
 0x581   : > { %v3376_v33 = vadd.f32 %v3374_v23, %v3362_v35  ;;  %v6350_v42 = vpop.f32.mrb[50].mxu1 }
 0x582   : > { %v3389_v61 = vmul.f32 %v6350_v42, %v3387_v55  ;;  %v3152_v26 = vpop.f32.mrb[51].mxu1  ;;  %v3471_v22 = vrot.slane %v3465_v45, %v6727_v16 }
 0x583   : > { %v3388_v34 = vmul.f32 %v3387_v55, %v3152_v26 }
 0x584   : > { %v3391_v59 = vadd.f32 %v3389_v61, %v3377_v56 }
 0x585   : > { %v3390_v19 = vadd.f32 %v3388_v34, %v3376_v33  ;;  %v6353_v6 = vpop.f32.mrb[52].mxu1  ;;  %v3478_v34 = vrot.slane %v7517_v31, 7 }
 0x586   : > { %v3403_v51 = vmul.f32 %v6353_v6, %v3401_v49  ;;  %v3162_v3 = vpop.f32.mrb[53].mxu1 }
 0x587   : > { %v3402_v52 = vmul.f32 %v3401_v49, %v3162_v3  ;;  %v3509_v49 = vrot.slane %v7520_v44, 2 }
 0x588   : > { %v3405_v37 = vadd.f32 %v3403_v51, %v3391_v59  ;;  %v3502_v59 = vrot.slane %v7517_v31, 3 }
 0x589   : > { %v3404_v38 = vadd.f32 %v3402_v52, %v3390_v19  ;;  %v6356_v41 = vpop.f32.mrb[54].mxu1 }
 0x58a   : > { %v3417_v15 = vmul.f32 %v6356_v41, %v3415_v48  ;;  %v3172_v13 = vpop.f32.mrb[55].mxu1 }
 0x58b   : > { %v3416_v14 = vmul.f32 %v3415_v48, %v3172_v13 }
 0x58c   : > { %v3419_v11 = vadd.f32 %v3417_v15, %v3405_v37 }
 0x58d   : > { %v3418_v12 = vadd.f32 %v3416_v14, %v3404_v38  ;;  %v6359_v39 = vpop.f32.mrb[56].mxu1 }
 0x58e   : > { %v3431_v1 = vmul.f32 %v6359_v39, %v3429_v2  ;;  %v3182_v32 = vpop.f32.mrb[57].mxu1 }
 0x58f   : > { %v3430_v62 = vmul.f32 %v3429_v2, %v3182_v32 }
 0x590   : > { %v3433_v50 = vadd.f32 %v3431_v1, %v3419_v11 }
 0x591   : > { %v3432_v57 = vadd.f32 %v3430_v62, %v3418_v12  ;;  %v6362_v60 = vpop.f32.mrb[58].mxu1 }
 0x592   : > { %v3445_v29 = vmul.f32 %v6362_v60, %v3443_v20  ;;  %v3192_v58 = vpop.f32.mrb[59].mxu1 }
 0x593   : > { %v3444_v28 = vmul.f32 %v3443_v20, %v3192_v58 }
 0x594   : > { %v3447_v35 = vadd.f32 %v3445_v29, %v3433_v50 }
 0x595   : > { %v3446_v24 = vadd.f32 %v3444_v28, %v3432_v57  ;;  %v6365_v23 = vpop.f32.mrb[60].mxu1 }
 0x596   : > { %v3459_v55 = vmul.f32 %v6365_v23, %v3457_v54  ;;  %v3202_v25 = vpop.f32.mrb[61].mxu1 }
 0x597   : > { %v3458_v56 = vmul.f32 %v3457_v54, %v3202_v25 }
 0x598   : > { %v3461_v27 = vadd.f32 %v3459_v55, %v3447_v35 }
 0x599   : > { %v3460_v40 = vadd.f32 %v3458_v56, %v3446_v24  ;;  %v6368_v33 = vpop.f32.mrb[62].mxu1 }
 0x59a   : > { %v3473_v42 = vmul.f32 %v6368_v33, %v3471_v22  ;;  %v3212_v61 = vpop.f32.mrb[63].mxu1 }
 0x59b   : > { %v3472_v26 = vmul.f32 %v3471_v22, %v3212_v61  ;;  %v8302_v22 = vld [vmem:[#allocation17_spill] sm:$0xff] }
 0x59c   : > { %v3475_v21 = vadd.f32 %v3473_v42, %v3461_v27 }
 0x59d   : > { %v7641_v7 = vadd.f32 %v3472_v26, %v3460_v40 }
 0x59e   : > { %v3518_v19 = vmul.f32 %v3475_v21, %v7595_v30  ;;  %v3519_v6 = vmul.f32 %v3478_v34, %v3475_v21  ;;  %v3524_v51 = vmul.f32 %v3486_v63, %v3475_v21  ;;  %v3530_v3 = vrot.slane %v3475_v21, 3 }
 0x59f   : > { %v3534_v52 = vrot.slane %v3475_v21, 5  ;;  %v3542_v36 = vrot.slane %v3475_v21, 7  ;;  %v3545_v8 = vrot.slane %v3475_v21, 1  ;;  %v3560_v37 = vrot.slane %v3475_v21, 2 }
 0x5a0   : > { %v3521_v48 = vrot.slane %v3519_v6, 1  ;;  %v3526_v53 = vrot.slane %v3524_v51, 2  ;;  %v3563_v43 = vrot.slane %v3475_v21, 6  ;;  %v3476_v38 = vmul.f32 %v7641_v7, %v7595_v30  ;;  %v8303_v21 = vld [vmem:[#allocation18_spill] sm:$0xff]  ;;  %v8304_v6 = vld [vmem:[#allocation16_spill] sm:$0xff] }
 0x5a1   : > { %v3480_v41 = vmul.f32 %v3478_v34, %v7641_v7  ;;  %v3488_v15 = vmul.f32 %v3486_v63, %v7641_v7  ;;  %v3494_v13 = vrot.slane %v7641_v7, 3  ;;  %v3501_v14 = vmul.f32 %v3499_v4, %v7641_v7 }
 0x5a2   : > { %v3523_v10 = vadd.f32 %v3521_v48, %v3518_v19  ;;  %v3504_v11 = vmul.f32 %v3502_v59, %v7641_v7  ;;  %v3511_v2 = vmul.f32 %v3509_v49, %v7641_v7  ;;  %v3536_v9 = vmul.f32 %v3534_v52, %v7641_v7 }
 0x5a3   : > { %v3482_v0 = vrot.slane %v3480_v41, 1  ;;  %v3490_v12 = vrot.slane %v3488_v15, 2  ;;  %v3537_v39 = vmul.f32 %v3530_v3, %v7641_v7  ;;  %v3544_v1 = vmul.f32 %v3542_v36, %v7641_v7 }
 0x5a4   : > { %v3506_v32 = vrot.slane %v3504_v11, 1  ;;  %v3513_v62 = vrot.slane %v3511_v2, 2  ;;  %v3528_v50 = vadd.f32 %v3526_v53, %v3523_v10  ;;  %v3547_v20 = vmul.f32 %v3545_v8, %v7641_v7 }
 0x5a5   : > { %v3484_v47 = vadd.f32 %v3482_v0, %v3476_v38  ;;  %v3539_v46 = vrot.slane %v3537_v39, 1  ;;  %v3552_v57 = vrot.slane %v7641_v7, 5  ;;  %v3555_v60 = vmul.f32 %v3494_v13, %v7641_v7 }
 0x5a6   : > { %v3508_v29 = vadd.f32 %v3506_v32, %v3501_v14  ;;  %v3532_v58 = vadd.f32 %v3530_v3, %v3528_v50  ;;  %v3549_v28 = vrot.slane %v3547_v20, 7  ;;  %v3562_v35 = vmul.f32 %v3560_v37, %v7641_v7 }
 0x5a7   : > { %v3492_v54 = vadd.f32 %v3490_v12, %v3484_v47  ;;  %v3541_v45 = vsub.f32 %v3536_v9, %v3539_v46  ;;  %v3554_v24 = vmul.f32 %v3552_v57, %v7641_v7  ;;  %v3557_v23 = vrot.slane %v3555_v60, 1 }
 0x5a8   : > { %v3515_v55 = vadd.f32 %v3513_v62, %v3508_v29  ;;  %v3551_v25 = vsub.f32 %v3544_v1, %v3549_v28  ;;  %v3565_v56 = vmul.f32 %v3563_v43, %v7641_v7  ;;  %v3533_v40 = vsub.f32 %v3532_v58, %v8302_v22 }
 0x5a9   : > { %v3496_v27 = vadd.f32 %v3494_v13, %v3492_v54  ;;  %v3559_v33 = vsub.f32 %v3554_v24, %v3557_v23  ;;  %v3576_v42 = vrot.slane %v7641_v7, 6  ;;  %v3584_v63 = vrot.slane %v3541_v45, 5 }
 0x5aa   : > { %v3516_v61 = vadd.f32 %v3515_v55, %v3494_v13  ;;  %v3567_v26 = vrot.slane %v3565_v56, 6  ;;  %v3570_v34 = vrot.slane %v3565_v56, 2  ;;  %v3573_v49 = vrot.slane %v7641_v7, 2 }
 0x5ab   : > { %v3497_v59 = vsub.f32 %v3496_v27, %v8303_v21  ;;  %v3578_v4 = vmul.f32 %v3576_v42, %v7641_v7  ;;  %v3595_v19 = vrot.slane %v3541_v45, 2  ;;  %v3586_v36 = vmul.f32 %v3584_v63, %v7641_v7 }
 0x5ac   : > { %v3517_v51 = vsub.f32 %v3516_v61, %v8304_v6  ;;  %v3569_v3 = vsub.f32 %v3562_v35, %v3567_v26  ;;  %v3572_v52 = vsub.f32 %v3562_v35, %v3570_v34  ;;  %v3622_v53 = vrot.slane %v3533_v40, 7 }
 0x5ad   : > { %v3580_v8 = vrot.slane %v3578_v4, 6  ;;  %v3597_v37 = vmul.f32 %v3595_v19, %v7641_v7  ;;  %v3610_v48 = vrot.slane %v3497_v59, 3  ;;  %v3635_v41 = vrot.slane %v3497_v59, 2 }
 0x5ae   : > { %v3588_v43 = vrot.slane %v3569_v3, 5  ;;  %v3614_v38 = vrot.slane %v3517_v51, 2  ;;  %v3638_v15 = vrot.slane %v3517_v51, 4  ;;  %v3575_v13 = vmul.f32 %v3573_v49, %v7641_v7 }
 0x5af   : > { %v3612_v14 = vmul.f32 %v3610_v48, %v3541_v45  ;;  %v3624_v10 = vmul.f32 %v3622_v53, %v3559_v33  ;;  %v3637_v9 = vmul.f32 %v3635_v41, %v3569_v3  ;;  %v3645_v39 = vrot.slane %v3533_v40, 6 }
 0x5b0   : > { %v3590_v11 = vmul.f32 %v3588_v43, %v7641_v7  ;;  %v3616_v2 = vmul.f32 %v3614_v38, %v3551_v25  ;;  %v3640_v0 = vmul.f32 %v3638_v15, %v3572_v52  ;;  %v3582_v12 = vsub.f32 %v3575_v13, %v3580_v8 }
 0x5b1   : > { %v3658_v1 = vrot.slane %v3497_v59, 4  ;;  %v3661_v32 = vrot.slane %v3517_v51, 3  ;;  %v3668_v47 = vmul.f32 %v3559_v33, %v3533_v40  ;;  %v3599_v46 = vrot.slane %v3597_v37, 2 }
 0x5b2   : > { %v3592_v62 = vrot.slane %v3590_v11, 1  ;;  %v3618_v50 = vrot.slane %v3616_v2, 5  ;;  %v3642_v20 = vrot.slane %v3640_v0, 2  ;;  %v3647_v57 = vmul.f32 %v3645_v39, %v3582_v12 }
 0x5b3   : > { %v3660_v60 = vmul.f32 %v3658_v1, %v3541_v45  ;;  %v3663_v29 = vmul.f32 %v3661_v32, %v3551_v25  ;;  %v3626_v35 = vrot.slane %v3624_v10, 4  ;;  %v3670_v22 = vrot.slane %v3668_v47, 4 }
 0x5b4   : > { %v3594_v58 = vadd.f32 %v3592_v62, %v3586_v36  ;;  %v3620_v28 = vadd.f32 %v3618_v50, %v3612_v14  ;;  %v3644_v54 = vadd.f32 %v3642_v20, %v3637_v9  ;;  %v3649_v7 = vrot.slane %v3647_v57, 4 }
 0x5b5   : > { %v3665_v24 = vrot.slane %v3663_v29, 5 }
 0x5b6   : > { %v3601_v23 = vadd.f32 %v3599_v46, %v3594_v58  ;;  %v3628_v55 = vadd.f32 %v3626_v35, %v3620_v28  ;;  %v3651_v56 = vadd.f32 %v3649_v7, %v3644_v54 }
 0x5b7   : > { %v3667_v27 = vadd.f32 %v3665_v24, %v3660_v60 }
 0x5b8   : > { %v3602_v42 = vand.u32 2147483647, %v3601_v23  ;;  %vm3604_vm7 = vcmp.lt.f32.partialorder %v3601_v23, 0.0  ;;  %v3630_v45 = vrot.slane %v3628_v55, 5  ;;  %v3653_v25 = vrot.slane %v3651_v56, 6 }
 0x5b9   : > { %v3605_v61 = vsel %vm3604_vm7, -1e-08, %v8289_v5  ;;  %v3672_v40 = vadd.f32 %v3670_v22, %v3667_v27 }
 0x5ba   : > { %vm3603_vm8 = vcmp.lt.f32.partialorder %v3602_v42, 1e-08 }
 0x5bb   : > { %v3606_v33 = vsel %vm3603_vm8, %v3605_v61, %v3601_v23  ;;  %v3674_v26 = vrot.slane %v3672_v40, 4 }
 0x5bc   : > { %6625 = vrcp.f32 %v3606_v33 }
 0x5c6   : > { %v6626_v34 = vpop.eup %6625 }
 0x5c7   : > { %v7673_v63 = vmul.f32 %v6626_v34, %v3630_v45  ;;  %v3655_v21 = vmul.f32 %v6626_v34, %v3653_v25  ;;  %v3676_v59 = vmul.f32 %v6626_v34, %v3674_v26 }
 0x5c9   : > { %v5758_v49 = vclamps-f32 %v3655_v21, 100.0  ;;  %v5759_v4 = vclamps-f32 %v3676_v59, 100.0  ;;  %v7693_v59 = vld [vmem:[%s8193_s1 + $0x8] sm:$0xff] }
 0x5cb   : > { %v7676_v19 = vsub.f32 %v7517_v31, %v5758_v49  ;;  %v7679_v51 = vsub.f32 %v7520_v44, %v5759_v4  ;;  %v7698_v49 = vld [vmem:[%s8193_s1 + $0x10] sm:$0xff]  ;;  %v7707_v4 = vld [vmem:[%s8193_s1 + $0x18] sm:$0xff] }
 0x5cd   : > { %v5761_v3 = vadd.f32 0.004301727, %v7676_v19  ;;  %v5762_v52 = vadd.f32 0.005185783, %v7679_v51 }
 0x5cf   : > { %v3685_v36 = vmul.f32 1.0514426, %v5761_v3  ;;  %v3687_v8 = vmul.f32 4.2057705, %v5762_v52  ;;  %v7712_v3 = vld [vmem:[%s8193_s1 + $0x20] sm:$0xff]  ;;  %v7721_v52 = vld [vmem:[%s8193_s1 + $0x28] sm:$0xff] }
 0x5d1   : > { %v3692_v37 = vadd.f32 1.0, %v3685_v36  ;;  %v3696_v48 = vadd.f32 1.0, %v3687_v8  ;;  %v7726_v36 = vld [vmem:[%s8193_s1 + $0x30] sm:$0xff]  ;;  %v7735_v8 = vld [vmem:[%s8193_s1 + $0x38] sm:$0xff] }
 0x5d3   : > { %v3693_v53 = vmul.f32 7.5, %v3692_v37  ;;  %v3697_v43 = vmul.f32 1.5, %v3696_v48  ;;  %v7740_v37 = vld [vmem:[%s8193_s1 + $0x40] sm:$0xff]  ;;  %v7749_v48 = vld [vmem:[%s8193_s1 + $0x48] sm:$0xff] }
 0x5d5   : > { %v3694_v38 = vmax.f32 %v3693_v53, 0.0  ;;  %v3698_v41 = vmax.f32 %v3697_v43, 0.0  ;;  %v7754_v53 = vld [vmem:[%s8193_s1 + $0x50] sm:$0xff]  ;;  %v7763_v43 = vld [vmem:[%s8193_s1 + $0x58] sm:$0xff] }
 0x5d7   : > { %v3695_v15 = vmin.f32 %v3694_v38, 15.0  ;;  %v3699_v13 = vmin.f32 %v3698_v41, 3.0  ;;  %v7768_v38 = vld [vmem:[%s8193_s1 + $0x60] sm:$0xff]  ;;  %v7777_v41 = vld [vmem:[%s8193_s1 + $0x68] sm:$0xff] }
 0x5d9   : > { %v3703_v31 = vrot.slane %v3695_v15, %v6727_v16  ;;  %v3712_v14 = vand.u32 2147483647, %v3699_v13  ;;  %v5763_v10 = vadd.f32 -1.0, %v3699_v13  ;;  %v5764_v44 = vadd.f32 -2.0, %v3699_v13  ;;  %v7782_v15 = vld [vmem:[%s8193_s1 + $0x70] sm:$0xff] }
 0x5da   : > { %v5765_v11 = vadd.f32 -3.0, %v3699_v13  ;;  %v7791_v13 = vld [vmem:[%s8193_s1 + $0x78] sm:$0xff] }
 0x5db   : > { %v3704_v2 = vsub.f32 %v3703_v31, %v6729_v17  ;;  %v3705_v9 = vsub.f32 %v3703_v31, %v6731_v18  ;;  %v3713_v0 = vsub.f32 1.0, %v3712_v14  ;;  %v3722_v12 = vand.u32 2147483647, %v5763_v10  ;;  %v7796_v31 = vld [vmem:[%s8193_s1 + $0x80] sm:$0xff]  ;;  %v7805_v14 = vld [vmem:[%s8193_s1 + $0x88] sm:$0xff]  ;;  %v7810_v10 = vld [vmem:[%s8193_s1 + $0x90] sm:$0xff] }
 0x5dc   : > { %v3732_v39 = vand.u32 2147483647, %v5764_v44  ;;  %v3742_v1 = vand.u32 2147483647, %v5765_v11  ;;  %v7819_v44 = vld [vmem:[%s8193_s1 + $0x98] sm:$0xff]  ;;  %v7824_v11 = vld [vmem:[%s8193_s1 + $0xa0] sm:$0xff] }
 0x5dd   : > { %v3706_v32 = vand.u32 2147483647, %v3704_v2  ;;  %v3707_v62 = vand.u32 2147483647, %v3705_v9  ;;  %v3714_v50 = vmax.f32 %v3713_v0, 0.0  ;;  %v3723_v20 = vsub.f32 1.0, %v3722_v12 }
 0x5de   : > { %v3733_v47 = vsub.f32 1.0, %v3732_v39  ;;  %v3743_v46 = vsub.f32 1.0, %v3742_v1  ;;  %8305 = vst [vmem:[#allocation4_spill] sm:$0xff] %v7819_v44  ;;  %8306 = vst [vmem:[#allocation5_spill] sm:$0xff] %v7824_v11  ;;  %v7833_v2 = vld [vmem:[%s8193_s1 + $0xa8] sm:$0xff]  ;;  %v7838_v9 = vld [vmem:[%s8193_s1 + $0xb0] sm:$0xff] }
 0x5df   : > { %v3708_v57 = vsub.f32 1.0, %v3706_v32  ;;  %v3709_v60 = vsub.f32 1.0, %v3707_v62  ;;  %v3724_v29 = vmax.f32 %v3723_v20, 0.0  ;;  %v3718_v54 = vrot.slane %v3714_v50, %v6727_v16  ;;  %8307 = vst [vmem:[#allocation6_spill] sm:$0xff] %v7833_v2  ;;  %8308 = vst [vmem:[#allocation7_spill] sm:$0xff] %v7838_v9  ;;  %v7847_v0 = vld [vmem:[%s8193_s1 + $0xb8] sm:$0xff] }
 0x5e0   : > { %v3734_v58 = vmax.f32 %v3733_v47, 0.0  ;;  %v3744_v23 = vmax.f32 %v3743_v46, 0.0  ;;  %8309 = vst [vmem:[#allocation8_spill] sm:$0xff] %v7847_v0  ;;  %v7852_v12 = vld [vmem:[%s8193_s1 + $0xc0] sm:$0xff]  ;;  %v7861_v39 = vld [vmem:[%s8193_s1 + $0xc8] sm:$0xff]  ;;  %v7866_v1 = vld [vmem:[%s8193_s1 + $0xd0] sm:$0xff] }
 0x5e1   : > { %v3710_v28 = vmax.f32 %v3708_v57, 0.0  ;;  %v3711_v35 = vmax.f32 %v3709_v60, 0.0  ;;  %v3728_v7 = vrot.slane %v3724_v29, %v6727_v16  ;;  %8310 = vst [vmem:[#allocation9_spill] sm:$0xff] %v7852_v12  ;;  %8311 = vst [vmem:[#allocation10_spill] sm:$0xff] %v7861_v39  ;;  %v7875_v32 = vld [vmem:[%s8193_s1 + $0xd8] sm:$0xff]  ;;  %v7880_v62 = vld [vmem:[%s8193_s1 + $0xe0] sm:$0xff] }
 0x5e2   : > { %v3738_v24 = vrot.slane %v3734_v58, %v6727_v16  ;;  %v3748_v45 = vrot.slane %v3744_v23, %v6727_v16  ;;  %8312 = vst [vmem:[#allocation11_spill] sm:$0xff] %v7866_v1  ;;  %8313 = vst [vmem:[#allocation12_spill] sm:$0xff] %v7875_v32  ;;  %v7889_v50 = vld [vmem:[%s8193_s1 + $0xe8] sm:$0xff]  ;;  %v7894_v20 = vld [vmem:[%s8193_s1 + $0xf0] sm:$0xff]  ;;  %v5757_v46 = vclamps-f32 %v7673_v63, 100.0 }
 0x5e3   : > { %v3719_v55 = vmul.f32 %v3718_v54, %v3710_v28  ;;  %v3720_v56 = vmul.f32 %v3718_v54, %v3711_v35  ;;  %v3729_v27 = vmul.f32 %v3728_v7, %v3710_v28  ;;  %v3730_v22 = vmul.f32 %v3728_v7, %v3711_v35  ;;  %8314 = vst [vmem:[#allocation13_spill] sm:$0xff] %v7880_v62  ;;  %v7903_v47 = vld [vmem:[%s8193_s1 + $0xf8] sm:$0xff] }
 0x5e4   : > { %v3739_v40 = vmul.f32 %v3738_v24, %v3710_v28  ;;  %v3740_v33 = vmul.f32 %v3738_v24, %v3711_v35  ;;  %v3749_v26 = vmul.f32 %v3748_v45, %v3710_v28  ;;  %v3750_v34 = vmul.f32 %v3748_v45, %v3711_v35  ;;  %8315 = vst [vmem:[#allocation14_spill] sm:$0xff] %v7889_v50 }
 0x5e5   : > { %v6561_v42 = vpack.c.bf16 %v3720_v56, %v3719_v55  ;;  %v6565_v61 = vpack.c.bf16 %v3730_v22, %v3729_v27  ;;  %8316 = vst [vmem:[#allocation15_spill] sm:$0xff] %v7894_v20  ;;  %8317 = vst [vmem:[#allocation17_spill] sm:$0xff] %v7903_v47  ;;  %v7909_v57 = vsub.f32 %v7595_v30, %v5757_v46 }
 0x5e6   : > { %v6569_v25 = vpack.c.bf16 %v3740_v33, %v3739_v40  ;;  %v6573_v21 = vpack.c.bf16 %v3750_v34, %v3749_v26 }
 0x5e7   : > { %6562 = vmatprep.subr.bf16.mxu0 %v6561_v42  ;;  %v5760_v60 = vadd.f32 -0.0016962886, %v7909_v57 }
 0x5e8   : > { %6564 = vmatpush3.bf16.msra.mxu0 %v6561_v42 }
 0x5e9   : > { %6566 = vmatprep.subr.bf16.mxu0 %v6565_v61  ;;  %v3683_v29 = vmul.f32 1.0514426, %v5760_v60 }
 0x5eb   : > { %v3688_v58 = vadd.f32 1.0, %v3683_v29 }
 0x5ec   : > { %6568 = vmatpush3.bf16.msra.mxu0 %v6565_v61 }
 0x5ed   : > { %6570 = vmatprep.subr.bf16.mxu0 %v6569_v25  ;;  %v3689_v28 = vmul.f32 7.5, %v3688_v58 }
 0x5ef   : > { %v3690_v35 = vmax.f32 %v3689_v28, 0.0 }
 0x5f0   : > { %6572 = vmatpush3.bf16.msra.mxu0 %v6569_v25 }
 0x5f1   : > { %6574 = vmatprep.subr.bf16.mxu0 %v6573_v21  ;;  %v7912_v54 = vmin.f32 %v3690_v35, 15.0 }
 0x5f3   : > { %v5798_v7 = vadd.f32 -1.0, %v7912_v54  ;;  %v4136_v24 = vand.u32 2147483647, %v7912_v54  ;;  %v5799_v55 = vadd.f32 -2.0, %v7912_v54  ;;  %v5800_v63 = vadd.f32 -3.0, %v7912_v54 }
 0x5f4   : > { %6576 = vmatpush3.bf16.msra.mxu0 %v6573_v21  ;;  %v5801_v33 = vadd.f32 -4.0, %v7912_v54  ;;  %v5802_v29 = vadd.f32 -5.0, %v7912_v54 }
 0x5f5   : > { %v4150_v23 = vand.u32 2147483647, %v5798_v7  ;;  %v4137_v56 = vsub.f32 1.0, %v4136_v24  ;;  %v4164_v27 = vand.u32 2147483647, %v5799_v55 }
 0x5f6   : > { %v4178_v42 = vand.u32 2147483647, %v5800_v63  ;;  %v4192_v60 = vand.u32 2147483647, %v5801_v33 }
 0x5f7   : > { %6386 = vmatmul.mubr.msk.f32.vlgmr.msra.gmra.mrb[64].mxu0 %vm247_vm0, %v7693_v59  ;;  %v4151_v30 = vsub.f32 1.0, %v4150_v23  ;;  %v4138_v22 = vmax.f32 %v4137_v56, 0.0  ;;  %v4165_v40 = vsub.f32 1.0, %v4164_v27  ;;  %v5803_v56 = vadd.f32 -6.0, %v7912_v54 }
 0x5f8   : > { %6388 = vmatprep.mubr.msk.f32.mxu0 %vm247_vm0, %v7698_v49  ;;  %v4179_v34 = vsub.f32 1.0, %v4178_v42  ;;  %v4193_v27 = vsub.f32 1.0, %v4192_v60 }
 0x5f9   : > { %v4152_v61 = vmax.f32 %v4151_v30, 0.0  ;;  %v4144_v26 = vrot.slane %v4138_v22, %v6727_v16  ;;  %v4166_v46 = vmax.f32 %v4165_v40, 0.0  ;;  %v4206_v22 = vand.u32 2147483647, %v5802_v29 }
 0x5fa   : > { %v4180_v55 = vmax.f32 %v4179_v34, 0.0 }
 0x5fb   : > { %6389 = vmatmul.mubr.msk.f32.gmra.mrb[66].mxu0 %vm247_vm0, %v7707_v4  ;;  %v4158_v21 = vrot.slane %v4152_v61, %v6727_v16  ;;  %v4172_v30 = vrot.slane %v4166_v46, %v6727_v16  ;;  %v4207_v34 = vsub.f32 1.0, %v4206_v22 }
 0x5fc   : > { %6391 = vmatprep.mubr.msk.f32.mxu0 %vm247_vm0, %v7712_v3 }
 0x5ff   : > { %6392 = vmatmul.mubr.msk.f32.gmra.mrb[68].mxu0 %vm247_vm0, %v7721_v52 }
 0x600   : > { %6394 = vmatprep.mubr.msk.f32.mxu0 %vm247_vm0, %v7726_v36 }
 0x603   : > { %6395 = vmatmul.mubr.msk.f32.gmra.mrb[70].mxu0 %vm247_vm0, %v7735_v8 }
 0x604   : > { %6397 = vmatprep.mubr.msk.f32.mxu0 %vm247_vm0, %v7740_v37 }
 0x607   : > { %6398 = vmatmul.mubr.msk.f32.gmra.mrb[72].mxu0 %vm247_vm0, %v7749_v48 }
 0x608   : > { %6400 = vmatprep.mubr.msk.f32.mxu0 %vm247_vm0, %v7754_v53 }
 0x60b   : > { %6401 = vmatmul.mubr.msk.f32.gmra.mrb[74].mxu0 %vm247_vm0, %v7763_v43 }
 0x60c   : > { %6403 = vmatprep.mubr.msk.f32.mxu0 %vm247_vm0, %v7768_v38 }
 0x60f   : > { %6404 = vmatmul.mubr.msk.f32.gmra.mrb[76].mxu0 %vm247_vm0, %v7777_v41 }
 0x610   : > { %6406 = vmatprep.mubr.msk.f32.mxu0 %vm247_vm0, %v7782_v15 }
 0x613   : > { %6407 = vmatmul.mubr.msk.f32.gmra.mrb[78].mxu0 %vm247_vm0, %v7791_v13 }
 0x614   : > { %6409 = vmatprep.mubr.msk.f32.mxu0 %vm247_vm0, %v7796_v31 }
 0x617   : > { %6410 = vmatmul.mubr.msk.f32.gmra.mrb[80].mxu0 %vm247_vm0, %v7805_v14 }
 0x618   : > { %6412 = vmatprep.mubr.msk.f32.mxu0 %vm247_vm0, %v7810_v10 }
 0x61b   : > { %6413 = vmatmul.mubr.msk.f32.gmra.mrb[82].mxu0 %vm247_vm0, %v7819_v44 }
 0x61c   : > { %6415 = vmatprep.mubr.msk.f32.mxu0 %vm247_vm0, %v7824_v11 }
 0x61f   : > { %6416 = vmatmul.mubr.msk.f32.gmra.mrb[84].mxu0 %vm247_vm0, %v7833_v2 }
 0x620   : > { %6418 = vmatprep.mubr.msk.f32.mxu0 %vm247_vm0, %v7838_v9 }
 0x623   : > { %6419 = vmatmul.mubr.msk.f32.gmra.mrb[86].mxu0 %vm247_vm0, %v7847_v0 }
 0x624   : > { %6421 = vmatprep.mubr.msk.f32.mxu0 %vm247_vm0, %v7852_v12 }
 0x627   : > { %6422 = vmatmul.mubr.msk.f32.gmra.mrb[88].mxu0 %vm247_vm0, %v7861_v39 }
 0x628   : > { %6424 = vmatprep.mubr.msk.f32.mxu0 %vm247_vm0, %v7866_v1 }
 0x62b   : > { %6425 = vmatmul.mubr.msk.f32.gmra.mrb[90].mxu0 %vm247_vm0, %v7875_v32 }
 0x62c   : > { %6427 = vmatprep.mubr.msk.f32.mxu0 %vm247_vm0, %v7880_v62 }
 0x62f   : > { %6428 = vmatmul.mubr.msk.f32.gmra.mrb[92].mxu0 %vm247_vm0, %v7889_v50 }
 0x630   : > { %6430 = vmatprep.mubr.msk.f32.mxu0 %vm247_vm0, %v7894_v20  ;;  %v4220_v20 = vand.u32 2147483647, %v5803_v56 }
 0x633   : > { %6431 = vmatmul.mubr.msk.f32.gmra.mrb[94].mxu0 %vm247_vm0, %v7903_v47 }
 0x6ca   : > { %v6387_v45 = vpop.f32.mrb[64].mxu0 }
 0x6cb   : > { %v3945_v25 = vpop.f32.mrb[65].mxu0  ;;  %v4146_v28 = vmul.f32 %v6387_v45, %v4144_v26  ;;  %v5804_v45 = vadd.f32 -7.0, %v7912_v54 }
 0x6cc   : > { %v4145_v24 = vmul.f32 %v4144_v26, %v3945_v25  ;;  %v4186_v25 = vrot.slane %v4180_v55, %v6727_v16  ;;  %v4194_v26 = vmax.f32 %v4193_v27, 0.0  ;;  %v4221_v55 = vsub.f32 1.0, %v4220_v20 }
 0x6cd   : > { %v5807_v20 = vadd.f32 -10.0, %v7912_v54 }
 0x6ce   : > { %v6390_v58 = vpop.f32.mrb[66].mxu0  ;;  %v4200_v56 = vrot.slane %v4194_v26, %v6727_v16 }
 0x6cf   : > { %v4160_v35 = vmul.f32 %v6390_v58, %v4158_v21  ;;  %v3955_v7 = vpop.f32.mrb[67].mxu0 }
 0x6d0   : > { %v4159_v23 = vmul.f32 %v4158_v21, %v3955_v7  ;;  %v6662_v21 = vmov 0.0   ;;  %v4234_v7 = vand.u32 2147483647, %v5804_v45 }
 0x6d1   : > { %v4162_v63 = vadd.f32 %v4160_v35, %v4146_v28  ;;  %5425 = vst [vmem:[%s7927_s9 + $0x1d] sm:$0x7] %v6662_v21 }
 0x6d2   : > { %v4161_v42 = vadd.f32 %v4159_v23, %v4145_v24  ;;  %v6393_v61 = vpop.f32.mrb[68].mxu0  ;;  %v5805_v24 = vadd.f32 -8.0, %v7912_v54  ;;  %v4235_v45 = vsub.f32 1.0, %v4234_v7  ;;  %v5808_v7 = vadd.f32 -11.0, %v7912_v54 }
 0x6d3   : > { %v4174_v40 = vmul.f32 %v6393_v61, %v4172_v30  ;;  %v3965_v33 = vpop.f32.mrb[69].mxu0 }
 0x6d4   : > { %v4173_v47 = vmul.f32 %v4172_v30, %v3965_v33  ;;  %v4248_v33 = vand.u32 2147483647, %v5805_v24 }
 0x6d5   : > { %v4176_v58 = vadd.f32 %v4174_v40, %v4162_v63  ;;  %v4208_v63 = vmax.f32 %v4207_v34, 0.0 }
 0x6d6   : > { %v4175_v46 = vadd.f32 %v4173_v47, %v4161_v42  ;;  %v6396_v60 = vpop.f32.mrb[70].mxu0  ;;  %v5806_v47 = vadd.f32 -9.0, %v7912_v54  ;;  %v4249_v24 = vsub.f32 1.0, %v4248_v33  ;;  %v4290_v33 = vand.u32 2147483647, %v5808_v7 }
 0x6d7   : > { %v4188_v29 = vmul.f32 %v6396_v60, %v4186_v25  ;;  %v3975_v28 = vpop.f32.mrb[71].mxu0  ;;  %v4214_v21 = vrot.slane %v4208_v63, %v6727_v16 }
 0x6d8   : > { %v4187_v35 = vmul.f32 %v4186_v25, %v3975_v28  ;;  %v4222_v25 = vmax.f32 %v4221_v55, 0.0  ;;  %v4262_v34 = vand.u32 2147483647, %v5806_v47  ;;  %v4276_v47 = vand.u32 2147483647, %v5807_v20 }
 0x6d9   : > { %v4190_v23 = vadd.f32 %v4188_v29, %v4176_v58 }
 0x6da   : > { %v4189_v30 = vadd.f32 %v4187_v35, %v4175_v46  ;;  %v6399_v27 = vpop.f32.mrb[72].mxu0  ;;  %v4228_v35 = vrot.slane %v4222_v25, %v6727_v16  ;;  %v4263_v55 = vsub.f32 1.0, %v4262_v34  ;;  %v5809_v34 = vadd.f32 -12.0, %v7912_v54 }
 0x6db   : > { %v4202_v22 = vmul.f32 %v6399_v27, %v4200_v56  ;;  %v3985_v61 = vpop.f32.mrb[73].mxu0 }
 0x6dc   : > { %v4201_v40 = vmul.f32 %v4200_v56, %v3985_v61  ;;  %v4236_v56 = vmax.f32 %v4235_v45, 0.0  ;;  %v4264_v45 = vmax.f32 %v4263_v55, 0.0  ;;  %v5810_v55 = vadd.f32 -13.0, %v7912_v54 }
 0x6dd   : > { %v4204_v42 = vadd.f32 %v4202_v22, %v4190_v23 }
 0x6de   : > { %v4203_v60 = vadd.f32 %v4201_v40, %v4189_v30  ;;  %v6402_v28 = vpop.f32.mrb[74].mxu0  ;;  %v4242_v40 = vrot.slane %v4236_v56, %v6727_v16  ;;  %v4270_v20 = vrot.slane %v4264_v45, %v6727_v16 }
 0x6df   : > { %v4216_v58 = vmul.f32 %v6402_v28, %v4214_v21  ;;  %v3995_v29 = vpop.f32.mrb[75].mxu0 }
 0x6e0   : > { %v4215_v26 = vmul.f32 %v4214_v21, %v3995_v29  ;;  %v4250_v21 = vmax.f32 %v4249_v24, 0.0  ;;  %v4291_v24 = vsub.f32 1.0, %v4290_v33 }
 0x6e1   : > { %v4218_v46 = vadd.f32 %v4216_v58, %v4204_v42 }
 0x6e2   : > { %v4217_v27 = vadd.f32 %v4215_v26, %v4203_v60  ;;  %v6405_v61 = vpop.f32.mrb[76].mxu0  ;;  %v4256_v26 = vrot.slane %v4250_v21, %v6727_v16 }
 0x6e3   : > { %v4230_v23 = vmul.f32 %v6405_v61, %v4228_v35  ;;  %v4005_v22 = vpop.f32.mrb[77].mxu0  ;;  %v4277_v61 = vsub.f32 1.0, %v4276_v47 }
 0x6e4   : > { %v4229_v63 = vmul.f32 %v4228_v35, %v4005_v22 }
 0x6e5   : > { %v4232_v30 = vadd.f32 %v4230_v23, %v4218_v46 }
 0x6e6   : > { %v4231_v28 = vadd.f32 %v4229_v63, %v4217_v27  ;;  %v6408_v29 = vpop.f32.mrb[78].mxu0  ;;  %v4278_v63 = vmax.f32 %v4277_v61, 0.0 }
 0x6e7   : > { %v4244_v42 = vmul.f32 %v6408_v29, %v4242_v40  ;;  %v4015_v58 = vpop.f32.mrb[79].mxu0  ;;  %v4304_v29 = vand.u32 2147483647, %v5809_v34 }
 0x6e8   : > { %v4243_v25 = vmul.f32 %v4242_v40, %v4015_v58 }
 0x6e9   : > { %v4246_v60 = vadd.f32 %v4244_v42, %v4232_v30  ;;  %v4292_v42 = vmax.f32 %v4291_v24, 0.0 }
 0x6ea   : > { %v4245_v35 = vadd.f32 %v4243_v25, %v4231_v28  ;;  %v6411_v22 = vpop.f32.mrb[80].mxu0  ;;  %v5811_v28 = vadd.f32 -14.0, %v7912_v54  ;;  %v4284_v25 = vrot.slane %v4278_v63, %v6727_v16 }
 0x6eb   : > { %v4258_v46 = vmul.f32 %v6411_v22, %v4256_v26  ;;  %v4025_v23 = vpop.f32.mrb[81].mxu0  ;;  %v4318_v22 = vand.u32 2147483647, %v5810_v55 }
 0x6ec   : > { %v4257_v56 = vmul.f32 %v4256_v26, %v4025_v23  ;;  %v4305_v26 = vsub.f32 1.0, %v4304_v29 }
 0x6ed   : > { %v4260_v27 = vadd.f32 %v4258_v46, %v4246_v60  ;;  %v4332_v46 = vand.u32 2147483647, %v5811_v28  ;;  %v4319_v24 = vsub.f32 1.0, %v4318_v22 }
 0x6ee   : > { %v4259_v7 = vadd.f32 %v4257_v56, %v4245_v35  ;;  %v6414_v30 = vpop.f32.mrb[82].mxu0  ;;  %v5812_v35 = vadd.f32 -15.0, %v7912_v54  ;;  %v4298_v56 = vrot.slane %v4292_v42, %v6727_v16 }
 0x6ef   : > { %v4272_v40 = vmul.f32 %v6414_v30, %v4270_v20  ;;  %v4035_v21 = vpop.f32.mrb[83].mxu0 }
 0x6f0   : > { %v4271_v47 = vmul.f32 %v4270_v20, %v4035_v21  ;;  %v4306_v20 = vmax.f32 %v4305_v26, 0.0  ;;  %v4346_v29 = vand.u32 2147483647, %v5812_v35 }
 0x6f1   : > { %v4274_v58 = vadd.f32 %v4272_v40, %v4260_v27 }
 0x6f2   : > { %v4273_v45 = vadd.f32 %v4271_v47, %v4259_v7  ;;  %v6417_v33 = vpop.f32.mrb[84].mxu0  ;;  %v4312_v7 = vrot.slane %v4306_v20, %v6727_v16  ;;  %v4320_v47 = vmax.f32 %v4319_v24, 0.0  ;;  %v4347_v22 = vsub.f32 1.0, %v4346_v29 }
 0x6f3   : > { %v4286_v60 = vmul.f32 %v6417_v33, %v4284_v25  ;;  %v4045_v61 = vpop.f32.mrb[85].mxu0  ;;  %v4333_v33 = vsub.f32 1.0, %v4332_v46 }
 0x6f4   : > { %v4285_v34 = vmul.f32 %v4284_v25, %v4045_v61  ;;  %v4326_v42 = vrot.slane %v4320_v47, %v6727_v16  ;;  %v4348_v24 = vmax.f32 %v4347_v22, 0.0  ;;  %v4382_v22 = vrot.slane %v7909_v57, 4 }
 0x6f5   : > { %v4288_v23 = vadd.f32 %v4286_v60, %v4274_v58  ;;  %v4334_v26 = vmax.f32 %v4333_v33, 0.0 }
 0x6f6   : > { %v4287_v30 = vadd.f32 %v4285_v34, %v4273_v45  ;;  %v6420_v21 = vpop.f32.mrb[86].mxu0 }
 0x6f7   : > { %v4300_v27 = vmul.f32 %v6420_v21, %v4298_v56  ;;  %v4055_v40 = vpop.f32.mrb[87].mxu0  ;;  %v4340_v20 = vrot.slane %v4334_v26, %v6727_v16 }
 0x6f8   : > { %v4299_v63 = vmul.f32 %v4298_v56, %v4055_v40 }
 0x6f9   : > { %v4302_v55 = vadd.f32 %v4300_v27, %v4288_v23 }
 0x6fa   : > { %v4301_v25 = vadd.f32 %v4299_v63, %v4287_v30  ;;  %v6423_v28 = vpop.f32.mrb[88].mxu0 }
 0x6fb   : > { %v4314_v61 = vmul.f32 %v6423_v28, %v4312_v7  ;;  %v4065_v54 = vpop.f32.mrb[89].mxu0 }
 0x6fc   : > { %v4313_v58 = vmul.f32 %v4312_v7, %v4065_v54  ;;  %v4369_v54 = vrot.slane %v7679_v51, 6 }
 0x6fd   : > { %v4316_v60 = vadd.f32 %v4314_v61, %v4302_v55  ;;  %v4354_v55 = vrot.slane %v4348_v24, %v6727_v16  ;;  %v4361_v61 = vrot.slane %v7676_v19, 7 }
 0x6fe   : > { %v4315_v45 = vadd.f32 %v4313_v58, %v4301_v25  ;;  %v6426_v34 = vpop.f32.mrb[90].mxu0 }
 0x6ff   : > { %v4328_v21 = vmul.f32 %v6426_v34, %v4326_v42  ;;  %v4075_v56 = vpop.f32.mrb[91].mxu0 }
 0x700   : > { %v4327_v35 = vmul.f32 %v4326_v42, %v4075_v56  ;;  %v4392_v42 = vrot.slane %v7679_v51, 2 }
 0x701   : > { %v4330_v23 = vadd.f32 %v4328_v21, %v4316_v60  ;;  %v4385_v60 = vrot.slane %v7676_v19, 3 }
 0x702   : > { %v4329_v46 = vadd.f32 %v4327_v35, %v4315_v45  ;;  %v6429_v30 = vpop.f32.mrb[92].mxu0 }
 0x703   : > { %v4342_v27 = vmul.f32 %v6429_v30, %v4340_v20  ;;  %v4085_v40 = vpop.f32.mrb[93].mxu0 }
 0x704   : > { %v4341_v63 = vmul.f32 %v4340_v20, %v4085_v40 }
 0x705   : > { %v4344_v7 = vadd.f32 %v4342_v27, %v4330_v23 }
 0x706   : > { %v4343_v47 = vadd.f32 %v4341_v63, %v4329_v46  ;;  %v6432_v33 = vpop.f32.mrb[94].mxu0 }
 0x707   : > { %v4356_v29 = vmul.f32 %v6432_v33, %v4354_v55  ;;  %v4095_v25 = vpop.f32.mrb[95].mxu0 }
 0x708   : > { %v4355_v28 = vmul.f32 %v4354_v55, %v4095_v25 }
 0x709   : > { %v4358_v58 = vadd.f32 %v4356_v29, %v4344_v7 }
 0x70a   : > { %v7954_v26 = vadd.f32 %v4355_v28, %v4343_v47 }
 0x70b   : > { %v4401_v45 = vmul.f32 %v4358_v58, %v7909_v57  ;;  %v4402_v34 = vmul.f32 %v4361_v61, %v4358_v58  ;;  %v4407_v21 = vmul.f32 %v4369_v54, %v4358_v58  ;;  %v4413_v56 = vrot.slane %v4358_v58, 3 }
 0x70c   : > { %v4417_v35 = vrot.slane %v4358_v58, 5  ;;  %v4425_v23 = vrot.slane %v4358_v58, 7  ;;  %v4428_v20 = vrot.slane %v4358_v58, 1  ;;  %v4443_v24 = vrot.slane %v4358_v58, 2 }
 0x70d   : > { %v4404_v46 = vrot.slane %v4402_v34, 1  ;;  %v4409_v30 = vrot.slane %v4407_v21, 2  ;;  %v4446_v27 = vrot.slane %v4358_v58, 6  ;;  %v4359_v40 = vmul.f32 %v7954_v26, %v7909_v57 }
 0x70e   : > { %v4363_v63 = vmul.f32 %v4361_v61, %v7954_v26  ;;  %v4371_v7 = vmul.f32 %v4369_v54, %v7954_v26  ;;  %v4377_v55 = vrot.slane %v7954_v26, 3  ;;  %v4384_v47 = vmul.f32 %v4382_v22, %v7954_v26 }
 0x70f   : > { %v4406_v33 = vadd.f32 %v4404_v46, %v4401_v45  ;;  %v4387_v29 = vmul.f32 %v4385_v60, %v7954_v26  ;;  %v4394_v25 = vmul.f32 %v4392_v42, %v7954_v26  ;;  %v4419_v28 = vmul.f32 %v4417_v35, %v7954_v26 }
 0x710   : > { %v4365_v34 = vrot.slane %v4363_v63, 1  ;;  %v4373_v58 = vrot.slane %v4371_v7, 2  ;;  %v4420_v21 = vmul.f32 %v4413_v56, %v7954_v26  ;;  %v4427_v50 = vmul.f32 %v4425_v23, %v7954_v26 }
 0x711   : > { %v4389_v61 = vrot.slane %v4387_v29, 1  ;;  %v4396_v62 = vrot.slane %v4394_v25, 2  ;;  %v4411_v54 = vadd.f32 %v4409_v30, %v4406_v33  ;;  %v4430_v32 = vmul.f32 %v4428_v20, %v7954_v26 }
 0x712   : > { %v4367_v1 = vadd.f32 %v4365_v34, %v4359_v40  ;;  %v4422_v22 = vrot.slane %v4420_v21, 1  ;;  %v4435_v60 = vrot.slane %v7954_v26, 5  ;;  %v4438_v42 = vmul.f32 %v4377_v55, %v7954_v26  ;;  %v7976_v34 = vld [vmem:[%s6717_s24 + $0x6] sm:$0x1] }
 0x713   : > { %v4391_v45 = vadd.f32 %v4389_v61, %v4384_v47  ;;  %v4415_v35 = vadd.f32 %v4413_v56, %v4411_v54  ;;  %v4432_v46 = vrot.slane %v4430_v32, 7  ;;  %v4445_v63 = vmul.f32 %v4443_v24, %v7954_v26  ;;  %8318 = vst [vmem:[#allocation18_spill] sm:$0xff] %v7976_v34 }
 0x714   : > { %v4375_v7 = vadd.f32 %v4373_v58, %v4367_v1  ;;  %v4424_v23 = vsub.f32 %v4419_v28, %v4422_v22  ;;  %v4437_v29 = vmul.f32 %v4435_v60, %v7954_v26  ;;  %v4440_v30 = vrot.slane %v4438_v42, 1  ;;  %v7981_v28 = vld [vmem:[%s6717_s24 + $0x4] sm:$0x1]  ;;  %s5870_s24 = sshll.u32 (%p6703_p4), %s6691_s12, 3 }
 0x715   : > { %v4398_v33 = vadd.f32 %v4396_v62, %v4391_v45  ;;  %v4434_v20 = vsub.f32 %v4427_v50, %v4432_v46  ;;  %v4448_v40 = vmul.f32 %v4446_v27, %v7954_v26  ;;  %v4416_v21 = vsub.f32 %v4415_v35, %v7976_v34  ;;  %8319 = vst [vmem:[#allocation19_spill] sm:$0xff] %v7981_v28  ;;  %s5434_s30 = scalar_lea.vmem (%p6703_p4), %s8194_s2, %s5870_s24 }
 0x716   : > { %v4379_v25 = vadd.f32 %v4377_v55, %v4375_v7  ;;  %v4442_v47 = vsub.f32 %v4437_v29, %v4440_v30  ;;  %v4459_v32 = vrot.slane %v7954_v26, 6  ;;  %v4467_v58 = vrot.slane %v4424_v23, 5 }
 0x717   : > { %v4399_v56 = vadd.f32 %v4398_v33, %v4377_v55  ;;  %v4450_v24 = vrot.slane %v4448_v40, 6  ;;  %v4453_v1 = vrot.slane %v4448_v40, 2  ;;  %v4456_v62 = vrot.slane %v7954_v26, 2 }
 0x718   : > { %v4380_v61 = vsub.f32 %v4379_v25, %v7981_v28  ;;  %v4461_v50 = vmul.f32 %v4459_v32, %v7954_v26  ;;  %v4478_v27 = vrot.slane %v4424_v23, 2  ;;  %v4469_v42 = vmul.f32 %v4467_v58, %v7954_v26 }
 0x719   : > { %v4400_v54 = vsub.f32 %v4399_v56, %v8304_v6  ;;  %v4452_v22 = vsub.f32 %v4445_v63, %v4450_v24  ;;  %v4455_v60 = vsub.f32 %v4445_v63, %v4453_v1  ;;  %v4505_v46 = vrot.slane %v4416_v21, 7 }
 0x71a   : > { %v4463_v45 = vrot.slane %v4461_v50, 6  ;;  %v4480_v55 = vmul.f32 %v4478_v27, %v7954_v26  ;;  %v4493_v35 = vrot.slane %v4380_v61, 3  ;;  %v4518_v30 = vrot.slane %v4380_v61, 2 }
 0x71b   : > { %v4471_v7 = vrot.slane %v4452_v22, 5  ;;  %v4497_v29 = vrot.slane %v4400_v54, 2  ;;  %v4521_v33 = vrot.slane %v4400_v54, 4  ;;  %v4458_v40 = vmul.f32 %v4456_v62, %v7954_v26 }
 0x71c   : > { %v4495_v25 = vmul.f32 %v4493_v35, %v4424_v23  ;;  %v4507_v32 = vmul.f32 %v4505_v46, %v4442_v47  ;;  %v4520_v24 = vmul.f32 %v4518_v30, %v4452_v22  ;;  %v4528_v58 = vrot.slane %v4416_v21, 6 }
 0x71d   : > { %v4473_v34 = vmul.f32 %v4471_v7, %v7954_v26  ;;  %v4499_v56 = vmul.f32 %v4497_v29, %v4434_v20  ;;  %v4523_v63 = vmul.f32 %v4521_v33, %v4455_v60  ;;  %v4465_v1 = vsub.f32 %v4458_v40, %v4463_v45 }
 0x71e   : > { %v4541_v50 = vrot.slane %v4380_v61, 4  ;;  %v4544_v6 = vrot.slane %v4400_v54, 3  ;;  %v4551_v12 = vmul.f32 %v4442_v47, %v4416_v21  ;;  %v4482_v0 = vrot.slane %v4480_v55, 2 }
 0x71f   : > { %v4475_v27 = vrot.slane %v4473_v34, 1  ;;  %v4501_v28 = vrot.slane %v4499_v56, 5  ;;  %v4525_v39 = vrot.slane %v4523_v63, 2  ;;  %v4530_v9 = vmul.f32 %v4528_v58, %v4465_v1 }
 0x720   : > { %v4543_v2 = vmul.f32 %v4541_v50, %v4424_v23  ;;  %v4546_v11 = vmul.f32 %v4544_v6, %v4434_v20  ;;  %v4509_v46 = vrot.slane %v4507_v32, 4  ;;  %v4553_v61 = vrot.slane %v4551_v12, 4 }
 0x721   : > { %v4477_v62 = vadd.f32 %v4475_v27, %v4469_v42  ;;  %v4503_v35 = vadd.f32 %v4501_v28, %v4495_v25  ;;  %v4527_v44 = vadd.f32 %v4525_v39, %v4520_v24  ;;  %v4532_v26 = vrot.slane %v4530_v9, 4 }
 0x722   : > { %v4548_v7 = vrot.slane %v4546_v11, 5 }
 0x723   : > { %v4484_v22 = vadd.f32 %v4482_v0, %v4477_v62  ;;  %v4511_v60 = vadd.f32 %v4509_v46, %v4503_v35  ;;  %v4534_v45 = vadd.f32 %v4532_v26, %v4527_v44 }
 0x724   : > { %v4550_v29 = vadd.f32 %v4548_v7, %v4543_v2 }
 0x725   : > { %v4485_v54 = vand.u32 2147483647, %v4484_v22  ;;  %vm4487_vm9 = vcmp.lt.f32.partialorder %v4484_v22, 0.0  ;;  %v4513_v6 = vrot.slane %v4511_v60, 5  ;;  %v4536_v23 = vrot.slane %v4534_v45, 6 }
 0x726   : > { %v4488_v34 = vsel %vm4487_vm9, -1e-08, %v8289_v5  ;;  %v4555_v21 = vadd.f32 %v4553_v61, %v4550_v29 }
 0x727   : > { %vm4486_vm10 = vcmp.lt.f32.partialorder %v4485_v54, 1e-08 }
 0x728   : > { %v4489_v47 = vsel %vm4486_vm10, %v4488_v34, %v4484_v22  ;;  %v4557_v9 = vrot.slane %v4555_v21, 4 }
 0x729   : > { %6627 = vrcp.f32 %v4489_v47 }
 0x733   : > { %v6628_v11 = vpop.eup %6627 }
 0x734   : > { %v4515_v0 = vmul.f32 %v6628_v11, %v4513_v6  ;;  %v4538_v39 = vmul.f32 %v6628_v11, %v4536_v23  ;;  %v4559_v44 = vmul.f32 %v6628_v11, %v4557_v9 }
 0x736   : > { %v5813_v2 = vclamps-f32 %v4515_v0, 100.0  ;;  %v5814_v12 = vclamps-f32 %v4538_v39, 100.0  ;;  %v5815_v20 = vclamps-f32 %v4559_v44, 100.0 }
 0x738   : > { %v7993_v28 = vsub.f32 %v7909_v57, %v5813_v2  ;;  %v7996_v42 = vsub.f32 %v7676_v19, %v5814_v12  ;;  %v7999_v55 = vsub.f32 %v7679_v51, %v5815_v20 }
 0x73a   : > { %v5817_v30 = vadd.f32 0.004301727, %v7996_v42  ;;  %v5818_v33 = vadd.f32 0.005185783, %v7999_v55  ;;  %5377 = vst [vmem:[%s7927_s9 + $0x10] sm:$0x1] %v7993_v28 }
 0x73b   : > { %5378 = vst [vmem:[%s7927_s9 + $0x11] sm:$0x1] %v7996_v42  ;;  %5379 = vst [vmem:[%s7927_s9 + $0x12] sm:$0x1] %v7999_v55 }
 0x73c   : > { %v4568_v40 = vmul.f32 1.0514426, %v5817_v30  ;;  %v4570_v25 = vmul.f32 4.2057705, %v5818_v33 }
 0x73e   : > { %v4575_v57 = vadd.f32 1.0, %v4568_v40  ;;  %v4579_v32 = vadd.f32 1.0, %v4570_v25 }
 0x740   : > { %v4576_v56 = vmul.f32 7.5, %v4575_v57  ;;  %v4580_v19 = vmul.f32 1.5, %v4579_v32 }
 0x742   : > { %v4577_v24 = vmax.f32 %v4576_v56, 0.0  ;;  %v4581_v63 = vmax.f32 %v4580_v19, 0.0 }
 0x744   : > { %v4578_v51 = vmin.f32 %v4577_v24, 15.0  ;;  %v4582_v1 = vmin.f32 %v4581_v63, 3.0 }
 0x746   : > { %v4586_v58 = vrot.slane %v4578_v51, %v6727_v16  ;;  %v4595_v50 = vand.u32 2147483647, %v4582_v1  ;;  %v5819_v27 = vadd.f32 -1.0, %v4582_v1  ;;  %v5820_v62 = vadd.f32 -2.0, %v4582_v1 }
 0x747   : > { %v5821_v35 = vadd.f32 -3.0, %v4582_v1 }
 0x748   : > { %v4587_v46 = vsub.f32 %v4586_v58, %v6729_v17  ;;  %v4588_v26 = vsub.f32 %v4586_v58, %v6731_v18  ;;  %v4596_v7 = vsub.f32 1.0, %v4595_v50  ;;  %v4605_v22 = vand.u32 2147483647, %v5819_v27 }
 0x749   : > { %v4615_v60 = vand.u32 2147483647, %v5820_v62  ;;  %v4625_v45 = vand.u32 2147483647, %v5821_v35 }
 0x74a   : > { %v4589_v29 = vand.u32 2147483647, %v4587_v46  ;;  %v4590_v61 = vand.u32 2147483647, %v4588_v26  ;;  %v4597_v54 = vmax.f32 %v4596_v7, 0.0  ;;  %v4606_v34 = vsub.f32 1.0, %v4605_v22 }
 0x74b   : > { %v4616_v21 = vsub.f32 1.0, %v4615_v60  ;;  %v4626_v47 = vsub.f32 1.0, %v4625_v45 }
 0x74c   : > { %v4591_v6 = vsub.f32 1.0, %v4589_v29  ;;  %v4592_v23 = vsub.f32 1.0, %v4590_v61  ;;  %v4607_v9 = vmax.f32 %v4606_v34, 0.0  ;;  %v4601_v17 = vrot.slane %v4597_v54, %v6727_v16 }
 0x74d   : > { %v4617_v11 = vmax.f32 %v4616_v21, 0.0  ;;  %v4627_v0 = vmax.f32 %v4626_v47, 0.0 }
 0x74e   : > { %v4593_v39 = vmax.f32 %v4591_v6, 0.0  ;;  %v4594_v44 = vmax.f32 %v4592_v23, 0.0  ;;  %v4611_v18 = vrot.slane %v4607_v9, %v6727_v16 }
 0x74f   : > { %v4621_v2 = vrot.slane %v4617_v11, %v6727_v16  ;;  %v4631_v12 = vrot.slane %v4627_v0, %v6727_v16 }
 0x750   : > { %v4602_v20 = vmul.f32 %v4601_v17, %v4593_v39  ;;  %v4603_v30 = vmul.f32 %v4601_v17, %v4594_v44  ;;  %v4612_v33 = vmul.f32 %v4611_v18, %v4593_v39  ;;  %v4613_v40 = vmul.f32 %v4611_v18, %v4594_v44 }
 0x751   : > { %v4622_v25 = vmul.f32 %v4621_v2, %v4593_v39  ;;  %v4623_v57 = vmul.f32 %v4621_v2, %v4594_v44  ;;  %v4632_v32 = vmul.f32 %v4631_v12, %v4593_v39  ;;  %v4633_v56 = vmul.f32 %v4631_v12, %v4594_v44 }
 0x752   : > { %v6577_v19 = vpack.c.bf16 %v4603_v30, %v4602_v20  ;;  %v6581_v24 = vpack.c.bf16 %v4613_v40, %v4612_v33 }
 0x753   : > { %v6585_v63 = vpack.c.bf16 %v4623_v57, %v4622_v25  ;;  %v6589_v51 = vpack.c.bf16 %v4633_v56, %v4632_v32 }
 0x754   : > { %6578 = vmatprep.subr.bf16.mxu1 %v6577_v19 }
 0x755   : > { %6580 = vmatpush3.bf16.msra.mxu1 %v6577_v19 }
 0x756   : > { %6582 = vmatprep.subr.bf16.mxu1 %v6581_v24 }
 0x759   : > { %6584 = vmatpush3.bf16.msra.mxu1 %v6581_v24 }
 0x75a   : > { %6586 = vmatprep.subr.bf16.mxu1 %v6585_v63 }
 0x75d   : > { %6588 = vmatpush3.bf16.msra.mxu1 %v6585_v63 }
 0x75e   : > { %6590 = vmatprep.subr.bf16.mxu1 %v6589_v51 }
 0x761   : > { %6592 = vmatpush3.bf16.msra.mxu1 %v6589_v51 }
 0x764   : > { %6450 = vmatmul.mubr.msk.f32.vlgmr.msra.gmra.mrb[64].mxu1 %vm247_vm0, %v7693_v59  ;;  %v8320_v59 = vld [vmem:[#allocation4_spill] sm:$0xff] }
 0x765   : > { %6452 = vmatprep.mubr.msk.f32.mxu1 %vm247_vm0, %v7698_v49  ;;  %v8321_v49 = vld [vmem:[#allocation5_spill] sm:$0xff] }
 0x768   : > { %6453 = vmatmul.mubr.msk.f32.gmra.mrb[66].mxu1 %vm247_vm0, %v7707_v4  ;;  %v8322_v4 = vld [vmem:[#allocation6_spill] sm:$0xff] }
 0x769   : > { %6455 = vmatprep.mubr.msk.f32.mxu1 %vm247_vm0, %v7712_v3  ;;  %v8323_v3 = vld [vmem:[#allocation7_spill] sm:$0xff] }
 0x76c   : > { %6456 = vmatmul.mubr.msk.f32.gmra.mrb[68].mxu1 %vm247_vm0, %v7721_v52  ;;  %v8324_v52 = vld [vmem:[#allocation8_spill] sm:$0xff] }
 0x76d   : > { %6458 = vmatprep.mubr.msk.f32.mxu1 %vm247_vm0, %v7726_v36  ;;  %v8325_v36 = vld [vmem:[#allocation9_spill] sm:$0xff] }
 0x770   : > { %6459 = vmatmul.mubr.msk.f32.gmra.mrb[70].mxu1 %vm247_vm0, %v7735_v8  ;;  %v8326_v8 = vld [vmem:[#allocation10_spill] sm:$0xff] }
 0x771   : > { %6461 = vmatprep.mubr.msk.f32.mxu1 %vm247_vm0, %v7740_v37  ;;  %v8327_v37 = vld [vmem:[#allocation11_spill] sm:$0xff] }
 0x774   : > { %6462 = vmatmul.mubr.msk.f32.gmra.mrb[72].mxu1 %vm247_vm0, %v7749_v48  ;;  %v8328_v48 = vld [vmem:[#allocation12_spill] sm:$0xff] }
 0x775   : > { %6464 = vmatprep.mubr.msk.f32.mxu1 %vm247_vm0, %v7754_v53  ;;  %v8329_v53 = vld [vmem:[#allocation13_spill] sm:$0xff] }
 0x778   : > { %6465 = vmatmul.mubr.msk.f32.gmra.mrb[74].mxu1 %vm247_vm0, %v7763_v43  ;;  %v8330_v43 = vld [vmem:[#allocation14_spill] sm:$0xff] }
 0x779   : > { %6467 = vmatprep.mubr.msk.f32.mxu1 %vm247_vm0, %v7768_v38  ;;  %v8331_v38 = vld [vmem:[#allocation15_spill] sm:$0xff] }
 0x77c   : > { %6468 = vmatmul.mubr.msk.f32.gmra.mrb[76].mxu1 %vm247_vm0, %v7777_v41  ;;  %v8332_v41 = vld [vmem:[#allocation17_spill] sm:$0xff] }
 0x77d   : > { %6470 = vmatprep.mubr.msk.f32.mxu1 %vm247_vm0, %v7782_v15  ;;  %v5816_v15 = vadd.f32 -0.0016962886, %v7993_v28 }
 0x780   : > { %6471 = vmatmul.mubr.msk.f32.gmra.mrb[78].mxu1 %vm247_vm0, %v7791_v13  ;;  %v4566_v13 = vmul.f32 1.0514426, %v5816_v15 }
 0x781   : > { %6473 = vmatprep.mubr.msk.f32.mxu1 %vm247_vm0, %v7796_v31 }
 0x782   : > { %v4571_v31 = vadd.f32 1.0, %v4566_v13 }
 0x784   : > { %6474 = vmatmul.mubr.msk.f32.gmra.mrb[80].mxu1 %vm247_vm0, %v7805_v14  ;;  %v4572_v14 = vmul.f32 7.5, %v4571_v31 }
 0x785   : > { %6476 = vmatprep.mubr.msk.f32.mxu1 %vm247_vm0, %v7810_v10 }
 0x786   : > { %v4573_v10 = vmax.f32 %v4572_v14, 0.0 }
 0x788   : > { %6477 = vmatmul.mubr.msk.f32.gmra.mrb[82].mxu1 %vm247_vm0, %v8320_v59  ;;  %v8079_v1 = vmin.f32 %v4573_v10, 15.0 }
 0x789   : > { %6479 = vmatprep.mubr.msk.f32.mxu1 %vm247_vm0, %v8321_v49 }
 0x78a   : > { %v5854_v58 = vadd.f32 -1.0, %v8079_v1  ;;  %v5019_v50 = vand.u32 2147483647, %v8079_v1  ;;  %v5855_v62 = vadd.f32 -2.0, %v8079_v1  ;;  %v5856_v46 = vadd.f32 -3.0, %v8079_v1 }
 0x78b   : > { %v5857_v61 = vadd.f32 -4.0, %v8079_v1  ;;  %v5858_v11 = vadd.f32 -5.0, %v8079_v1  ;;  %v5859_v20 = vadd.f32 -6.0, %v8079_v1  ;;  %v5860_v51 = vadd.f32 -7.0, %v8079_v1 }
 0x78c   : > { %6480 = vmatmul.mubr.msk.f32.gmra.mrb[84].mxu1 %vm247_vm0, %v8322_v4  ;;  %v5033_v27 = vand.u32 2147483647, %v5854_v58  ;;  %v5020_v35 = vsub.f32 1.0, %v5019_v50  ;;  %v5047_v7 = vand.u32 2147483647, %v5855_v62  ;;  %v5862_v62 = vadd.f32 -9.0, %v8079_v1 }
 0x78d   : > { %6482 = vmatprep.mubr.msk.f32.mxu1 %vm247_vm0, %v8323_v3  ;;  %v5061_v60 = vand.u32 2147483647, %v5856_v46  ;;  %v5075_v9 = vand.u32 2147483647, %v5857_v61  ;;  %v5089_v25 = vand.u32 2147483647, %v5858_v11 }
 0x78e   : > { %v5034_v26 = vsub.f32 1.0, %v5033_v27  ;;  %v5021_v22 = vmax.f32 %v5020_v35, 0.0  ;;  %v5048_v29 = vsub.f32 1.0, %v5047_v7  ;;  %v5103_v63 = vand.u32 2147483647, %v5859_v20 }
 0x78f   : > { %v5062_v47 = vsub.f32 1.0, %v5061_v60  ;;  %v5076_v40 = vsub.f32 1.0, %v5075_v9  ;;  %v5090_v3 = vsub.f32 1.0, %v5089_v25 }
 0x790   : > { %6483 = vmatmul.mubr.msk.f32.gmra.mrb[86].mxu1 %vm247_vm0, %v8324_v52  ;;  %v5035_v45 = vmax.f32 %v5034_v26, 0.0  ;;  %v5027_v21 = vrot.slane %v5021_v22, %v6727_v16  ;;  %v5049_v23 = vmax.f32 %v5048_v29, 0.0  ;;  %v5104_v13 = vsub.f32 1.0, %v5103_v63 }
 0x791   : > { %6485 = vmatprep.mubr.msk.f32.mxu1 %vm247_vm0, %v8325_v36  ;;  %v5063_v12 = vmax.f32 %v5062_v47, 0.0  ;;  %v5077_v4 = vmax.f32 %v5076_v40, 0.0  ;;  %v5091_v15 = vmax.f32 %v5090_v3, 0.0 }
 0x792   : > { %v5041_v6 = vrot.slane %v5035_v45, %v6727_v16  ;;  %v5055_v33 = vrot.slane %v5049_v23, %v6727_v16  ;;  %v5105_v26 = vmax.f32 %v5104_v13, 0.0 }
 0x793   : > { %v5069_v49 = vrot.slane %v5063_v12, %v6727_v16  ;;  %v5097_v46 = vrot.slane %v5091_v15, %v6727_v16 }
 0x794   : > { %6486 = vmatmul.mubr.msk.f32.gmra.mrb[88].mxu1 %vm247_vm0, %v8326_v8  ;;  %v5111_v47 = vrot.slane %v5105_v26, %v6727_v16 }
 0x795   : > { %6488 = vmatprep.mubr.msk.f32.mxu1 %vm247_vm0, %v8327_v37 }
 0x798   : > { %6489 = vmatmul.mubr.msk.f32.gmra.mrb[90].mxu1 %vm247_vm0, %v8328_v48 }
 0x799   : > { %6491 = vmatprep.mubr.msk.f32.mxu1 %vm247_vm0, %v8329_v53  ;;  %v5117_v53 = vand.u32 2147483647, %v5860_v51 }
 0x79b   : > { %v5118_v7 = vsub.f32 1.0, %v5117_v53 }
 0x79c   : > { %6492 = vmatmul.mubr.msk.f32.gmra.mrb[92].mxu1 %vm247_vm0, %v8330_v43  ;;  %v5861_v43 = vadd.f32 -8.0, %v8079_v1 }
 0x79d   : > { %6494 = vmatprep.mubr.msk.f32.mxu1 %vm247_vm0, %v8331_v38 }
 0x79e   : > { %v5131_v27 = vand.u32 2147483647, %v5861_v43 }
 0x7a0   : > { %6495 = vmatmul.mubr.msk.f32.gmra.mrb[94].mxu1 %vm247_vm0, %v8332_v41  ;;  %v5083_v41 = vrot.slane %v5077_v4, %v6727_v16  ;;  %v5132_v23 = vsub.f32 1.0, %v5131_v27 }
 0x7a2   : > { %v5133_v20 = vmax.f32 %v5132_v23, 0.0 }
 0x7a4   : > { %v5139_v63 = vrot.slane %v5133_v20, %v6727_v16 }
 0x837   : > { %v6451_v54 = vpop.f32.mrb[64].mxu1 }
 0x838   : > { %v4828_v34 = vpop.f32.mrb[65].mxu1  ;;  %v5029_v39 = vmul.f32 %v6451_v54, %v5027_v21  ;;  %v5145_v54 = vand.u32 2147483647, %v5862_v62 }
 0x839   : > { %v5028_v18 = vmul.f32 %v5027_v21, %v4828_v34  ;;  %v5863_v34 = vadd.f32 -10.0, %v8079_v1 }
 0x83b   : > { %v6454_v0 = vpop.f32.mrb[66].mxu1 }
 0x83c   : > { %v5043_v44 = vmul.f32 %v6454_v0, %v5041_v6  ;;  %v4838_v17 = vpop.f32.mrb[67].mxu1 }
 0x83d   : > { %v5042_v2 = vmul.f32 %v5041_v6, %v4838_v17  ;;  %v5119_v6 = vmax.f32 %v5118_v7, 0.0  ;;  %v5146_v17 = vsub.f32 1.0, %v5145_v54 }
 0x83e   : > { %v5045_v30 = vadd.f32 %v5043_v44, %v5029_v39 }
 0x83f   : > { %v5044_v57 = vadd.f32 %v5042_v2, %v5028_v18  ;;  %v6457_v32 = vpop.f32.mrb[68].mxu1  ;;  %v5864_v18 = vadd.f32 -11.0, %v8079_v1  ;;  %v5125_v12 = vrot.slane %v5119_v6, %v6727_v16 }
 0x840   : > { %v5057_v56 = vmul.f32 %v6457_v32, %v5055_v33  ;;  %v4848_v19 = vpop.f32.mrb[69].mxu1 }
 0x841   : > { %v5056_v24 = vmul.f32 %v5055_v33, %v4848_v19  ;;  %v5173_v19 = vand.u32 2147483647, %v5864_v18 }
 0x842   : > { %v5059_v59 = vadd.f32 %v5057_v56, %v5045_v30  ;;  %v5159_v30 = vand.u32 2147483647, %v5863_v34  ;;  %v5147_v56 = vmax.f32 %v5146_v17, 0.0 }
 0x843   : > { %v5058_v52 = vadd.f32 %v5056_v24, %v5044_v57  ;;  %v6460_v36 = vpop.f32.mrb[70].mxu1 }
 0x844   : > { %v5071_v8 = vmul.f32 %v6460_v36, %v5069_v49  ;;  %v4858_v37 = vpop.f32.mrb[71].mxu1  ;;  %v5160_v51 = vsub.f32 1.0, %v5159_v30 }
 0x845   : > { %v5070_v48 = vmul.f32 %v5069_v49, %v4858_v37  ;;  %v5174_v37 = vsub.f32 1.0, %v5173_v19 }
 0x846   : > { %v5073_v38 = vadd.f32 %v5071_v8, %v5059_v59  ;;  %v5865_v59 = vadd.f32 -12.0, %v8079_v1  ;;  %v5153_v8 = vrot.slane %v5147_v56, %v6727_v16  ;;  %v5161_v53 = vmax.f32 %v5160_v51, 0.0 }
 0x847   : > { %v5072_v31 = vadd.f32 %v5070_v48, %v5058_v52  ;;  %v6463_v14 = vpop.f32.mrb[72].mxu1 }
 0x848   : > { %v5085_v10 = vmul.f32 %v6463_v14, %v5083_v41  ;;  %v4868_v58 = vpop.f32.mrb[73].mxu1  ;;  %v5187_v43 = vand.u32 2147483647, %v5865_v59  ;;  %v5167_v27 = vrot.slane %v5161_v53, %v6727_v16 }
 0x849   : > { %v5084_v50 = vmul.f32 %v5083_v41, %v4868_v58  ;;  %v5867_v58 = vadd.f32 -14.0, %v8079_v1 }
 0x84a   : > { %v5087_v35 = vadd.f32 %v5085_v10, %v5073_v38  ;;  %v5866_v38 = vadd.f32 -13.0, %v8079_v1  ;;  %v5175_v10 = vmax.f32 %v5174_v37, 0.0  ;;  %v5188_v62 = vsub.f32 1.0, %v5187_v43 }
 0x84b   : > { %v5086_v22 = vadd.f32 %v5084_v50, %v5072_v31  ;;  %v6466_v60 = vpop.f32.mrb[74].mxu1 }
 0x84c   : > { %v5099_v45 = vmul.f32 %v6466_v60, %v5097_v46  ;;  %v4878_v29 = vpop.f32.mrb[75].mxu1  ;;  %v5181_v54 = vrot.slane %v5175_v10, %v6727_v16  ;;  %v5189_v34 = vmax.f32 %v5188_v62, 0.0 }
 0x84d   : > { %v5098_v61 = vmul.f32 %v5097_v46, %v4878_v29  ;;  %v5868_v29 = vadd.f32 -15.0, %v8079_v1 }
 0x84e   : > { %v5101_v21 = vadd.f32 %v5099_v45, %v5087_v35  ;;  %v5201_v35 = vand.u32 2147483647, %v5866_v38  ;;  %v5215_v45 = vand.u32 2147483647, %v5867_v58  ;;  %v5265_v58 = vrot.slane %v7993_v28, 4 }
 0x84f   : > { %v5100_v9 = vadd.f32 %v5098_v61, %v5086_v22  ;;  %v6469_v11 = vpop.f32.mrb[76].mxu1 }
 0x850   : > { %v5113_v0 = vmul.f32 %v6469_v11, %v5111_v47  ;;  %v4888_v39 = vpop.f32.mrb[77].mxu1  ;;  %v5216_v18 = vsub.f32 1.0, %v5215_v45 }
 0x851   : > { %v5112_v44 = vmul.f32 %v5111_v47, %v4888_v39 }
 0x852   : > { %v5115_v2 = vadd.f32 %v5113_v0, %v5101_v21  ;;  %v5202_v21 = vsub.f32 1.0, %v5201_v35  ;;  %v5229_v0 = vand.u32 2147483647, %v5868_v29 }
 0x853   : > { %v5114_v33 = vadd.f32 %v5112_v44, %v5100_v9  ;;  %v6472_v40 = vpop.f32.mrb[78].mxu1  ;;  %v5195_v44 = vrot.slane %v5189_v34, %v6727_v16 }
 0x854   : > { %v5127_v25 = vmul.f32 %v6472_v40, %v5125_v12  ;;  %v4898_v57 = vpop.f32.mrb[79].mxu1  ;;  %v5203_v17 = vmax.f32 %v5202_v21, 0.0 }
 0x855   : > { %v5126_v32 = vmul.f32 %v5125_v12, %v4898_v57  ;;  %v5230_v57 = vsub.f32 1.0, %v5229_v0 }
 0x856   : > { %v5129_v24 = vadd.f32 %v5127_v25, %v5115_v2  ;;  %v5209_v40 = vrot.slane %v5203_v17, %v6727_v16  ;;  %v5217_v25 = vmax.f32 %v5216_v18, 0.0 }
 0x857   : > { %v5128_v49 = vadd.f32 %v5126_v32, %v5114_v33  ;;  %v6475_v4 = vpop.f32.mrb[80].mxu1 }
 0x858   : > { %v5141_v3 = vmul.f32 %v6475_v4, %v5139_v63  ;;  %v4908_v52 = vpop.f32.mrb[81].mxu1  ;;  %v5223_v59 = vrot.slane %v5217_v25, %v6727_v16 }
 0x859   : > { %v5140_v36 = vmul.f32 %v5139_v63, %v4908_v52 }
 0x85a   : > { %v5143_v48 = vadd.f32 %v5141_v3, %v5129_v24 }
 0x85b   : > { %v5142_v41 = vadd.f32 %v5140_v36, %v5128_v49  ;;  %v6478_v15 = vpop.f32.mrb[82].mxu1  ;;  %v5231_v49 = vmax.f32 %v5230_v57, 0.0 }
 0x85c   : > { %v5155_v13 = vmul.f32 %v6478_v15, %v5153_v8  ;;  %v4918_v31 = vpop.f32.mrb[83].mxu1 }
 0x85d   : > { %v5154_v14 = vmul.f32 %v5153_v8, %v4918_v31  ;;  %v5252_v31 = vrot.slane %v7999_v55, 6 }
 0x85e   : > { %v5157_v50 = vadd.f32 %v5155_v13, %v5143_v48  ;;  %v5237_v48 = vrot.slane %v5231_v49, %v6727_v16  ;;  %v5244_v13 = vrot.slane %v7996_v42, 7  ;;  %v5275_v16 = vrot.slane %v7999_v55, 2  ;;  %v8333_v49 = vld [vmem:[#allocation19_spill] sm:$0xff] }
 0x85f   : > { %v5156_v46 = vadd.f32 %v5154_v14, %v5142_v41  ;;  %v6481_v26 = vpop.f32.mrb[84].mxu1 }
 0x860   : > { %v5169_v7 = vmul.f32 %v6481_v26, %v5167_v27  ;;  %v4928_v22 = vpop.f32.mrb[85].mxu1 }
 0x861   : > { %v5168_v60 = vmul.f32 %v5167_v27, %v4928_v22 }
 0x862   : > { %v5171_v61 = vadd.f32 %v5169_v7, %v5157_v50  ;;  %v5268_v50 = vrot.slane %v7996_v42, 3 }
 0x863   : > { %v5170_v47 = vadd.f32 %v5168_v60, %v5156_v46  ;;  %v6484_v6 = vpop.f32.mrb[86].mxu1 }
 0x864   : > { %v5183_v23 = vmul.f32 %v6484_v6, %v5181_v54  ;;  %v4938_v9 = vpop.f32.mrb[87].mxu1 }
 0x865   : > { %v5182_v11 = vmul.f32 %v5181_v54, %v4938_v9 }
 0x866   : > { %v5185_v39 = vadd.f32 %v5183_v23, %v5171_v61 }
 0x867   : > { %v5184_v2 = vadd.f32 %v5182_v11, %v5170_v47  ;;  %v6487_v12 = vpop.f32.mrb[88].mxu1 }
 0x868   : > { %v5197_v20 = vmul.f32 %v6487_v12, %v5195_v44  ;;  %v4948_v1 = vpop.f32.mrb[89].mxu1 }
 0x869   : > { %v5196_v30 = vmul.f32 %v5195_v44, %v4948_v1 }
 0x86a   : > { %v5199_v33 = vadd.f32 %v5197_v20, %v5185_v39 }
 0x86b   : > { %v5198_v32 = vadd.f32 %v5196_v30, %v5184_v2  ;;  %v6490_v56 = vpop.f32.mrb[90].mxu1 }
 0x86c   : > { %v5211_v19 = vmul.f32 %v6490_v56, %v5209_v40  ;;  %v4958_v24 = vpop.f32.mrb[91].mxu1 }
 0x86d   : > { %v5210_v63 = vmul.f32 %v5209_v40, %v4958_v24 }
 0x86e   : > { %v5213_v51 = vadd.f32 %v5211_v19, %v5199_v33 }
 0x86f   : > { %v5212_v4 = vadd.f32 %v5210_v63, %v5198_v32  ;;  %v6493_v3 = vpop.f32.mrb[92].mxu1 }
 0x870   : > { %v5225_v52 = vmul.f32 %v6493_v3, %v5223_v59  ;;  %v4968_v36 = vpop.f32.mrb[93].mxu1 }
 0x871   : > { %v5224_v8 = vmul.f32 %v5223_v59, %v4968_v36 }
 0x872   : > { %v5227_v37 = vadd.f32 %v5225_v52, %v5213_v51  ;;  %v8334_v52 = vld [vmem:[#allocation16_spill] sm:$0xff] }
 0x873   : > { %v5226_v53 = vadd.f32 %v5224_v8, %v5212_v4  ;;  %v6496_v43 = vpop.f32.mrb[94].mxu1 }
 0x874   : > { %v5239_v38 = vmul.f32 %v6496_v43, %v5237_v48  ;;  %v4978_v41 = vpop.f32.mrb[95].mxu1  ;;  %v8335_v43 = vld [vmem:[#allocation18_spill] sm:$0xff] }
 0x875   : > { %v5238_v15 = vmul.f32 %v5237_v48, %v4978_v41 }
 0x876   : > { %v5241_v14 = vadd.f32 %v5239_v38, %v5227_v37 }
 0x877   : > { %v8115_v10 = vadd.f32 %v5238_v15, %v5226_v53 }
 0x878   : > { %v5285_v27 = vmul.f32 %v5244_v13, %v5241_v14  ;;  %v5290_v62 = vmul.f32 %v5252_v31, %v5241_v14  ;;  %5376 = vst [vmem:[%s7927_s9 + $0x8] sm:$0xff] %v5241_v14  ;;  %v5296_v35 = vrot.slane %v5241_v14, 3  ;;  %v5300_v46 = vrot.slane %v5241_v14, 5 }
 0x879   : > { %v5308_v26 = vrot.slane %v5241_v14, 7  ;;  %5375 = vst [vmem:[%s7927_s9] sm:$0xff] %v8115_v10  ;;  %v5284_v7 = vmul.f32 %v5241_v14, %v7993_v28  ;;  %v5311_v60 = vrot.slane %v5241_v14, 1  ;;  %v5326_v45 = vrot.slane %v5241_v14, 2 }
 0x87a   : > { %v5287_v22 = vrot.slane %v5285_v27, 1  ;;  %v5292_v29 = vrot.slane %v5290_v62, 2  ;;  %v5329_v61 = vrot.slane %v5241_v14, 6  ;;  %v5246_v54 = vmul.f32 %v5244_v13, %v8115_v10 }
 0x87b   : > { %v5254_v42 = vmul.f32 %v5252_v31, %v8115_v10  ;;  %v5270_v21 = vmul.f32 %v5268_v50, %v8115_v10  ;;  %v5277_v55 = vmul.f32 %v5275_v16, %v8115_v10  ;;  %v5302_v47 = vmul.f32 %v5300_v46, %v8115_v10 }
 0x87c   : > { %v5289_v34 = vadd.f32 %v5287_v22, %v5284_v7  ;;  %v5242_v6 = vmul.f32 %v8115_v10, %v7993_v28  ;;  %v5248_v23 = vrot.slane %v5246_v54, 1  ;;  %v5303_v9 = vmul.f32 %v5296_v35, %v8115_v10 }
 0x87d   : > { %v5310_v11 = vmul.f32 %v5308_v26, %v8115_v10  ;;  %v5267_v39 = vmul.f32 %v5265_v58, %v8115_v10  ;;  %v5272_v44 = vrot.slane %v5270_v21, 1  ;;  %v5313_v17 = vmul.f32 %v5311_v60, %v8115_v10 }
 0x87e   : > { %v5294_v0 = vadd.f32 %v5292_v29, %v5289_v34  ;;  %v5250_v18 = vadd.f32 %v5248_v23, %v5242_v6  ;;  %v5256_v2 = vrot.slane %v5254_v42, 2  ;;  %v5279_v12 = vrot.slane %v5277_v55, 2 }
 0x87f   : > { %v5305_v20 = vrot.slane %v5303_v9, 1  ;;  %v5274_v30 = vadd.f32 %v5272_v44, %v5267_v39  ;;  %v5315_v33 = vrot.slane %v5313_v17, 7  ;;  %v5328_v28 = vmul.f32 %v5326_v45, %v8115_v10 }
 0x880   : > { %v5298_v1 = vadd.f32 %v5296_v35, %v5294_v0  ;;  %v5258_v40 = vadd.f32 %v5256_v2, %v5250_v18  ;;  %v5260_v25 = vrot.slane %v8115_v10, 3  ;;  %v5331_v19 = vmul.f32 %v5329_v61, %v8115_v10 }
 0x881   : > { %v8137_v57 = vsub.f32 %v5302_v47, %v5305_v20  ;;  %v5281_v32 = vadd.f32 %v5279_v12, %v5274_v30  ;;  %v8139_v56 = vsub.f32 %v5310_v11, %v5315_v33  ;;  %v5342_v45 = vrot.slane %v8115_v10, 6 }
 0x882   : > { %v5262_v24 = vadd.f32 %v5260_v25, %v5258_v40  ;;  %v5333_v51 = vrot.slane %v5331_v19, 6  ;;  %v5336_v59 = vrot.slane %v5331_v19, 2  ;;  %v5299_v38 = vsub.f32 %v5298_v1, %v8335_v43 }
 0x883   : > { %v5282_v63 = vadd.f32 %v5281_v32, %v5260_v25  ;;  %v5350_v3 = vrot.slane %v8137_v57, 5  ;;  %v5361_v48 = vrot.slane %v8137_v57, 2  ;;  %v5321_v29 = vmul.f32 %v5260_v25, %v8115_v10 }
 0x884   : > { %v5263_v4 = vsub.f32 %v5262_v24, %v8333_v49  ;;  %v5335_v8 = vsub.f32 %v5328_v28, %v5333_v51  ;;  %v5338_v37 = vsub.f32 %v5328_v28, %v5336_v59  ;;  %v5386_v50 = vmul.f32 %v5299_v38, %v5299_v38  ;;  %v5470_v24 = vld [vmem:[%s7927_s9 + $0x8] sm:$0xff] (%p6703_p4) }
 0x885   : > { %v5283_v36 = vsub.f32 %v5282_v63, %v8334_v52  ;;  %v5352_v53 = vmul.f32 %v5350_v3, %v8115_v10  ;;  %v5363_v15 = vmul.f32 %v5361_v48, %v8115_v10  ;;  %v5318_v54 = vrot.slane %v8115_v10, 5  ;;  %5471 = vst [vmem:[%s5434_s30 + $0x38] sm:$0xff] (%p6703_p4), %v5470_v24 }
 0x886   : > { %v5354_v41 = vrot.slane %v5335_v8, 5  ;;  %v5380_v14 = vmul.f32 %v5263_v4, %v5263_v4  ;;  %v5344_v42 = vmul.f32 %v5342_v45, %v8115_v10  ;;  %v5323_v21 = vrot.slane %v5321_v29, 1 }
 0x887   : > { %v5381_v13 = vmul.f32 %v5283_v36, %v5283_v36  ;;  %v5365_v35 = vrot.slane %v5363_v15, 2  ;;  %v5339_v55 = vrot.slane %v8115_v10, 2  ;;  %v5320_v6 = vmul.f32 %v5318_v54, %v8115_v10 }
 0x888   : > { %v5356_v31 = vmul.f32 %v5354_v41, %v8115_v10  ;;  %v5346_v23 = vrot.slane %v5344_v42, 6 }
 0x889   : > { %v5383_v58 = vrot.slane %v5381_v13, 4  ;;  %v5325_v0 = vsub.f32 %v5320_v6, %v5323_v21  ;;  %v5341_v39 = vmul.f32 %v5339_v55, %v8115_v10 }
 0x88a   : > { %v5358_v27 = vrot.slane %v5356_v31, 1 }
 0x88b   : > { %v5385_v62 = vadd.f32 %v5383_v58, %v5380_v14  ;;  %v5348_v12 = vsub.f32 %v5341_v39, %v5346_v23 }
 0x88c   : > { %v5360_v16 = vadd.f32 %v5358_v27, %v5352_v53 }
 0x88d   : > { %v5387_v46 = vadd.f32 %v5386_v50, %v5385_v62 }
 0x88e   : > { %v5367_v26 = vadd.f32 %v5365_v35, %v5360_v16 }
 0x88f   : > { %6629 = vrsqrt.f32 %v5387_v46  ;;  %vm5390_vm13 = vcmp.eq.f32.partialorder %v5387_v46, inf  ;;  %v5393_v47 = vand.u32 2147483648, %v5387_v46  ;;  %vm5392_vm14 = vcmp.eq.f32.partialorder %v5387_v46, 0.0 }
 0x890   : > { %v5368_v7 = vand.u32 2147483647, %v5367_v26  ;;  %vm5370_vm11 = vcmp.lt.f32.partialorder %v5367_v26, 0.0 }
 0x891   : > { %v5371_v22 = vsel %vm5370_vm11, -1e-08, %v8289_v5 }
 0x892   : > { %vm5369_vm12 = vcmp.lt.f32.partialorder %v5368_v7, 1e-08 }
 0x893   : > { %v5372_v60 = vsel %vm5369_vm12, %v5371_v22, %v5367_v26 }
 0x894   : > { %6631 = vrcp.f32 %v5372_v60 }
 0x899   : > { %v6630_v61 = vpop.eup %6629 }
 0x89a   : > { %v5389_v34 = vmul.f32 %v6630_v61, %v5387_v46 }
 0x89c   : > { %v5391_v5 = vsel %vm5390_vm13, %v5387_v46, %v5389_v34 }
 0x89d   : > { %v5394_v9 = vsel %vm5392_vm14, %v5393_v47, %v5391_v5 }
 0x89e   : > { %5395 = vst [vmem:[%s7927_s9 + $0x13] sm:$0x1] %v5394_v9  ;;  %v6632_v11 = vpop.eup %6631 }
 0x89f   : > { %v5397_v44 = vrot.slane %v6632_v11, 3  ;;  %v5401_v17 = vrot.slane %v6632_v11, 6  ;;  %v5405_v18 = vrot.slane %v6632_v11, 7  ;;  %v5409_v2 = vrot.slane %v6632_v11, 2 }
 0x8a0   : > { %v5413_v20 = vmul.f32 %v6632_v11, %v5338_v37  ;;  %v5417_v1 = vrot.slane %v6632_v11, 4  ;;  %v5423_v30 = vmul.f32 %v6632_v11, %v5325_v0  ;;  %5432 = sbr.rel (!%p6703_p4) target bundleno = 2223 (0x8af), region = 32 }
 0x8a1   : > { %v5399_v33 = vmul.f32 %v5397_v44, %v8137_v57  ;;  %v5403_v10 = vmul.f32 %v5401_v17, %v8139_v56  ;;  %v5407_v28 = vmul.f32 %v5405_v18, %v5325_v0  ;;  %v5411_v40 = vmul.f32 %v5409_v2, %v5335_v8 }
 0x8a2   : > { %5414 = vst [vmem:[%s7927_s9 + $0x18] sm:$0x1] %v5413_v20  ;;  %v5415_v25 = vmul.f32 %v5401_v17, %v5348_v12  ;;  %v5419_v32 = vmul.f32 %v5417_v1, %v8137_v57  ;;  %v5421_v19 = vmul.f32 %v5405_v18, %v8139_v56  ;;  %5424 = vst [vmem:[%s7927_s9 + $0x1c] sm:$0x1] %v5423_v30  ;;  %v5468_v57 = vld [vmem:[%s7927_s9] sm:$0xff] (%p6703_p4) }
 0x8a3   : > { %5400 = vst [vmem:[%s7927_s9 + $0xf] sm:$0x20] %v5399_v33  ;;  %5404 = vst [vmem:[%s7927_s9 + $0x13] sm:$0x4] %v5403_v10 }
 0x8a4   : > { %5408 = vst [vmem:[%s7927_s9 + $0x15] sm:$0x2] %v5407_v28  ;;  %5412 = vst [vmem:[%s7927_s9 + $0x11] sm:$0x40] %v5411_v40 }
 0x8a5   : > { %5416 = vst [vmem:[%s7927_s9 + $0x17] sm:$0x4] %v5415_v25  ;;  %5420 = vst [vmem:[%s7927_s9 + $0x16] sm:$0x10] %v5419_v32 }
 0x8a6   : > { %5422 = vst [vmem:[%s7927_s9 + $0x1a] sm:$0x2] %v5421_v19  ;;  %5469 = vst [vmem:[%s5434_s30] sm:$0xff] (%p6703_p4), %v5468_v57 }
 0x8ab   : > { %v5472_v56 = vld [vmem:[%s7927_s9 + $0x10] sm:$0xff] }
 0x8ac   : > { %5473 = vst [vmem:[%s5434_s30 + $0x70] sm:$0xff] %v5472_v56 }
 0x8ad   : > { %v5474_v63 = vld [vmem:[%s7927_s9 + $0x18] sm:$0xff] }
 0x8ae   : > { %5475 = vst [vmem:[%s5434_s30 + $0xa8] sm:$0xff] %v5474_v63 }
 0x8af PF: > { %p9_p8 = scmp.ge.s32.totalorder %s6693_s13, 9   ;;  %s8336_s9 = smov %s6655_s10 }
 0x8b0   : > { %s8337_s10 = smov %s6701_s16  ;;  %s8338_s11 = smov %s6693_s13 }
 0x8b1   :  { %11 = sbr.rel (!%p9_p8) target bundleno = 2 (0x2), region = 96 }

</bundles_post_ra>
